<compile_context>
chip_gen: v7x
topology: tpu7x:2x2x1
jax: 0.10.0
libtpu: 0.0.40
codegen_flags: <defaults>
</compile_context>

<pallas_src>
import functools

import jax
import jax.numpy as jnp
from jax.experimental import pallas as pl
from jax.experimental.pallas import tpu as pltpu

LANE = 128


def _round_up(x, m):
    return ((x + m - 1) // m) * m


def _pad_channels(c):
    return _round_up(max(int(c), 1), LANE)


# --------------------------------------------------------------------------
# Fused kernel: (conv => BN => ReLU) * 2, everything resident in VMEM.
# --------------------------------------------------------------------------
def _double_conv_kernel(x_ref, w1_ref, g1_ref, b1_ref, w2_ref, g2_ref, b2_ref,
                        o_ref, pad1_ref, pad2_ref, *, ksize, pad, wl):
    """
    x_ref   : (N, H, W, Cp_in)        channel-padded NHWC input (lane-dense)
    w*_ref  : (k*k*Cp_in, Cp_out)     im2col-packed conv weights (zero-padded)
    g*/b*   : (1, Cp_out)             BN gamma / beta (padded lanes: 1 / 0)
    o_ref   : (N*H*W, Cp_out2)        lane-dense output block
    pad1/2  : (N, H+2p, wl+W+p, Cp)   zero-padded activation scratch in VMEM
                                      (wl = sublane-aligned left halo)
    """
    n, h, w, _ = x_ref.shape
    m = n * h * w
    inv_m = 1.0 / float(m)
    eps = 1e-5

    def conv_bn_relu(src_ref, w_ref, g_ref, b_ref):
        cp = src_ref.shape[-1]
        # im2col: gather the k*k shifted windows once (lane-dense, cp lanes),
        # concatenate along lanes, then a single MXU contraction.
        cols = []
        for kh in range(ksize):
            for kw in range(ksize):
                win = src_ref[:, kh:kh + h, wl - pad + kw:wl - pad + kw + w, :]
                cols.append(win.reshape(m, cp))
        patches = jnp.concatenate(cols, axis=-1)            # (M, k*k*cp)
        y = jnp.dot(patches, w_ref[...],
                    preferred_element_type=jnp.float32)     # (M, cp_out)
        # NOTE: conv bias omitted -- training-mode BN's mean subtraction
        # cancels any per-channel bias exactly.
        # One-pass BN stats via the MXU ones-vector trick.
        ones_row = jnp.ones((1, m), jnp.float32)
        s = jnp.dot(ones_row, y, preferred_element_type=jnp.float32)
        ss = jnp.dot(ones_row, y * y, preferred_element_type=jnp.float32)
        mean = s * inv_m
        var = jnp.maximum(ss * inv_m - mean * mean, 0.0)     # biased variance
        scale = g_ref[...] * jax.lax.rsqrt(var + eps)
        shift = b_ref[...] - mean * scale
        return jnp.maximum(y * scale + shift, 0.0)           # fused BN + ReLU

    # ---- fused "same" zero padding for block 1 (aligned full-lane stores).
    pad1_ref[...] = jnp.zeros_like(pad1_ref)
    pad1_ref[:, pad:pad + h, wl:wl + w, :] = x_ref[...].astype(jnp.float32)

    # ---- block 1: conv1 => BN1 => ReLU1 ; intermediate stays in VMEM.
    y1 = conv_bn_relu(pad1_ref, w1_ref, g1_ref, b1_ref)

    pad2_ref[...] = jnp.zeros_like(pad2_ref)
    pad2_ref[:, pad:pad + h, wl:wl + w, :] = y1.reshape(n, h, w, y1.shape[-1])

    # ---- block 2: conv2 => BN2 => ReLU2 ; lane-dense output store.
    o_ref[...] = conv_bn_relu(pad2_ref, w2_ref, g2_ref, b2_ref).astype(o_ref.dtype)


def _double_conv_pallas(xc, w1, g1, b1, w2, g2, b2, ksize):
    """xc: (N, H, W, Cp_in) channel-padded NHWC input. Returns (N*H*W, Cp_out)."""
    n, h, w, cpi = xc.shape
    cpm = w1.shape[-1]
    cpo = w2.shape[-1]
    pad = (ksize - 1) // 2
    wl = max(8, _round_up(pad, 8))        # sublane-aligned left halo
    m = n * h * w

    kernel = functools.partial(_double_conv_kernel, ksize=ksize, pad=pad, wl=wl)
    return pl.pallas_call(
        kernel,
        out_shape=jax.ShapeDtypeStruct((m, cpo), jnp.float32),
        grid=(1,),
        in_specs=[
            pl.BlockSpec(xc.shape, lambda i: (0, 0, 0, 0)),
            pl.BlockSpec(w1.shape, lambda i: (0, 0)),
            pl.BlockSpec(g1.shape, lambda i: (0, 0)),
            pl.BlockSpec(b1.shape, lambda i: (0, 0)),
            pl.BlockSpec(w2.shape, lambda i: (0, 0)),
            pl.BlockSpec(g2.shape, lambda i: (0, 0)),
            pl.BlockSpec(b2.shape, lambda i: (0, 0)),
        ],
        out_specs=pl.BlockSpec((m, cpo), lambda i: (0, 0)),
        scratch_shapes=[
            pltpu.VMEM((n, h + 2 * pad, wl + w + pad, cpi), jnp.float32),
            pltpu.VMEM((n, h + 2 * pad, wl + w + pad, cpm), jnp.float32),
        ],
        compiler_params=pltpu.CompilerParams(
            dimension_semantics=("arbitrary",)),
    )(xc, w1, g1, b1, w2, g2, b2)


# --------------------------------------------------------------------------
# Parameter construction (packed once, offline -- no per-call weight reshuffle).
# --------------------------------------------------------------------------
def _pack_conv_weight(w_oihw, cp_in, cp_out):
    """PyTorch (Cout, Cin, kh, kw) -> im2col-packed (k*k*cp_in, cp_out)."""
    cout, cin, kh, kw = w_oihw.shape
    w_hwio = jnp.transpose(w_oihw, (2, 3, 1, 0))          # (kh, kw, Cin, Cout)
    w_full = jnp.zeros((kh, kw, cp_in, cp_out), jnp.float32)
    w_full = w_full.at[:, :, :cin, :cout].set(w_hwio)
    return w_full.reshape(kh * kw * cp_in, cp_out)


def _pad_vec(v, cp, fill):
    out = jnp.full((1, cp), fill, jnp.float32)
    return out.at[0, :v.shape[0]].set(v)


def init_double_conv_params(key, in_channels, out_channels, ksize,
                            mid_channels=None):
    """Returns (packed_params_for_kernel, raw_params_for_reference)."""
    if not mid_channels:
        mid_channels = out_channels
    cpi = _pad_channels(in_channels)
    cpm = _pad_channels(mid_channels)
    cpo = _pad_channels(out_channels)

    ks = jax.random.split(key, 6)
    scale1 = 1.0 / jnp.sqrt(in_channels * ksize * ksize)
    scale2 = 1.0 / jnp.sqrt(mid_channels * ksize * ksize)
    w1 = jax.random.uniform(ks[0], (mid_channels, in_channels, ksize, ksize),
                            jnp.float32, -scale1, scale1)
    w2 = jax.random.uniform(ks[1], (out_channels, mid_channels, ksize, ksize),
                            jnp.float32, -scale2, scale2)
    g1 = 1.0 + 0.1 * jax.random.normal(ks[2], (mid_channels,), jnp.float32)
    beta1 = 0.1 * jax.random.normal(ks[3], (mid_channels,), jnp.float32)
    g2 = 1.0 + 0.1 * jax.random.normal(ks[4], (out_channels,), jnp.float32)
    beta2 = 0.1 * jax.random.normal(ks[5], (out_channels,), jnp.float32)

    # NOTE: no conv bias is materialised -- training-mode BatchNorm subtracts
    # the per-channel batch mean, which cancels a per-channel bias exactly.
    packed = dict(
        w1=_pack_conv_weight(w1, cpi, cpm),
        g1=_pad_vec(g1, cpm, 1.0), beta1=_pad_vec(beta1, cpm, 0.0),
        w2=_pack_conv_weight(w2, cpm, cpo),
        g2=_pad_vec(g2, cpo, 1.0), beta2=_pad_vec(beta2, cpo, 0.0),
    )
    raw = dict(w1=w1, g1=g1, beta1=beta1, w2=w2, g2=g2, beta2=beta2)
    return packed, raw


# --------------------------------------------------------------------------
# Public forward (NCHW in/out to match the PyTorch module; the transposes and
# channel padding are boundary glue -- a NHWC end-to-end model would drop them).
# --------------------------------------------------------------------------
@functools.partial(jax.jit, static_argnames=("ksize", "out_channels"))
def double_conv(x_nchw, params, ksize, out_channels):
    n, cin, h, w = x_nchw.shape
    cpi = params["w1"].shape[0] // (ksize * ksize)
    x = jnp.transpose(x_nchw, (0, 2, 3, 1))                       # NCHW -> NHWC
    x = jnp.pad(x, ((0, 0), (0, 0), (0, 0), (0, cpi - cin)))      # lane padding
    y = _double_conv_pallas(x, params["w1"], params["g1"], params["beta1"],
                            params["w2"], params["g2"], params["beta2"], ksize)
    y = y[:, :out_channels].reshape(n, h, w, out_channels)
    return jnp.transpose(y, (0, 3, 1, 2))                         # NHWC -> NCHW


# --------------------------------------------------------------------------
# Pure-JAX reference (PyTorch training-mode BN semantics) for a sanity check.
# --------------------------------------------------------------------------
def reference_double_conv(x_nchw, raw, eps=1e-5):
    def block(x, w_oihw, gamma, beta):
        y = jax.lax.conv_general_dilated(
            x, w_oihw, window_strides=(1, 1), padding="SAME",
            dimension_numbers=("NCHW", "OIHW", "NCHW"))
        mean = jnp.mean(y, axis=(0, 2, 3), keepdims=True)
        var = jnp.mean((y - mean) ** 2, axis=(0, 2, 3), keepdims=True)
        yh = (y - mean) * jax.lax.rsqrt(var + eps)
        yh = yh * gamma[None, :, None, None] + beta[None, :, None, None]
        return jnp.maximum(yh, 0.0)

    y = block(x_nchw, raw["w1"], raw["g1"], raw["beta1"])
    return block(y, raw["w2"], raw["g2"], raw["beta2"])


if __name__ == "__main__":
    key = jax.random.PRNGKey(0)
    kx, kp = jax.random.split(key)

    # Small shapes consistent with the module: N=2, Cin=4, H=W=16, k=3,
    # mid_channels = out_channels = 8 (mid defaults to out in the module).
    N, Cin, H, W = 2, 4, 16, 16
    Cout, K = 8, 3

    x = jax.random.normal(kx, (N, Cin, H, W), jnp.float32)
    params, raw = init_double_conv_params(kp, Cin, Cout, K)

    out = double_conv(x, params, ksize=K, out_channels=Cout)
    out = jax.block_until_ready(out)

    assert out.shape == (N, Cout, H, W), out.shape
    assert jnp.isfinite(out).all()
    assert jnp.all(out >= 0.0)  # ReLU output

    # Sanity check against a plain-JAX reference. Tolerance is loose enough to
    # absorb MXU f32 (bf16-pass) precision differences between the Pallas
    # matmul formulation and XLA's convolution, but tight enough to catch any
    # structural bug (tap alignment, weight packing, BN stats).
    ref = jax.block_until_ready(reference_double_conv(x, raw))
    assert jnp.allclose(out, ref, rtol=3e-2, atol=3e-2), (
        float(jnp.max(jnp.abs(out - ref))))

    print("KERNEL_OK")
</pallas_src>

<mosaic_0001>
module attributes {stable_mosaic.version = 11 : i64} {
  func.func @_double_conv_kernel(%arg0: i32, %arg1: memref<2x16x16x128xf32, #tpu.memory_space<vmem>>, %arg2: memref<1152x128xf32, #tpu.memory_space<vmem>>, %arg3: memref<1x128xf32, #tpu.memory_space<vmem>>, %arg4: memref<1x128xf32, #tpu.memory_space<vmem>>, %arg5: memref<1152x128xf32, #tpu.memory_space<vmem>>, %arg6: memref<1x128xf32, #tpu.memory_space<vmem>>, %arg7: memref<1x128xf32, #tpu.memory_space<vmem>>, %arg8: memref<512x128xf32, #tpu.memory_space<vmem>>, %arg9: memref<2x18x25x128xf32, #tpu.memory_space<vmem>>, %arg10: memref<2x18x25x128xf32, #tpu.memory_space<vmem>>) attributes {dimension_semantics = [#tpu.dimension_semantics<arbitrary>], iteration_bounds = array<i64: 1>, scalar_prefetch = 0 : i64, scratch_operands = 2 : i64, tpu.core_type = #tpu.core_type<tc>, window_params = [{pipeline_mode = #tpu.pipeline_mode<synchronous>, transform_indices = @transform_0, window_bounds = array<i64: 2, 16, 16, 128>}, {pipeline_mode = #tpu.pipeline_mode<synchronous>, transform_indices = @transform_1, window_bounds = array<i64: 1152, 128>}, {pipeline_mode = #tpu.pipeline_mode<synchronous>, transform_indices = @transform_2, window_bounds = array<i64: 1, 128>}, {pipeline_mode = #tpu.pipeline_mode<synchronous>, transform_indices = @transform_3, window_bounds = array<i64: 1, 128>}, {pipeline_mode = #tpu.pipeline_mode<synchronous>, transform_indices = @transform_4, window_bounds = array<i64: 1152, 128>}, {pipeline_mode = #tpu.pipeline_mode<synchronous>, transform_indices = @transform_5, window_bounds = array<i64: 1, 128>}, {pipeline_mode = #tpu.pipeline_mode<synchronous>, transform_indices = @transform_6, window_bounds = array<i64: 1, 128>}, {pipeline_mode = #tpu.pipeline_mode<synchronous>, transform_indices = @transform_7, window_bounds = array<i64: 512, 128>}]} {
    %cst = arith.constant 0.000000e+00 : f32
    %0 = vector.broadcast %cst : f32 to vector<2x18x25x128xf32>
    %c0 = arith.constant 0 : index
    %c0_0 = arith.constant 0 : index
    %c0_1 = arith.constant 0 : index
    %c0_2 = arith.constant 0 : index
    %1 = vector.load %arg9[%c0, %c0_0, %c0_1, %c0_2] : memref<2x18x25x128xf32, #tpu.memory_space<vmem>>, vector<2x18x25x128xf32>
    tpu.vector_store %arg9[%c0, %c0_0, %c0_1, %c0_2], %0 {strides = array<i32>} : memref<2x18x25x128xf32, #tpu.memory_space<vmem>>, vector<2x18x25x128xf32>,
    %c0_3 = arith.constant 0 : index
    %c0_4 = arith.constant 0 : index
    %c0_5 = arith.constant 0 : index
    %c0_6 = arith.constant 0 : index
    %2 = vector.load %arg1[%c0_3, %c0_4, %c0_5, %c0_6] : memref<2x16x16x128xf32, #tpu.memory_space<vmem>>, vector<2x16x16x128xf32>
    %c0_7 = arith.constant 0 : index
    %c1 = arith.constant 1 : index
    %c8 = arith.constant 8 : index
    %c0_8 = arith.constant 0 : index
    %3 = vector.load %arg9[%c0_7, %c1, %c8, %c0_8] : memref<2x18x25x128xf32, #tpu.memory_space<vmem>>, vector<2x16x16x128xf32>
    tpu.vector_store %arg9[%c0_7, %c1, %c8, %c0_8], %2 {strides = array<i32>} : memref<2x18x25x128xf32, #tpu.memory_space<vmem>>, vector<2x16x16x128xf32>,
    %c0_9 = arith.constant 0 : index
    %c0_10 = arith.constant 0 : index
    %c7 = arith.constant 7 : index
    %c0_11 = arith.constant 0 : index
    %4 = vector.load %arg9[%c0_9, %c0_10, %c7, %c0_11] : memref<2x18x25x128xf32, #tpu.memory_space<vmem>>, vector<2x16x16x128xf32>
    %5 = vector.shape_cast %4 : vector<2x16x16x128xf32> to vector<512x128xf32>
    %c0_12 = arith.constant 0 : index
    %c0_13 = arith.constant 0 : index
    %c8_14 = arith.constant 8 : index
    %c0_15 = arith.constant 0 : index
    %6 = vector.load %arg9[%c0_12, %c0_13, %c8_14, %c0_15] : memref<2x18x25x128xf32, #tpu.memory_space<vmem>>, vector<2x16x16x128xf32>
    %7 = vector.shape_cast %6 : vector<2x16x16x128xf32> to vector<512x128xf32>
    %c0_16 = arith.constant 0 : index
    %c0_17 = arith.constant 0 : index
    %c9 = arith.constant 9 : index
    %c0_18 = arith.constant 0 : index
    %8 = vector.load %arg9[%c0_16, %c0_17, %c9, %c0_18] : memref<2x18x25x128xf32, #tpu.memory_space<vmem>>, vector<2x16x16x128xf32>
    %9 = vector.shape_cast %8 : vector<2x16x16x128xf32> to vector<512x128xf32>
    %c0_19 = arith.constant 0 : index
    %c1_20 = arith.constant 1 : index
    %c7_21 = arith.constant 7 : index
    %c0_22 = arith.constant 0 : index
    %10 = vector.load %arg9[%c0_19, %c1_20, %c7_21, %c0_22] : memref<2x18x25x128xf32, #tpu.memory_space<vmem>>, vector<2x16x16x128xf32>
    %11 = vector.shape_cast %10 : vector<2x16x16x128xf32> to vector<512x128xf32>
    %c0_23 = arith.constant 0 : index
    %c1_24 = arith.constant 1 : index
    %c8_25 = arith.constant 8 : index
    %c0_26 = arith.constant 0 : index
    %12 = vector.load %arg9[%c0_23, %c1_24, %c8_25, %c0_26] : memref<2x18x25x128xf32, #tpu.memory_space<vmem>>, vector<2x16x16x128xf32>
    %13 = vector.shape_cast %12 : vector<2x16x16x128xf32> to vector<512x128xf32>
    %c0_27 = arith.constant 0 : index
    %c1_28 = arith.constant 1 : index
    %c9_29 = arith.constant 9 : index
    %c0_30 = arith.constant 0 : index
    %14 = vector.load %arg9[%c0_27, %c1_28, %c9_29, %c0_30] : memref<2x18x25x128xf32, #tpu.memory_space<vmem>>, vector<2x16x16x128xf32>
    %15 = vector.shape_cast %14 : vector<2x16x16x128xf32> to vector<512x128xf32>
    %c0_31 = arith.constant 0 : index
    %c2 = arith.constant 2 : index
    %c7_32 = arith.constant 7 : index
    %c0_33 = arith.constant 0 : index
    %16 = vector.load %arg9[%c0_31, %c2, %c7_32, %c0_33] : memref<2x18x25x128xf32, #tpu.memory_space<vmem>>, vector<2x16x16x128xf32>
    %17 = vector.shape_cast %16 : vector<2x16x16x128xf32> to vector<512x128xf32>
    %c0_34 = arith.constant 0 : index
    %c2_35 = arith.constant 2 : index
    %c8_36 = arith.constant 8 : index
    %c0_37 = arith.constant 0 : index
    %18 = vector.load %arg9[%c0_34, %c2_35, %c8_36, %c0_37] : memref<2x18x25x128xf32, #tpu.memory_space<vmem>>, vector<2x16x16x128xf32>
    %19 = vector.shape_cast %18 : vector<2x16x16x128xf32> to vector<512x128xf32>
    %c0_38 = arith.constant 0 : index
    %c2_39 = arith.constant 2 : index
    %c9_40 = arith.constant 9 : index
    %c0_41 = arith.constant 0 : index
    %20 = vector.load %arg9[%c0_38, %c2_39, %c9_40, %c0_41] : memref<2x18x25x128xf32, #tpu.memory_space<vmem>>, vector<2x16x16x128xf32>
    %21 = vector.shape_cast %20 : vector<2x16x16x128xf32> to vector<512x128xf32>
    %22 = tpu.concatenate %5, %7, %9, %11, %13, %15, %17, %19, %21 in 1 : vector<512x128xf32>, vector<512x128xf32>, vector<512x128xf32>, vector<512x128xf32>, vector<512x128xf32>, vector<512x128xf32>, vector<512x128xf32>, vector<512x128xf32>, vector<512x128xf32> -> vector<512x1152xf32>
    %c0_42 = arith.constant 0 : index
    %c0_43 = arith.constant 0 : index
    %23 = vector.load %arg2[%c0_42, %c0_43] : memref<1152x128xf32, #tpu.memory_space<vmem>>, vector<1152x128xf32>
    %cst_44 = arith.constant dense<0.000000e+00> : vector<512x128xf32>
    %24 = tpu.matmul %22, %23, %cst_44 {dimension_numbers = #tpu.dot_dimension_numbers<[1], [0], [0], [1], [0, 0, 1, 1], [], []>} : vector<512x1152xf32>, vector<1152x128xf32>, vector<512x128xf32> -> vector<512x128xf32>
    %cst_45 = arith.constant 1.000000e+00 : f32
    %25 = vector.broadcast %cst_45 : f32 to vector<1x512xf32>
    %cst_46 = arith.constant dense<0.000000e+00> : vector<1x128xf32>
    %26 = tpu.matmul %25, %24, %cst_46 {dimension_numbers = #tpu.dot_dimension_numbers<[1], [0], [0], [1], [0, 0, 1, 1], [], []>} : vector<1x512xf32>, vector<512x128xf32>, vector<1x128xf32> -> vector<1x128xf32>
    %27 = arith.mulf %24, %24 : vector<512x128xf32>
    %cst_47 = arith.constant dense<0.000000e+00> : vector<1x128xf32>
    %28 = tpu.matmul %25, %27, %cst_47 {dimension_numbers = #tpu.dot_dimension_numbers<[1], [0], [0], [1], [0, 0, 1, 1], [], []>} : vector<1x512xf32>, vector<512x128xf32>, vector<1x128xf32> -> vector<1x128xf32>
    %cst_48 = arith.constant 0.001953125 : f32
    %29 = vector.broadcast %cst_48 : f32 to vector<1x128xf32>
    %30 = arith.mulf %26, %29 : vector<1x128xf32>
    %cst_49 = arith.constant 0.001953125 : f32
    %31 = vector.broadcast %cst_49 : f32 to vector<1x128xf32>
    %32 = arith.mulf %28, %31 : vector<1x128xf32>
    %33 = arith.mulf %30, %30 : vector<1x128xf32>
    %34 = arith.subf %32, %33 : vector<1x128xf32>
    %cst_50 = arith.constant 0.000000e+00 : f32
    %35 = vector.broadcast %cst_50 : f32 to vector<1x128xf32>
    %36 = arith.maximumf %34, %35 : vector<1x128xf32>
    %c0_51 = arith.constant 0 : index
    %c0_52 = arith.constant 0 : index
    %37 = vector.load %arg3[%c0_51, %c0_52] : memref<1x128xf32, #tpu.memory_space<vmem>>, vector<1x128xf32>
    %cst_53 = arith.constant 9.99999974E-6 : f32
    %38 = vector.broadcast %cst_53 : f32 to vector<1x128xf32>
    %39 = arith.addf %36, %38 : vector<1x128xf32>
    %40 = math.rsqrt %39 : vector<1x128xf32>
    %41 = arith.mulf %37, %40 : vector<1x128xf32>
    %c0_54 = arith.constant 0 : index
    %c0_55 = arith.constant 0 : index
    %42 = vector.load %arg4[%c0_54, %c0_55] : memref<1x128xf32, #tpu.memory_space<vmem>>, vector<1x128xf32>
    %43 = arith.mulf %30, %41 : vector<1x128xf32>
    %44 = arith.subf %42, %43 : vector<1x128xf32>
    %45 = vector.broadcast %41 : vector<1x128xf32> to vector<512x128xf32>
    %46 = arith.mulf %24, %45 : vector<512x128xf32>
    %47 = vector.broadcast %44 : vector<1x128xf32> to vector<512x128xf32>
    %48 = arith.addf %46, %47 : vector<512x128xf32>
    %cst_56 = arith.constant 0.000000e+00 : f32
    %49 = vector.broadcast %cst_56 : f32 to vector<512x128xf32>
    %50 = arith.maximumf %48, %49 : vector<512x128xf32>
    %cst_57 = arith.constant 0.000000e+00 : f32
    %51 = vector.broadcast %cst_57 : f32 to vector<2x18x25x128xf32>
    %c0_58 = arith.constant 0 : index
    %c0_59 = arith.constant 0 : index
    %c0_60 = arith.constant 0 : index
    %c0_61 = arith.constant 0 : index
    %52 = vector.load %arg10[%c0_58, %c0_59, %c0_60, %c0_61] : memref<2x18x25x128xf32, #tpu.memory_space<vmem>>, vector<2x18x25x128xf32>
    tpu.vector_store %arg10[%c0_58, %c0_59, %c0_60, %c0_61], %51 {strides = array<i32>} : memref<2x18x25x128xf32, #tpu.memory_space<vmem>>, vector<2x18x25x128xf32>,
    %53 = vector.shape_cast %50 : vector<512x128xf32> to vector<2x16x16x128xf32>
    %c0_62 = arith.constant 0 : index
    %c1_63 = arith.constant 1 : index
    %c8_64 = arith.constant 8 : index
    %c0_65 = arith.constant 0 : index
    %54 = vector.load %arg10[%c0_62, %c1_63, %c8_64, %c0_65] : memref<2x18x25x128xf32, #tpu.memory_space<vmem>>, vector<2x16x16x128xf32>
    tpu.vector_store %arg10[%c0_62, %c1_63, %c8_64, %c0_65], %53 {strides = array<i32>} : memref<2x18x25x128xf32, #tpu.memory_space<vmem>>, vector<2x16x16x128xf32>,
    %c0_66 = arith.constant 0 : index
    %c0_67 = arith.constant 0 : index
    %c7_68 = arith.constant 7 : index
    %c0_69 = arith.constant 0 : index
    %55 = vector.load %arg10[%c0_66, %c0_67, %c7_68, %c0_69] : memref<2x18x25x128xf32, #tpu.memory_space<vmem>>, vector<2x16x16x128xf32>
    %56 = vector.shape_cast %55 : vector<2x16x16x128xf32> to vector<512x128xf32>
    %c0_70 = arith.constant 0 : index
    %c0_71 = arith.constant 0 : index
    %c8_72 = arith.constant 8 : index
    %c0_73 = arith.constant 0 : index
    %57 = vector.load %arg10[%c0_70, %c0_71, %c8_72, %c0_73] : memref<2x18x25x128xf32, #tpu.memory_space<vmem>>, vector<2x16x16x128xf32>
    %58 = vector.shape_cast %57 : vector<2x16x16x128xf32> to vector<512x128xf32>
    %c0_74 = arith.constant 0 : index
    %c0_75 = arith.constant 0 : index
    %c9_76 = arith.constant 9 : index
    %c0_77 = arith.constant 0 : index
    %59 = vector.load %arg10[%c0_74, %c0_75, %c9_76, %c0_77] : memref<2x18x25x128xf32, #tpu.memory_space<vmem>>, vector<2x16x16x128xf32>
    %60 = vector.shape_cast %59 : vector<2x16x16x128xf32> to vector<512x128xf32>
    %c0_78 = arith.constant 0 : index
    %c1_79 = arith.constant 1 : index
    %c7_80 = arith.constant 7 : index
    %c0_81 = arith.constant 0 : index
    %61 = vector.load %arg10[%c0_78, %c1_79, %c7_80, %c0_81] : memref<2x18x25x128xf32, #tpu.memory_space<vmem>>, vector<2x16x16x128xf32>
    %62 = vector.shape_cast %61 : vector<2x16x16x128xf32> to vector<512x128xf32>
    %c0_82 = arith.constant 0 : index
    %c1_83 = arith.constant 1 : index
    %c8_84 = arith.constant 8 : index
    %c0_85 = arith.constant 0 : index
    %63 = vector.load %arg10[%c0_82, %c1_83, %c8_84, %c0_85] : memref<2x18x25x128xf32, #tpu.memory_space<vmem>>, vector<2x16x16x128xf32>
    %64 = vector.shape_cast %63 : vector<2x16x16x128xf32> to vector<512x128xf32>
    %c0_86 = arith.constant 0 : index
    %c1_87 = arith.constant 1 : index
    %c9_88 = arith.constant 9 : index
    %c0_89 = arith.constant 0 : index
    %65 = vector.load %arg10[%c0_86, %c1_87, %c9_88, %c0_89] : memref<2x18x25x128xf32, #tpu.memory_space<vmem>>, vector<2x16x16x128xf32>
    %66 = vector.shape_cast %65 : vector<2x16x16x128xf32> to vector<512x128xf32>
    %c0_90 = arith.constant 0 : index
    %c2_91 = arith.constant 2 : index
    %c7_92 = arith.constant 7 : index
    %c0_93 = arith.constant 0 : index
    %67 = vector.load %arg10[%c0_90, %c2_91, %c7_92, %c0_93] : memref<2x18x25x128xf32, #tpu.memory_space<vmem>>, vector<2x16x16x128xf32>
    %68 = vector.shape_cast %67 : vector<2x16x16x128xf32> to vector<512x128xf32>
    %c0_94 = arith.constant 0 : index
    %c2_95 = arith.constant 2 : index
    %c8_96 = arith.constant 8 : index
    %c0_97 = arith.constant 0 : index
    %69 = vector.load %arg10[%c0_94, %c2_95, %c8_96, %c0_97] : memref<2x18x25x128xf32, #tpu.memory_space<vmem>>, vector<2x16x16x128xf32>
    %70 = vector.shape_cast %69 : vector<2x16x16x128xf32> to vector<512x128xf32>
    %c0_98 = arith.constant 0 : index
    %c2_99 = arith.constant 2 : index
    %c9_100 = arith.constant 9 : index
    %c0_101 = arith.constant 0 : index
    %71 = vector.load %arg10[%c0_98, %c2_99, %c9_100, %c0_101] : memref<2x18x25x128xf32, #tpu.memory_space<vmem>>, vector<2x16x16x128xf32>
    %72 = vector.shape_cast %71 : vector<2x16x16x128xf32> to vector<512x128xf32>
    %73 = tpu.concatenate %56, %58, %60, %62, %64, %66, %68, %70, %72 in 1 : vector<512x128xf32>, vector<512x128xf32>, vector<512x128xf32>, vector<512x128xf32>, vector<512x128xf32>, vector<512x128xf32>, vector<512x128xf32>, vector<512x128xf32>, vector<512x128xf32> -> vector<512x1152xf32>
    %c0_102 = arith.constant 0 : index
    %c0_103 = arith.constant 0 : index
    %74 = vector.load %arg5[%c0_102, %c0_103] : memref<1152x128xf32, #tpu.memory_space<vmem>>, vector<1152x128xf32>
    %cst_104 = arith.constant dense<0.000000e+00> : vector<512x128xf32>
    %75 = tpu.matmul %73, %74, %cst_104 {dimension_numbers = #tpu.dot_dimension_numbers<[1], [0], [0], [1], [0, 0, 1, 1], [], []>} : vector<512x1152xf32>, vector<1152x128xf32>, vector<512x128xf32> -> vector<512x128xf32>
    %cst_105 = arith.constant 1.000000e+00 : f32
    %76 = vector.broadcast %cst_105 : f32 to vector<1x512xf32>
    %cst_106 = arith.constant dense<0.000000e+00> : vector<1x128xf32>
    %77 = tpu.matmul %76, %75, %cst_106 {dimension_numbers = #tpu.dot_dimension_numbers<[1], [0], [0], [1], [0, 0, 1, 1], [], []>} : vector<1x512xf32>, vector<512x128xf32>, vector<1x128xf32> -> vector<1x128xf32>
    %78 = arith.mulf %75, %75 : vector<512x128xf32>
    %cst_107 = arith.constant dense<0.000000e+00> : vector<1x128xf32>
    %79 = tpu.matmul %76, %78, %cst_107 {dimension_numbers = #tpu.dot_dimension_numbers<[1], [0], [0], [1], [0, 0, 1, 1], [], []>} : vector<1x512xf32>, vector<512x128xf32>, vector<1x128xf32> -> vector<1x128xf32>
    %cst_108 = arith.constant 0.001953125 : f32
    %80 = vector.broadcast %cst_108 : f32 to vector<1x128xf32>
    %81 = arith.mulf %77, %80 : vector<1x128xf32>
    %cst_109 = arith.constant 0.001953125 : f32
    %82 = vector.broadcast %cst_109 : f32 to vector<1x128xf32>
    %83 = arith.mulf %79, %82 : vector<1x128xf32>
    %84 = arith.mulf %81, %81 : vector<1x128xf32>
    %85 = arith.subf %83, %84 : vector<1x128xf32>
    %cst_110 = arith.constant 0.000000e+00 : f32
    %86 = vector.broadcast %cst_110 : f32 to vector<1x128xf32>
    %87 = arith.maximumf %85, %86 : vector<1x128xf32>
    %c0_111 = arith.constant 0 : index
    %c0_112 = arith.constant 0 : index
    %88 = vector.load %arg6[%c0_111, %c0_112] : memref<1x128xf32, #tpu.memory_space<vmem>>, vector<1x128xf32>
    %cst_113 = arith.constant 9.99999974E-6 : f32
    %89 = vector.broadcast %cst_113 : f32 to vector<1x128xf32>
    %90 = arith.addf %87, %89 : vector<1x128xf32>
    %91 = math.rsqrt %90 : vector<1x128xf32>
    %92 = arith.mulf %88, %91 : vector<1x128xf32>
    %c0_114 = arith.constant 0 : index
    %c0_115 = arith.constant 0 : index
    %93 = vector.load %arg7[%c0_114, %c0_115] : memref<1x128xf32, #tpu.memory_space<vmem>>, vector<1x128xf32>
    %94 = arith.mulf %81, %92 : vector<1x128xf32>
    %95 = arith.subf %93, %94 : vector<1x128xf32>
    %96 = vector.broadcast %92 : vector<1x128xf32> to vector<512x128xf32>
    %97 = arith.mulf %75, %96 : vector<512x128xf32>
    %98 = vector.broadcast %95 : vector<1x128xf32> to vector<512x128xf32>
    %99 = arith.addf %97, %98 : vector<512x128xf32>
    %cst_116 = arith.constant 0.000000e+00 : f32
    %100 = vector.broadcast %cst_116 : f32 to vector<512x128xf32>
    %101 = arith.maximumf %99, %100 : vector<512x128xf32>
    %c0_117 = arith.constant 0 : index
    %c0_118 = arith.constant 0 : index
    %102 = vector.load %arg8[%c0_117, %c0_118] : memref<512x128xf32, #tpu.memory_space<vmem>>, vector<512x128xf32>
    tpu.vector_store %arg8[%c0_117, %c0_118], %101 {strides = array<i32>} : memref<512x128xf32, #tpu.memory_space<vmem>>, vector<512x128xf32>,
    return
  }
  func.func @transform_0(%arg0: i32) -> (i32, i32, i32, i32) {
    %c0_i32 = arith.constant 0 : i32
    %c0_i32_0 = arith.constant 0 : i32
    %c0_i32_1 = arith.constant 0 : i32
    %c0_i32_2 = arith.constant 0 : i32
    %c0_i32_3 = arith.constant 0 : i32
    return %c0_i32, %c0_i32_0, %c0_i32_1, %c0_i32_2 : i32, i32, i32, i32
  }
  func.func @transform_1(%arg0: i32) -> (i32, i32) {
    %c0_i32 = arith.constant 0 : i32
    %c0_i32_0 = arith.constant 0 : i32
    %c0_i32_1 = arith.constant 0 : i32
    return %c0_i32, %c0_i32_0 : i32, i32
  }
  func.func @transform_2(%arg0: i32) -> (i32, i32) {
    %c0_i32 = arith.constant 0 : i32
    %c0_i32_0 = arith.constant 0 : i32
    %c0_i32_1 = arith.constant 0 : i32
    return %c0_i32, %c0_i32_0 : i32, i32
  }
  func.func @transform_3(%arg0: i32) -> (i32, i32) {
    %c0_i32 = arith.constant 0 : i32
    %c0_i32_0 = arith.constant 0 : i32
    %c0_i32_1 = arith.constant 0 : i32
    return %c0_i32, %c0_i32_0 : i32, i32
  }
  func.func @transform_4(%arg0: i32) -> (i32, i32) {
    %c0_i32 = arith.constant 0 : i32
    %c0_i32_0 = arith.constant 0 : i32
    %c0_i32_1 = arith.constant 0 : i32
    return %c0_i32, %c0_i32_0 : i32, i32
  }
  func.func @transform_5(%arg0: i32) -> (i32, i32) {
    %c0_i32 = arith.constant 0 : i32
    %c0_i32_0 = arith.constant 0 : i32
    %c0_i32_1 = arith.constant 0 : i32
    return %c0_i32, %c0_i32_0 : i32, i32
  }
  func.func @transform_6(%arg0: i32) -> (i32, i32) {
    %c0_i32 = arith.constant 0 : i32
    %c0_i32_0 = arith.constant 0 : i32
    %c0_i32_1 = arith.constant 0 : i32
    return %c0_i32, %c0_i32_0 : i32, i32
  }
  func.func @transform_7(%arg0: i32) -> (i32, i32) {
    %c0_i32 = arith.constant 0 : i32
    %c0_i32_0 = arith.constant 0 : i32
    %c0_i32_1 = arith.constant 0 : i32
    return %c0_i32, %c0_i32_0 : i32, i32
  }
}

</mosaic_0001>

<bundles_post_ra>
// kernel: double_conv.1
= control target key start
LH: loop header
LB: loop body
LE: loop exit
PB: predicated region body
PF: predicated region fallthrough
CT: control target
= control target key end

     0   :  { %12 = vsyncpa [#allocation5], 0  ;;  %s9210_s24 = smov [#allocation4]   ;;  %s14517_s0 = inlined_call_operand.vmem [shape: f32[2,16,16,128], index: 0, kind: input, shape index: {}]   ;;  %s14518_s1 = inlined_call_operand.vmem [shape: f32[1152,128], index: 1, kind: input, shape index: {}]   ;;  %s14519_s2 = inlined_call_operand.vmem [shape: f32[1,128], index: 2, kind: input, shape index: {}]   ;;  %s14520_s3 = inlined_call_operand.vmem [shape: f32[1,128], index: 3, kind: input, shape index: {}]   ;;  %s14521_s4 = inlined_call_operand.hbm [shape: f32[1152,128], index: 4, kind: input, shape index: {}]   ;;  %s14522_s5 = inlined_call_operand.vmem [shape: f32[1,128], index: 5, kind: input, shape index: {}]   ;;  %s14523_s6 = inlined_call_operand.vmem [shape: f32[1,128], index: 6, kind: input, shape index: {}]   ;;  %s14524_s7 = inlined_call_operand.vmem [shape: f32[512,128], index: 7, kind: output, shape index: {}]  }
   0x1   :  { %s26_s25 = sshll.u32 %s9210_s24, 4  ;;  %s9186_s28 = scalar_lea.hbm %s14521_s4, 18432  ;;  %s27_s25 = int_to_ptr.vmem [resolvable:$true] %s26_s25 }
   0x2   :  { %p9187_p0 = scmp.ne.s32.totalorder %s14521_s4, %s9186_s28  ;;  %p9190_p1 = scmp.lt.u32.totalorder %s9186_s28, %s14521_s4 }
   0x4   :  { %p9192_p2 = pnand %p9190_p1, %p9187_p0 }
   0x6   :  { %9195 = shalt.err (!%p9192_p2)
}
   0x7   :  { %s9196_s10 = scalar_lea.vmem %s27_s25, 18432  ;;  %p9201_p4 = scmp.lt.s32.totalorder %s27_s25, %s27_s25 }
   0x8   :  { %p9197_p3 = scmp.ne.s32.totalorder %s27_s25, %s9196_s10  ;;  %p9202_p5 = scmp.lt.s32.totalorder %s9196_s10, %s9196_s10 }
   0xa   :  { %p9203_p6 = por %p9202_p5, %p9201_p4 }
   0xc   :  { %p9204_p7 = pnand %p9203_p6, %p9197_p3 }
   0xe   :  { %9207 = shalt.err (!%p9204_p7)
}
   0xf   :  { %s9211_s11 = smov 128   ;;  %s9212_s12 = smov 8  }
  0x10   :  { %32 = dma.hbm_to_vmem [thread:$0]  %s14521_s4, 18432, %s27_s25, [#allocation5], %s9211_s11, %s9211_s11, %s9212_s12  }
  0x11   :  { %9208 = dma.done.wait [#allocation5], 18432  }
  0x12   :  { %9209 = vsyncadd [#allocation5], 4294948864  ;;  %v14525_v0 = vmov 0.0|0.0   ;;  %v9214_v1 = vmov 0.0   ;;  %v890_v2 = vld [vmem:[%s14518_s1] sm:$0xff]  ;;  %v891_v3 = vld [vmem:[%s14518_s1 + $0x8] sm:$0xff] }
  0x13   :  { %7699 = vmatprep.subr.bf16.mxu0 %v14525_v0  ;;  %41 = vst [vmem:[#allocation2 + $0x8] sm:$0xff] %v9214_v1  ;;  %1098 = vmatprep.mubr.f32.mxu0 %v9214_v1  ;;  %40 = vst [vmem:[#allocation2] sm:$0xff] %v9214_v1  ;;  %v892_v4 = vld [vmem:[%s14518_s1 + $0x10] sm:$0xff]  ;;  %v7700_v5 = vpack.c.bf16 %v891_v3, %v890_v2  ;;  %v893_v6 = vld [vmem:[%s14518_s1 + $0x18] sm:$0xff] }
  0x14   :  { %42 = vst [vmem:[#allocation2 + $0x10] sm:$0xff] %v9214_v1  ;;  %43 = vst [vmem:[#allocation2 + $0x18] sm:$0x1] %v9214_v1  ;;  %v7703_v7 = vpack.c.bf16 %v893_v6, %v892_v4  ;;  %v894_v8 = vld [vmem:[%s14518_s1 + $0x20] sm:$0xff]  ;;  %v895_v9 = vld [vmem:[%s14518_s1 + $0x28] sm:$0xff] }
  0x15   :  { %44 = vst [vmem:[#allocation2 + $0x20] sm:$0xff] %v9214_v1  ;;  %47 = vst [vmem:[#allocation2 + $0x38] sm:$0x1] %v9214_v1  ;;  %7701 = vmatpush1.bf16.msra.mxu0 %v7700_v5  ;;  %v7706_v10 = vpack.c.bf16 %v895_v9, %v894_v8  ;;  %v896_v11 = vld [vmem:[%s14518_s1 + $0x30] sm:$0xff]  ;;  %v897_v12 = vld [vmem:[%s14518_s1 + $0x38] sm:$0xff] }
  0x16   :  { %48 = vst [vmem:[#allocation2 + $0x40] sm:$0xff] %v9214_v1  ;;  %51 = vst [vmem:[#allocation2 + $0x58] sm:$0x1] %v9214_v1  ;;  %7702 = vmatprep.subr.bf16.mxu0 %v14525_v0  ;;  %v7709_v13 = vpack.c.bf16 %v897_v12, %v896_v11  ;;  %v898_v14 = vld [vmem:[%s14518_s1 + $0x40] sm:$0xff]  ;;  %v899_v15 = vld [vmem:[%s14518_s1 + $0x48] sm:$0xff] }
  0x17   :  { %52 = vst [vmem:[#allocation2 + $0x60] sm:$0xff] %v9214_v1  ;;  %55 = vst [vmem:[#allocation2 + $0x78] sm:$0x1] %v9214_v1  ;;  %v9466_v16 = vld [vmem:[%s14517_s0] sm:$0xff]  ;;  %v9471_v17 = vld [vmem:[%s14517_s0 + $0x8] sm:$0xff]  ;;  %v7712_v23 = vpack.c.bf16 %v899_v15, %v898_v14 }
  0x18   :  { %56 = vst [vmem:[#allocation2 + $0x80] sm:$0xff] %v9214_v1  ;;  %59 = vst [vmem:[#allocation2 + $0x98] sm:$0x1] %v9214_v1  ;;  %v9476_v18 = vld [vmem:[%s14517_s0 + $0x10] sm:$0xff]  ;;  %v9484_v19 = vld [vmem:[%s14517_s0 + $0x18] sm:$0xff] }
  0x19   :  { %60 = vst [vmem:[#allocation2 + $0xa0] sm:$0xff] %v9214_v1  ;;  %63 = vst [vmem:[#allocation2 + $0xb8] sm:$0x1] %v9214_v1  ;;  %7704 = vmatpush1.bf16.msra.mxu0 %v7703_v7  ;;  %v9490_v20 = vld [vmem:[%s14517_s0 + $0x20] sm:$0xff]  ;;  %v9495_v21 = vld [vmem:[%s14517_s0 + $0x28] sm:$0xff] }
  0x1a   :  { %64 = vst [vmem:[#allocation2 + $0xc0] sm:$0xff] %v9214_v1  ;;  %67 = vst [vmem:[#allocation2 + $0xd8] sm:$0x1] %v9214_v1  ;;  %7705 = vmatprep.subr.bf16.mxu0 %v14525_v0  ;;  %v9500_v22 = vld [vmem:[%s14517_s0 + $0x30] sm:$0xff]  ;;  %v901_v25 = vld [vmem:[%s14518_s1 + $0x58] sm:$0xff] }
  0x1b   :  { %68 = vst [vmem:[#allocation2 + $0xe0] sm:$0xff] %v9214_v1  ;;  %71 = vst [vmem:[#allocation2 + $0xf8] sm:$0x1] %v9214_v1  ;;  %v900_v24 = vld [vmem:[%s14518_s1 + $0x50] sm:$0xff]  ;;  %v9514_v26 = vld [vmem:[%s14517_s0 + $0x38] sm:$0xff] }
  0x1c   :  { %72 = vst [vmem:[#allocation2 + $0x100] sm:$0xff] %v9214_v1  ;;  %75 = vst [vmem:[#allocation2 + $0x118] sm:$0x1] %v9214_v1  ;;  %v9521_v27 = vld [vmem:[%s14517_s0 + $0x40] sm:$0xff]  ;;  %v9526_v28 = vld [vmem:[%s14517_s0 + $0x48] sm:$0xff]  ;;  %v7715_v34 = vpack.c.bf16 %v901_v25, %v900_v24 }
  0x1d   :  { %76 = vst [vmem:[#allocation2 + $0x120] sm:$0xff] %v9214_v1  ;;  %79 = vst [vmem:[#allocation2 + $0x138] sm:$0x1] %v9214_v1  ;;  %7707 = vmatpush1.bf16.msra.mxu0 %v7706_v10  ;;  %v9531_v29 = vld [vmem:[%s14517_s0 + $0x50] sm:$0xff]  ;;  %v9539_v30 = vld [vmem:[%s14517_s0 + $0x58] sm:$0xff] }
  0x1e   :  { %80 = vst [vmem:[#allocation2 + $0x140] sm:$0xff] %v9214_v1  ;;  %83 = vst [vmem:[#allocation2 + $0x158] sm:$0x1] %v9214_v1  ;;  %7708 = vmatprep.subr.bf16.mxu0 %v14525_v0  ;;  %v9545_v31 = vld [vmem:[%s14517_s0 + $0x60] sm:$0xff]  ;;  %v9550_v32 = vld [vmem:[%s14517_s0 + $0x68] sm:$0xff] }
  0x1f   :  { %84 = vst [vmem:[#allocation2 + $0x160] sm:$0xff] %v9214_v1  ;;  %87 = vst [vmem:[#allocation2 + $0x178] sm:$0x1] %v9214_v1  ;;  %v9555_v33 = vld [vmem:[%s14517_s0 + $0x70] sm:$0xff]  ;;  %v9563_v35 = vld [vmem:[%s14517_s0 + $0x78] sm:$0xff] }
  0x20   :  { %88 = vst [vmem:[#allocation2 + $0x180] sm:$0xff] %v9214_v1  ;;  %91 = vst [vmem:[#allocation2 + $0x198] sm:$0x1] %v9214_v1  ;;  %v902_v36 = vld [vmem:[%s14518_s1 + $0x60] sm:$0xff]  ;;  %v903_v37 = vld [vmem:[%s14518_s1 + $0x68] sm:$0xff] }
  0x21   :  { %92 = vst [vmem:[#allocation2 + $0x1a0] sm:$0xff] %v9214_v1  ;;  %95 = vst [vmem:[#allocation2 + $0x1b8] sm:$0x1] %v9214_v1  ;;  %7710 = vmatpush1.bf16.msra.mxu0 %v7709_v13  ;;  %v9576_v38 = vld [vmem:[%s14517_s0 + $0x80] sm:$0xff]  ;;  %v9581_v39 = vld [vmem:[%s14517_s0 + $0x88] sm:$0xff]  ;;  %v7718_v40 = vpack.c.bf16 %v903_v37, %v902_v36 }
  0x22   :  { %96 = vst [vmem:[#allocation2 + $0x1c0] sm:$0xff] %v9214_v1  ;;  %99 = vst [vmem:[#allocation2 + $0x1d8] sm:$0x1] %v9214_v1  ;;  %7711 = vmatprep.subr.bf16.mxu0 %v14525_v0  ;;  %v9588_v41 = vld [vmem:[%s14517_s0 + $0x90] sm:$0xff]  ;;  %v905_v43 = vld [vmem:[%s14518_s1 + $0x78] sm:$0xff] }
  0x23   :  { %100 = vst [vmem:[#allocation2 + $0x1e0] sm:$0xff] %v9214_v1  ;;  %103 = vst [vmem:[#allocation2 + $0x1f8] sm:$0x1] %v9214_v1  ;;  %v904_v42 = vld [vmem:[%s14518_s1 + $0x70] sm:$0xff]  ;;  %v9601_v44 = vld [vmem:[%s14517_s0 + $0x98] sm:$0xff] }
  0x24   :  { %104 = vst [vmem:[#allocation2 + $0x200] sm:$0xff] %v9214_v1  ;;  %107 = vst [vmem:[#allocation2 + $0x218] sm:$0x1] %v9214_v1  ;;  %v7721_v45 = vpack.c.bf16 %v905_v43, %v904_v42  ;;  %v9607_v46 = vld [vmem:[%s14517_s0 + $0xa0] sm:$0xff]  ;;  %v9612_v47 = vld [vmem:[%s14517_s0 + $0xa8] sm:$0xff] }
  0x25   :  { %108 = vst [vmem:[#allocation2 + $0x220] sm:$0xff] %v9214_v1  ;;  %109 = vst [vmem:[#allocation2 + $0x228] sm:$0xff] %v9214_v1  ;;  %7713 = vmatpush1.bf16.msra.mxu0 %v7712_v23  ;;  %v906_v48 = vld [vmem:[%s14518_s1 + $0x80] sm:$0xff]  ;;  %v907_v49 = vld [vmem:[%s14518_s1 + $0x88] sm:$0xff] }
  0x26   :  { %110 = vst [vmem:[#allocation2 + $0x230] sm:$0xff] %v9214_v1  ;;  %111 = vst [vmem:[#allocation2 + $0x238] sm:$0x1] %v9214_v1  ;;  %7714 = vmatprep.subr.bf16.mxu0 %v14525_v0  ;;  %v9626_v50 = vld [vmem:[%s14517_s0 + $0xb0] sm:$0xff]  ;;  %v9632_v51 = vld [vmem:[%s14517_s0 + $0xb8] sm:$0xff]  ;;  %v7724_v52 = vpack.c.bf16 %v907_v49, %v906_v48 }
  0x27   :  { %112 = vst [vmem:[#allocation2 + $0x240] sm:$0xff] %v9214_v1  ;;  %113 = vst [vmem:[#allocation2 + $0x248] sm:$0xff] %v9214_v1  ;;  %v908_v53 = vld [vmem:[%s14518_s1 + $0x90] sm:$0xff]  ;;  %v909_v54 = vld [vmem:[%s14518_s1 + $0x98] sm:$0xff] }
  0x28   :  { %114 = vst [vmem:[#allocation2 + $0x250] sm:$0xff] %v9214_v1  ;;  %115 = vst [vmem:[#allocation2 + $0x258] sm:$0x1] %v9214_v1  ;;  %v9645_v55 = vld [vmem:[%s14517_s0 + $0xc0] sm:$0xff]  ;;  %v7727_v56 = vpack.c.bf16 %v909_v54, %v908_v53  ;;  %v911_v58 = vld [vmem:[%s14518_s1 + $0xa8] sm:$0xff] }
  0x29   :  { %116 = vst [vmem:[#allocation2 + $0x260] sm:$0xff] %v9214_v1  ;;  %119 = vst [vmem:[#allocation2 + $0x278] sm:$0x1] %v9214_v1  ;;  %7716 = vmatpush1.bf16.msra.mxu0 %v7715_v34  ;;  %v910_v57 = vld [vmem:[%s14518_s1 + $0xa0] sm:$0xff]  ;;  %v9658_v59 = vld [vmem:[%s14517_s0 + $0xc8] sm:$0xff] }
  0x2a   :  { %120 = vst [vmem:[#allocation2 + $0x280] sm:$0xff] %v9214_v1  ;;  %123 = vst [vmem:[#allocation2 + $0x298] sm:$0x1] %v9214_v1  ;;  %7717 = vmatprep.subr.bf16.mxu0 %v14525_v0  ;;  %v7730_v60 = vpack.c.bf16 %v911_v58, %v910_v57  ;;  %v912_v61 = vld [vmem:[%s14518_s1 + $0xb0] sm:$0xff]  ;;  %v913_v62 = vld [vmem:[%s14518_s1 + $0xb8] sm:$0xff] }
  0x2b   :  { %124 = vst [vmem:[#allocation2 + $0x2a0] sm:$0xff] %v9214_v1  ;;  %127 = vst [vmem:[#allocation2 + $0x2b8] sm:$0x1] %v9214_v1  ;;  %v9671_v63 = vld [vmem:[%s14517_s0 + $0xd0] sm:$0xff]  ;;  %v7733_v2 = vpack.c.bf16 %v913_v62, %v912_v61  ;;  %v914_v3 = vld [vmem:[%s14518_s1 + $0xc0] sm:$0xff] }
  0x2c   :  { %128 = vst [vmem:[#allocation2 + $0x2c0] sm:$0xff] %v9214_v1  ;;  %131 = vst [vmem:[#allocation2 + $0x2d8] sm:$0x1] %v9214_v1  ;;  %v915_v4 = vld [vmem:[%s14518_s1 + $0xc8] sm:$0xff]  ;;  %v9684_v5 = vld [vmem:[%s14517_s0 + $0xd8] sm:$0xff] }
  0x2d   :  { %132 = vst [vmem:[#allocation2 + $0x2e0] sm:$0xff] %v9214_v1  ;;  %135 = vst [vmem:[#allocation2 + $0x2f8] sm:$0x1] %v9214_v1  ;;  %7719 = vmatpush1.bf16.msra.mxu0 %v7718_v40  ;;  %v7736_v6 = vpack.c.bf16 %v915_v4, %v914_v3  ;;  %v916_v7 = vld [vmem:[%s14518_s1 + $0xd0] sm:$0xff]  ;;  %v917_v8 = vld [vmem:[%s14518_s1 + $0xd8] sm:$0xff] }
  0x2e   :  { %136 = vst [vmem:[#allocation2 + $0x300] sm:$0xff] %v9214_v1  ;;  %139 = vst [vmem:[#allocation2 + $0x318] sm:$0x1] %v9214_v1  ;;  %7720 = vmatprep.subr.bf16.mxu0 %v14525_v0  ;;  %v9697_v9 = vld [vmem:[%s14517_s0 + $0xe0] sm:$0xff]  ;;  %v7739_v10 = vpack.c.bf16 %v917_v8, %v916_v7  ;;  %v919_v12 = vld [vmem:[%s14518_s1 + $0xe8] sm:$0xff] }
  0x2f   :  { %140 = vst [vmem:[#allocation2 + $0x320] sm:$0xff] %v9214_v1  ;;  %143 = vst [vmem:[#allocation2 + $0x338] sm:$0x1] %v9214_v1  ;;  %v918_v11 = vld [vmem:[%s14518_s1 + $0xe0] sm:$0xff]  ;;  %v9710_v13 = vld [vmem:[%s14517_s0 + $0xe8] sm:$0xff] }
  0x30   :  { %144 = vst [vmem:[#allocation2 + $0x340] sm:$0xff] %v9214_v1  ;;  %147 = vst [vmem:[#allocation2 + $0x358] sm:$0x1] %v9214_v1  ;;  %v7742_v14 = vpack.c.bf16 %v919_v12, %v918_v11  ;;  %v920_v15 = vld [vmem:[%s14518_s1 + $0xf0] sm:$0xff]  ;;  %v921_v23 = vld [vmem:[%s14518_s1 + $0xf8] sm:$0xff] }
  0x31   :  { %148 = vst [vmem:[#allocation2 + $0x360] sm:$0xff] %v9214_v1  ;;  %151 = vst [vmem:[#allocation2 + $0x378] sm:$0x1] %v9214_v1  ;;  %7722 = vmatpush1.bf16.msra.mxu0 %v7721_v45  ;;  %v7745_v24 = vpack.c.bf16 %v921_v23, %v920_v15  ;;  %v922_v25 = vld [vmem:[%s14518_s1 + $0x100] sm:$0xff]  ;;  %v923_v34 = vld [vmem:[%s14518_s1 + $0x108] sm:$0xff] }
  0x32   :  { %152 = vst [vmem:[#allocation2 + $0x380] sm:$0xff] %v9214_v1  ;;  %155 = vst [vmem:[#allocation2 + $0x398] sm:$0x1] %v9214_v1  ;;  %7723 = vmatprep.subr.bf16.mxu0 %v14525_v0  ;;  %v313_v36 = vld [vmem:[#allocation2 + $0x7] sm:$0xff]  ;;  %v7748_v37 = vpack.c.bf16 %v923_v34, %v922_v25  ;;  %v924_v40 = vld [vmem:[%s14518_s1 + $0x110] sm:$0xff] }
  0x33   :  { %156 = vst [vmem:[#allocation2 + $0x3a0] sm:$0xff] %v9214_v1  ;;  %159 = vst [vmem:[#allocation2 + $0x3b8] sm:$0x1] %v9214_v1  ;;  %v925_v42 = vld [vmem:[%s14518_s1 + $0x118] sm:$0xff]  ;;  %v9737_v43 = vld [vmem:[%s14517_s0 + $0x100] sm:$0xff] }
  0x34   :  { %160 = vst [vmem:[#allocation2 + $0x3c0] sm:$0xff] %v9214_v1  ;;  %163 = vst [vmem:[#allocation2 + $0x3d8] sm:$0x1] %v9214_v1  ;;  %v314_v45 = vld [vmem:[#allocation2 + $0xf] sm:$0xff]  ;;  %v7751_v48 = vpack.c.bf16 %v925_v42, %v924_v40  ;;  %v926_v49 = vld [vmem:[%s14518_s1 + $0x120] sm:$0xff] }
  0x35   :  { %164 = vst [vmem:[#allocation2 + $0x3e0] sm:$0xff] %v9214_v1  ;;  %167 = vst [vmem:[#allocation2 + $0x3f8] sm:$0x1] %v9214_v1  ;;  %7725 = vmatpush1.bf16.msra.mxu0 %v7724_v52  ;;  %v927_v52 = vld [vmem:[%s14518_s1 + $0x128] sm:$0xff]  ;;  %v929_v57 = vld [vmem:[%s14518_s1 + $0x138] sm:$0xff] }
  0x36   :  { %168 = vst [vmem:[#allocation2 + $0x400] sm:$0xff] %v9214_v1  ;;  %171 = vst [vmem:[#allocation2 + $0x418] sm:$0x1] %v9214_v1  ;;  %7726 = vmatprep.subr.bf16.mxu0 %v14525_v0  ;;  %v9751_v53 = vld [vmem:[%s14517_s0 + $0x108] sm:$0xff]  ;;  %v7754_v54 = vpack.c.bf16 %v927_v52, %v926_v49  ;;  %v9767_v58 = vld [vmem:[%s14517_s0 + $0x110] sm:$0xff] }
  0x37   :  { %172 = vst [vmem:[#allocation2 + $0x420] sm:$0xff] %v9214_v1  ;;  %175 = vst [vmem:[#allocation2 + $0x438] sm:$0x1] %v9214_v1  ;;  %v930_v61 = vld [vmem:[%s14518_s1 + $0x140] sm:$0xff]  ;;  %v931_v62 = vld [vmem:[%s14518_s1 + $0x148] sm:$0xff] }
  0x38   :  { %176 = vst [vmem:[#allocation2 + $0x440] sm:$0xff] %v9214_v1  ;;  %179 = vst [vmem:[#allocation2 + $0x458] sm:$0x1] %v9214_v1  ;;  %v7760_v3 = vpack.c.bf16 %v931_v62, %v930_v61  ;;  %v932_v4 = vld [vmem:[%s14518_s1 + $0x150] sm:$0xff]  ;;  %v9801_v7 = vld [vmem:[%s14517_s0 + $0x120] sm:$0xff] }
  0x39   :  { %180 = vst [vmem:[#allocation2 + $0x460] sm:$0xff] %v9214_v1  ;;  %181 = vst [vmem:[#allocation2 + $0x468] sm:$0xff] %v9214_v1  ;;  %7728 = vmatpush1.bf16.msra.mxu0 %v7727_v56  ;;  %v928_v56 = vld [vmem:[%s14518_s1 + $0x130] sm:$0xff]  ;;  %v935_v11 = vld [vmem:[%s14518_s1 + $0x168] sm:$0xff] }
  0x3a   :  { %182 = vst [vmem:[#allocation2 + $0x470] sm:$0xff] %v9214_v1  ;;  %183 = vst [vmem:[#allocation2 + $0x478] sm:$0x1] %v9214_v1  ;;  %7729 = vmatprep.subr.bf16.mxu0 %v14525_v0  ;;  %v9818_v12 = vld [vmem:[%s14517_s0 + $0x128] sm:$0xff]  ;;  %v936_v15 = vld [vmem:[%s14518_s1 + $0x170] sm:$0xff] }
  0x3b   :  { %3519 = vst [vmem:[#allocation3] sm:$0xff] %v9214_v1  ;;  %3520 = vst [vmem:[#allocation3 + $0x8] sm:$0xff] %v9214_v1  ;;  %v937_v23 = vld [vmem:[%s14518_s1 + $0x178] sm:$0xff]  ;;  %v938_v34 = vld [vmem:[%s14518_s1 + $0x180] sm:$0xff] }
  0x3c   :  { %3521 = vst [vmem:[#allocation3 + $0x10] sm:$0xff] %v9214_v1  ;;  %3522 = vst [vmem:[#allocation3 + $0x18] sm:$0x1] %v9214_v1  ;;  %v7769_v25 = vpack.c.bf16 %v937_v23, %v936_v15  ;;  %v940_v42 = vld [vmem:[%s14518_s1 + $0x190] sm:$0xff]  ;;  %v942_v52 = vld [vmem:[%s14518_s1 + $0x1a0] sm:$0xff] }
  0x3d   :  { %3523 = vst [vmem:[#allocation3 + $0x20] sm:$0xff] %v9214_v1  ;;  %3526 = vst [vmem:[#allocation3 + $0x38] sm:$0x1] %v9214_v1  ;;  %7731 = vmatpush1.bf16.msra.mxu0 %v7730_v60  ;;  %v7757_v60 = vpack.c.bf16 %v929_v57, %v928_v56  ;;  %v9886_v56 = vld [vmem:[%s14517_s0 + $0x148] sm:$0xff]  ;;  %v9965_v15 = vld [vmem:[%s14517_s0 + $0x180] sm:$0xff] }
  0x3e   :  { %3527 = vst [vmem:[#allocation3 + $0x40] sm:$0xff] %v9214_v1  ;;  %3530 = vst [vmem:[#allocation3 + $0x58] sm:$0x1] %v9214_v1  ;;  %7732 = vmatprep.subr.bf16.mxu0 %v14525_v0  ;;  %v947_v23 = vld [vmem:[%s14518_s1 + $0x1c8] sm:$0xff] }
  0x3f   :  { %3531 = vst [vmem:[#allocation3 + $0x60] sm:$0xff] %v9214_v1  ;;  %3534 = vst [vmem:[#allocation3 + $0x78] sm:$0x1] %v9214_v1 }
  0x40   :  { %3535 = vst [vmem:[#allocation3 + $0x80] sm:$0xff] %v9214_v1  ;;  %3538 = vst [vmem:[#allocation3 + $0x98] sm:$0x1] %v9214_v1 }
  0x41   :  { %3539 = vst [vmem:[#allocation3 + $0xa0] sm:$0xff] %v9214_v1  ;;  %3542 = vst [vmem:[#allocation3 + $0xb8] sm:$0x1] %v9214_v1  ;;  %7734 = vmatpush1.bf16.msra.mxu0 %v7733_v2  ;;  %v9784_v2 = vld [vmem:[%s14517_s0 + $0x118] sm:$0xff] }
  0x42   :  { %3543 = vst [vmem:[#allocation3 + $0xc0] sm:$0xff] %v9214_v1  ;;  %3546 = vst [vmem:[#allocation3 + $0xd8] sm:$0x1] %v9214_v1  ;;  %7735 = vmatprep.subr.bf16.mxu0 %v14525_v0 }
  0x43   :  { %3547 = vst [vmem:[#allocation3 + $0xe0] sm:$0xff] %v9214_v1  ;;  %3550 = vst [vmem:[#allocation3 + $0xf8] sm:$0x1] %v9214_v1 }
  0x44   :  { %3551 = vst [vmem:[#allocation3 + $0x100] sm:$0xff] %v9214_v1  ;;  %3554 = vst [vmem:[#allocation3 + $0x118] sm:$0x1] %v9214_v1 }
  0x45   :  { %3555 = vst [vmem:[#allocation3 + $0x120] sm:$0xff] %v9214_v1  ;;  %3558 = vst [vmem:[#allocation3 + $0x138] sm:$0x1] %v9214_v1  ;;  %7737 = vmatpush1.bf16.msra.mxu0 %v7736_v6  ;;  %v933_v6 = vld [vmem:[%s14518_s1 + $0x158] sm:$0xff] }
  0x46   :  { %3559 = vst [vmem:[#allocation3 + $0x140] sm:$0xff] %v9214_v1  ;;  %3562 = vst [vmem:[#allocation3 + $0x158] sm:$0x1] %v9214_v1  ;;  %7738 = vmatprep.subr.bf16.mxu0 %v14525_v0  ;;  %v7763_v8 = vpack.c.bf16 %v933_v6, %v932_v4  ;;  %v945_v4 = vld [vmem:[%s14518_s1 + $0x1b8] sm:$0xff] }
  0x47   :  { %3563 = vst [vmem:[#allocation3 + $0x160] sm:$0xff] %v9214_v1  ;;  %3566 = vst [vmem:[#allocation3 + $0x178] sm:$0x1] %v9214_v1 }
  0x48   :  { %3567 = vst [vmem:[#allocation3 + $0x180] sm:$0xff] %v9214_v1  ;;  %3570 = vst [vmem:[#allocation3 + $0x198] sm:$0x1] %v9214_v1 }
  0x49   :  { %3571 = vst [vmem:[#allocation3 + $0x1a0] sm:$0xff] %v9214_v1  ;;  %3574 = vst [vmem:[#allocation3 + $0x1b8] sm:$0x1] %v9214_v1  ;;  %7740 = vmatpush1.bf16.msra.mxu0 %v7739_v10  ;;  %v934_v10 = vld [vmem:[%s14518_s1 + $0x160] sm:$0xff] }
  0x4a   :  { %3575 = vst [vmem:[#allocation3 + $0x1c0] sm:$0xff] %v9214_v1  ;;  %3578 = vst [vmem:[#allocation3 + $0x1d8] sm:$0x1] %v9214_v1  ;;  %7741 = vmatprep.subr.bf16.mxu0 %v14525_v0 }
  0x4b   :  { %3579 = vst [vmem:[#allocation3 + $0x1e0] sm:$0xff] %v9214_v1  ;;  %3582 = vst [vmem:[#allocation3 + $0x1f8] sm:$0x1] %v9214_v1 }
  0x4c   :  { %3583 = vst [vmem:[#allocation3 + $0x200] sm:$0xff] %v9214_v1  ;;  %3586 = vst [vmem:[#allocation3 + $0x218] sm:$0x1] %v9214_v1 }
  0x4d   :  { %3587 = vst [vmem:[#allocation3 + $0x220] sm:$0xff] %v9214_v1  ;;  %3588 = vst [vmem:[#allocation3 + $0x228] sm:$0xff] %v9214_v1  ;;  %7743 = vmatpush1.bf16.msra.mxu0 %v7742_v14  ;;  %v7766_v14 = vpack.c.bf16 %v935_v11, %v934_v10 }
  0x4e   :  { %3589 = vst [vmem:[#allocation3 + $0x230] sm:$0xff] %v9214_v1  ;;  %3590 = vst [vmem:[#allocation3 + $0x238] sm:$0x1] %v9214_v1  ;;  %7744 = vmatprep.subr.bf16.mxu0 %v14525_v0 }
  0x4f   :  { %3591 = vst [vmem:[#allocation3 + $0x240] sm:$0xff] %v9214_v1  ;;  %3592 = vst [vmem:[#allocation3 + $0x248] sm:$0xff] %v9214_v1 }
  0x50   :  { %3593 = vst [vmem:[#allocation3 + $0x250] sm:$0xff] %v9214_v1  ;;  %3594 = vst [vmem:[#allocation3 + $0x258] sm:$0x1] %v9214_v1 }
  0x51   :  { %3595 = vst [vmem:[#allocation3 + $0x260] sm:$0xff] %v9214_v1  ;;  %3598 = vst [vmem:[#allocation3 + $0x278] sm:$0x1] %v9214_v1  ;;  %7746 = vmatpush1.bf16.msra.mxu0 %v7745_v24  ;;  %v9835_v24 = vld [vmem:[%s14517_s0 + $0x130] sm:$0xff] }
  0x52   :  { %3599 = vst [vmem:[#allocation3 + $0x280] sm:$0xff] %v9214_v1  ;;  %3602 = vst [vmem:[#allocation3 + $0x298] sm:$0x1] %v9214_v1  ;;  %7747 = vmatprep.subr.bf16.mxu0 %v14525_v0 }
  0x53   :  { %3603 = vst [vmem:[#allocation3 + $0x2a0] sm:$0xff] %v9214_v1  ;;  %3606 = vst [vmem:[#allocation3 + $0x2b8] sm:$0x1] %v9214_v1 }
  0x54   :  { %3607 = vst [vmem:[#allocation3 + $0x2c0] sm:$0xff] %v9214_v1  ;;  %3610 = vst [vmem:[#allocation3 + $0x2d8] sm:$0x1] %v9214_v1  ;;  %1099 = vmatmul.mubr.f32.vlgmr.msra.gmra.mrb[0].mxu0 %v313_v36  ;;  %v939_v36 = vld [vmem:[%s14518_s1 + $0x188] sm:$0xff] }
  0x55   :  { %3611 = vst [vmem:[#allocation3 + $0x2e0] sm:$0xff] %v9214_v1  ;;  %3614 = vst [vmem:[#allocation3 + $0x2f8] sm:$0x1] %v9214_v1  ;;  %7749 = vmatpush1.bf16.msra.mxu0 %v7748_v37  ;;  %1103 = vmatprep.mubr.f32.mxu0 %v9214_v1  ;;  %v9852_v37 = vld [vmem:[%s14517_s0 + $0x138] sm:$0xff]  ;;  %v7772_v40 = vpack.c.bf16 %v939_v36, %v938_v34  ;;  %v9981_v34 = vld [vmem:[%s14517_s0 + $0x188] sm:$0xff] }
  0x56   :  { %3615 = vst [vmem:[#allocation3 + $0x300] sm:$0xff] %v9214_v1  ;;  %3618 = vst [vmem:[#allocation3 + $0x318] sm:$0x1] %v9214_v1  ;;  %7750 = vmatprep.subr.bf16.mxu0 %v14525_v0 }
  0x57   :  { %3619 = vst [vmem:[#allocation3 + $0x320] sm:$0xff] %v9214_v1  ;;  %3622 = vst [vmem:[#allocation3 + $0x338] sm:$0x1] %v9214_v1 }
  0x58   :  { %3623 = vst [vmem:[#allocation3 + $0x340] sm:$0xff] %v9214_v1  ;;  %3626 = vst [vmem:[#allocation3 + $0x358] sm:$0x1] %v9214_v1  ;;  %1104 = vmatmul.mubr.f32.gmra.mrb[2].mxu0 %v314_v45  ;;  %v941_v45 = vld [vmem:[%s14518_s1 + $0x198] sm:$0xff] }
  0x59   :  { %3627 = vst [vmem:[#allocation3 + $0x360] sm:$0xff] %v9214_v1  ;;  %3630 = vst [vmem:[#allocation3 + $0x378] sm:$0x1] %v9214_v1  ;;  %1108 = vmatprep.mubr.f32.mxu0 %v9466_v16  ;;  %7752 = vmatpush1.bf16.msra.mxu0 %v7751_v48  ;;  %v9869_v48 = vld [vmem:[%s14517_s0 + $0x140] sm:$0xff]  ;;  %v7775_v49 = vpack.c.bf16 %v941_v45, %v940_v42  ;;  %v10002_v42 = vld [vmem:[%s14517_s0 + $0x198] sm:$0xff] }
  0x5a   :  { %3631 = vst [vmem:[#allocation3 + $0x380] sm:$0xff] %v9214_v1  ;;  %3634 = vst [vmem:[#allocation3 + $0x398] sm:$0x1] %v9214_v1  ;;  %7753 = vmatprep.subr.bf16.mxu0 %v14525_v0  ;;  %v10012_v45 = vld [vmem:[%s14517_s0 + $0x1a0] sm:$0xff] }
  0x5b   :  { %3635 = vst [vmem:[#allocation3 + $0x3a0] sm:$0xff] %v9214_v1  ;;  %3638 = vst [vmem:[#allocation3 + $0x3b8] sm:$0x1] %v9214_v1 }
  0x5c   :  { %3639 = vst [vmem:[#allocation3 + $0x3c0] sm:$0xff] %v9214_v1  ;;  %3642 = vst [vmem:[#allocation3 + $0x3d8] sm:$0x1] %v9214_v1 }
  0x5d   :  { %3643 = vst [vmem:[#allocation3 + $0x3e0] sm:$0xff] %v9214_v1  ;;  %3646 = vst [vmem:[#allocation3 + $0x3f8] sm:$0x1] %v9214_v1  ;;  %7755 = vmatpush1.bf16.msra.mxu0 %v7754_v54  ;;  %v943_v54 = vld [vmem:[%s14518_s1 + $0x1a8] sm:$0xff] }
  0x5e   :  { %3647 = vst [vmem:[#allocation3 + $0x400] sm:$0xff] %v9214_v1  ;;  %3650 = vst [vmem:[#allocation3 + $0x418] sm:$0x1] %v9214_v1  ;;  %7756 = vmatprep.subr.bf16.mxu0 %v14525_v0  ;;  %v7778_v57 = vpack.c.bf16 %v943_v54, %v942_v52  ;;  %v10028_v54 = vld [vmem:[%s14517_s0 + $0x1a8] sm:$0xff] }
  0x5f   :  { %3651 = vst [vmem:[#allocation3 + $0x420] sm:$0xff] %v9214_v1  ;;  %3654 = vst [vmem:[#allocation3 + $0x438] sm:$0x1] %v9214_v1 }
  0x60   :  { %3655 = vst [vmem:[#allocation3 + $0x440] sm:$0xff] %v9214_v1  ;;  %3658 = vst [vmem:[#allocation3 + $0x458] sm:$0x1] %v9214_v1 }
  0x61   :  { %3659 = vst [vmem:[#allocation3 + $0x460] sm:$0xff] %v9214_v1  ;;  %3660 = vst [vmem:[#allocation3 + $0x468] sm:$0xff] %v9214_v1  ;;  %7758 = vmatpush1.bf16.msra.mxu0 %v7757_v60  ;;  %v9897_v60 = vld [vmem:[%s14517_s0 + $0x150] sm:$0xff] }
  0x62   :  { %3661 = vst [vmem:[#allocation3 + $0x470] sm:$0xff] %v9214_v1  ;;  %3662 = vst [vmem:[#allocation3 + $0x478] sm:$0x1] %v9214_v1  ;;  %7759 = vmatprep.subr.bf16.mxu0 %v14525_v0 }
  0x63   :  { %249 = vst [vmem:[#allocation2 + $0x28] sm:$0xff] %v9466_v16  ;;  %250 = vst [vmem:[#allocation2 + $0x30] sm:$0xff] %v9471_v17 }
  0x64   :  { %251 = vst [vmem:[#allocation2 + $0x48] sm:$0xff] %v9476_v18  ;;  %252 = vst [vmem:[#allocation2 + $0x50] sm:$0xff] %v9484_v19 }
  0x65   :  { %253 = vst [vmem:[#allocation2 + $0x68] sm:$0xff] %v9490_v20  ;;  %254 = vst [vmem:[#allocation2 + $0x70] sm:$0xff] %v9495_v21  ;;  %7761 = vmatpush1.bf16.msra.mxu0 %v7760_v3  ;;  %v944_v3 = vld [vmem:[%s14518_s1 + $0x1b0] sm:$0xff] }
  0x66   :  { %255 = vst [vmem:[#allocation2 + $0x88] sm:$0xff] %v9500_v22  ;;  %256 = vst [vmem:[#allocation2 + $0x90] sm:$0xff] %v9514_v26  ;;  %7762 = vmatprep.subr.bf16.mxu0 %v14525_v0  ;;  %v7781_v6 = vpack.c.bf16 %v945_v4, %v944_v3  ;;  %v10049_v4 = vld [vmem:[%s14517_s0 + $0x1b8] sm:$0xff] }
  0x67   :  { %257 = vst [vmem:[#allocation2 + $0xa8] sm:$0xff] %v9521_v27  ;;  %258 = vst [vmem:[#allocation2 + $0xb0] sm:$0xff] %v9526_v28 }
  0x68   :  { %259 = vst [vmem:[#allocation2 + $0xc8] sm:$0xff] %v9531_v29  ;;  %260 = vst [vmem:[#allocation2 + $0xd0] sm:$0xff] %v9539_v30 }
  0x69   :  { %261 = vst [vmem:[#allocation2 + $0xe8] sm:$0xff] %v9545_v31  ;;  %262 = vst [vmem:[#allocation2 + $0xf0] sm:$0xff] %v9550_v32  ;;  %7764 = vmatpush1.bf16.msra.mxu0 %v7763_v8  ;;  %v9934_v8 = vld [vmem:[%s14517_s0 + $0x168] sm:$0xff] }
  0x6a   :  { %263 = vst [vmem:[#allocation2 + $0x108] sm:$0xff] %v9555_v33  ;;  %264 = vst [vmem:[#allocation2 + $0x110] sm:$0xff] %v9563_v35  ;;  %v9755_v1 = vld [vmem:[#allocation2 + $0x27] sm:$0xff]  ;;  %v9772_v16 = vld [vmem:[#allocation2 + $0x2f] sm:$0xff]  ;;  %7765 = vmatprep.subr.bf16.mxu0 %v14525_v0 }
  0x6b   :  { %265 = vst [vmem:[#allocation2 + $0x128] sm:$0xff] %v9576_v38  ;;  %266 = vst [vmem:[#allocation2 + $0x130] sm:$0xff] %v9581_v39  ;;  %1109 = vmatmul.mubr.f32.gmra.mrb[4].mxu0 %v9755_v1 }
  0x6c   :  { %267 = vst [vmem:[#allocation2 + $0x148] sm:$0xff] %v9588_v41  ;;  %268 = vst [vmem:[#allocation2 + $0x150] sm:$0xff] %v9601_v44  ;;  %1113 = vmatprep.mubr.f32.mxu0 %v9471_v17  ;;  %v9789_v17 = vld [vmem:[#allocation2 + $0x47] sm:$0xff] }
  0x6d   :  { %269 = vst [vmem:[#allocation2 + $0x168] sm:$0xff] %v9607_v46  ;;  %270 = vst [vmem:[#allocation2 + $0x170] sm:$0xff] %v9612_v47  ;;  %7767 = vmatpush1.bf16.msra.mxu0 %v7766_v14  ;;  %v9955_v14 = vld [vmem:[%s14517_s0 + $0x178] sm:$0xff] }
  0x6e   :  { %271 = vst [vmem:[#allocation2 + $0x188] sm:$0xff] %v9626_v50  ;;  %272 = vst [vmem:[#allocation2 + $0x190] sm:$0xff] %v9632_v51  ;;  %7768 = vmatprep.subr.bf16.mxu0 %v14525_v0  ;;  %v9902_v61 = vld [vmem:[#allocation2 + $0xaf] sm:$0xff] }
  0x6f   :  { %273 = vst [vmem:[#allocation2 + $0x1a8] sm:$0xff] %v9645_v55  ;;  %274 = vst [vmem:[#allocation2 + $0x1b0] sm:$0xff] %v9658_v59  ;;  %1114 = vmatmul.mubr.f32.gmra.mrb[6].mxu0 %v9772_v16  ;;  %v9913_v62 = vld [vmem:[#allocation2 + $0xc7] sm:$0xff] }
  0x70   :  { %275 = vst [vmem:[#allocation2 + $0x1c8] sm:$0xff] %v9671_v63  ;;  %276 = vst [vmem:[#allocation2 + $0x1d0] sm:$0xff] %v9684_v5  ;;  %1118 = vmatprep.mubr.f32.mxu0 %v9476_v18  ;;  %v9806_v18 = vld [vmem:[#allocation2 + $0x4f] sm:$0xff]  ;;  %v9940_v10 = vld [vmem:[#allocation2 + $0xe7] sm:$0xff] }
  0x71   :  { %277 = vst [vmem:[#allocation2 + $0x1e8] sm:$0xff] %v9697_v9  ;;  %278 = vst [vmem:[#allocation2 + $0x1f0] sm:$0xff] %v9710_v13  ;;  %7770 = vmatpush1.bf16.msra.mxu0 %v7769_v25  ;;  %v9950_v11 = vld [vmem:[#allocation2 + $0xef] sm:$0xff] }
  0x72   :  { %281 = vst [vmem:[#allocation2 + $0x268] sm:$0xff] %v9737_v43  ;;  %282 = vst [vmem:[#allocation2 + $0x270] sm:$0xff] %v9751_v53  ;;  %7771 = vmatprep.subr.bf16.mxu0 %v14525_v0  ;;  %v9987_v36 = vld [vmem:[#allocation2 + $0x127] sm:$0xff] }
  0x73   :  { %283 = vst [vmem:[#allocation2 + $0x288] sm:$0xff] %v9767_v58  ;;  %284 = vst [vmem:[#allocation2 + $0x290] sm:$0xff] %v9784_v2  ;;  %1119 = vmatmul.mubr.f32.gmra.mrb[8].mxu0 %v9789_v17 }
  0x74   :  { %285 = vst [vmem:[#allocation2 + $0x2a8] sm:$0xff] %v9801_v7  ;;  %1123 = vmatprep.mubr.f32.mxu0 %v9484_v19  ;;  %286 = vst [vmem:[#allocation2 + $0x2b0] sm:$0xff] %v9818_v12  ;;  %v9823_v19 = vld [vmem:[#allocation2 + $0x67] sm:$0xff]  ;;  %v10044_v3 = vld [vmem:[#allocation2 + $0x16f] sm:$0xff] }
  0x75   :  { %287 = vst [vmem:[#allocation2 + $0x2c8] sm:$0xff] %v9835_v24  ;;  %288 = vst [vmem:[#allocation2 + $0x2d0] sm:$0xff] %v9852_v37  ;;  %7773 = vmatpush1.bf16.msra.mxu0 %v7772_v40  ;;  %v9997_v40 = vld [vmem:[#allocation2 + $0x12f] sm:$0xff] }
  0x76   :  { %289 = vst [vmem:[#allocation2 + $0x2e8] sm:$0xff] %v9869_v48  ;;  %7774 = vmatprep.subr.bf16.mxu0 %v14525_v0  ;;  %290 = vst [vmem:[#allocation2 + $0x2f0] sm:$0xff] %v9886_v56 }
  0x77   :  { %1124 = vmatmul.mubr.f32.gmra.mrb[10].mxu0 %v9806_v18  ;;  %291 = vst [vmem:[#allocation2 + $0x308] sm:$0xff] %v9897_v60  ;;  %294 = vst [vmem:[#allocation2 + $0x330] sm:$0xff] %v9934_v8 }
  0x78   :  { %1128 = vmatprep.mubr.f32.mxu0 %v9490_v20  ;;  %v9840_v20 = vld [vmem:[#allocation2 + $0x6f] sm:$0xff]  ;;  %296 = vst [vmem:[#allocation2 + $0x350] sm:$0xff] %v9955_v14  ;;  %297 = vst [vmem:[#allocation2 + $0x368] sm:$0xff] %v9965_v15 }
  0x79   :  { %7776 = vmatpush1.bf16.msra.mxu0 %v7775_v49  ;;  %298 = vst [vmem:[#allocation2 + $0x370] sm:$0xff] %v9981_v34  ;;  %300 = vst [vmem:[#allocation2 + $0x390] sm:$0xff] %v10002_v42  ;;  %v949_v49 = vld [vmem:[%s14518_s1 + $0x1d8] sm:$0xff] }
  0x7a   :  { %7777 = vmatprep.subr.bf16.mxu0 %v14525_v0  ;;  %301 = vst [vmem:[#allocation2 + $0x3a8] sm:$0xff] %v10012_v45  ;;  %302 = vst [vmem:[#allocation2 + $0x3b0] sm:$0xff] %v10028_v54 }
  0x7b   :  { %1129 = vmatmul.mubr.f32.gmra.mrb[12].mxu0 %v9823_v19  ;;  %304 = vst [vmem:[#allocation2 + $0x3d0] sm:$0xff] %v10049_v4 }
  0x7c   :  { %1133 = vmatprep.mubr.f32.mxu0 %v9495_v21  ;;  %v9857_v21 = vld [vmem:[#allocation2 + $0x87] sm:$0xff] }
  0x7d   :  { %7779 = vmatpush1.bf16.msra.mxu0 %v7778_v57  ;;  %v10034_v57 = vld [vmem:[#allocation2 + $0x167] sm:$0xff] }
  0x7e   :  { %7780 = vmatprep.subr.bf16.mxu0 %v14525_v0 }
  0x7f   :  { %1134 = vmatmul.mubr.f32.gmra.mrb[14].mxu0 %v9840_v20 }
  0x80   :  { %1138 = vmatprep.mubr.f32.mxu0 %v9500_v22  ;;  %v9874_v22 = vld [vmem:[#allocation2 + $0x8f] sm:$0xff] }
  0x81   :  { %7782 = vmatpush1.bf16.msra.mxu0 %v7781_v6  ;;  %v10059_v6 = vld [vmem:[%s14517_s0 + $0x1c0] sm:$0xff] }
  0x82   :  { %7783 = vmatprep.subr.bf16.mxu0 %v14525_v0  ;;  %305 = vst [vmem:[#allocation2 + $0x3e8] sm:$0xff] %v10059_v6 }
  0x83   :  { %1139 = vmatmul.mubr.f32.gmra.mrb[16].mxu0 %v9857_v21 }
  0x84   :  { %1143 = vmatprep.mubr.f32.mxu0 %v9514_v26  ;;  %v9891_v26 = vld [vmem:[#allocation2 + $0xa7] sm:$0xff] }
  0x87   :  { %1144 = vmatmul.mubr.f32.gmra.mrb[18].mxu0 %v9874_v22 }
  0x88   :  { %1148 = vmatprep.mubr.f32.mxu0 %v9521_v27  ;;  %v9908_v27 = vld [vmem:[%s14517_s0 + $0x158] sm:$0xff] }
  0x89   :  { %292 = vst [vmem:[#allocation2 + $0x310] sm:$0xff] %v9908_v27 }
  0x8b   :  { %1149 = vmatmul.mubr.f32.gmra.mrb[20].mxu0 %v9891_v26 }
  0x8c   :  { %1153 = vmatprep.mubr.f32.mxu0 %v9526_v28  ;;  %v9918_v28 = vld [vmem:[%s14517_s0 + $0x160] sm:$0xff] }
  0x8d   :  { %293 = vst [vmem:[#allocation2 + $0x328] sm:$0xff] %v9918_v28 }
  0x8f   :  { %1154 = vmatmul.mubr.f32.gmra.mrb[22].mxu0 %v9902_v61 }
  0x90   :  { %1158 = vmatprep.mubr.f32.mxu0 %v9531_v29  ;;  %v9929_v29 = vld [vmem:[#allocation2 + $0xcf] sm:$0xff] }
  0x93   :  { %1159 = vmatmul.mubr.f32.gmra.mrb[24].mxu0 %v9913_v62 }
  0x94   :  { %1163 = vmatprep.mubr.f32.mxu0 %v9539_v30  ;;  %v9945_v30 = vld [vmem:[%s14517_s0 + $0x170] sm:$0xff] }
  0x95   :  { %295 = vst [vmem:[#allocation2 + $0x348] sm:$0xff] %v9945_v30 }
  0x97   :  { %1164 = vmatmul.mubr.f32.gmra.mrb[26].mxu0 %v9929_v29 }
  0x98   :  { %1168 = vmatprep.mubr.f32.mxu0 %v9545_v31  ;;  %v9960_v31 = vld [vmem:[#allocation2 + $0x107] sm:$0xff] }
  0x9b   :  { %1169 = vmatmul.mubr.f32.gmra.mrb[28].mxu0 %v9940_v10 }
  0x9c   :  { %1173 = vmatprep.mubr.f32.mxu0 %v9550_v32  ;;  %v946_v32 = vld [vmem:[%s14518_s1 + $0x1c0] sm:$0xff] }
  0x9d   :  { %v7784_v25 = vpack.c.bf16 %v947_v23, %v946_v32  ;;  %v951_v32 = vld [vmem:[%s14518_s1 + $0x1e8] sm:$0xff] }
  0x9f   :  { %1174 = vmatmul.mubr.f32.gmra.mrb[30].mxu0 %v9950_v11 }
  0xa0   :  { %1178 = vmatprep.mubr.f32.mxu0 %v9555_v33  ;;  %v9976_v33 = vld [vmem:[#allocation2 + $0x10f] sm:$0xff]  ;;  %7785 = vmatpush1.bf16.msra.mxu0 %v7784_v25 }
  0xa1   :  { %7786 = vmatprep.subr.bf16.mxu0 %v14525_v0  ;;  %v10075_v25 = vld [vmem:[%s14517_s0 + $0x1c8] sm:$0xff] }
  0xa2   :  { %306 = vst [vmem:[#allocation2 + $0x3f0] sm:$0xff] %v10075_v25 }
  0xa3   :  { %1179 = vmatmul.mubr.f32.gmra.mrb[32].mxu0 %v9960_v31 }
  0xa4   :  { %1183 = vmatprep.mubr.f32.mxu0 %v9563_v35  ;;  %v9992_v35 = vld [vmem:[%s14517_s0 + $0x190] sm:$0xff] }
  0xa5   :  { %299 = vst [vmem:[#allocation2 + $0x388] sm:$0xff] %v9992_v35 }
  0xa7   :  { %1184 = vmatmul.mubr.f32.gmra.mrb[34].mxu0 %v9976_v33 }
  0xa8   :  { %1188 = vmatprep.mubr.f32.mxu0 %v9576_v38  ;;  %v10007_v38 = vld [vmem:[#allocation2 + $0x147] sm:$0xff] }
  0xab   :  { %1189 = vmatmul.mubr.f32.gmra.mrb[36].mxu0 %v9987_v36 }
  0xac   :  { %1193 = vmatprep.mubr.f32.mxu0 %v9581_v39  ;;  %v948_v39 = vld [vmem:[%s14518_s1 + $0x1d0] sm:$0xff] }
  0xad   :  { %v7787_v52 = vpack.c.bf16 %v949_v49, %v948_v39  ;;  %v10081_v39 = vld [vmem:[#allocation2 + $0x1a7] sm:$0xff]  ;;  %v10091_v49 = vld [vmem:[#allocation2 + $0x1af] sm:$0xff] }
  0xae   :  { %14698 = vst [vmem:[#allocation7_spill] sm:$0xff] %v10091_v49 }
  0xaf   :  { %1194 = vmatmul.mubr.f32.gmra.mrb[38].mxu0 %v9997_v40 }
  0xb0   :  { %1198 = vmatprep.mubr.f32.mxu0 %v9588_v41  ;;  %v10023_v41 = vld [vmem:[#allocation2 + $0x14f] sm:$0xff]  ;;  %7788 = vmatpush1.bf16.msra.mxu0 %v7787_v52  ;;  %v10096_v52 = vld [vmem:[%s14517_s0 + $0x1d8] sm:$0xff] }
  0xb1   :  { %7789 = vmatprep.subr.bf16.mxu0 %v14525_v0  ;;  %308 = vst [vmem:[#allocation2 + $0x410] sm:$0xff] %v10096_v52 }
  0xb3   :  { %1199 = vmatmul.mubr.f32.gmra.mrb[40].mxu0 %v10007_v38 }
  0xb4   :  { %1203 = vmatprep.mubr.f32.mxu0 %v9601_v44  ;;  %v10039_v44 = vld [vmem:[%s14517_s0 + $0x1b0] sm:$0xff] }
  0xb5   :  { %303 = vst [vmem:[#allocation2 + $0x3c8] sm:$0xff] %v10039_v44 }
  0xb7   :  { %1204 = vmatmul.mubr.f32.gmra.mrb[42].mxu0 %v10023_v41 }
  0xb8   :  { %1208 = vmatprep.mubr.f32.mxu0 %v9607_v46  ;;  %v10054_v46 = vld [vmem:[#allocation2 + $0x187] sm:$0xff] }
  0xbb   :  { %1209 = vmatmul.mubr.f32.gmra.mrb[44].mxu0 %v10034_v57 }
  0xbc   :  { %1213 = vmatprep.mubr.f32.mxu0 %v9612_v47  ;;  %v950_v47 = vld [vmem:[%s14518_s1 + $0x1e0] sm:$0xff] }
  0xbd   :  { %v7790_v23 = vpack.c.bf16 %v951_v32, %v950_v47  ;;  %v10106_v47 = vld [vmem:[%s14517_s0 + $0x1e0] sm:$0xff]  ;;  %v953_v32 = vld [vmem:[%s14518_s1 + $0x1f8] sm:$0xff] }
  0xbe   :  { %309 = vst [vmem:[#allocation2 + $0x428] sm:$0xff] %v10106_v47 }
  0xbf   :  { %1214 = vmatmul.mubr.f32.gmra.mrb[46].mxu0 %v10044_v3 }
  0xc0   :  { %1218 = vmatprep.mubr.f32.mxu0 %v9626_v50  ;;  %v10070_v50 = vld [vmem:[#allocation2 + $0x18f] sm:$0xff]  ;;  %7791 = vmatpush1.bf16.msra.mxu0 %v7790_v23 }
  0xc1   :  { %7792 = vmatprep.subr.bf16.mxu0 %v14525_v0  ;;  %v10122_v0 = vld [vmem:[%s14517_s0 + $0x1e8] sm:$0xff] }
  0xc2   :  { %310 = vst [vmem:[#allocation2 + $0x430] sm:$0xff] %v10122_v0 }
  0xc3   :  { %1219 = vmatmul.mubr.f32.gmra.mrb[48].mxu0 %v10054_v46 }
  0xc4   :  { %1223 = vmatprep.mubr.f32.mxu0 %v9632_v51  ;;  %v10086_v51 = vld [vmem:[%s14517_s0 + $0x1d0] sm:$0xff] }
  0xc5   :  { %307 = vst [vmem:[#allocation2 + $0x408] sm:$0xff] %v10086_v51 }
  0xc7   :  { %1224 = vmatmul.mubr.f32.gmra.mrb[50].mxu0 %v10070_v50 }
  0xc8   :  { %1228 = vmatprep.mubr.f32.mxu0 %v9645_v55  ;;  %v10101_v55 = vld [vmem:[#allocation2 + $0x1c7] sm:$0xff] }
  0xc9   :  { %14699 = vst [vmem:[#allocation8_spill] sm:$0xff] %v10101_v55 }
  0xcb   :  { %1229 = vmatmul.mubr.f32.gmra.mrb[52].mxu0 %v10081_v39 }
  0xcc   :  { %1233 = vmatprep.mubr.f32.mxu0 %v9658_v59  ;;  %v952_v59 = vld [vmem:[%s14518_s1 + $0x1f0] sm:$0xff] }
  0xcd   :  { %v7793_v23 = vpack.c.bf16 %v953_v32, %v952_v59  ;;  %v9181_v59 = vld [vmem:[#allocation2 + $0x8] sm:$0xff] }
  0xce   :  { %v345_v32 = vld [vmem:[#allocation2 + $0x247] sm:$0xff] }
  0xcf   :  { %1234 = vmatmul.mubr.f32.gmra.mrb[54].mxu0 %v10091_v49  ;;  %v10128_v49 = vld [vmem:[#allocation2 + $0x1e7] sm:$0xff] }
  0xd0   :  { %1238 = vmatprep.mubr.f32.mxu0 %v9671_v63  ;;  %v10117_v63 = vld [vmem:[#allocation2 + $0x1cf] sm:$0xff]  ;;  %7794 = vmatpush1.bf16.msra.mxu0 %v7793_v23 }
  0xd1   :  { %v346_v23 = vld [vmem:[#allocation2 + $0x24f] sm:$0xff] }
  0xd3   :  { %1239 = vmatmul.mubr.f32.gmra.mrb[56].mxu0 %v10101_v55  ;;  %v14700_v55 = vmov 0.0|0.0  }
  0xd4   :  { %1243 = vmatprep.mubr.f32.mxu0 %v9684_v5  ;;  %7795 = vmatprep.subr.bf16.mxu0 %v14700_v55  ;;  %v10132_v5 = vld [vmem:[#allocation2 + $0x1ef] sm:$0xff] }
  0xd5   :  { %14701 = vst [vmem:[#allocation9_spill] sm:$0xff] %v10132_v5 }
  0xd7   :  { %1244 = vmatmul.mubr.f32.gmra.mrb[58].mxu0 %v10117_v63 }
  0xd8   :  { %1248 = vmatprep.mubr.f32.mxu0 %v9697_v9  ;;  %v10136_v9 = vld [vmem:[#allocation2 + $0x267] sm:$0xff] }
  0xdb   :  { %1249 = vmatmul.mubr.f32.gmra.mrb[60].mxu0 %v10128_v49 }
  0xdc   :  { %1253 = vmatprep.mubr.f32.mxu0 %v9710_v13  ;;  %v10140_v13 = vld [vmem:[#allocation2 + $0x26f] sm:$0xff] }
  0xdf   :  { %1254 = vmatmul.mubr.f32.gmra.mrb[62].mxu0 %v10132_v5  ;;  %v10144_v5 = vld [vmem:[#allocation2 + $0x287] sm:$0xff] }
  0xe0   :  { %1258 = vmatprep.mubr.f32.mxu0 %v9181_v59 }
  0xe3   :  { %1259 = vmatmul.mubr.f32.gmra.mrb[64].mxu0 %v345_v32  ;;  %v954_v32 = vld [vmem:[%s14518_s1 + $0x200] sm:$0xff] }
  0xe4   :  { %1263 = vmatprep.mubr.f32.mxu0 %v9181_v59  ;;  %v10148_v59 = vld [vmem:[#allocation2 + $0x28f] sm:$0xff] }
  0xe7   :  { %1264 = vmatmul.mubr.f32.gmra.mrb[66].mxu0 %v346_v23  ;;  %v955_v23 = vld [vmem:[%s14518_s1 + $0x208] sm:$0xff] }
  0xe8   :  { %1268 = vmatprep.mubr.f32.mxu0 %v9737_v43  ;;  %v10152_v43 = vld [vmem:[#allocation2 + $0x2a7] sm:$0xff] }
  0xeb   :  { %1269 = vmatmul.mubr.f32.gmra.mrb[68].mxu0 %v10136_v9 }
  0xec   :  { %1273 = vmatprep.mubr.f32.mxu0 %v9751_v53  ;;  %v10156_v53 = vld [vmem:[#allocation2 + $0x2af] sm:$0xff] }
  0xef   :  { %1274 = vmatmul.mubr.f32.gmra.mrb[70].mxu0 %v10140_v13 }
  0xf0   :  { %1278 = vmatprep.mubr.f32.mxu0 %v9767_v58  ;;  %v10160_v58 = vld [vmem:[#allocation2 + $0x2c7] sm:$0xff] }
  0xf3   :  { %1279 = vmatmul.mubr.f32.gmra.mrb[72].mxu0 %v10144_v5 }
  0xf4   :  { %1283 = vmatprep.mubr.f32.mxu0 %v9784_v2  ;;  %v10164_v2 = vld [vmem:[#allocation2 + $0x2cf] sm:$0xff] }
  0xf7   :  { %1284 = vmatmul.mubr.f32.gmra.mrb[74].mxu0 %v10148_v59 }
  0xf8   :  { %1288 = vmatprep.mubr.f32.mxu0 %v9801_v7  ;;  %v10168_v7 = vld [vmem:[#allocation2 + $0x2e7] sm:$0xff] }
  0xfb   :  { %1289 = vmatmul.mubr.f32.gmra.mrb[76].mxu0 %v10152_v43 }
  0xfc   :  { %1293 = vmatprep.mubr.f32.mxu0 %v9818_v12  ;;  %v10172_v12 = vld [vmem:[#allocation2 + $0x2ef] sm:$0xff] }
  0xff   :  { %1294 = vmatmul.mubr.f32.gmra.mrb[78].mxu0 %v10156_v53 }
 0x100   :  { %1298 = vmatprep.mubr.f32.mxu0 %v9835_v24  ;;  %v10176_v24 = vld [vmem:[#allocation2 + $0x307] sm:$0xff] }
 0x103   :  { %1299 = vmatmul.mubr.f32.gmra.mrb[80].mxu0 %v10160_v58 }
 0x104   :  { %1303 = vmatprep.mubr.f32.mxu0 %v9852_v37  ;;  %v10180_v37 = vld [vmem:[#allocation2 + $0x30f] sm:$0xff] }
 0x107   :  { %1304 = vmatmul.mubr.f32.gmra.mrb[82].mxu0 %v10164_v2 }
 0x108   :  { %1308 = vmatprep.mubr.f32.mxu0 %v9869_v48  ;;  %v10184_v48 = vld [vmem:[#allocation2 + $0x327] sm:$0xff] }
 0x10b   :  { %1309 = vmatmul.mubr.f32.gmra.mrb[84].mxu0 %v10168_v7 }
 0x10c   :  { %1313 = vmatprep.mubr.f32.mxu0 %v9886_v56  ;;  %v10188_v56 = vld [vmem:[#allocation2 + $0x32f] sm:$0xff] }
 0x10f   :  { %1314 = vmatmul.mubr.f32.gmra.mrb[86].mxu0 %v10172_v12 }
 0x110   :  { %1318 = vmatprep.mubr.f32.mxu0 %v9897_v60  ;;  %v10192_v60 = vld [vmem:[#allocation2 + $0x347] sm:$0xff] }
 0x113   :  { %1319 = vmatmul.mubr.f32.gmra.mrb[88].mxu0 %v10176_v24 }
 0x114   :  { %1323 = vmatprep.mubr.f32.mxu0 %v9908_v27  ;;  %v10196_v27 = vld [vmem:[#allocation2 + $0x34f] sm:$0xff] }
 0x117   :  { %1324 = vmatmul.mubr.f32.gmra.mrb[90].mxu0 %v10180_v37 }
 0x118   :  { %1328 = vmatprep.mubr.f32.mxu0 %v9918_v28  ;;  %v10200_v28 = vld [vmem:[#allocation2 + $0x367] sm:$0xff] }
 0x11b   :  { %1329 = vmatmul.mubr.f32.gmra.mrb[92].mxu0 %v10184_v48 }
 0x11c   :  { %1333 = vmatprep.mubr.f32.mxu0 %v9934_v8  ;;  %v10204_v8 = vld [vmem:[#allocation2 + $0x36f] sm:$0xff] }
 0x11f   :  { %1334 = vmatmul.mubr.f32.gmra.mrb[94].mxu0 %v10188_v56 }
 0x120   :  { %1338 = vmatprep.mubr.f32.mxu0 %v9945_v30  ;;  %v10208_v30 = vld [vmem:[#allocation2 + $0x387] sm:$0xff] }
 0x123   :  { %1339 = vmatmul.mubr.f32.gmra.mrb[96].mxu0 %v10192_v60 }
 0x124   :  { %1343 = vmatprep.mubr.f32.mxu0 %v9955_v14  ;;  %v10212_v14 = vld [vmem:[#allocation2 + $0x38f] sm:$0xff] }
 0x127   :  { %1344 = vmatmul.mubr.f32.gmra.mrb[98].mxu0 %v10196_v27 }
 0x128   :  { %1348 = vmatprep.mubr.f32.mxu0 %v9965_v15  ;;  %v10216_v15 = vld [vmem:[#allocation2 + $0x3a7] sm:$0xff] }
 0x12b   :  { %1349 = vmatmul.mubr.f32.gmra.mrb[100].mxu0 %v10200_v28 }
 0x12c   :  { %1353 = vmatprep.mubr.f32.mxu0 %v9981_v34  ;;  %v10220_v34 = vld [vmem:[#allocation2 + $0x3af] sm:$0xff] }
 0x12f   :  { %1354 = vmatmul.mubr.f32.gmra.mrb[102].mxu0 %v10204_v8 }
 0x130   :  { %1358 = vmatprep.mubr.f32.mxu0 %v9992_v35  ;;  %v10224_v35 = vld [vmem:[#allocation2 + $0x3c7] sm:$0xff] }
 0x133   :  { %1359 = vmatmul.mubr.f32.gmra.mrb[104].mxu0 %v10208_v30 }
 0x134   :  { %1363 = vmatprep.mubr.f32.mxu0 %v10002_v42  ;;  %v10228_v42 = vld [vmem:[#allocation2 + $0x3cf] sm:$0xff] }
 0x137   :  { %1364 = vmatmul.mubr.f32.gmra.mrb[106].mxu0 %v10212_v14 }
 0x138   :  { %1368 = vmatprep.mubr.f32.mxu0 %v10012_v45  ;;  %v10232_v45 = vld [vmem:[#allocation2 + $0x3e7] sm:$0xff] }
 0x13b   :  { %1369 = vmatmul.mubr.f32.gmra.mrb[108].mxu0 %v10216_v15 }
 0x13c   :  { %1373 = vmatprep.mubr.f32.mxu0 %v10028_v54  ;;  %v10236_v54 = vld [vmem:[#allocation2 + $0x3ef] sm:$0xff] }
 0x13f   :  { %1374 = vmatmul.mubr.f32.gmra.mrb[110].mxu0 %v10220_v34 }
 0x140   :  { %1378 = vmatprep.mubr.f32.mxu0 %v10039_v44  ;;  %v10240_v44 = vld [vmem:[#allocation2 + $0x407] sm:$0xff] }
 0x143   :  { %1379 = vmatmul.mubr.f32.gmra.mrb[112].mxu0 %v10224_v35 }
 0x144   :  { %1383 = vmatprep.mubr.f32.mxu0 %v10049_v4  ;;  %v10245_v4 = vld [vmem:[%s14517_s0 + $0xf0] sm:$0xff] }
 0x145   :  { %14702 = vst [vmem:[#allocation10_spill] sm:$0xff] %v10245_v4  ;;  %279 = vst [vmem:[#allocation2 + $0x208] sm:$0xff] %v10245_v4  ;;  %v957_v4 = vld [vmem:[%s14518_s1 + $0x218] sm:$0xff] }
 0x147   :  { %1384 = vmatmul.mubr.f32.gmra.mrb[114].mxu0 %v10228_v42 }
 0x148   :  { %1388 = vmatprep.mubr.f32.mxu0 %v10059_v6  ;;  %v10250_v6 = vld [vmem:[#allocation2 + $0x40f] sm:$0xff] }
 0x149   :  { %14703 = vst [vmem:[#allocation11_spill] sm:$0xff] %v10250_v6 }
 0x14b   :  { %1389 = vmatmul.mubr.f32.gmra.mrb[116].mxu0 %v10232_v45 }
 0x14c   :  { %1393 = vmatprep.mubr.f32.mxu0 %v10075_v25  ;;  %v10255_v25 = vld [vmem:[%s14517_s0 + $0xf8] sm:$0xff] }
 0x14d   :  { %14704 = vst [vmem:[#allocation12_spill] sm:$0xff] %v10255_v25  ;;  %280 = vst [vmem:[#allocation2 + $0x210] sm:$0xff] %v10255_v25  ;;  %v7796_v25 = vpack.c.bf16 %v955_v23, %v954_v32  ;;  %v959_v32 = vld [vmem:[%s14518_s1 + $0x228] sm:$0xff] }
 0x14e   :  { %v10289_v23 = vld [vmem:[#allocation2 + $0x29] sm:$0xff] }
 0x14f   :  { %1394 = vmatmul.mubr.f32.gmra.mrb[118].mxu0 %v10236_v54 }
 0x150   :  { %1398 = vmatprep.mubr.f32.mxu0 %v10086_v51  ;;  %v10260_v51 = vld [vmem:[#allocation2 + $0x427] sm:$0xff] }
 0x151   :  { %14705 = vst [vmem:[#allocation13_spill] sm:$0xff] %v10260_v51 }
 0x153   :  { %1399 = vmatmul.mubr.f32.gmra.mrb[120].mxu0 %v10240_v44 }
 0x154   :  { %1403 = vmatprep.mubr.f32.mxu0 %v10096_v52  ;;  %v10264_v52 = vld [vmem:[#allocation2 + $0x42f] sm:$0xff] }
 0x157   :  { %1404 = vmatmul.mubr.f32.gmra.mrb[122].mxu0 %v10250_v6 }
 0x158   :  { %1408 = vmatprep.mubr.f32.mxu0 %v10106_v47  ;;  %v441_v47 = vld [vmem:[#allocation2 + $0x9] sm:$0xff] }
 0x15b   :  { %1409 = vmatmul.mubr.f32.gmra.mrb[124].mxu0 %v10260_v51  ;;  %v442_v51 = vld [vmem:[#allocation2 + $0x11] sm:$0xff] }
 0x15c   :  { %1413 = vmatprep.mubr.f32.mxu0 %v10122_v0  ;;  %v956_v0 = vld [vmem:[%s14518_s1 + $0x210] sm:$0xff] }
 0x15d   :  { %v7799_v6 = vpack.c.bf16 %v957_v4, %v956_v0  ;;  %v961_v4 = vld [vmem:[%s14518_s1 + $0x238] sm:$0xff]  ;;  %v10311_v0 = vld [vmem:[#allocation2 + $0x49] sm:$0xff] }
 0x15f   :  { %1414 = vmatmul.mubr.f32.gmra.mrb[126].mxu0 %v10264_v52 }
 0x160   :  { %1483 = vmatprep.mubr.f32.mxu0 %v9755_v1  ;;  %v958_v1 = vld [vmem:[%s14518_s1 + $0x220] sm:$0xff] }
 0x163   :  { %1484 = vmatmul.mubr.f32.vlgmr.msra.gmra.mrb[0].mxu0 %v441_v47  ;;  %v963_v47 = vld [vmem:[%s14518_s1 + $0x248] sm:$0xff] }
 0x164   :  { %7797 = vmatpush1.bf16.msra.mxu0 %v7796_v25  ;;  %1488 = vmatprep.mubr.f32.mxu0 %v9772_v16  ;;  %v7802_v25 = vpack.c.bf16 %v959_v32, %v958_v1  ;;  %v960_v16 = vld [vmem:[%s14518_s1 + $0x230] sm:$0xff]  ;;  %v965_v32 = vld [vmem:[%s14518_s1 + $0x258] sm:$0xff] }
 0x165   :  { %7798 = vmatprep.subr.bf16.mxu0 %v14700_v55  ;;  %v964_v1 = vld [vmem:[%s14518_s1 + $0x250] sm:$0xff] }
 0x167   :  { %1489 = vmatmul.mubr.f32.gmra.mrb[2].mxu0 %v442_v51  ;;  %v10300_v51 = vld [vmem:[#allocation2 + $0x31] sm:$0xff] }
 0x168   :  { %1493 = vmatprep.mubr.f32.mxu0 %v9789_v17  ;;  %7800 = vmatpush1.bf16.msra.mxu0 %v7799_v6  ;;  %v7805_v17 = vpack.c.bf16 %v961_v4, %v960_v16  ;;  %v962_v6 = vld [vmem:[%s14518_s1 + $0x240] sm:$0xff]  ;;  %v967_v4 = vld [vmem:[%s14518_s1 + $0x268] sm:$0xff] }
 0x169   :  { %7801 = vmatprep.subr.bf16.mxu0 %v14700_v55  ;;  %v966_v16 = vld [vmem:[%s14518_s1 + $0x260] sm:$0xff] }
 0x16b   :  { %1494 = vmatmul.mubr.f32.gmra.mrb[4].mxu0 %v10289_v23 }
 0x16c   :  { %1498 = vmatprep.mubr.f32.mxu0 %v9806_v18  ;;  %7803 = vmatpush1.bf16.msra.mxu0 %v7802_v25  ;;  %v7808_v18 = vpack.c.bf16 %v963_v47, %v962_v6  ;;  %v10322_v25 = vld [vmem:[#allocation2 + $0x51] sm:$0xff] }
 0x16d   :  { %7804 = vmatprep.subr.bf16.mxu0 %v14700_v55  ;;  %v968_v6 = vld [vmem:[%s14518_s1 + $0x270] sm:$0xff]  ;;  %v969_v47 = vld [vmem:[%s14518_s1 + $0x278] sm:$0xff] }
 0x16f   :  { %1499 = vmatmul.mubr.f32.gmra.mrb[6].mxu0 %v10300_v51 }
 0x170   :  { %1503 = vmatprep.mubr.f32.mxu0 %v9823_v19  ;;  %7806 = vmatpush1.bf16.msra.mxu0 %v7805_v17  ;;  %v7811_v19 = vpack.c.bf16 %v965_v32, %v964_v1  ;;  %v10333_v17 = vld [vmem:[#allocation2 + $0x69] sm:$0xff]  ;;  %v970_v1 = vld [vmem:[%s14518_s1 + $0x280] sm:$0xff] }
 0x171   :  { %7807 = vmatprep.subr.bf16.mxu0 %v14700_v55  ;;  %v971_v32 = vld [vmem:[%s14518_s1 + $0x288] sm:$0xff] }
 0x173   :  { %1504 = vmatmul.mubr.f32.gmra.mrb[8].mxu0 %v10311_v0 }
 0x174   :  { %1508 = vmatprep.mubr.f32.mxu0 %v9840_v20  ;;  %7809 = vmatpush1.bf16.msra.mxu0 %v7808_v18  ;;  %v7814_v20 = vpack.c.bf16 %v967_v4, %v966_v16  ;;  %v10344_v18 = vld [vmem:[#allocation2 + $0x71] sm:$0xff] }
 0x175   :  { %7810 = vmatprep.subr.bf16.mxu0 %v14700_v55  ;;  %v972_v16 = vld [vmem:[%s14518_s1 + $0x290] sm:$0xff]  ;;  %v973_v4 = vld [vmem:[%s14518_s1 + $0x298] sm:$0xff] }
 0x177   :  { %1509 = vmatmul.mubr.f32.gmra.mrb[10].mxu0 %v10322_v25 }
 0x178   :  { %1513 = vmatprep.mubr.f32.mxu0 %v9857_v21  ;;  %7812 = vmatpush1.bf16.msra.mxu0 %v7811_v19  ;;  %v7817_v21 = vpack.c.bf16 %v969_v47, %v968_v6  ;;  %v10355_v19 = vld [vmem:[#allocation2 + $0x89] sm:$0xff]  ;;  %v974_v6 = vld [vmem:[%s14518_s1 + $0x2a0] sm:$0xff] }
 0x179   :  { %7813 = vmatprep.subr.bf16.mxu0 %v14700_v55  ;;  %v975_v47 = vld [vmem:[%s14518_s1 + $0x2a8] sm:$0xff] }
 0x17b   :  { %1514 = vmatmul.mubr.f32.gmra.mrb[12].mxu0 %v10333_v17 }
 0x17c   :  { %1518 = vmatprep.mubr.f32.mxu0 %v9874_v22  ;;  %7815 = vmatpush1.bf16.msra.mxu0 %v7814_v20  ;;  %v7820_v22 = vpack.c.bf16 %v971_v32, %v970_v1  ;;  %v10366_v20 = vld [vmem:[#allocation2 + $0x91] sm:$0xff] }
 0x17d   :  { %7816 = vmatprep.subr.bf16.mxu0 %v14700_v55  ;;  %v10382_v1 = vld [vmem:[#allocation2 + $0xb1] sm:$0xff] }
 0x17e   :  { %v976_v32 = vld [vmem:[%s14518_s1 + $0x2b0] sm:$0xff] }
 0x17f   :  { %1519 = vmatmul.mubr.f32.gmra.mrb[14].mxu0 %v10344_v18 }
 0x180   :  { %1523 = vmatprep.mubr.f32.mxu0 %v9891_v26  ;;  %7818 = vmatpush1.bf16.msra.mxu0 %v7817_v21  ;;  %v7823_v26 = vpack.c.bf16 %v973_v4, %v972_v16  ;;  %v10377_v21 = vld [vmem:[#allocation2 + $0xa9] sm:$0xff]  ;;  %v10406_v4 = vld [vmem:[#allocation2 + $0xf1] sm:$0xff] }
 0x181   :  { %7819 = vmatprep.subr.bf16.mxu0 %v14700_v55 }
 0x183   :  { %1524 = vmatmul.mubr.f32.gmra.mrb[16].mxu0 %v10355_v19 }
 0x184   :  { %1528 = vmatprep.mubr.f32.mxu0 %v9902_v61  ;;  %7821 = vmatpush1.bf16.msra.mxu0 %v7820_v22  ;;  %v7826_v61 = vpack.c.bf16 %v975_v47, %v974_v6  ;;  %v10397_v22 = vld [vmem:[#allocation2 + $0xd1] sm:$0xff] }
 0x185   :  { %7822 = vmatprep.subr.bf16.mxu0 %v14700_v55  ;;  %v10429_v47 = vld [vmem:[#allocation2 + $0x131] sm:$0xff] }
 0x187   :  { %1529 = vmatmul.mubr.f32.gmra.mrb[18].mxu0 %v10366_v20 }
 0x188   :  { %1533 = vmatprep.mubr.f32.mxu0 %v9913_v62  ;;  %7824 = vmatpush1.bf16.msra.mxu0 %v7823_v26  ;;  %v10387_v62 = vld [vmem:[#allocation2 + $0xc9] sm:$0xff] }
 0x189   :  { %7825 = vmatprep.subr.bf16.mxu0 %v14700_v55  ;;  %v979_v26 = vld [vmem:[%s14518_s1 + $0x2c8] sm:$0xff] }
 0x18b   :  { %1534 = vmatmul.mubr.f32.gmra.mrb[20].mxu0 %v10377_v21 }
 0x18c   :  { %1538 = vmatprep.mubr.f32.mxu0 %v9929_v29  ;;  %7827 = vmatpush1.bf16.msra.mxu0 %v7826_v61  ;;  %v977_v29 = vld [vmem:[%s14518_s1 + $0x2b8] sm:$0xff] }
 0x18d   :  { %7828 = vmatprep.subr.bf16.mxu0 %v14700_v55  ;;  %v7829_v16 = vpack.c.bf16 %v977_v29, %v976_v32  ;;  %v981_v61 = vld [vmem:[%s14518_s1 + $0x2d8] sm:$0xff] }
 0x18e   :  { %v10452_v29 = vld [vmem:[#allocation2 + $0x171] sm:$0xff] }
 0x18f   :  { %1539 = vmatmul.mubr.f32.gmra.mrb[22].mxu0 %v10382_v1 }
 0x190   :  { %1543 = vmatprep.mubr.f32.mxu0 %v9940_v10  ;;  %7830 = vmatpush1.bf16.msra.mxu0 %v7829_v16  ;;  %v10402_v10 = vld [vmem:[#allocation2 + $0xe9] sm:$0xff] }
 0x191   :  { %7831 = vmatprep.subr.bf16.mxu0 %v14700_v55  ;;  %v983_v16 = vld [vmem:[%s14518_s1 + $0x2e8] sm:$0xff] }
 0x193   :  { %1544 = vmatmul.mubr.f32.gmra.mrb[24].mxu0 %v10387_v62 }
 0x194   :  { %1548 = vmatprep.mubr.f32.mxu0 %v9950_v11  ;;  %v10410_v11 = vld [vmem:[#allocation2 + $0x109] sm:$0xff] }
 0x197   :  { %1549 = vmatmul.mubr.f32.gmra.mrb[26].mxu0 %v10397_v22 }
 0x198   :  { %1553 = vmatprep.mubr.f32.mxu0 %v9960_v31  ;;  %v978_v31 = vld [vmem:[%s14518_s1 + $0x2c0] sm:$0xff] }
 0x199   :  { %v7832_v6 = vpack.c.bf16 %v979_v26, %v978_v31  ;;  %v14706_v31 = vld [vmem:[#allocation7_spill] sm:$0xff] }
 0x19b   :  { %1554 = vmatmul.mubr.f32.gmra.mrb[28].mxu0 %v10402_v10 }
 0x19c   :  { %1558 = vmatprep.mubr.f32.mxu0 %v9976_v33  ;;  %v10420_v33 = vld [vmem:[#allocation2 + $0x111] sm:$0xff]  ;;  %7833 = vmatpush1.bf16.msra.mxu0 %v7832_v6  ;;  %v10471_v6 = vld [vmem:[#allocation2 + $0x1a9] sm:$0xff] }
 0x19d   :  { %7834 = vmatprep.subr.bf16.mxu0 %v14700_v55 }
 0x19f   :  { %1559 = vmatmul.mubr.f32.gmra.mrb[30].mxu0 %v10406_v4 }
 0x1a0   :  { %1563 = vmatprep.mubr.f32.mxu0 %v9987_v36  ;;  %v10425_v36 = vld [vmem:[#allocation2 + $0x129] sm:$0xff] }
 0x1a3   :  { %1564 = vmatmul.mubr.f32.gmra.mrb[32].mxu0 %v10410_v11 }
 0x1a4   :  { %1568 = vmatprep.mubr.f32.mxu0 %v9997_v40  ;;  %v10433_v40 = vld [vmem:[#allocation2 + $0x149] sm:$0xff] }
 0x1a7   :  { %1569 = vmatmul.mubr.f32.gmra.mrb[34].mxu0 %v10420_v33 }
 0x1a8   :  { %1573 = vmatprep.mubr.f32.mxu0 %v10007_v38  ;;  %v980_v38 = vld [vmem:[%s14518_s1 + $0x2d0] sm:$0xff] }
 0x1a9   :  { %v7835_v32 = vpack.c.bf16 %v981_v61, %v980_v38  ;;  %v10475_v38 = vld [vmem:[#allocation2 + $0x1b1] sm:$0xff]  ;;  %v10479_v61 = vld [vmem:[#allocation2 + $0x1c9] sm:$0xff] }
 0x1ab   :  { %1574 = vmatmul.mubr.f32.gmra.mrb[36].mxu0 %v10425_v36 }
 0x1ac   :  { %1578 = vmatprep.mubr.f32.mxu0 %v10023_v41  ;;  %v10443_v41 = vld [vmem:[#allocation2 + $0x151] sm:$0xff]  ;;  %7836 = vmatpush1.bf16.msra.mxu0 %v7835_v32 }
 0x1ad   :  { %7837 = vmatprep.subr.bf16.mxu0 %v14700_v55  ;;  %v10484_v32 = vld [vmem:[%s14517_s0 + $0x1f0] sm:$0xff] }
 0x1ae   :  { %14708 = vst [vmem:[#allocation7_spill] sm:$0xff] %v10484_v32  ;;  %311 = vst [vmem:[#allocation2 + $0x448] sm:$0xff] %v10484_v32  ;;  %v10505_v32 = vld [vmem:[#allocation2 + $0x1e9] sm:$0xff] }
 0x1af   :  { %1579 = vmatmul.mubr.f32.gmra.mrb[38].mxu0 %v10429_v47 }
 0x1b0   :  { %1583 = vmatprep.mubr.f32.mxu0 %v10034_v57  ;;  %v10448_v57 = vld [vmem:[#allocation2 + $0x169] sm:$0xff] }
 0x1b3   :  { %1584 = vmatmul.mubr.f32.gmra.mrb[40].mxu0 %v10433_v40 }
 0x1b4   :  { %1588 = vmatprep.mubr.f32.mxu0 %v10044_v3  ;;  %v10456_v3 = vld [vmem:[#allocation2 + $0x189] sm:$0xff] }
 0x1b7   :  { %1589 = vmatmul.mubr.f32.gmra.mrb[42].mxu0 %v10443_v41 }
 0x1b8   :  { %1593 = vmatprep.mubr.f32.mxu0 %v10054_v46  ;;  %v982_v46 = vld [vmem:[%s14518_s1 + $0x2e0] sm:$0xff] }
 0x1b9   :  { %v7838_v26 = vpack.c.bf16 %v983_v16, %v982_v46  ;;  %v985_v46 = vld [vmem:[%s14518_s1 + $0x2f8] sm:$0xff] }
 0x1ba   :  { %v10495_v16 = vld [vmem:[#allocation2 + $0x1d1] sm:$0xff] }
 0x1bb   :  { %1594 = vmatmul.mubr.f32.gmra.mrb[44].mxu0 %v10448_v57 }
 0x1bc   :  { %1598 = vmatprep.mubr.f32.mxu0 %v10070_v50  ;;  %v10466_v50 = vld [vmem:[#allocation2 + $0x191] sm:$0xff]  ;;  %7839 = vmatpush1.bf16.msra.mxu0 %v7838_v26  ;;  %v535_v26 = vld [vmem:[#allocation2 + $0x207] sm:$0xff] }
 0x1bd   :  { %7840 = vmatprep.subr.bf16.mxu0 %v14700_v55 }
 0x1bf   :  { %1599 = vmatmul.mubr.f32.gmra.mrb[46].mxu0 %v10452_v29 }
 0x1c0   :  { %1603 = vmatprep.mubr.f32.mxu0 %v10081_v39  ;;  %v14707_v39 = vld [vmem:[#allocation8_spill] sm:$0xff] }
 0x1c3   :  { %1604 = vmatmul.mubr.f32.gmra.mrb[48].mxu0 %v10456_v3 }
 0x1c4   :  { %1608 = vmatprep.mubr.f32.mxu0 %v14706_v31 }
 0x1c7   :  { %1609 = vmatmul.mubr.f32.gmra.mrb[50].mxu0 %v10466_v50 }
 0x1c8   :  { %1613 = vmatprep.mubr.f32.mxu0 %v14707_v39  ;;  %v10500_v39 = vld [vmem:[%s14517_s0 + $0x1f8] sm:$0xff] }
 0x1c9   :  { %14710 = vst [vmem:[#allocation8_spill] sm:$0xff] %v10500_v39  ;;  %312 = vst [vmem:[#allocation2 + $0x450] sm:$0xff] %v10500_v39  ;;  %v10625_v39 = vld [vmem:[#allocation2 + $0x429] sm:$0xff] }
 0x1ca   :  { %14717 = vst [vmem:[#allocation15_spill] sm:$0xff] %v10625_v39 }
 0x1cb   :  { %1614 = vmatmul.mubr.f32.gmra.mrb[52].mxu0 %v10471_v6 }
 0x1cc   :  { %1618 = vmatprep.mubr.f32.mxu0 %v10117_v63  ;;  %v984_v63 = vld [vmem:[%s14518_s1 + $0x2f0] sm:$0xff] }
 0x1cd   :  { %v7841_v31 = vpack.c.bf16 %v985_v46, %v984_v63  ;;  %v10508_v63 = vld [vmem:[#allocation2 + $0x1f1] sm:$0xff]  ;;  %v473_v46 = vld [vmem:[#allocation2 + $0x249] sm:$0xff] }
 0x1cf   :  { %1619 = vmatmul.mubr.f32.gmra.mrb[54].mxu0 %v10475_v38 }
 0x1d0   :  { %1623 = vmatprep.mubr.f32.mxu0 %v10128_v49  ;;  %v14709_v49 = vld [vmem:[#allocation9_spill] sm:$0xff]  ;;  %7842 = vmatpush1.bf16.msra.mxu0 %v7841_v31 }
 0x1d1   :  { %7843 = vmatprep.subr.bf16.mxu0 %v14700_v55  ;;  %v474_v31 = vld [vmem:[#allocation2 + $0x251] sm:$0xff] }
 0x1d3   :  { %1624 = vmatmul.mubr.f32.gmra.mrb[56].mxu0 %v10479_v61 }
 0x1d4   :  { %1628 = vmatprep.mubr.f32.mxu0 %v14709_v49  ;;  %v536_v49 = vld [vmem:[#allocation2 + $0x20f] sm:$0xff] }
 0x1d7   :  { %1629 = vmatmul.mubr.f32.gmra.mrb[58].mxu0 %v10495_v16 }
 0x1d8   :  { %1633 = vmatprep.mubr.f32.mxu0 %v535_v26  ;;  %v10514_v26 = vld [vmem:[#allocation2 + $0x269] sm:$0xff] }
 0x1db   :  { %1634 = vmatmul.mubr.f32.gmra.mrb[60].mxu0 %v10505_v32 }
 0x1dc   :  { %1638 = vmatprep.mubr.f32.mxu0 %v536_v49  ;;  %v10518_v49 = vld [vmem:[#allocation2 + $0x271] sm:$0xff] }
 0x1df   :  { %1639 = vmatmul.mubr.f32.gmra.mrb[62].mxu0 %v10508_v63 }
 0x1e0   :  { %1643 = vmatprep.mubr.f32.mxu0 %v10136_v9  ;;  %v10522_v9 = vld [vmem:[#allocation2 + $0x289] sm:$0xff] }
 0x1e3   :  { %1644 = vmatmul.mubr.f32.gmra.mrb[64].mxu0 %v473_v46  ;;  %v10614_v46 = vld [vmem:[#allocation2 + $0x3f1] sm:$0xff] }
 0x1e4   :  { %1648 = vmatprep.mubr.f32.mxu0 %v10140_v13  ;;  %v10526_v13 = vld [vmem:[#allocation2 + $0x291] sm:$0xff] }
 0x1e7   :  { %1649 = vmatmul.mubr.f32.gmra.mrb[66].mxu0 %v474_v31  ;;  %v10618_v31 = vld [vmem:[#allocation2 + $0x409] sm:$0xff] }
 0x1e8   :  { %1653 = vmatprep.mubr.f32.mxu0 %v10144_v5  ;;  %v10530_v5 = vld [vmem:[#allocation2 + $0x2a9] sm:$0xff] }
 0x1eb   :  { %1654 = vmatmul.mubr.f32.gmra.mrb[68].mxu0 %v10514_v26 }
 0x1ec   :  { %1658 = vmatprep.mubr.f32.mxu0 %v10148_v59  ;;  %v10534_v59 = vld [vmem:[#allocation2 + $0x2b1] sm:$0xff] }
 0x1ef   :  { %1659 = vmatmul.mubr.f32.gmra.mrb[70].mxu0 %v10518_v49 }
 0x1f0   :  { %1663 = vmatprep.mubr.f32.mxu0 %v10152_v43  ;;  %v10538_v43 = vld [vmem:[#allocation2 + $0x2c9] sm:$0xff] }
 0x1f3   :  { %1664 = vmatmul.mubr.f32.gmra.mrb[72].mxu0 %v10522_v9 }
 0x1f4   :  { %1668 = vmatprep.mubr.f32.mxu0 %v10156_v53  ;;  %v10542_v53 = vld [vmem:[#allocation2 + $0x2d1] sm:$0xff] }
 0x1f7   :  { %1669 = vmatmul.mubr.f32.gmra.mrb[74].mxu0 %v10526_v13 }
 0x1f8   :  { %1673 = vmatprep.mubr.f32.mxu0 %v10160_v58  ;;  %v10546_v58 = vld [vmem:[#allocation2 + $0x2e9] sm:$0xff] }
 0x1fb   :  { %1674 = vmatmul.mubr.f32.gmra.mrb[76].mxu0 %v10530_v5 }
 0x1fc   :  { %1678 = vmatprep.mubr.f32.mxu0 %v10164_v2  ;;  %v10550_v2 = vld [vmem:[#allocation2 + $0x2f1] sm:$0xff] }
 0x1ff   :  { %1679 = vmatmul.mubr.f32.gmra.mrb[78].mxu0 %v10534_v59 }
 0x200   :  { %1683 = vmatprep.mubr.f32.mxu0 %v10168_v7  ;;  %v10554_v7 = vld [vmem:[#allocation2 + $0x309] sm:$0xff] }
 0x203   :  { %1684 = vmatmul.mubr.f32.gmra.mrb[80].mxu0 %v10538_v43 }
 0x204   :  { %1688 = vmatprep.mubr.f32.mxu0 %v10172_v12  ;;  %v10558_v12 = vld [vmem:[#allocation2 + $0x311] sm:$0xff] }
 0x207   :  { %1689 = vmatmul.mubr.f32.gmra.mrb[82].mxu0 %v10542_v53 }
 0x208   :  { %1693 = vmatprep.mubr.f32.mxu0 %v10176_v24  ;;  %v10562_v24 = vld [vmem:[#allocation2 + $0x329] sm:$0xff] }
 0x20b   :  { %1694 = vmatmul.mubr.f32.gmra.mrb[84].mxu0 %v10546_v58 }
 0x20c   :  { %1698 = vmatprep.mubr.f32.mxu0 %v10180_v37  ;;  %v10566_v37 = vld [vmem:[#allocation2 + $0x331] sm:$0xff] }
 0x20f   :  { %1699 = vmatmul.mubr.f32.gmra.mrb[86].mxu0 %v10550_v2 }
 0x210   :  { %1703 = vmatprep.mubr.f32.mxu0 %v10184_v48  ;;  %v10570_v48 = vld [vmem:[#allocation2 + $0x349] sm:$0xff] }
 0x213   :  { %1704 = vmatmul.mubr.f32.gmra.mrb[88].mxu0 %v10554_v7 }
 0x214   :  { %1708 = vmatprep.mubr.f32.mxu0 %v10188_v56  ;;  %v10574_v56 = vld [vmem:[#allocation2 + $0x351] sm:$0xff] }
 0x217   :  { %1709 = vmatmul.mubr.f32.gmra.mrb[90].mxu0 %v10558_v12 }
 0x218   :  { %1713 = vmatprep.mubr.f32.mxu0 %v10192_v60  ;;  %v10578_v60 = vld [vmem:[#allocation2 + $0x369] sm:$0xff] }
 0x21b   :  { %1714 = vmatmul.mubr.f32.gmra.mrb[92].mxu0 %v10562_v24 }
 0x21c   :  { %1718 = vmatprep.mubr.f32.mxu0 %v10196_v27  ;;  %v10582_v27 = vld [vmem:[#allocation2 + $0x371] sm:$0xff] }
 0x21f   :  { %1719 = vmatmul.mubr.f32.gmra.mrb[94].mxu0 %v10566_v37 }
 0x220   :  { %1723 = vmatprep.mubr.f32.mxu0 %v10200_v28  ;;  %v10586_v28 = vld [vmem:[#allocation2 + $0x389] sm:$0xff] }
 0x223   :  { %1724 = vmatmul.mubr.f32.gmra.mrb[96].mxu0 %v10570_v48 }
 0x224   :  { %1728 = vmatprep.mubr.f32.mxu0 %v10204_v8  ;;  %v10590_v8 = vld [vmem:[#allocation2 + $0x391] sm:$0xff] }
 0x227   :  { %1729 = vmatmul.mubr.f32.gmra.mrb[98].mxu0 %v10574_v56 }
 0x228   :  { %1733 = vmatprep.mubr.f32.mxu0 %v10208_v30  ;;  %v10594_v30 = vld [vmem:[#allocation2 + $0x3a9] sm:$0xff] }
 0x22b   :  { %1734 = vmatmul.mubr.f32.gmra.mrb[100].mxu0 %v10578_v60 }
 0x22c   :  { %1738 = vmatprep.mubr.f32.mxu0 %v10212_v14  ;;  %v10598_v14 = vld [vmem:[#allocation2 + $0x3b1] sm:$0xff] }
 0x22f   :  { %1739 = vmatmul.mubr.f32.gmra.mrb[102].mxu0 %v10582_v27 }
 0x230   :  { %1743 = vmatprep.mubr.f32.mxu0 %v10216_v15  ;;  %v10602_v15 = vld [vmem:[#allocation2 + $0x3c9] sm:$0xff] }
 0x233   :  { %1744 = vmatmul.mubr.f32.gmra.mrb[104].mxu0 %v10586_v28 }
 0x234   :  { %1748 = vmatprep.mubr.f32.mxu0 %v10220_v34  ;;  %v10606_v34 = vld [vmem:[#allocation2 + $0x3d1] sm:$0xff] }
 0x237   :  { %1749 = vmatmul.mubr.f32.gmra.mrb[106].mxu0 %v10590_v8 }
 0x238   :  { %1753 = vmatprep.mubr.f32.mxu0 %v10224_v35  ;;  %v10610_v35 = vld [vmem:[#allocation2 + $0x3e9] sm:$0xff] }
 0x239   :  { %14711 = vst [vmem:[#allocation9_spill] sm:$0xff] %v10610_v35 }
 0x23b   :  { %1754 = vmatmul.mubr.f32.gmra.mrb[108].mxu0 %v10594_v30 }
 0x23c   :  { %1758 = vmatprep.mubr.f32.mxu0 %v10228_v42  ;;  %v14712_v42 = vld [vmem:[#allocation11_spill] sm:$0xff] }
 0x23d   :  { %14713 = vst [vmem:[#allocation11_spill] sm:$0xff] %v10614_v46 }
 0x23f   :  { %1759 = vmatmul.mubr.f32.gmra.mrb[110].mxu0 %v10598_v14 }
 0x240   :  { %1763 = vmatprep.mubr.f32.mxu0 %v10232_v45  ;;  %v14714_v45 = vld [vmem:[#allocation13_spill] sm:$0xff] }
 0x241   :  { %14715 = vst [vmem:[#allocation13_spill] sm:$0xff] %v10618_v31 }
 0x243   :  { %1764 = vmatmul.mubr.f32.gmra.mrb[112].mxu0 %v10602_v15 }
 0x244   :  { %1768 = vmatprep.mubr.f32.mxu0 %v10236_v54  ;;  %v10622_v54 = vld [vmem:[#allocation2 + $0x411] sm:$0xff] }
 0x245   :  { %14716 = vst [vmem:[#allocation14_spill] sm:$0xff] %v10622_v54 }
 0x247   :  { %1769 = vmatmul.mubr.f32.gmra.mrb[114].mxu0 %v10606_v34 }
 0x248   :  { %1773 = vmatprep.mubr.f32.mxu0 %v10240_v44  ;;  %v567_v44 = vld [vmem:[#allocation2 + $0x447] sm:$0xff] }
 0x24b   :  { %1774 = vmatmul.mubr.f32.gmra.mrb[116].mxu0 %v10610_v35 }
 0x24c   :  { %1778 = vmatprep.mubr.f32.mxu0 %v14712_v42  ;;  %v568_v42 = vld [vmem:[#allocation2 + $0x44f] sm:$0xff] }
 0x24f   :  { %1779 = vmatmul.mubr.f32.gmra.mrb[118].mxu0 %v10614_v46  ;;  %v10628_v46 = vld [vmem:[#allocation2 + $0x431] sm:$0xff] }
 0x250   :  { %1783 = vmatprep.mubr.f32.mxu0 %v14714_v45  ;;  %v986_v45 = vld [vmem:[%s14518_s1 + $0x300] sm:$0xff] }
 0x253   :  { %1784 = vmatmul.mubr.f32.gmra.mrb[120].mxu0 %v10618_v31  ;;  %v570_v31 = vld [vmem:[#allocation2 + $0x30] sm:$0xff] }
 0x254   :  { %1788 = vmatprep.mubr.f32.mxu0 %v10264_v52  ;;  %v987_v52 = vld [vmem:[%s14518_s1 + $0x308] sm:$0xff] }
 0x257   :  { %1789 = vmatmul.mubr.f32.gmra.mrb[122].mxu0 %v10622_v54  ;;  %v7844_v54 = vpack.c.bf16 %v987_v52, %v986_v45  ;;  %v991_v45 = vld [vmem:[%s14518_s1 + $0x328] sm:$0xff] }
 0x258   :  { %1793 = vmatprep.mubr.f32.mxu0 %v567_v44  ;;  %v569_v44 = vld [vmem:[#allocation2 + $0x28] sm:$0xff] }
 0x259   :  { %v10653_v52 = vld [vmem:[#allocation2 + $0x48] sm:$0xff] }
 0x25b   :  { %1794 = vmatmul.mubr.f32.gmra.mrb[124].mxu0 %v10625_v39  ;;  %v989_v39 = vld [vmem:[%s14518_s1 + $0x318] sm:$0xff] }
 0x25c   :  { %1798 = vmatprep.mubr.f32.mxu0 %v568_v42  ;;  %v988_v42 = vld [vmem:[%s14518_s1 + $0x310] sm:$0xff] }
 0x25d   :  { %v7847_v35 = vpack.c.bf16 %v989_v39, %v988_v42  ;;  %v993_v39 = vld [vmem:[%s14518_s1 + $0x338] sm:$0xff]  ;;  %v10675_v42 = vld [vmem:[#allocation2 + $0x68] sm:$0xff] }
 0x25f   :  { %1799 = vmatmul.mubr.f32.gmra.mrb[126].mxu0 %v10628_v46 }
 0x260   :  { %1868 = vmatprep.mubr.f32.mxu0 %v10289_v23  ;;  %v990_v23 = vld [vmem:[%s14518_s1 + $0x320] sm:$0xff] }
 0x263   :  { %1869 = vmatmul.mubr.f32.vlgmr.msra.gmra.mrb[0].mxu0 %v569_v44  ;;  %v995_v44 = vld [vmem:[%s14518_s1 + $0x348] sm:$0xff] }
 0x264   :  { %7845 = vmatpush1.bf16.msra.mxu0 %v7844_v54  ;;  %1873 = vmatprep.mubr.f32.mxu0 %v10300_v51  ;;  %v7850_v54 = vpack.c.bf16 %v991_v45, %v990_v23  ;;  %v992_v51 = vld [vmem:[%s14518_s1 + $0x330] sm:$0xff]  ;;  %v997_v45 = vld [vmem:[%s14518_s1 + $0x358] sm:$0xff] }
 0x265   :  { %7846 = vmatprep.subr.bf16.mxu0 %v14700_v55  ;;  %v996_v23 = vld [vmem:[%s14518_s1 + $0x350] sm:$0xff] }
 0x267   :  { %1874 = vmatmul.mubr.f32.gmra.mrb[2].mxu0 %v570_v31  ;;  %v10664_v31 = vld [vmem:[#allocation2 + $0x50] sm:$0xff] }
 0x268   :  { %1878 = vmatprep.mubr.f32.mxu0 %v10311_v0  ;;  %7848 = vmatpush1.bf16.msra.mxu0 %v7847_v35  ;;  %v7853_v0 = vpack.c.bf16 %v993_v39, %v992_v51  ;;  %v994_v35 = vld [vmem:[%s14518_s1 + $0x340] sm:$0xff]  ;;  %v999_v39 = vld [vmem:[%s14518_s1 + $0x368] sm:$0xff] }
 0x269   :  { %7849 = vmatprep.subr.bf16.mxu0 %v14700_v55  ;;  %v998_v51 = vld [vmem:[%s14518_s1 + $0x360] sm:$0xff] }
 0x26b   :  { %1879 = vmatmul.mubr.f32.gmra.mrb[4].mxu0 %v10653_v52 }
 0x26c   :  { %1883 = vmatprep.mubr.f32.mxu0 %v10322_v25  ;;  %7851 = vmatpush1.bf16.msra.mxu0 %v7850_v54  ;;  %v7856_v25 = vpack.c.bf16 %v995_v44, %v994_v35  ;;  %v10686_v54 = vld [vmem:[#allocation2 + $0x70] sm:$0xff]  ;;  %v1001_v44 = vld [vmem:[%s14518_s1 + $0x378] sm:$0xff] }
 0x26d   :  { %7852 = vmatprep.subr.bf16.mxu0 %v14700_v55  ;;  %v1000_v35 = vld [vmem:[%s14518_s1 + $0x370] sm:$0xff] }
 0x26f   :  { %1884 = vmatmul.mubr.f32.gmra.mrb[6].mxu0 %v10664_v31 }
 0x270   :  { %1888 = vmatprep.mubr.f32.mxu0 %v10333_v17  ;;  %7854 = vmatpush1.bf16.msra.mxu0 %v7853_v0  ;;  %v7859_v17 = vpack.c.bf16 %v997_v45, %v996_v23  ;;  %v10697_v0 = vld [vmem:[#allocation2 + $0x88] sm:$0xff]  ;;  %v1002_v23 = vld [vmem:[%s14518_s1 + $0x380] sm:$0xff] }
 0x271   :  { %7855 = vmatprep.subr.bf16.mxu0 %v14700_v55  ;;  %v1003_v45 = vld [vmem:[%s14518_s1 + $0x388] sm:$0xff] }
 0x273   :  { %1889 = vmatmul.mubr.f32.gmra.mrb[8].mxu0 %v10675_v42 }
 0x274   :  { %1893 = vmatprep.mubr.f32.mxu0 %v10344_v18  ;;  %7857 = vmatpush1.bf16.msra.mxu0 %v7856_v25  ;;  %v7862_v18 = vpack.c.bf16 %v999_v39, %v998_v51  ;;  %v10708_v25 = vld [vmem:[#allocation2 + $0x90] sm:$0xff]  ;;  %v1005_v39 = vld [vmem:[%s14518_s1 + $0x398] sm:$0xff] }
 0x275   :  { %7858 = vmatprep.subr.bf16.mxu0 %v14700_v55  ;;  %v1004_v51 = vld [vmem:[%s14518_s1 + $0x390] sm:$0xff] }
 0x277   :  { %1894 = vmatmul.mubr.f32.gmra.mrb[10].mxu0 %v10686_v54 }
 0x278   :  { %1898 = vmatprep.mubr.f32.mxu0 %v10355_v19  ;;  %7860 = vmatpush1.bf16.msra.mxu0 %v7859_v17  ;;  %v7865_v19 = vpack.c.bf16 %v1001_v44, %v1000_v35  ;;  %v10719_v17 = vld [vmem:[#allocation2 + $0xa8] sm:$0xff]  ;;  %v1006_v35 = vld [vmem:[%s14518_s1 + $0x3a0] sm:$0xff] }
 0x279   :  { %7861 = vmatprep.subr.bf16.mxu0 %v14700_v55  ;;  %v1007_v44 = vld [vmem:[%s14518_s1 + $0x3a8] sm:$0xff] }
 0x27b   :  { %1899 = vmatmul.mubr.f32.gmra.mrb[12].mxu0 %v10697_v0 }
 0x27c   :  { %1903 = vmatprep.mubr.f32.mxu0 %v10366_v20  ;;  %7863 = vmatpush1.bf16.msra.mxu0 %v7862_v18  ;;  %v7868_v20 = vpack.c.bf16 %v1003_v45, %v1002_v23  ;;  %v10730_v18 = vld [vmem:[#allocation2 + $0xb0] sm:$0xff] }
 0x27d   :  { %7864 = vmatprep.subr.bf16.mxu0 %v14700_v55  ;;  %v10746_v23 = vld [vmem:[#allocation2 + $0xd0] sm:$0xff] }
 0x27e   :  { %v1008_v45 = vld [vmem:[%s14518_s1 + $0x3b0] sm:$0xff] }
 0x27f   :  { %1904 = vmatmul.mubr.f32.gmra.mrb[14].mxu0 %v10708_v25 }
 0x280   :  { %1908 = vmatprep.mubr.f32.mxu0 %v10377_v21  ;;  %7866 = vmatpush1.bf16.msra.mxu0 %v7865_v19  ;;  %v7871_v21 = vpack.c.bf16 %v1005_v39, %v1004_v51  ;;  %v10741_v19 = vld [vmem:[#allocation2 + $0xc8] sm:$0xff]  ;;  %v10770_v39 = vld [vmem:[#allocation2 + $0x110] sm:$0xff] }
 0x281   :  { %7867 = vmatprep.subr.bf16.mxu0 %v14700_v55 }
 0x283   :  { %1909 = vmatmul.mubr.f32.gmra.mrb[16].mxu0 %v10719_v17 }
 0x284   :  { %1913 = vmatprep.mubr.f32.mxu0 %v10382_v1  ;;  %7869 = vmatpush1.bf16.msra.mxu0 %v7868_v20  ;;  %v7874_v1 = vpack.c.bf16 %v1007_v44, %v1006_v35  ;;  %v10761_v20 = vld [vmem:[#allocation2 + $0xf0] sm:$0xff] }
 0x285   :  { %7870 = vmatprep.subr.bf16.mxu0 %v14700_v55  ;;  %v10793_v44 = vld [vmem:[#allocation2 + $0x150] sm:$0xff] }
 0x287   :  { %1914 = vmatmul.mubr.f32.gmra.mrb[18].mxu0 %v10730_v18 }
 0x288   :  { %1918 = vmatprep.mubr.f32.mxu0 %v10387_v62  ;;  %7872 = vmatpush1.bf16.msra.mxu0 %v7871_v21  ;;  %v10751_v62 = vld [vmem:[#allocation2 + $0xe8] sm:$0xff] }
 0x289   :  { %7873 = vmatprep.subr.bf16.mxu0 %v14700_v55  ;;  %v1011_v21 = vld [vmem:[%s14518_s1 + $0x3c8] sm:$0xff] }
 0x28b   :  { %1919 = vmatmul.mubr.f32.gmra.mrb[20].mxu0 %v10741_v19 }
 0x28c   :  { %1923 = vmatprep.mubr.f32.mxu0 %v10397_v22  ;;  %7875 = vmatpush1.bf16.msra.mxu0 %v7874_v1  ;;  %v1009_v22 = vld [vmem:[%s14518_s1 + $0x3b8] sm:$0xff] }
 0x28d   :  { %7876 = vmatprep.subr.bf16.mxu0 %v14700_v55  ;;  %v7877_v51 = vpack.c.bf16 %v1009_v22, %v1008_v45  ;;  %v1013_v1 = vld [vmem:[%s14518_s1 + $0x3d8] sm:$0xff]  ;;  %v10816_v22 = vld [vmem:[#allocation2 + $0x190] sm:$0xff] }
 0x28f   :  { %1924 = vmatmul.mubr.f32.gmra.mrb[22].mxu0 %v10746_v23 }
 0x290   :  { %1928 = vmatprep.mubr.f32.mxu0 %v10402_v10  ;;  %7878 = vmatpush1.bf16.msra.mxu0 %v7877_v51  ;;  %v10766_v10 = vld [vmem:[#allocation2 + $0x108] sm:$0xff] }
 0x291   :  { %7879 = vmatprep.subr.bf16.mxu0 %v14700_v55  ;;  %v1019_v51 = vld [vmem:[%s14518_s1 + $0x408] sm:$0xff] }
 0x293   :  { %1929 = vmatmul.mubr.f32.gmra.mrb[24].mxu0 %v10751_v62 }
 0x294   :  { %1933 = vmatprep.mubr.f32.mxu0 %v10406_v4  ;;  %v10774_v4 = vld [vmem:[#allocation2 + $0x128] sm:$0xff] }
 0x297   :  { %1934 = vmatmul.mubr.f32.gmra.mrb[26].mxu0 %v10761_v20 }
 0x298   :  { %1938 = vmatprep.mubr.f32.mxu0 %v10410_v11  ;;  %v1010_v11 = vld [vmem:[%s14518_s1 + $0x3c0] sm:$0xff] }
 0x299   :  { %v7880_v35 = vpack.c.bf16 %v1011_v21, %v1010_v11  ;;  %v1015_v21 = vld [vmem:[%s14518_s1 + $0x3e8] sm:$0xff] }
 0x29b   :  { %1939 = vmatmul.mubr.f32.gmra.mrb[28].mxu0 %v10766_v10 }
 0x29c   :  { %1943 = vmatprep.mubr.f32.mxu0 %v10420_v33  ;;  %v10784_v33 = vld [vmem:[#allocation2 + $0x130] sm:$0xff]  ;;  %7881 = vmatpush1.bf16.msra.mxu0 %v7880_v35 }
 0x29d   :  { %7882 = vmatprep.subr.bf16.mxu0 %v14700_v55  ;;  %v1020_v35 = vld [vmem:[%s14518_s1 + $0x410] sm:$0xff] }
 0x29f   :  { %1944 = vmatmul.mubr.f32.gmra.mrb[30].mxu0 %v10770_v39 }
 0x2a0   :  { %1948 = vmatprep.mubr.f32.mxu0 %v10425_v36  ;;  %v10789_v36 = vld [vmem:[#allocation2 + $0x148] sm:$0xff] }
 0x2a3   :  { %1949 = vmatmul.mubr.f32.gmra.mrb[32].mxu0 %v10774_v4 }
 0x2a4   :  { %1953 = vmatprep.mubr.f32.mxu0 %v10429_v47  ;;  %v10797_v47 = vld [vmem:[#allocation2 + $0x168] sm:$0xff] }
 0x2a7   :  { %1954 = vmatmul.mubr.f32.gmra.mrb[34].mxu0 %v10784_v33 }
 0x2a8   :  { %1958 = vmatprep.mubr.f32.mxu0 %v10433_v40  ;;  %v1012_v40 = vld [vmem:[%s14518_s1 + $0x3d0] sm:$0xff] }
 0x2a9   :  { %v7883_v45 = vpack.c.bf16 %v1013_v1, %v1012_v40  ;;  %v1021_v1 = vld [vmem:[%s14518_s1 + $0x418] sm:$0xff] }
 0x2ab   :  { %1959 = vmatmul.mubr.f32.gmra.mrb[36].mxu0 %v10789_v36 }
 0x2ac   :  { %1963 = vmatprep.mubr.f32.mxu0 %v10443_v41  ;;  %v10807_v41 = vld [vmem:[#allocation2 + $0x170] sm:$0xff]  ;;  %7884 = vmatpush1.bf16.msra.mxu0 %v7883_v45  ;;  %v7895_v45 = vpack.c.bf16 %v1021_v1, %v1020_v35  ;;  %v1027_v1 = vld [vmem:[%s14518_s1 + $0x448] sm:$0xff] }
 0x2ad   :  { %7885 = vmatprep.subr.bf16.mxu0 %v14700_v55 }
 0x2af   :  { %1964 = vmatmul.mubr.f32.gmra.mrb[38].mxu0 %v10793_v44 }
 0x2b0   :  { %1968 = vmatprep.mubr.f32.mxu0 %v10448_v57  ;;  %v10812_v57 = vld [vmem:[#allocation2 + $0x188] sm:$0xff] }
 0x2b3   :  { %1969 = vmatmul.mubr.f32.gmra.mrb[40].mxu0 %v10797_v47 }
 0x2b4   :  { %1973 = vmatprep.mubr.f32.mxu0 %v10452_v29  ;;  %v1018_v29 = vld [vmem:[%s14518_s1 + $0x400] sm:$0xff] }
 0x2b5   :  { %v7891_v11 = vpack.c.bf16 %v1019_v51, %v1018_v29  ;;  %v1022_v29 = vld [vmem:[%s14518_s1 + $0x420] sm:$0xff]  ;;  %v10852_v51 = vld [vmem:[#allocation2 + $0x1c8] sm:$0xff] }
 0x2b7   :  { %1974 = vmatmul.mubr.f32.gmra.mrb[42].mxu0 %v10807_v41  ;;  %7892 = vmatprep.subr.bf16.mxu1 %v7891_v11 }
 0x2b8   :  { %1978 = vmatprep.mubr.f32.mxu0 %v10456_v3  ;;  %v10826_v3 = vld [vmem:[#allocation2 + $0x1a8] sm:$0xff]  ;;  %7894 = vmatpush3.bf16.msra.mxu1 %v7891_v11 }
 0x2b9   :  { %7896 = vmatprep.subr.bf16.mxu1 %v7895_v45 }
 0x2bb   :  { %1979 = vmatmul.mubr.f32.gmra.mrb[44].mxu0 %v10812_v57 }
 0x2bc   :  { %1983 = vmatprep.mubr.f32.mxu0 %v10466_v50  ;;  %v1014_v50 = vld [vmem:[%s14518_s1 + $0x3e0] sm:$0xff]  ;;  %7898 = vmatpush3.bf16.msra.mxu1 %v7895_v45  ;;  %v10873_v45 = vld [vmem:[#allocation2 + $0x1e8] sm:$0xff] }
 0x2bd   :  { %v7886_v40 = vpack.c.bf16 %v1015_v21, %v1014_v50  ;;  %v1024_v50 = vld [vmem:[%s14518_s1 + $0x430] sm:$0xff]  ;;  %v1025_v21 = vld [vmem:[%s14518_s1 + $0x438] sm:$0xff] }
 0x2be   :  { %v7903_v35 = vpack.c.bf16 %v1025_v21, %v1024_v50  ;;  %v1029_v21 = vld [vmem:[%s14518_s1 + $0x458] sm:$0xff] }
 0x2bf   :  { %1984 = vmatmul.mubr.f32.gmra.mrb[46].mxu0 %v10816_v22 }
 0x2c0   :  { %1988 = vmatprep.mubr.f32.mxu0 %v10471_v6  ;;  %v10839_v6 = vld [vmem:[#allocation2 + $0x1b0] sm:$0xff]  ;;  %7887 = vmatpush1.bf16.msra.mxu0 %v7886_v40  ;;  %v1026_v40 = vld [vmem:[%s14518_s1 + $0x440] sm:$0xff] }
 0x2c1   :  { %7888 = vmatprep.subr.bf16.mxu0 %v14700_v55  ;;  %v602_v55 = vld [vmem:[#allocation2 + $0x270] sm:$0xff] }
 0x2c3   :  { %1989 = vmatmul.mubr.f32.gmra.mrb[48].mxu0 %v10826_v3 }
 0x2c4   :  { %1993 = vmatprep.mubr.f32.mxu0 %v10475_v38  ;;  %v1023_v38 = vld [vmem:[%s14518_s1 + $0x428] sm:$0xff] }
 0x2c5   :  { %v7899_v11 = vpack.c.bf16 %v1023_v38, %v1022_v29  ;;  %v1016_v29 = vld [vmem:[%s14518_s1 + $0x3f0] sm:$0xff]  ;;  %v1017_v38 = vld [vmem:[%s14518_s1 + $0x3f8] sm:$0xff] }
 0x2c6   :  { %v7889_v50 = vpack.c.bf16 %v1017_v38, %v1016_v29  ;;  %v10901_v29 = vld [vmem:[#allocation2 + $0x211] sm:$0xff] }
 0x2c7   :  { %1994 = vmatmul.mubr.f32.gmra.mrb[50].mxu0 %v10839_v6  ;;  %7900 = vmatprep.subr.bf16.mxu1 %v7899_v11  ;;  %v14719_v38 = vld [vmem:[#allocation10_spill] sm:$0xff] }
 0x2c8   :  { %1998 = vmatprep.mubr.f32.mxu0 %v10479_v61  ;;  %v10863_v61 = vld [vmem:[#allocation2 + $0x1d0] sm:$0xff]  ;;  %7902 = vmatpush3.bf16.msra.mxu1 %v7899_v11 }
 0x2c9   :  { %7904 = vmatprep.subr.bf16.mxu1 %v7903_v35  ;;  %v1028_v11 = vld [vmem:[%s14518_s1 + $0x450] sm:$0xff]  ;;  %7890 = vmatpush1.bf16.msra.mxu0 %v7889_v50  ;;  %v1033_v50 = vld [vmem:[%s14518_s1 + $0x478] sm:$0xff] }
 0x2cb   :  { %1999 = vmatmul.mubr.f32.gmra.mrb[52].mxu0 %v10852_v51 }
 0x2cc   :  { %2003 = vmatprep.mubr.f32.mxu0 %v10495_v16  ;;  %7906 = vmatpush3.bf16.msra.mxu1 %v7903_v35  ;;  %v7907_v16 = vpack.c.bf16 %v1027_v1, %v1026_v40  ;;  %v10891_v35 = vld [vmem:[#allocation2 + $0x209] sm:$0xff]  ;;  %v7911_v40 = vpack.c.bf16 %v1029_v21, %v1028_v11  ;;  %v1030_v1 = vld [vmem:[%s14518_s1 + $0x460] sm:$0xff] }
 0x2cd   :  { %v1032_v11 = vld [vmem:[%s14518_s1 + $0x470] sm:$0xff] }
 0x2ce   :  { %7908 = vmatprep.subr.bf16.mxu1 %v7907_v16  ;;  %v7919_v21 = vpack.c.bf16 %v1033_v50, %v1032_v11  ;;  %v829_v11 = vld [vmem:[#allocation2 + $0x71] sm:$0xff]  ;;  %v830_v50 = vld [vmem:[#allocation2 + $0x89] sm:$0xff] }
 0x2cf   :  { %2004 = vmatmul.mubr.f32.gmra.mrb[54].mxu0 %v10863_v61 }
 0x2d0   :  { %2008 = vmatprep.mubr.f32.mxu0 %v10505_v32  ;;  %v10886_v32 = vld [vmem:[#allocation2 + $0x1f0] sm:$0xff]  ;;  %7910 = vmatpush3.bf16.msra.mxu1 %v7907_v16 }
 0x2d1   :  { %14718 = vst [vmem:[#allocation16_spill] sm:$0xff] %v10886_v32  ;;  %7912 = vmatprep.subr.bf16.mxu1 %v7911_v40 }
 0x2d3   :  { %2009 = vmatmul.mubr.f32.gmra.mrb[56].mxu0 %v10873_v45 }
 0x2d4   :  { %2013 = vmatprep.mubr.f32.mxu0 %v10508_v63  ;;  %v1031_v63 = vld [vmem:[%s14518_s1 + $0x468] sm:$0xff]  ;;  %7914 = vmatpush3.bf16.msra.mxu1 %v7911_v40 }
 0x2d5   :  { %v7915_v16 = vpack.c.bf16 %v1031_v63, %v1030_v1  ;;  %v14720_v40 = vld [vmem:[#allocation12_spill] sm:$0xff] }
 0x2d6   :  { %v826_v1 = vld [vmem:[#allocation2 + $0x49] sm:$0xff] }
 0x2d7   :  { %2014 = vmatmul.mubr.f32.gmra.mrb[58].mxu0 %v10886_v32  ;;  %7916 = vmatprep.subr.bf16.mxu1 %v7915_v16  ;;  %v601_v63 = vld [vmem:[#allocation2 + $0x268] sm:$0xff] }
 0x2d8   :  { %2018 = vmatprep.mubr.f32.mxu0 %v10891_v35  ;;  %7918 = vmatpush3.bf16.msra.mxu1 %v7915_v16  ;;  %v828_v32 = vld [vmem:[#allocation2 + $0x69] sm:$0xff] }
 0x2d9   :  { %7920 = vmatprep.subr.bf16.mxu1 %v7919_v21  ;;  %7475 = vmatprep.mubr.f32.mxu1 %v826_v1  ;;  %v10915_v16 = vld [vmem:[#allocation2 + $0x288] sm:$0xff]  ;;  %v10943_v1 = vld [vmem:[#allocation2 + $0x2f0] sm:$0xff] }
 0x2db   :  { %2019 = vmatmul.mubr.f32.gmra.mrb[60].mxu0 %v14719_v38  ;;  %v827_v38 = vld [vmem:[#allocation2 + $0x51] sm:$0xff] }
 0x2dc   :  { %2023 = vmatprep.mubr.f32.mxu0 %v10901_v29  ;;  %7922 = vmatpush3.bf16.msra.mxu1 %v7919_v21  ;;  %v10935_v21 = vld [vmem:[#allocation2 + $0x2d0] sm:$0xff] }
 0x2df   :  { %2024 = vmatmul.mubr.f32.gmra.mrb[62].mxu0 %v14720_v40  ;;  %7476 = vmatmul.mubr.f32.vlgmr.msra.gmra.mrb[0].mxu1 %v827_v38  ;;  %v10939_v40 = vld [vmem:[#allocation2 + $0x2e8] sm:$0xff]  ;;  %v10951_v38 = vld [vmem:[#allocation2 + $0x310] sm:$0xff] }
 0x2e0   :  { %2028 = vmatprep.mubr.f32.mxu0 %v10514_v26  ;;  %7478 = vmatprep.mubr.f32.mxu1 %v828_v32  ;;  %v10919_v26 = vld [vmem:[#allocation2 + $0x290] sm:$0xff]  ;;  %v10931_v32 = vld [vmem:[#allocation2 + $0x2c8] sm:$0xff] }
 0x2e3   :  { %2029 = vmatmul.mubr.f32.gmra.mrb[64].mxu0 %v601_v63  ;;  %7479 = vmatmul.mubr.f32.gmra.mrb[2].mxu1 %v829_v11  ;;  %v10947_v63 = vld [vmem:[#allocation2 + $0x308] sm:$0xff] }
 0x2e4   :  { %2033 = vmatprep.mubr.f32.mxu0 %v10518_v49  ;;  %7481 = vmatprep.mubr.f32.mxu1 %v830_v50  ;;  %v831_v49 = vld [vmem:[#allocation2 + $0x91] sm:$0xff]  ;;  %v10955_v11 = vld [vmem:[#allocation2 + $0x328] sm:$0xff] }
 0x2e5   :  { %v10959_v50 = vld [vmem:[#allocation2 + $0x330] sm:$0xff] }
 0x2e7   :  { %2034 = vmatmul.mubr.f32.gmra.mrb[66].mxu0 %v602_v55  ;;  %v10923_v55 = vld [vmem:[#allocation2 + $0x2a8] sm:$0xff]  ;;  %7482 = vmatmul.mubr.f32.gmra.mrb[4].mxu1 %v831_v49 }
 0x2e8   :  { %2038 = vmatprep.mubr.f32.mxu0 %v10522_v9  ;;  %v10927_v9 = vld [vmem:[#allocation2 + $0x2b0] sm:$0xff]  ;;  %v10963_v49 = vld [vmem:[#allocation2 + $0x348] sm:$0xff] }
 0x2eb   :  { %2039 = vmatmul.mubr.f32.gmra.mrb[68].mxu0 %v10915_v16 }
 0x2ec   :  { %2043 = vmatprep.mubr.f32.mxu0 %v10526_v13  ;;  %v832_v13 = vld [vmem:[#allocation2 + $0xa9] sm:$0xff] }
 0x2ed   :  { %7484 = vmatprep.mubr.f32.mxu1 %v832_v13  ;;  %v10967_v13 = vld [vmem:[#allocation2 + $0x350] sm:$0xff] }
 0x2ef   :  { %2044 = vmatmul.mubr.f32.gmra.mrb[70].mxu0 %v10919_v26 }
 0x2f0   :  { %2048 = vmatprep.mubr.f32.mxu0 %v10530_v5  ;;  %v833_v5 = vld [vmem:[#allocation2 + $0xb1] sm:$0xff] }
 0x2f1   :  { %7485 = vmatmul.mubr.f32.gmra.mrb[6].mxu1 %v833_v5  ;;  %v10971_v5 = vld [vmem:[#allocation2 + $0x368] sm:$0xff] }
 0x2f3   :  { %2049 = vmatmul.mubr.f32.gmra.mrb[72].mxu0 %v10923_v55 }
 0x2f4   :  { %2053 = vmatprep.mubr.f32.mxu0 %v10534_v59  ;;  %v834_v59 = vld [vmem:[#allocation2 + $0xc9] sm:$0xff] }
 0x2f5   :  { %7487 = vmatprep.mubr.f32.mxu1 %v834_v59  ;;  %v10975_v59 = vld [vmem:[#allocation2 + $0x370] sm:$0xff] }
 0x2f7   :  { %2054 = vmatmul.mubr.f32.gmra.mrb[74].mxu0 %v10927_v9 }
 0x2f8   :  { %2058 = vmatprep.mubr.f32.mxu0 %v10538_v43  ;;  %v835_v43 = vld [vmem:[#allocation2 + $0xd1] sm:$0xff] }
 0x2f9   :  { %7488 = vmatmul.mubr.f32.gmra.mrb[8].mxu1 %v835_v43  ;;  %v10979_v43 = vld [vmem:[#allocation2 + $0x388] sm:$0xff] }
 0x2fb   :  { %2059 = vmatmul.mubr.f32.gmra.mrb[76].mxu0 %v10931_v32 }
 0x2fc   :  { %2063 = vmatprep.mubr.f32.mxu0 %v10542_v53  ;;  %v836_v53 = vld [vmem:[#allocation2 + $0xe9] sm:$0xff] }
 0x2fd   :  { %7490 = vmatprep.mubr.f32.mxu1 %v836_v53  ;;  %v10983_v53 = vld [vmem:[#allocation2 + $0x390] sm:$0xff] }
 0x2ff   :  { %2064 = vmatmul.mubr.f32.gmra.mrb[78].mxu0 %v10935_v21 }
 0x300   :  { %2068 = vmatprep.mubr.f32.mxu0 %v10546_v58  ;;  %v837_v58 = vld [vmem:[#allocation2 + $0xf1] sm:$0xff] }
 0x301   :  { %7491 = vmatmul.mubr.f32.gmra.mrb[10].mxu1 %v837_v58  ;;  %v10987_v58 = vld [vmem:[#allocation2 + $0x3a8] sm:$0xff] }
 0x303   :  { %2069 = vmatmul.mubr.f32.gmra.mrb[80].mxu0 %v10939_v40 }
 0x304   :  { %2073 = vmatprep.mubr.f32.mxu0 %v10550_v2  ;;  %v838_v2 = vld [vmem:[#allocation2 + $0x109] sm:$0xff] }
 0x305   :  { %7493 = vmatprep.mubr.f32.mxu1 %v838_v2  ;;  %v10991_v2 = vld [vmem:[#allocation2 + $0x3b0] sm:$0xff] }
 0x307   :  { %2074 = vmatmul.mubr.f32.gmra.mrb[82].mxu0 %v10943_v1 }
 0x308   :  { %2078 = vmatprep.mubr.f32.mxu0 %v10554_v7  ;;  %v839_v7 = vld [vmem:[#allocation2 + $0x111] sm:$0xff] }
 0x309   :  { %7494 = vmatmul.mubr.f32.gmra.mrb[12].mxu1 %v839_v7  ;;  %v10995_v7 = vld [vmem:[#allocation2 + $0x3c8] sm:$0xff] }
 0x30b   :  { %2079 = vmatmul.mubr.f32.gmra.mrb[84].mxu0 %v10947_v63 }
 0x30c   :  { %2083 = vmatprep.mubr.f32.mxu0 %v10558_v12  ;;  %v840_v12 = vld [vmem:[#allocation2 + $0x129] sm:$0xff] }
 0x30d   :  { %7496 = vmatprep.mubr.f32.mxu1 %v840_v12  ;;  %v10999_v12 = vld [vmem:[#allocation2 + $0x3d0] sm:$0xff] }
 0x30f   :  { %2084 = vmatmul.mubr.f32.gmra.mrb[86].mxu0 %v10951_v38 }
 0x310   :  { %2088 = vmatprep.mubr.f32.mxu0 %v10562_v24  ;;  %v841_v24 = vld [vmem:[#allocation2 + $0x131] sm:$0xff] }
 0x311   :  { %7497 = vmatmul.mubr.f32.gmra.mrb[14].mxu1 %v841_v24  ;;  %v14721_v24 = vld [vmem:[#allocation9_spill] sm:$0xff] }
 0x313   :  { %2089 = vmatmul.mubr.f32.gmra.mrb[88].mxu0 %v10955_v11 }
 0x314   :  { %2093 = vmatprep.mubr.f32.mxu0 %v10566_v37  ;;  %v842_v37 = vld [vmem:[#allocation2 + $0x149] sm:$0xff] }
 0x315   :  { %7499 = vmatprep.mubr.f32.mxu1 %v842_v37  ;;  %v11003_v37 = vld [vmem:[#allocation2 + $0x3e8] sm:$0xff] }
 0x317   :  { %2094 = vmatmul.mubr.f32.gmra.mrb[90].mxu0 %v10959_v50 }
 0x318   :  { %2098 = vmatprep.mubr.f32.mxu0 %v10570_v48  ;;  %v843_v48 = vld [vmem:[#allocation2 + $0x151] sm:$0xff] }
 0x319   :  { %7500 = vmatmul.mubr.f32.gmra.mrb[16].mxu1 %v843_v48  ;;  %v14722_v48 = vld [vmem:[#allocation11_spill] sm:$0xff] }
 0x31b   :  { %2099 = vmatmul.mubr.f32.gmra.mrb[92].mxu0 %v10963_v49 }
 0x31c   :  { %2103 = vmatprep.mubr.f32.mxu0 %v10574_v56  ;;  %v844_v56 = vld [vmem:[#allocation2 + $0x169] sm:$0xff] }
 0x31d   :  { %7502 = vmatprep.mubr.f32.mxu1 %v844_v56  ;;  %v11007_v56 = vld [vmem:[#allocation2 + $0x3f0] sm:$0xff] }
 0x31f   :  { %2104 = vmatmul.mubr.f32.gmra.mrb[94].mxu0 %v10967_v13 }
 0x320   :  { %2108 = vmatprep.mubr.f32.mxu0 %v10578_v60  ;;  %v845_v60 = vld [vmem:[#allocation2 + $0x171] sm:$0xff] }
 0x321   :  { %7503 = vmatmul.mubr.f32.gmra.mrb[18].mxu1 %v845_v60  ;;  %v14723_v60 = vld [vmem:[#allocation13_spill] sm:$0xff] }
 0x323   :  { %2109 = vmatmul.mubr.f32.gmra.mrb[96].mxu0 %v10971_v5 }
 0x324   :  { %2113 = vmatprep.mubr.f32.mxu0 %v10582_v27  ;;  %v846_v27 = vld [vmem:[#allocation2 + $0x189] sm:$0xff] }
 0x325   :  { %7505 = vmatprep.mubr.f32.mxu1 %v846_v27  ;;  %v11011_v27 = vld [vmem:[#allocation2 + $0x408] sm:$0xff] }
 0x327   :  { %2114 = vmatmul.mubr.f32.gmra.mrb[98].mxu0 %v10975_v59 }
 0x328   :  { %2118 = vmatprep.mubr.f32.mxu0 %v10586_v28  ;;  %v847_v28 = vld [vmem:[#allocation2 + $0x191] sm:$0xff] }
 0x329   :  { %7506 = vmatmul.mubr.f32.gmra.mrb[20].mxu1 %v847_v28  ;;  %v853_v28 = vld [vmem:[#allocation2 + $0x1f1] sm:$0xff] }
 0x32b   :  { %2119 = vmatmul.mubr.f32.gmra.mrb[100].mxu0 %v10979_v43 }
 0x32c   :  { %2123 = vmatprep.mubr.f32.mxu0 %v10590_v8  ;;  %v848_v8 = vld [vmem:[#allocation2 + $0x1a9] sm:$0xff] }
 0x32d   :  { %7508 = vmatprep.mubr.f32.mxu1 %v848_v8  ;;  %v14724_v8 = vld [vmem:[#allocation14_spill] sm:$0xff] }
 0x32f   :  { %2124 = vmatmul.mubr.f32.gmra.mrb[102].mxu0 %v10983_v53 }
 0x330   :  { %2128 = vmatprep.mubr.f32.mxu0 %v10594_v30  ;;  %v849_v30 = vld [vmem:[#allocation2 + $0x1b1] sm:$0xff] }
 0x331   :  { %7509 = vmatmul.mubr.f32.gmra.mrb[22].mxu1 %v849_v30  ;;  %v11016_v30 = vld [vmem:[#allocation2 + $0x410] sm:$0xff] }
 0x333   :  { %2129 = vmatmul.mubr.f32.gmra.mrb[104].mxu0 %v10987_v58 }
 0x334   :  { %2133 = vmatprep.mubr.f32.mxu0 %v10598_v14  ;;  %v850_v14 = vld [vmem:[#allocation2 + $0x1c9] sm:$0xff] }
 0x335   :  { %7511 = vmatprep.mubr.f32.mxu1 %v850_v14  ;;  %v14725_v14 = vld [vmem:[#allocation15_spill] sm:$0xff] }
 0x337   :  { %2134 = vmatmul.mubr.f32.gmra.mrb[106].mxu0 %v10991_v2 }
 0x338   :  { %2138 = vmatprep.mubr.f32.mxu0 %v10602_v15  ;;  %v851_v15 = vld [vmem:[#allocation2 + $0x1d1] sm:$0xff] }
 0x339   :  { %7512 = vmatmul.mubr.f32.gmra.mrb[24].mxu1 %v851_v15  ;;  %v11025_v15 = vld [vmem:[#allocation2 + $0x430] sm:$0xff] }
 0x33a   :  { %14726 = vst [vmem:[#allocation10_spill] sm:$0xff] %v11025_v15 }
 0x33b   :  { %2139 = vmatmul.mubr.f32.gmra.mrb[108].mxu0 %v10995_v7 }
 0x33c   :  { %2143 = vmatprep.mubr.f32.mxu0 %v10606_v34  ;;  %v852_v34 = vld [vmem:[#allocation2 + $0x1e9] sm:$0xff] }
 0x33d   :  { %7514 = vmatprep.mubr.f32.mxu1 %v852_v34  ;;  %v11031_v34 = vld [vmem:[#allocation2 + $0x451] sm:$0xff] }
 0x33e   :  { %7515 = vmatmul.mubr.f32.gmra.mrb[26].mxu1 %v853_v28  ;;  %v14728_v28 = vld [vmem:[#allocation8_spill] sm:$0xff] }
 0x33f   :  { %2144 = vmatmul.mubr.f32.gmra.mrb[110].mxu0 %v10999_v12  ;;  %7517 = vmatprep.mubr.f32.mxu1 %v10891_v35  ;;  %v11027_v35 = vld [vmem:[#allocation2 + $0x449] sm:$0xff] }
 0x340   :  { %2148 = vmatprep.mubr.f32.mxu0 %v14721_v24  ;;  %v11021_v24 = vld [vmem:[#allocation2 + $0x428] sm:$0xff] }
 0x342   :  { %7518 = vmatmul.mubr.f32.gmra.mrb[28].mxu1 %v10901_v29  ;;  %v857_v29 = vld [vmem:[#allocation2 + $0x231] sm:$0xff] }
 0x343   :  { %2149 = vmatmul.mubr.f32.gmra.mrb[112].mxu0 %v11003_v37 }
 0x344   :  { %2153 = vmatprep.mubr.f32.mxu0 %v14722_v48  ;;  %v856_v48 = vld [vmem:[#allocation2 + $0x229] sm:$0xff] }
 0x345   :  { %7520 = vmatprep.mubr.f32.mxu1 %v856_v48  ;;  %v699_v48 = vld [vmem:[#allocation2 + $0x4f] sm:$0xff] }
 0x346   :  { %7521 = vmatmul.mubr.f32.gmra.mrb[30].mxu1 %v857_v29  ;;  %v700_v29 = vld [vmem:[#allocation2 + $0x67] sm:$0xff] }
 0x347   :  { %2154 = vmatmul.mubr.f32.gmra.mrb[114].mxu0 %v11007_v56 }
 0x348   :  { %2158 = vmatprep.mubr.f32.mxu0 %v14723_v60  ;;  %v14727_v60 = vld [vmem:[#allocation7_spill] sm:$0xff] }
 0x34b   :  { %2159 = vmatmul.mubr.f32.gmra.mrb[116].mxu0 %v11011_v27 }
 0x34c   :  { %2163 = vmatprep.mubr.f32.mxu0 %v14724_v8  ;;  %v698_v8 = vld [vmem:[#allocation2 + $0x47] sm:$0xff] }
 0x34f   :  { %2164 = vmatmul.mubr.f32.gmra.mrb[118].mxu0 %v11016_v30 }
 0x350   :  { %2168 = vmatprep.mubr.f32.mxu0 %v14725_v14  ;;  %v859_v14 = vld [vmem:[#allocation2 + $0x291] sm:$0xff] }
 0x353   :  { %2169 = vmatmul.mubr.f32.gmra.mrb[120].mxu0 %v11021_v24 }
 0x354   :  { %2173 = vmatprep.mubr.f32.mxu0 %v10628_v46  ;;  %v858_v46 = vld [vmem:[#allocation2 + $0x289] sm:$0xff] }
 0x355   :  { %7523 = vmatprep.mubr.f32.mxu1 %v858_v46  ;;  %v702_v46 = vld [vmem:[#allocation2 + $0x87] sm:$0xff] }
 0x356   :  { %7524 = vmatmul.mubr.f32.gmra.mrb[32].mxu1 %v859_v14  ;;  %v866_v14 = vld [vmem:[#allocation2 + $0x309] sm:$0xff] }
 0x357   :  { %2174 = vmatmul.mubr.f32.gmra.mrb[122].mxu0 %v11025_v15  ;;  %v860_v15 = vld [vmem:[#allocation2 + $0x2a9] sm:$0xff] }
 0x358   :  { %2178 = vmatprep.mubr.f32.mxu0 %v11027_v35  ;;  %7526 = vmatprep.mubr.f32.mxu1 %v860_v15  ;;  %v864_v15 = vld [vmem:[#allocation2 + $0x2e9] sm:$0xff] }
 0x35b   :  { %2179 = vmatmul.mubr.f32.gmra.mrb[124].mxu0 %v14727_v60  ;;  %v861_v60 = vld [vmem:[#allocation2 + $0x2b1] sm:$0xff] }
 0x35c   :  { %2183 = vmatprep.mubr.f32.mxu0 %v11031_v34  ;;  %7527 = vmatmul.mubr.f32.gmra.mrb[34].mxu1 %v861_v60  ;;  %v708_v60 = vld [vmem:[#allocation2 + $0xe7] sm:$0xff] }
 0x35f   :  { %2184 = vmatmul.mubr.f32.gmra.mrb[126].mxu0 %v14728_v28  ;;  %v862_v28 = vld [vmem:[#allocation2 + $0x2c9] sm:$0xff] }
 0x360   :  { %2253 = vmatprep.mubr.f32.mxu0 %v10653_v52  ;;  %v701_v52 = vld [vmem:[#allocation2 + $0x6f] sm:$0xff]  ;;  %7529 = vmatprep.mubr.f32.mxu1 %v862_v28  ;;  %v710_v28 = vld [vmem:[#allocation2 + $0x107] sm:$0xff] }
 0x363   :  { %2254 = vmatmul.mubr.f32.vlgmr.msra.gmra.mrb[0].mxu0 %v698_v8  ;;  %v704_v8 = vld [vmem:[#allocation2 + $0xa7] sm:$0xff] }
 0x364   :  { %2258 = vmatprep.mubr.f32.mxu0 %v10664_v31  ;;  %v863_v31 = vld [vmem:[#allocation2 + $0x2d1] sm:$0xff] }
 0x365   :  { %7530 = vmatmul.mubr.f32.gmra.mrb[36].mxu1 %v863_v31  ;;  %v712_v31 = vld [vmem:[#allocation2 + $0x127] sm:$0xff] }
 0x366   :  { %7532 = vmatprep.mubr.f32.mxu1 %v864_v15  ;;  %v714_v15 = vld [vmem:[#allocation2 + $0x147] sm:$0xff] }
 0x367   :  { %2259 = vmatmul.mubr.f32.gmra.mrb[2].mxu0 %v699_v48  ;;  %v706_v48 = vld [vmem:[#allocation2 + $0xc7] sm:$0xff] }
 0x368   :  { %2263 = vmatprep.mubr.f32.mxu0 %v10675_v42  ;;  %v703_v42 = vld [vmem:[#allocation2 + $0x8f] sm:$0xff] }
 0x36b   :  { %2264 = vmatmul.mubr.f32.gmra.mrb[4].mxu0 %v700_v29  ;;  %v868_v29 = vld [vmem:[#allocation2 + $0x329] sm:$0xff] }
 0x36c   :  { %2268 = vmatprep.mubr.f32.mxu0 %v10686_v54  ;;  %v865_v54 = vld [vmem:[#allocation2 + $0x2f1] sm:$0xff] }
 0x36d   :  { %7533 = vmatmul.mubr.f32.gmra.mrb[38].mxu1 %v865_v54  ;;  %v716_v54 = vld [vmem:[#allocation2 + $0x167] sm:$0xff] }
 0x36e   :  { %7535 = vmatprep.mubr.f32.mxu1 %v866_v14  ;;  %v718_v14 = vld [vmem:[#allocation2 + $0x187] sm:$0xff] }
 0x36f   :  { %2269 = vmatmul.mubr.f32.gmra.mrb[6].mxu0 %v701_v52  ;;  %v870_v52 = vld [vmem:[#allocation2 + $0x349] sm:$0xff] }
 0x370   :  { %2273 = vmatprep.mubr.f32.mxu0 %v10697_v0  ;;  %v705_v0 = vld [vmem:[#allocation2 + $0xaf] sm:$0xff] }
 0x373   :  { %2274 = vmatmul.mubr.f32.gmra.mrb[8].mxu0 %v702_v46  ;;  %v872_v46 = vld [vmem:[#allocation2 + $0x369] sm:$0xff] }
 0x374   :  { %2278 = vmatprep.mubr.f32.mxu0 %v10708_v25  ;;  %v867_v25 = vld [vmem:[#allocation2 + $0x311] sm:$0xff] }
 0x375   :  { %7536 = vmatmul.mubr.f32.gmra.mrb[40].mxu1 %v867_v25 }
 0x376   :  { %7538 = vmatprep.mubr.f32.mxu1 %v868_v29  ;;  %v881_v29 = vld [vmem:[#allocation2 + $0x3f1] sm:$0xff] }
 0x377   :  { %2279 = vmatmul.mubr.f32.gmra.mrb[10].mxu0 %v703_v42  ;;  %v874_v42 = vld [vmem:[#allocation2 + $0x389] sm:$0xff] }
 0x378   :  { %2283 = vmatprep.mubr.f32.mxu0 %v10719_v17  ;;  %v707_v17 = vld [vmem:[#allocation2 + $0xcf] sm:$0xff] }
 0x37b   :  { %2284 = vmatmul.mubr.f32.gmra.mrb[12].mxu0 %v704_v8  ;;  %v876_v8 = vld [vmem:[#allocation2 + $0x3a9] sm:$0xff] }
 0x37c   :  { %2288 = vmatprep.mubr.f32.mxu0 %v10730_v18  ;;  %v869_v18 = vld [vmem:[#allocation2 + $0x331] sm:$0xff] }
 0x37d   :  { %7539 = vmatmul.mubr.f32.gmra.mrb[42].mxu1 %v869_v18  ;;  %v722_v18 = vld [vmem:[#allocation2 + $0x1c7] sm:$0xff] }
 0x37e   :  { %7541 = vmatprep.mubr.f32.mxu1 %v870_v52  ;;  %v723_v52 = vld [vmem:[#allocation2 + $0x1cf] sm:$0xff] }
 0x37f   :  { %2289 = vmatmul.mubr.f32.gmra.mrb[14].mxu0 %v705_v0  ;;  %v878_v0 = vld [vmem:[#allocation2 + $0x3c9] sm:$0xff] }
 0x380   :  { %2293 = vmatprep.mubr.f32.mxu0 %v10741_v19  ;;  %v709_v19 = vld [vmem:[#allocation2 + $0xef] sm:$0xff] }
 0x383   :  { %2294 = vmatmul.mubr.f32.gmra.mrb[16].mxu0 %v706_v48 }
 0x384   :  { %2298 = vmatprep.mubr.f32.mxu0 %v10746_v23  ;;  %v871_v23 = vld [vmem:[#allocation2 + $0x351] sm:$0xff] }
 0x385   :  { %7542 = vmatmul.mubr.f32.gmra.mrb[44].mxu1 %v871_v23  ;;  %v724_v23 = vld [vmem:[#allocation2 + $0x1e7] sm:$0xff] }
 0x386   :  { %7544 = vmatprep.mubr.f32.mxu1 %v872_v46  ;;  %v14729_v46 = vld [vmem:[#allocation16_spill] sm:$0xff] }
 0x387   :  { %2299 = vmatmul.mubr.f32.gmra.mrb[18].mxu0 %v707_v17  ;;  %v880_v17 = vld [vmem:[#allocation2 + $0x3e9] sm:$0xff] }
 0x388   :  { %2303 = vmatprep.mubr.f32.mxu0 %v10751_v62  ;;  %v711_v62 = vld [vmem:[#allocation2 + $0x10f] sm:$0xff] }
 0x38b   :  { %2304 = vmatmul.mubr.f32.gmra.mrb[20].mxu0 %v708_v60 }
 0x38c   :  { %2308 = vmatprep.mubr.f32.mxu0 %v10761_v20  ;;  %v873_v20 = vld [vmem:[#allocation2 + $0x371] sm:$0xff] }
 0x38d   :  { %7545 = vmatmul.mubr.f32.gmra.mrb[46].mxu1 %v873_v20 }
 0x38e   :  { %7547 = vmatprep.mubr.f32.mxu1 %v874_v42  ;;  %v791_v42 = vld [vmem:[#allocation2 + $0x210] sm:$0xff] }
 0x38f   :  { %2309 = vmatmul.mubr.f32.gmra.mrb[22].mxu0 %v709_v19  ;;  %v882_v19 = vld [vmem:[#allocation2 + $0x409] sm:$0xff] }
 0x390   :  { %2313 = vmatprep.mubr.f32.mxu0 %v10766_v10  ;;  %v713_v10 = vld [vmem:[#allocation2 + $0x12f] sm:$0xff] }
 0x393   :  { %2314 = vmatmul.mubr.f32.gmra.mrb[24].mxu0 %v710_v28 }
 0x394   :  { %2318 = vmatprep.mubr.f32.mxu0 %v10770_v39  ;;  %v875_v39 = vld [vmem:[#allocation2 + $0x391] sm:$0xff] }
 0x395   :  { %7548 = vmatmul.mubr.f32.gmra.mrb[48].mxu1 %v875_v39 }
 0x396   :  { %7550 = vmatprep.mubr.f32.mxu1 %v876_v8  ;;  %v728_v8 = vld [vmem:[#allocation2 + $0x227] sm:$0xff] }
 0x397   :  { %2319 = vmatmul.mubr.f32.gmra.mrb[26].mxu0 %v711_v62  ;;  %v884_v62 = vld [vmem:[#allocation2 + $0x429] sm:$0xff] }
 0x398   :  { %2323 = vmatprep.mubr.f32.mxu0 %v10774_v4  ;;  %v715_v4 = vld [vmem:[#allocation2 + $0x14f] sm:$0xff] }
 0x39b   :  { %2324 = vmatmul.mubr.f32.gmra.mrb[28].mxu0 %v712_v31  ;;  %v725_v31 = vld [vmem:[#allocation2 + $0x1ef] sm:$0xff] }
 0x39c   :  { %2328 = vmatprep.mubr.f32.mxu0 %v10784_v33  ;;  %v877_v33 = vld [vmem:[#allocation2 + $0x3b1] sm:$0xff] }
 0x39d   :  { %7551 = vmatmul.mubr.f32.gmra.mrb[50].mxu1 %v877_v33  ;;  %v729_v33 = vld [vmem:[#allocation2 + $0x22f] sm:$0xff] }
 0x39e   :  { %7553 = vmatprep.mubr.f32.mxu1 %v878_v0 }
 0x39f   :  { %2329 = vmatmul.mubr.f32.gmra.mrb[30].mxu0 %v713_v10 }
 0x3a0   :  { %2333 = vmatprep.mubr.f32.mxu0 %v10789_v36  ;;  %v717_v36 = vld [vmem:[#allocation2 + $0x16f] sm:$0xff] }
 0x3a3   :  { %2334 = vmatmul.mubr.f32.gmra.mrb[32].mxu0 %v714_v15  ;;  %v727_v15 = vld [vmem:[#allocation2 + $0x20f] sm:$0xff] }
 0x3a4   :  { %2338 = vmatprep.mubr.f32.mxu0 %v10793_v44  ;;  %v879_v44 = vld [vmem:[#allocation2 + $0x3d1] sm:$0xff] }
 0x3a5   :  { %7554 = vmatmul.mubr.f32.gmra.mrb[52].mxu1 %v879_v44  ;;  %v731_v44 = vld [vmem:[#allocation2 + $0x28f] sm:$0xff] }
 0x3a6   :  { %7556 = vmatprep.mubr.f32.mxu1 %v880_v17  ;;  %v732_v17 = vld [vmem:[#allocation2 + $0x2a7] sm:$0xff] }
 0x3a7   :  { %2339 = vmatmul.mubr.f32.gmra.mrb[34].mxu0 %v715_v4  ;;  %v11086_v4 = vld [vmem:[#allocation2 + $0x8] sm:$0xff] }
 0x3a8   :  { %2343 = vmatprep.mubr.f32.mxu0 %v10797_v47  ;;  %v719_v47 = vld [vmem:[#allocation2 + $0x18f] sm:$0xff] }
 0x3a9   :  { %7557 = vmatmul.mubr.f32.gmra.mrb[54].mxu1 %v881_v29  ;;  %v733_v29 = vld [vmem:[#allocation2 + $0x2af] sm:$0xff] }
 0x3aa   :  { %7559 = vmatprep.mubr.f32.mxu1 %v882_v19 }
 0x3ab   :  { %2344 = vmatmul.mubr.f32.gmra.mrb[36].mxu0 %v716_v54  ;;  %v888_v54 = vld [vmem:[#allocation2 + $0x469] sm:$0xff] }
 0x3ac   :  { %2348 = vmatprep.mubr.f32.mxu0 %v10807_v41  ;;  %v720_v41 = vld [vmem:[#allocation2 + $0x1a7] sm:$0xff] }
 0x3af   :  { %2349 = vmatmul.mubr.f32.gmra.mrb[38].mxu0 %v717_v36 }
 0x3b0   :  { %2353 = vmatprep.mubr.f32.mxu0 %v10812_v57  ;;  %v721_v57 = vld [vmem:[#allocation2 + $0x1af] sm:$0xff] }
 0x3b2   :  { %v11058_v48 = vpop.f32.mrb[0].mxu1 }
 0x3b3   :  { %2354 = vmatmul.mubr.f32.gmra.mrb[40].mxu0 %v718_v14  ;;  %v11060_v25 = vpop.f32.mrb[1].mxu1  ;;  %v730_v14 = vld [vmem:[#allocation2 + $0x287] sm:$0xff] }
 0x3b4   :  { %2358 = vmatprep.mubr.f32.mxu0 %v10816_v22 }
 0x3b6   :  { %v11064_v60 = vpop.f32.mrb[2].mxu1 }
 0x3b7   :  { %2359 = vmatmul.mubr.f32.gmra.mrb[42].mxu0 %v719_v47  ;;  %v11066_v22 = vpop.f32.mrb[3].mxu1 }
 0x3b8   :  { %2363 = vmatprep.mubr.f32.mxu0 %v10826_v3  ;;  %v883_v3 = vld [vmem:[#allocation2 + $0x411] sm:$0xff] }
 0x3b9   :  { %7560 = vmatmul.mubr.f32.gmra.mrb[56].mxu1 %v883_v3  ;;  %v737_v3 = vld [vmem:[#allocation2 + $0x2ef] sm:$0xff] }
 0x3ba   :  { %v11070_v28 = vpop.f32.mrb[4].mxu1  ;;  %7562 = vmatprep.mubr.f32.mxu1 %v884_v62 }
 0x3bb   :  { %2364 = vmatmul.mubr.f32.gmra.mrb[44].mxu0 %v720_v41 }
 0x3bc   :  { %2368 = vmatprep.mubr.f32.mxu0 %v10839_v6  ;;  %v11072_v6 = vpop.f32.mrb[5].mxu1 }
 0x3bf   :  { %2369 = vmatmul.mubr.f32.gmra.mrb[46].mxu0 %v721_v57 }
 0x3c0   :  { %2373 = vmatprep.mubr.f32.mxu0 %v10852_v51  ;;  %v885_v51 = vld [vmem:[#allocation2 + $0x431] sm:$0xff] }
 0x3c1   :  { %7563 = vmatmul.mubr.f32.gmra.mrb[58].mxu1 %v885_v51  ;;  %v741_v51 = vld [vmem:[#allocation2 + $0x32f] sm:$0xff] }
 0x3c2   :  { %7565 = vmatprep.mubr.f32.mxu1 %v11027_v35 }
 0x3c3   :  { %2374 = vmatmul.mubr.f32.gmra.mrb[48].mxu0 %v722_v18  ;;  %v735_v18 = vld [vmem:[#allocation2 + $0x2cf] sm:$0xff] }
 0x3c4   :  { %2378 = vmatprep.mubr.f32.mxu0 %v10863_v61  ;;  %v790_v61 = vld [vmem:[#allocation2 + $0x208] sm:$0xff]  ;;  %v11077_v20 = vpop.f32.mrb[6].mxu1 }
 0x3c5   :  { %v11079_v10 = vpop.f32.mrb[7].mxu1  ;;  %7566 = vmatmul.mubr.f32.gmra.mrb[60].mxu1 %v11031_v34  ;;  %v889_v34 = vld [vmem:[#allocation2 + $0x471] sm:$0xff] }
 0x3c6   :  { %7568 = vmatprep.mubr.f32.mxu1 %v888_v54  ;;  %v749_v54 = vld [vmem:[#allocation2 + $0x3af] sm:$0xff] }
 0x3c7   :  { %2379 = vmatmul.mubr.f32.gmra.mrb[50].mxu0 %v723_v52 }
 0x3c8   :  { %2383 = vmatprep.mubr.f32.mxu0 %v10873_v45  ;;  %v726_v45 = vld [vmem:[#allocation2 + $0x207] sm:$0xff] }
 0x3c9   :  { %7569 = vmatmul.mubr.f32.gmra.mrb[62].mxu1 %v889_v34 }
 0x3cb   :  { %2384 = vmatmul.mubr.f32.gmra.mrb[52].mxu0 %v724_v23  ;;  %v739_v23 = vld [vmem:[#allocation2 + $0x30f] sm:$0xff] }
 0x3cc   :  { %2388 = vmatprep.mubr.f32.mxu0 %v14729_v46  ;;  %v11082_v39 = vpop.f32.mrb[8].mxu1 }
 0x3cd   :  { %v11084_v35 = vpop.f32.mrb[9].mxu1 }
 0x3cf   :  { %2389 = vmatmul.mubr.f32.gmra.mrb[54].mxu0 %v725_v31  ;;  %v743_v31 = vld [vmem:[#allocation2 + $0x34f] sm:$0xff] }
 0x3d0   :  { %2393 = vmatprep.mubr.f32.mxu0 %v790_v61 }
 0x3d3   :  { %2394 = vmatmul.mubr.f32.gmra.mrb[56].mxu0 %v726_v45  ;;  %v745_v45 = vld [vmem:[#allocation2 + $0x36f] sm:$0xff] }
 0x3d4   :  { %2398 = vmatprep.mubr.f32.mxu0 %v791_v42  ;;  %v11090_v36 = vpop.f32.mrb[10].mxu1 }
 0x3d5   :  { %v11092_v0 = vpop.f32.mrb[11].mxu1 }
 0x3d7   :  { %2399 = vmatmul.mubr.f32.gmra.mrb[58].mxu0 %v727_v15  ;;  %v747_v15 = vld [vmem:[#allocation2 + $0x38f] sm:$0xff] }
 0x3d8   :  { %2403 = vmatprep.mubr.f32.mxu0 %v11086_v4 }
 0x3db   :  { %2404 = vmatmul.mubr.f32.gmra.mrb[60].mxu0 %v728_v8 }
 0x3dc   :  { %2408 = vmatprep.mubr.f32.mxu0 %v11086_v4  ;;  %v11096_v47 = vpop.f32.mrb[12].mxu1 }
 0x3dd   :  { %v11098_v41 = vpop.f32.mrb[13].mxu1 }
 0x3df   :  { %2409 = vmatmul.mubr.f32.gmra.mrb[62].mxu0 %v729_v33  ;;  %v751_v33 = vld [vmem:[#allocation2 + $0x3cf] sm:$0xff] }
 0x3e0   :  { %2413 = vmatprep.mubr.f32.mxu0 %v10915_v16 }
 0x3e3   :  { %2414 = vmatmul.mubr.f32.gmra.mrb[64].mxu0 %v730_v14 }
 0x3e4   :  { %2418 = vmatprep.mubr.f32.mxu0 %v10919_v26  ;;  %v11102_v57 = vpop.f32.mrb[14].mxu1  ;;  %v734_v26 = vld [vmem:[#allocation2 + $0x2c7] sm:$0xff] }
 0x3e5   :  { %v11104_v16 = vpop.f32.mrb[15].mxu1 }
 0x3e7   :  { %2419 = vmatmul.mubr.f32.gmra.mrb[66].mxu0 %v731_v44 }
 0x3e8   :  { %2423 = vmatprep.mubr.f32.mxu0 %v10923_v55 }
 0x3eb   :  { %2424 = vmatmul.mubr.f32.gmra.mrb[68].mxu0 %v732_v17 }
 0x3ec   :  { %2428 = vmatprep.mubr.f32.mxu0 %v10927_v9  ;;  %v11108_v19 = vpop.f32.mrb[16].mxu1  ;;  %v736_v9 = vld [vmem:[#allocation2 + $0x2e7] sm:$0xff] }
 0x3ed   :  { %v11110_v55 = vpop.f32.mrb[17].mxu1 }
 0x3ef   :  { %2429 = vmatmul.mubr.f32.gmra.mrb[70].mxu0 %v733_v29  ;;  %v752_v29 = vld [vmem:[#allocation2 + $0x3e7] sm:$0xff] }
 0x3f0   :  { %2433 = vmatprep.mubr.f32.mxu0 %v10931_v32 }
 0x3f3   :  { %2434 = vmatmul.mubr.f32.gmra.mrb[72].mxu0 %v734_v26 }
 0x3f4   :  { %2438 = vmatprep.mubr.f32.mxu0 %v10935_v21  ;;  %v11114_v52 = vpop.f32.mrb[18].mxu1  ;;  %v738_v21 = vld [vmem:[#allocation2 + $0x307] sm:$0xff] }
 0x3f5   :  { %v11116_v32 = vpop.f32.mrb[19].mxu1 }
 0x3f7   :  { %2439 = vmatmul.mubr.f32.gmra.mrb[74].mxu0 %v735_v18 }
 0x3f8   :  { %2443 = vmatprep.mubr.f32.mxu0 %v10939_v40 }
 0x3fb   :  { %2444 = vmatmul.mubr.f32.gmra.mrb[76].mxu0 %v736_v9 }
 0x3fc   :  { %2448 = vmatprep.mubr.f32.mxu0 %v10943_v1  ;;  %v11120_v62 = vpop.f32.mrb[20].mxu1  ;;  %v740_v1 = vld [vmem:[#allocation2 + $0x327] sm:$0xff] }
 0x3fd   :  { %v11122_v40 = vpop.f32.mrb[21].mxu1 }
 0x3ff   :  { %2449 = vmatmul.mubr.f32.gmra.mrb[78].mxu0 %v737_v3 }
 0x400   :  { %2453 = vmatprep.mubr.f32.mxu0 %v10947_v63 }
 0x403   :  { %2454 = vmatmul.mubr.f32.gmra.mrb[80].mxu0 %v738_v21 }
 0x404   :  { %2458 = vmatprep.mubr.f32.mxu0 %v10951_v38  ;;  %v11126_v46 = vpop.f32.mrb[22].mxu1  ;;  %v742_v38 = vld [vmem:[#allocation2 + $0x347] sm:$0xff] }
 0x405   :  { %v11128_v63 = vpop.f32.mrb[23].mxu1 }
 0x407   :  { %2459 = vmatmul.mubr.f32.gmra.mrb[82].mxu0 %v739_v23 }
 0x408   :  { %2463 = vmatprep.mubr.f32.mxu0 %v10955_v11 }
 0x40b   :  { %2464 = vmatmul.mubr.f32.gmra.mrb[84].mxu0 %v740_v1 }
 0x40c   :  { %2468 = vmatprep.mubr.f32.mxu0 %v10959_v50  ;;  %v11132_v61 = vpop.f32.mrb[24].mxu1  ;;  %v744_v50 = vld [vmem:[#allocation2 + $0x367] sm:$0xff] }
 0x40d   :  { %v11134_v11 = vpop.f32.mrb[25].mxu1 }
 0x40f   :  { %2469 = vmatmul.mubr.f32.gmra.mrb[86].mxu0 %v741_v51 }
 0x410   :  { %2473 = vmatprep.mubr.f32.mxu0 %v10963_v49 }
 0x411   :  { %v11138_v42 = vpop.f32.mrb[26].mxu1 }
 0x412   :  { %v11140_v49 = vpop.f32.mrb[27].mxu1 }
 0x413   :  { %2474 = vmatmul.mubr.f32.gmra.mrb[88].mxu0 %v742_v38 }
 0x414   :  { %2478 = vmatprep.mubr.f32.mxu0 %v10967_v13  ;;  %v746_v13 = vld [vmem:[#allocation2 + $0x387] sm:$0xff] }
 0x415   :  { %v11144_v8 = vpop.f32.mrb[28].mxu1 }
 0x417   :  { %2479 = vmatmul.mubr.f32.gmra.mrb[90].mxu0 %v743_v31 }
 0x418   :  { %2483 = vmatprep.mubr.f32.mxu0 %v10971_v5  ;;  %v11146_v5 = vpop.f32.mrb[29].mxu1 }
 0x419   :  { %v11150_v34 = vpop.f32.mrb[30].mxu1 }
 0x41b   :  { %2484 = vmatmul.mubr.f32.gmra.mrb[92].mxu0 %v744_v50 }
 0x41c   :  { %2488 = vmatprep.mubr.f32.mxu0 %v10975_v59  ;;  %v748_v59 = vld [vmem:[#allocation2 + $0x3a7] sm:$0xff] }
 0x41f   :  { %2489 = vmatmul.mubr.f32.gmra.mrb[94].mxu0 %v745_v45 }
 0x420   :  { %2493 = vmatprep.mubr.f32.mxu0 %v10979_v43  ;;  %v11152_v43 = vpop.f32.mrb[31].mxu1 }
 0x423   :  { %2494 = vmatmul.mubr.f32.gmra.mrb[96].mxu0 %v746_v13 }
 0x424   :  { %2498 = vmatprep.mubr.f32.mxu0 %v10983_v53  ;;  %v750_v53 = vld [vmem:[#allocation2 + $0x3c7] sm:$0xff] }
 0x427   :  { %2499 = vmatmul.mubr.f32.gmra.mrb[98].mxu0 %v747_v15 }
 0x428   :  { %2503 = vmatprep.mubr.f32.mxu0 %v10987_v58 }
 0x429   :  { %v11156_v14 = vpop.f32.mrb[32].mxu1 }
 0x42a   :  { %v11158_v44 = vpop.f32.mrb[33].mxu1 }
 0x42b   :  { %2504 = vmatmul.mubr.f32.gmra.mrb[100].mxu0 %v748_v59  ;;  %v757_v59 = vld [vmem:[#allocation2 + $0x42f] sm:$0xff] }
 0x42c   :  { %2508 = vmatprep.mubr.f32.mxu0 %v10991_v2 }
 0x42f   :  { %2509 = vmatmul.mubr.f32.gmra.mrb[102].mxu0 %v749_v54  ;;  %v11168_v9 = vpop.f32.mrb[34].mxu1  ;;  %v822_v54 = vld [vmem:[#allocation2 + $0x448] sm:$0xff] }
 0x430   :  { %2513 = vmatprep.mubr.f32.mxu0 %v10995_v7  ;;  %v11170_v21 = vpop.f32.mrb[35].mxu1 }
 0x433   :  { %2514 = vmatmul.mubr.f32.gmra.mrb[104].mxu0 %v750_v53 }
 0x434   :  { %2518 = vmatprep.mubr.f32.mxu0 %v10999_v12  ;;  %v753_v12 = vld [vmem:[#allocation2 + $0x3ef] sm:$0xff] }
 0x436   :  { %v2255_v58 = vpop.f32.mrb[0].mxu0 }
 0x437   :  { %v11161_v2 = vadd.f32 %v11060_v25, %v2255_v58  ;;  %v2257_v17 = vpop.f32.mrb[1].mxu0  ;;  %2519 = vmatmul.mubr.f32.gmra.mrb[106].mxu0 %v751_v33 }
 0x438   :  { %2523 = vmatprep.mubr.f32.mxu0 %v11003_v37  ;;  %v754_v37 = vld [vmem:[#allocation2 + $0x407] sm:$0xff]  ;;  %v11180_v38 = vpop.f32.mrb[36].mxu1 }
 0x439   :  { %v11182_v50 = vpop.f32.mrb[37].mxu1  ;;  %v758_v17 = vld [vmem:[#allocation2 + $0x447] sm:$0xff] }
 0x43a   :  { %v2260_v26 = vpop.f32.mrb[2].mxu0 }
 0x43b   :  { %v11165_v7 = vadd.f32 %v11058_v48, %v2260_v26  ;;  %v2262_v18 = vpop.f32.mrb[3].mxu0  ;;  %2524 = vmatmul.mubr.f32.gmra.mrb[108].mxu0 %v752_v29 }
 0x43c   :  { %2528 = vmatprep.mubr.f32.mxu0 %v11007_v56  ;;  %v755_v56 = vld [vmem:[#allocation2 + $0x40f] sm:$0xff] }
 0x43e   :  { %v2265_v3 = vpop.f32.mrb[4].mxu0 }
 0x43f   :  { %v11173_v25 = vadd.f32 %v11066_v22, %v2265_v3  ;;  %v2267_v23 = vpop.f32.mrb[5].mxu0  ;;  %2529 = vmatmul.mubr.f32.gmra.mrb[110].mxu0 %v753_v12  ;;  %v759_v12 = vld [vmem:[#allocation2 + $0x44f] sm:$0xff] }
 0x440   :  { %2533 = vmatprep.mubr.f32.mxu0 %v11011_v27  ;;  %v756_v27 = vld [vmem:[#allocation2 + $0x427] sm:$0xff]  ;;  %v11192_v53 = vpop.f32.mrb[38].mxu1 }
 0x441   :  { %14730 = vst [vmem:[#allocation12_spill] sm:$0xff] %v11173_v25 }
 0x442   :  { %v2270_v48 = vpop.f32.mrb[6].mxu0 }
 0x443   :  { %v11177_v1 = vadd.f32 %v11064_v60, %v2270_v48  ;;  %v2272_v51 = vpop.f32.mrb[7].mxu0  ;;  %2534 = vmatmul.mubr.f32.gmra.mrb[112].mxu0 %v754_v37 }
 0x444   :  { %2538 = vmatprep.mubr.f32.mxu0 %v11016_v30  ;;  %v14734_v30 = vld [vmem:[#allocation10_spill] sm:$0xff]  ;;  %v760_v51 = vld [vmem:[#allocation2 + $0x467] sm:$0xff] }
 0x445   :  { %14731 = vst [vmem:[#allocation9_spill] sm:$0xff] %v11177_v1 }
 0x446   :  { %v2275_v31 = vpop.f32.mrb[8].mxu0 }
 0x447   :  { %v11185_v22 = vadd.f32 %v11072_v6, %v2275_v31  ;;  %v2277_v45 = vpop.f32.mrb[9].mxu0  ;;  %2539 = vmatmul.mubr.f32.gmra.mrb[114].mxu0 %v755_v56  ;;  %v11194_v6 = vpop.f32.mrb[39].mxu1 }
 0x448   :  { %2543 = vmatprep.mubr.f32.mxu0 %v11021_v24  ;;  %v11202_v3 = vpop.f32.mrb[40].mxu1  ;;  %v761_v45 = vld [vmem:[#allocation2 + $0x46f] sm:$0xff] }
 0x449   :  { %14732 = vst [vmem:[#allocation11_spill] sm:$0xff] %v11185_v22  ;;  %v11204_v37 = vpop.f32.mrb[41].mxu1 }
 0x44a   :  { %v2280_v60 = vpop.f32.mrb[10].mxu0 }
 0x44b   :  { %v11189_v13 = vadd.f32 %v11070_v28, %v2280_v60  ;;  %v2282_v15 = vpop.f32.mrb[11].mxu0  ;;  %2544 = vmatmul.mubr.f32.gmra.mrb[116].mxu0 %v756_v27  ;;  %v823_v28 = vld [vmem:[#allocation2 + $0x450] sm:$0xff] }
 0x44c   :  { %2548 = vmatprep.mubr.f32.mxu0 %v14734_v30 }
 0x44d   :  { %14733 = vst [vmem:[#allocation13_spill] sm:$0xff] %v11189_v13 }
 0x44e   :  { %v2285_v33 = vpop.f32.mrb[12].mxu0 }
 0x44f   :  { %v11197_v58 = vadd.f32 %v11079_v10, %v2285_v33  ;;  %v2287_v24 = vpop.f32.mrb[13].mxu0  ;;  %2549 = vmatmul.mubr.f32.gmra.mrb[118].mxu0 %v757_v59 }
 0x450   :  { %2553 = vmatprep.mubr.f32.mxu0 %v822_v54  ;;  %v11214_v27 = vpop.f32.mrb[42].mxu1 }
 0x451   :  { %14735 = vst [vmem:[#allocation14_spill] sm:$0xff] %v11197_v58  ;;  %v11216_v15 = vpop.f32.mrb[43].mxu1 }
 0x452   :  { %v2290_v29 = vpop.f32.mrb[14].mxu0 }
 0x453   :  { %v11200_v26 = vadd.f32 %v11077_v20, %v2290_v29  ;;  %v2292_v18 = vpop.f32.mrb[15].mxu0  ;;  %2554 = vmatmul.mubr.f32.gmra.mrb[120].mxu0 %v758_v17 }
 0x454   :  { %2558 = vmatprep.mubr.f32.mxu0 %v823_v28 }
 0x455   :  { %14736 = vst [vmem:[#allocation15_spill] sm:$0xff] %v11200_v26 }
 0x456   :  { %v2295_v23 = vpop.f32.mrb[16].mxu0 }
 0x457   :  { %v11207_v10 = vadd.f32 %v11084_v35, %v2295_v23  ;;  %v2297_v48 = vpop.f32.mrb[17].mxu0  ;;  %2559 = vmatmul.mubr.f32.gmra.mrb[122].mxu0 %v759_v12 }
 0x458   :  { %2563 = vmatprep.mubr.f32.mxu0 %v11086_v4  ;;  %v11224_v33 = vpop.f32.mrb[44].mxu1 }
 0x459   :  { %14737 = vst [vmem:[#allocation7_spill] sm:$0xff] %v11207_v10 }
 0x45a   :  { %v2300_v56 = vpop.f32.mrb[18].mxu0 }
 0x45b   :  { %v11211_v20 = vadd.f32 %v11082_v39, %v2300_v56  ;;  %v2302_v31 = vpop.f32.mrb[19].mxu0  ;;  %2564 = vmatmul.mubr.f32.gmra.mrb[124].mxu0 %v760_v51 }
 0x45c   :  { %2568 = vmatprep.mubr.f32.mxu0 %v11086_v4  ;;  %v11226_v4 = vpop.f32.mrb[45].mxu1 }
 0x45d   :  { %14738 = vst [vmem:[#allocation8_spill] sm:$0xff] %v11211_v20 }
 0x45e   :  { %v2305_v60 = vpop.f32.mrb[20].mxu0 }
 0x45f   :  { %v11219_v35 = vadd.f32 %v11092_v0, %v2305_v60  ;;  %v2307_v30 = vpop.f32.mrb[21].mxu0  ;;  %2569 = vmatmul.mubr.f32.gmra.mrb[126].mxu0 %v761_v45 }
 0x460   :  { %v11234_v12 = vpop.f32.mrb[46].mxu1 }
 0x461   :  { %14739 = vst [vmem:[#allocation16_spill] sm:$0xff] %v11219_v35 }
 0x462   :  { %v2310_v59 = vpop.f32.mrb[22].mxu0 }
 0x463   :  { %v11222_v54 = vadd.f32 %v11090_v36, %v2310_v59  ;;  %v2312_v39 = vpop.f32.mrb[23].mxu0  ;;  %v11236_v36 = vpop.f32.mrb[47].mxu1 }
 0x465   :  { %14740 = vst [vmem:[#allocation10_spill] sm:$0xff] %v11222_v54 }
 0x466   :  { %v2315_v24 = vpop.f32.mrb[24].mxu0 }
 0x467   :  { %v11229_v17 = vadd.f32 %v11098_v41, %v2315_v24  ;;  %v2317_v28 = vpop.f32.mrb[25].mxu0 }
 0x468   :  { %v11244_v45 = vpop.f32.mrb[48].mxu1 }
 0x469   :  { %14741 = vst [vmem:[#allocation17_spill] sm:$0xff] %v11229_v17 }
 0x46a   :  { %v2320_v29 = vpop.f32.mrb[26].mxu0 }
 0x46b   :  { %v11232_v0 = vadd.f32 %v11096_v47, %v2320_v29  ;;  %v2322_v18 = vpop.f32.mrb[27].mxu0  ;;  %v11246_v47 = vpop.f32.mrb[49].mxu1  ;;  %v7925_v29 = vpack.c.bf16 %v11165_v7, %v11161_v2 }
 0x46e   :  { %v2325_v23 = vpop.f32.mrb[28].mxu0 }
 0x46f   :  { %v11239_v48 = vadd.f32 %v11104_v16, %v2325_v23  ;;  %v2327_v51 = vpop.f32.mrb[29].mxu0 }
 0x471   :  { %14742 = vst [vmem:[#allocation18_spill] sm:$0xff] %v11239_v48 }
 0x472   :  { %v2330_v56 = vpop.f32.mrb[30].mxu0 }
 0x473   :  { %v11242_v31 = vadd.f32 %v11102_v57, %v2330_v56  ;;  %v2332_v41 = vpop.f32.mrb[31].mxu0  ;;  %v11256_v57 = vpop.f32.mrb[50].mxu1  ;;  %v14544_v56 = vmov 1.0  }
 0x474   :  { %v11260_v23 = vpop.f32.mrb[51].mxu1  ;;  %3023 = vmatprep.mubr.f32.mxu1 %v14544_v56 }
 0x475   :  { %14743 = vst [vmem:[#allocation19_spill] sm:$0xff] %v11242_v31 }
 0x476   :  { %v2335_v60 = vpop.f32.mrb[32].mxu0 }
 0x477   :  { %v11249_v30 = vadd.f32 %v11110_v55, %v2335_v60  ;;  %v2337_v59 = vpop.f32.mrb[33].mxu0 }
 0x479   :  { %14744 = vst [vmem:[#allocation20_spill] sm:$0xff] %v11249_v30 }
 0x47a   :  { %v2340_v39 = vpop.f32.mrb[34].mxu0 }
 0x47b   :  { %v11252_v24 = vadd.f32 %v11108_v19, %v2340_v39  ;;  %v2342_v16 = vpop.f32.mrb[35].mxu0  ;;  %v11271_v39 = vpop.f32.mrb[52].mxu1 }
 0x47d   :  { %14745 = vst [vmem:[#allocation21_spill] sm:$0xff] %v11252_v24  ;;  %v7923_v28 = vpack.c.bf16 %v11252_v24, %v11249_v30 }
 0x47e   :  { %v2345_v18 = vpop.f32.mrb[36].mxu0 }
 0x47f   :  { %v11263_v55 = vadd.f32 %v11116_v32, %v2345_v18  ;;  %v2347_v51 = vpop.f32.mrb[37].mxu0  ;;  %7924 = vmatprep.subr.bf16.mxu1 %v7923_v28  ;;  %v7929_v32 = vpack.c.bf16 %v11177_v1, %v11173_v25  ;;  %v11275_v18 = vpop.f32.mrb[53].mxu1  ;;  %v7933_v25 = vpack.c.bf16 %v11189_v13, %v11185_v22 }
 0x480   :  { %7926 = vmatpush3.bf16.msra.mxu1 %v7925_v29  ;;  %v11285_v56 = vpop.f32.mrb[54].mxu1 }
 0x481   :  { %14746 = vst [vmem:[#allocation22_spill] sm:$0xff] %v11263_v55 }
 0x482   :  { %v2350_v19 = vpop.f32.mrb[38].mxu0 }
 0x483   :  { %v11267_v41 = vadd.f32 %v11114_v52, %v2350_v19  ;;  %v2352_v60 = vpop.f32.mrb[39].mxu0 }
 0x485   :  { %14747 = vst [vmem:[#allocation23_spill] sm:$0xff] %v11267_v41  ;;  %v7927_v59 = vpack.c.bf16 %v11267_v41, %v11263_v55  ;;  %v11289_v55 = vpop.f32.mrb[55].mxu1 }
 0x486   :  { %v2355_v16 = vpop.f32.mrb[40].mxu0 }
 0x487   :  { %v11278_v28 = vadd.f32 %v11122_v40, %v2355_v16  ;;  %v2357_v29 = vpop.f32.mrb[41].mxu0  ;;  %7928 = vmatprep.subr.bf16.mxu1 %v7927_v59 }
 0x488   :  { %7930 = vmatpush3.bf16.msra.mxu1 %v7929_v32 }
 0x489   :  { %14748 = vst [vmem:[#allocation24_spill] sm:$0xff] %v11278_v28 }
 0x48a   :  { %v2360_v52 = vpop.f32.mrb[42].mxu0 }
 0x48b   :  { %v11281_v51 = vadd.f32 %v11120_v62, %v2360_v52  ;;  %v2362_v19 = vpop.f32.mrb[43].mxu0 }
 0x48c   :  { %v11299_v52 = vpop.f32.mrb[56].mxu1  ;;  %v7937_v19 = vpack.c.bf16 %v11200_v26, %v11197_v58 }
 0x48d   :  { %14749 = vst [vmem:[#allocation25_spill] sm:$0xff] %v11281_v51  ;;  %v7931_v60 = vpack.c.bf16 %v11281_v51, %v11278_v28  ;;  %v11303_v13 = vpop.f32.mrb[57].mxu1 }
 0x48e   :  { %v2365_v1 = vpop.f32.mrb[44].mxu0 }
 0x48f   :  { %v11292_v40 = vadd.f32 %v11128_v63, %v2365_v1  ;;  %v2367_v59 = vpop.f32.mrb[45].mxu0  ;;  %7932 = vmatprep.subr.bf16.mxu1 %v7931_v60 }
 0x490   :  { %7934 = vmatpush3.bf16.msra.mxu1 %v7933_v25 }
 0x491   :  { %14750 = vst [vmem:[#allocation26_spill] sm:$0xff] %v11292_v40 }
 0x492   :  { %v2370_v62 = vpop.f32.mrb[46].mxu0 }
 0x493   :  { %v11295_v32 = vadd.f32 %v11126_v46, %v2370_v62  ;;  %v2372_v16 = vpop.f32.mrb[47].mxu0 }
 0x494   :  { %v11313_v62 = vpop.f32.mrb[58].mxu1  ;;  %v7941_v16 = vpack.c.bf16 %v11211_v20, %v11207_v10 }
 0x495   :  { %14751 = vst [vmem:[#allocation27_spill] sm:$0xff] %v11295_v32  ;;  %v7935_v29 = vpack.c.bf16 %v11295_v32, %v11292_v40  ;;  %v11317_v26 = vpop.f32.mrb[59].mxu1 }
 0x496   :  { %v2375_v22 = vpop.f32.mrb[48].mxu0 }
 0x497   :  { %v11306_v63 = vadd.f32 %v11134_v11, %v2375_v22  ;;  %v2377_v25 = vpop.f32.mrb[49].mxu0  ;;  %7936 = vmatprep.subr.bf16.mxu1 %v7935_v29 }
 0x498   :  { %7938 = vmatpush3.bf16.msra.mxu1 %v7937_v19 }
 0x499   :  { %14752 = vst [vmem:[#allocation28_spill] sm:$0xff] %v11306_v63 }
 0x49a   :  { %v2380_v46 = vpop.f32.mrb[50].mxu0 }
 0x49b   :  { %v11309_v1 = vadd.f32 %v11132_v61, %v2380_v46  ;;  %v2382_v60 = vpop.f32.mrb[51].mxu0  ;;  %v11327_v46 = vpop.f32.mrb[60].mxu1 }
 0x49c   :  { %v7945_v60 = vpack.c.bf16 %v11222_v54, %v11219_v35  ;;  %v11331_v20 = vpop.f32.mrb[61].mxu1 }
 0x49d   :  { %14753 = vst [vmem:[#allocation29_spill] sm:$0xff] %v11309_v1  ;;  %v7939_v59 = vpack.c.bf16 %v11309_v1, %v11306_v63 }
 0x49e   :  { %v2385_v58 = vpop.f32.mrb[52].mxu0 }
 0x49f   :  { %v11320_v11 = vadd.f32 %v11140_v49, %v2385_v58  ;;  %v2387_v22 = vpop.f32.mrb[53].mxu0  ;;  %7940 = vmatprep.subr.bf16.mxu1 %v7939_v59 }
 0x4a0   :  { %7942 = vmatpush3.bf16.msra.mxu1 %v7941_v16 }
 0x4a2   :  { %v2390_v61 = vpop.f32.mrb[54].mxu0 }
 0x4a3   :  { %v11323_v29 = vadd.f32 %v11138_v42, %v2390_v61  ;;  %v2392_v19 = vpop.f32.mrb[55].mxu0  ;;  %v11341_v61 = vpop.f32.mrb[62].mxu1 }
 0x4a4   :  { %v7949_v19 = vpack.c.bf16 %v11232_v0, %v11229_v17  ;;  %v11345_v54 = vpop.f32.mrb[63].mxu1 }
 0x4a5   :  { %14754 = vst [vmem:[#allocation30_spill] sm:$0xff] %v11323_v29  ;;  %v7943_v25 = vpack.c.bf16 %v11323_v29, %v11320_v11 }
 0x4a6   :  { %v2395_v10 = vpop.f32.mrb[56].mxu0 }
 0x4a7   :  { %v11334_v49 = vadd.f32 %v11146_v5, %v2395_v10  ;;  %v2397_v58 = vpop.f32.mrb[57].mxu0  ;;  %7944 = vmatprep.subr.bf16.mxu1 %v7943_v25 }
 0x4a8   :  { %7946 = vmatpush3.bf16.msra.mxu1 %v7945_v60 }
 0x4a9   :  { %14755 = vst [vmem:[#allocation31_spill] sm:$0xff] %v11334_v49 }
 0x4aa   :  { %v2400_v42 = vpop.f32.mrb[58].mxu0 }
 0x4ab   :  { %v11337_v59 = vadd.f32 %v11144_v8, %v2400_v42  ;;  %v2402_v16 = vpop.f32.mrb[59].mxu0  ;;  %v7953_v42 = vpack.c.bf16 %v11242_v31, %v11239_v48 }
 0x4ad   :  { %14756 = vst [vmem:[#allocation32_spill] sm:$0xff] %v11337_v59  ;;  %v7947_v22 = vpack.c.bf16 %v11337_v59, %v11334_v49 }
 0x4ae   :  { %v2405_v35 = vpop.f32.mrb[60].mxu0 }
 0x4af   :  { %v11348_v5 = vadd.f32 %v11152_v43, %v2405_v35  ;;  %v2407_v10 = vpop.f32.mrb[61].mxu0  ;;  %7948 = vmatprep.subr.bf16.mxu1 %v7947_v22 }
 0x4b0   :  { %7950 = vmatpush3.bf16.msra.mxu1 %v7949_v19  ;;  %v14758_v19 = vmov 1.0  }
 0x4b2   :  { %v2410_v8 = vpop.f32.mrb[62].mxu0 }
 0x4b3   :  { %v11351_v25 = vadd.f32 %v11150_v34, %v2410_v8  ;;  %v2412_v60 = vpop.f32.mrb[63].mxu0 }
 0x4b5   :  { %14757 = vst [vmem:[#allocation33_spill] sm:$0xff] %v11351_v25  ;;  %v7951_v58 = vpack.c.bf16 %v11351_v25, %v11348_v5 }
 0x4b6   :  { %v2415_v16 = vpop.f32.mrb[64].mxu0 }
 0x4b7   :  { %v11358_v17 = vadd.f32 %v11158_v44, %v2415_v16  ;;  %v2417_v43 = vpop.f32.mrb[65].mxu0  ;;  %7952 = vmatprep.subr.bf16.mxu1 %v7951_v58 }
 0x4b8   :  { %7954 = vmatpush3.bf16.msra.mxu1 %v7953_v42 }
 0x4ba   :  { %v2420_v35 = vpop.f32.mrb[66].mxu0 }
 0x4bb   :  { %v11361_v22 = vadd.f32 %v11156_v14, %v2420_v35  ;;  %v2422_v34 = vpop.f32.mrb[67].mxu0  ;;  %3024 = vmatmul.mubr.f32.vlgmr.msra.gmra.mrb[64].mxu1 %v14758_v19 }
 0x4bc   :  { %3093 = vmatprep.mubr.f32.mxu1 %v14758_v19 }
 0x4be   :  { %v2425_v10 = vpop.f32.mrb[68].mxu0 }
 0x4bf   :  { %v11366_v8 = vadd.f32 %v11170_v21, %v2425_v10  ;;  %v2427_v60 = vpop.f32.mrb[69].mxu0 }
 0x4c2   :  { %v2430_v48 = vpop.f32.mrb[70].mxu0 }
 0x4c3   :  { %v11369_v44 = vadd.f32 %v11168_v9, %v2430_v48  ;;  %v2432_v58 = vpop.f32.mrb[71].mxu0 }
 0x4c6   :  { %v2435_v42 = vpop.f32.mrb[72].mxu0 }
 0x4c7   :  { %v11372_v16 = vadd.f32 %v11182_v50, %v2435_v42  ;;  %v2437_v14 = vpop.f32.mrb[73].mxu0 }
 0x4ca   :  { %v2440_v43 = vpop.f32.mrb[74].mxu0 }
 0x4cb   :  { %v11375_v35 = vadd.f32 %v11180_v38, %v2440_v43  ;;  %v2442_v34 = vpop.f32.mrb[75].mxu0 }
 0x4ce   :  { %v2445_v31 = vpop.f32.mrb[76].mxu0 }
 0x4cf   :  { %v11378_v21 = vadd.f32 %v11194_v6, %v2445_v31  ;;  %v2447_v10 = vpop.f32.mrb[77].mxu0 }
 0x4d2   :  { %v2450_v60 = vpop.f32.mrb[78].mxu0 }
 0x4d3   :  { %v11381_v9 = vadd.f32 %v11192_v53, %v2450_v60  ;;  %v2452_v48 = vpop.f32.mrb[79].mxu0 }
 0x4d6   :  { %v2455_v58 = vpop.f32.mrb[80].mxu0 }
 0x4d7   :  { %v11384_v50 = vadd.f32 %v11204_v37, %v2455_v58  ;;  %v2457_v42 = vpop.f32.mrb[81].mxu0 }
 0x4da   :  { %v2460_v14 = vpop.f32.mrb[82].mxu0 }
 0x4db   :  { %v11387_v38 = vadd.f32 %v11202_v3, %v2460_v14  ;;  %v2462_v43 = vpop.f32.mrb[83].mxu0 }
 0x4de   :  { %v2465_v34 = vpop.f32.mrb[84].mxu0 }
 0x4df   :  { %v11390_v6 = vadd.f32 %v11216_v15, %v2465_v34  ;;  %v2467_v31 = vpop.f32.mrb[85].mxu0 }
 0x4e2   :  { %v2470_v10 = vpop.f32.mrb[86].mxu0 }
 0x4e3   :  { %v11393_v53 = vadd.f32 %v11214_v27, %v2470_v10  ;;  %v2472_v60 = vpop.f32.mrb[87].mxu0 }
 0x4e6   :  { %v2475_v48 = vpop.f32.mrb[88].mxu0 }
 0x4e7   :  { %v11396_v37 = vadd.f32 %v11226_v4, %v2475_v48  ;;  %v2477_v58 = vpop.f32.mrb[89].mxu0 }
 0x4ea   :  { %v2480_v42 = vpop.f32.mrb[90].mxu0 }
 0x4eb   :  { %v11399_v3 = vadd.f32 %v11224_v33, %v2480_v42  ;;  %v2482_v14 = vpop.f32.mrb[91].mxu0 }
 0x4ec   :  { %v7957_v14 = vpack.c.bf16 %v11361_v22, %v11358_v17 }
 0x4ee   :  { %v2485_v43 = vpop.f32.mrb[92].mxu0 }
 0x4ef   :  { %v11402_v15 = vadd.f32 %v11236_v36, %v2485_v43  ;;  %v2487_v34 = vpop.f32.mrb[93].mxu0 }
 0x4f2   :  { %v2490_v31 = vpop.f32.mrb[94].mxu0 }
 0x4f3   :  { %v11405_v27 = vadd.f32 %v11234_v12, %v2490_v31  ;;  %v2492_v10 = vpop.f32.mrb[95].mxu0 }
 0x4f6   :  { %v2495_v60 = vpop.f32.mrb[96].mxu0 }
 0x4f7   :  { %v11408_v4 = vadd.f32 %v11246_v47, %v2495_v60  ;;  %v2497_v48 = vpop.f32.mrb[97].mxu0  ;;  %v7961_v60 = vpack.c.bf16 %v11369_v44, %v11366_v8 }
 0x4fa   :  { %v2500_v58 = vpop.f32.mrb[98].mxu0 }
 0x4fb   :  { %v11411_v33 = vadd.f32 %v11244_v45, %v2500_v58  ;;  %v2502_v42 = vpop.f32.mrb[99].mxu0 }
 0x4fd   :  { %v7955_v36 = vpack.c.bf16 %v11411_v33, %v11408_v4 }
 0x4fe   :  { %v2505_v43 = vpop.f32.mrb[100].mxu0 }
 0x4ff   :  { %v11418_v12 = vadd.f32 %v11260_v23, %v2505_v43  ;;  %v2507_v34 = vpop.f32.mrb[101].mxu0  ;;  %7956 = vmatprep.subr.bf16.mxu1 %v7955_v36  ;;  %v7965_v43 = vpack.c.bf16 %v11375_v35, %v11372_v16 }
 0x500   :  { %7958 = vmatpush3.bf16.msra.mxu1 %v7957_v14 }
 0x502   :  { %v2510_v47 = vpop.f32.mrb[102].mxu0 }
 0x503   :  { %v11421_v31 = vadd.f32 %v11256_v57, %v2510_v47  ;;  %v2512_v45 = vpop.f32.mrb[103].mxu0 }
 0x505   :  { %v7959_v10 = vpack.c.bf16 %v11421_v31, %v11418_v12 }
 0x506   :  { %v2515_v48 = vpop.f32.mrb[104].mxu0 }
 0x507   :  { %v11428_v58 = vadd.f32 %v11275_v18, %v2515_v48  ;;  %v2517_v23 = vpop.f32.mrb[105].mxu0  ;;  %7960 = vmatprep.subr.bf16.mxu1 %v7959_v10  ;;  %v7969_v48 = vpack.c.bf16 %v11381_v9, %v11378_v21 }
 0x508   :  { %7962 = vmatpush3.bf16.msra.mxu1 %v7961_v60 }
 0x50a   :  { %v2520_v42 = vpop.f32.mrb[106].mxu0 }
 0x50b   :  { %v11431_v36 = vadd.f32 %v11271_v39, %v2520_v42  ;;  %v2522_v57 = vpop.f32.mrb[107].mxu0 }
 0x50d   :  { %v7963_v14 = vpack.c.bf16 %v11431_v36, %v11428_v58 }
 0x50e   :  { %v2525_v34 = vpop.f32.mrb[108].mxu0 }
 0x50f   :  { %v11438_v47 = vadd.f32 %v11289_v55, %v2525_v34  ;;  %v2527_v18 = vpop.f32.mrb[109].mxu0  ;;  %7964 = vmatprep.subr.bf16.mxu1 %v7963_v14  ;;  %v7973_v34 = vpack.c.bf16 %v11387_v38, %v11384_v50 }
 0x510   :  { %7966 = vmatpush3.bf16.msra.mxu1 %v7965_v43 }
 0x512   :  { %v2530_v45 = vpop.f32.mrb[110].mxu0 }
 0x513   :  { %v11441_v10 = vadd.f32 %v11285_v56, %v2530_v45  ;;  %v2532_v39 = vpop.f32.mrb[111].mxu0 }
 0x515   :  { %v7967_v60 = vpack.c.bf16 %v11441_v10, %v11438_v47 }
 0x516   :  { %v2535_v23 = vpop.f32.mrb[112].mxu0 }
 0x517   :  { %v11448_v42 = vadd.f32 %v11303_v13, %v2535_v23  ;;  %v2537_v55 = vpop.f32.mrb[113].mxu0  ;;  %7968 = vmatprep.subr.bf16.mxu1 %v7967_v60  ;;  %v7977_v23 = vpack.c.bf16 %v11393_v53, %v11390_v6 }
 0x518   :  { %7970 = vmatpush3.bf16.msra.mxu1 %v7969_v48 }
 0x51a   :  { %v2540_v57 = vpop.f32.mrb[114].mxu0 }
 0x51b   :  { %v11451_v14 = vadd.f32 %v11299_v52, %v2540_v57  ;;  %v2542_v56 = vpop.f32.mrb[115].mxu0 }
 0x51d   :  { %14759 = vst [vmem:[#allocation34_spill] sm:$0xff] %v11451_v14  ;;  %v7971_v43 = vpack.c.bf16 %v11451_v14, %v11448_v42 }
 0x51e   :  { %v2545_v18 = vpop.f32.mrb[116].mxu0 }
 0x51f   :  { %v11458_v45 = vadd.f32 %v11317_v26, %v2545_v18  ;;  %v2547_v13 = vpop.f32.mrb[117].mxu0  ;;  %7972 = vmatprep.subr.bf16.mxu1 %v7971_v43  ;;  %v7981_v18 = vpack.c.bf16 %v11399_v3, %v11396_v37 }
 0x520   :  { %7974 = vmatpush3.bf16.msra.mxu1 %v7973_v34 }
 0x521   :  { %14760 = vst [vmem:[#allocation35_spill] sm:$0xff] %v11458_v45 }
 0x522   :  { %v2550_v39 = vpop.f32.mrb[118].mxu0 }
 0x523   :  { %v11461_v60 = vadd.f32 %v11313_v62, %v2550_v39  ;;  %v2552_v52 = vpop.f32.mrb[119].mxu0 }
 0x525   :  { %14761 = vst [vmem:[#allocation36_spill] sm:$0xff] %v11461_v60  ;;  %v7975_v48 = vpack.c.bf16 %v11461_v60, %v11458_v45 }
 0x526   :  { %v2555_v55 = vpop.f32.mrb[120].mxu0 }
 0x527   :  { %v11468_v57 = vadd.f32 %v11331_v20, %v2555_v55  ;;  %v2557_v26 = vpop.f32.mrb[121].mxu0  ;;  %7976 = vmatprep.subr.bf16.mxu1 %v7975_v48  ;;  %v3116_v48 = vmul.f32 %v11252_v24, %v11252_v24  ;;  %v3115_v55 = vmul.f32 %v11249_v30, %v11249_v30  ;;  %v3120_v24 = vmul.f32 %v11281_v51, %v11281_v51  ;;  %v14771_v30 = vld [vmem:[#allocation15_spill] sm:$0xff] }
 0x528   :  { %7978 = vmatpush3.bf16.msra.mxu1 %v7977_v23 }
 0x529   :  { %14762 = vst [vmem:[#allocation37_spill] sm:$0xff] %v11468_v57 }
 0x52a   :  { %v2560_v56 = vpop.f32.mrb[122].mxu0 }
 0x52b   :  { %v11471_v43 = vadd.f32 %v11327_v46, %v2560_v56  ;;  %v2562_v62 = vpop.f32.mrb[123].mxu0  ;;  %v7985_v56 = vpack.c.bf16 %v11405_v27, %v11402_v15 }
 0x52c   :  { %v3118_v62 = vmul.f32 %v11267_v41, %v11267_v41 }
 0x52d   :  { %14763 = vst [vmem:[#allocation38_spill] sm:$0xff] %v11471_v43  ;;  %v7979_v34 = vpack.c.bf16 %v11471_v43, %v11468_v57 }
 0x52e   :  { %v2565_v13 = vpop.f32.mrb[124].mxu0 }
 0x52f   :  { %v11478_v39 = vadd.f32 %v11345_v54, %v2565_v13  ;;  %v2567_v20 = vpop.f32.mrb[125].mxu0  ;;  %7980 = vmatprep.subr.bf16.mxu1 %v7979_v34  ;;  %v3100_v54 = vmul.f32 %v11165_v7, %v11165_v7  ;;  %v7987_v34 = vpack.c.bf16 %v3116_v48, %v3115_v55  ;;  %v3119_v55 = vmul.f32 %v11278_v28, %v11278_v28  ;;  %v14772_v28 = vld [vmem:[#allocation14_spill] sm:$0xff] }
 0x530   :  { %7982 = vmatpush3.bf16.msra.mxu1 %v7981_v18  ;;  %v14766_v18 = vld [vmem:[#allocation22_spill] sm:$0xff] }
 0x531   :  { %14764 = vst [vmem:[#allocation39_spill] sm:$0xff] %v11478_v39  ;;  %v3117_v13 = vmul.f32 %v14766_v18, %v14766_v18  ;;  %v7995_v51 = vpack.c.bf16 %v3120_v24, %v3119_v55  ;;  %v14770_v18 = vld [vmem:[#allocation11_spill] sm:$0xff]  ;;  %v3123_v24 = vmul.f32 %v11306_v63, %v11306_v63  ;;  %v14776_v63 = vld [vmem:[#allocation16_spill] sm:$0xff] }
 0x532   :  { %v2570_v52 = vpop.f32.mrb[126].mxu0 }
 0x533   :  { %v11483_v46 = vadd.f32 %v11341_v61, %v2570_v52  ;;  %v2572_v23 = vpop.f32.mrb[127].mxu0  ;;  %v3099_v61 = vmul.f32 %v11161_v2, %v11161_v2  ;;  %v14767_v52 = vld [vmem:[#allocation9_spill] sm:$0xff]  ;;  %v7991_v41 = vpack.c.bf16 %v3118_v62, %v3117_v13  ;;  %v3103_v62 = vmul.f32 %v14770_v18, %v14770_v18 }
 0x534   :  { %v3102_v23 = vmul.f32 %v14767_v52, %v14767_v52  ;;  %v3121_v13 = vmul.f32 %v11292_v40, %v11292_v40  ;;  %v14774_v40 = vld [vmem:[#allocation7_spill] sm:$0xff] }
 0x535   :  { %14765 = vst [vmem:[#allocation40_spill] sm:$0xff] %v11483_v46  ;;  %v7983_v26 = vpack.c.bf16 %v11483_v46, %v11478_v39  ;;  %v7989_v20 = vpack.c.bf16 %v3100_v54, %v3099_v61  ;;  %v3122_v61 = vmul.f32 %v11295_v32, %v11295_v32  ;;  %v3105_v32 = vmul.f32 %v14772_v28, %v14772_v28 }
 0x537   :  { %7984 = vmatprep.subr.bf16.mxu1 %v7983_v26  ;;  %v14768_v26 = vld [vmem:[#allocation12_spill] sm:$0xff] }
 0x538   :  { %7986 = vmatpush3.bf16.msra.mxu1 %v7985_v56  ;;  %v3101_v48 = vmul.f32 %v14768_v26, %v14768_v26  ;;  %v14769_v56 = vld [vmem:[#allocation13_spill] sm:$0xff] }
 0x539   :  { %7988 = vmatprep.subr.bf16.mxu1 %v7987_v34  ;;  %v3104_v34 = vmul.f32 %v14769_v56, %v14769_v56 }
 0x53a   :  { %v7993_v54 = vpack.c.bf16 %v3102_v23, %v3101_v48  ;;  %v3124_v23 = vmul.f32 %v11309_v1, %v11309_v1  ;;  %v7999_v48 = vpack.c.bf16 %v3122_v61, %v3121_v13  ;;  %v3107_v1 = vmul.f32 %v14774_v40, %v14774_v40 }
 0x53b   :  { %3094 = vmatmul.mubr.f32.vlgmr.msra.gmra.mrb[66].mxu1 %v14758_v19  ;;  %v3125_v61 = vmul.f32 %v11320_v11, %v11320_v11 }
 0x53c   :  { %7990 = vmatpush3.bf16.msra.mxu1 %v7989_v20  ;;  %3227 = vmatprep.mubr.f32.mxu1 %v14758_v19  ;;  %v7997_v20 = vpack.c.bf16 %v3104_v34, %v3103_v62  ;;  %v3126_v34 = vmul.f32 %v11323_v29, %v11323_v29  ;;  %v8003_v62 = vpack.c.bf16 %v3124_v23, %v3123_v24 }
 0x53d   :  { %7992 = vmatprep.subr.bf16.mxu1 %v7991_v41  ;;  %v3106_v41 = vmul.f32 %v14771_v30, %v14771_v30  ;;  %v3109_v29 = vmul.f32 %v14776_v63, %v14776_v63  ;;  %v3127_v23 = vmul.f32 %v11334_v49, %v11334_v49  ;;  %v14779_v49 = vld [vmem:[#allocation18_spill] sm:$0xff] }
 0x53f   :  { %v8001_v55 = vpack.c.bf16 %v3106_v41, %v3105_v32  ;;  %v3128_v32 = vmul.f32 %v11337_v59, %v11337_v59  ;;  %v8007_v41 = vpack.c.bf16 %v3126_v34, %v3125_v61  ;;  %v3129_v34 = vmul.f32 %v11348_v5, %v11348_v5 }
 0x540   :  { %7994 = vmatpush3.bf16.msra.mxu1 %v7993_v54  ;;  %v14773_v54 = vld [vmem:[#allocation8_spill] sm:$0xff] }
 0x541   :  { %7996 = vmatprep.subr.bf16.mxu1 %v7995_v51  ;;  %v3108_v51 = vmul.f32 %v14773_v54, %v14773_v54 }
 0x543   :  { %v8005_v13 = vpack.c.bf16 %v3108_v51, %v3107_v1  ;;  %v3130_v1 = vmul.f32 %v11351_v25, %v11351_v25  ;;  %v8011_v51 = vpack.c.bf16 %v3128_v32, %v3127_v23  ;;  %v3113_v25 = vmul.f32 %v14779_v49, %v14779_v49 }
 0x544   :  { %7998 = vmatpush3.bf16.msra.mxu1 %v7997_v20  ;;  %v14775_v20 = vld [vmem:[#allocation10_spill] sm:$0xff]  ;;  %v3147_v32 = vmul.f32 %v11408_v4, %v11408_v4 }
 0x545   :  { %8000 = vmatprep.subr.bf16.mxu1 %v7999_v48  ;;  %v3110_v48 = vmul.f32 %v14775_v20, %v14775_v20 }
 0x547   :  { %v8009_v24 = vpack.c.bf16 %v3110_v48, %v3109_v29  ;;  %v3148_v29 = vmul.f32 %v11411_v33, %v11411_v33  ;;  %v8015_v48 = vpack.c.bf16 %v3130_v1, %v3129_v34  ;;  %v3149_v1 = vmul.f32 %v11418_v12, %v11418_v12 }
 0x548   :  { %8002 = vmatpush3.bf16.msra.mxu1 %v8001_v55  ;;  %v3112_v55 = vmul.f32 %v11232_v0, %v11232_v0 }
 0x549   :  { %8004 = vmatprep.subr.bf16.mxu1 %v8003_v62  ;;  %v14777_v62 = vld [vmem:[#allocation17_spill] sm:$0xff] }
 0x54a   :  { %v3111_v59 = vmul.f32 %v14777_v62, %v14777_v62 }
 0x54c   :  { %8006 = vmatpush3.bf16.msra.mxu1 %v8005_v13  ;;  %v8013_v61 = vpack.c.bf16 %v3112_v55, %v3111_v59  ;;  %v14778_v13 = vld [vmem:[#allocation19_spill] sm:$0xff]  ;;  %v3150_v59 = vmul.f32 %v11421_v31, %v11421_v31  ;;  %v8019_v55 = vpack.c.bf16 %v3148_v29, %v3147_v32  ;;  %v3133_v29 = vmul.f32 %v11366_v8, %v11366_v8 }
 0x54d   :  { %8008 = vmatprep.subr.bf16.mxu1 %v8007_v41  ;;  %v3114_v41 = vmul.f32 %v14778_v13, %v14778_v13 }
 0x54f   :  { %v8017_v23 = vpack.c.bf16 %v3114_v41, %v3113_v25  ;;  %v3152_v25 = vmul.f32 %v11431_v36, %v11431_v36  ;;  %v8023_v41 = vpack.c.bf16 %v3150_v59, %v3149_v1  ;;  %v3135_v59 = vmul.f32 %v11372_v16, %v11372_v16 }
 0x550   :  { %8010 = vmatpush3.bf16.msra.mxu1 %v8009_v24  ;;  %v3132_v24 = vmul.f32 %v11361_v22, %v11361_v22 }
 0x551   :  { %8012 = vmatprep.subr.bf16.mxu1 %v8011_v51  ;;  %v3131_v51 = vmul.f32 %v11358_v17, %v11358_v17 }
 0x553   :  { %v8021_v34 = vpack.c.bf16 %v3132_v24, %v3131_v51  ;;  %v3154_v24 = vmul.f32 %v11441_v10, %v11441_v10  ;;  %v3153_v51 = vmul.f32 %v11438_v47, %v11438_v47 }
 0x554   :  { %8014 = vmatpush3.bf16.msra.mxu1 %v8013_v61  ;;  %v3134_v61 = vmul.f32 %v11369_v44, %v11369_v44 }
 0x555   :  { %8016 = vmatprep.subr.bf16.mxu1 %v8015_v48  ;;  %v3151_v48 = vmul.f32 %v11428_v58, %v11428_v58 }
 0x556   :  { %v8025_v32 = vpack.c.bf16 %v3134_v61, %v3133_v29  ;;  %v3156_v61 = vmul.f32 %v11451_v14, %v11451_v14  ;;  %v3137_v29 = vmul.f32 %v11378_v21, %v11378_v21 }
 0x558   :  { %8018 = vmatpush3.bf16.msra.mxu1 %v8017_v23  ;;  %v3136_v23 = vmul.f32 %v11375_v35, %v11375_v35 }
 0x559   :  { %8020 = vmatprep.subr.bf16.mxu1 %v8019_v55  ;;  %v8027_v55 = vpack.c.bf16 %v3152_v25, %v3151_v48  ;;  %v3155_v25 = vmul.f32 %v11448_v42, %v11448_v42 }
 0x55a   :  { %v8029_v1 = vpack.c.bf16 %v3136_v23, %v3135_v59  ;;  %v3158_v23 = vmul.f32 %v11461_v60, %v11461_v60  ;;  %v3139_v59 = vmul.f32 %v11384_v50, %v11384_v50 }
 0x55b   :  { %3228 = vmatmul.mubr.f32.vlgmr.msra.gmra.mrb[68].mxu1 %v14758_v19 }
 0x55c   :  { %8022 = vmatpush3.bf16.msra.mxu1 %v8021_v34  ;;  %3297 = vmatprep.mubr.f32.mxu1 %v14758_v19  ;;  %v3138_v34 = vmul.f32 %v11381_v9, %v11381_v9 }
 0x55d   :  { %8024 = vmatprep.subr.bf16.mxu1 %v8023_v41  ;;  %v8031_v41 = vpack.c.bf16 %v3154_v24, %v3153_v51  ;;  %v3157_v24 = vmul.f32 %v11458_v45, %v11458_v45 }
 0x55e   :  { %v8033_v48 = vpack.c.bf16 %v3138_v34, %v3137_v29  ;;  %v3160_v34 = vmul.f32 %v11471_v43, %v11471_v43  ;;  %v3141_v29 = vmul.f32 %v11390_v6, %v11390_v6  ;;  %v4316_v43 = vld [vmem:[#allocation4 + $0x58] sm:$0xff] }
 0x560   :  { %8026 = vmatpush3.bf16.msra.mxu1 %v8025_v32  ;;  %v3140_v32 = vmul.f32 %v11387_v38, %v11387_v38 }
 0x561   :  { %8028 = vmatprep.subr.bf16.mxu1 %v8027_v55  ;;  %v8035_v55 = vpack.c.bf16 %v3156_v61, %v3155_v25  ;;  %v3159_v61 = vmul.f32 %v11468_v57, %v11468_v57  ;;  %v4334_v57 = vld [vmem:[#allocation4 + $0xe8] sm:$0xff] }
 0x562   :  { %v8037_v51 = vpack.c.bf16 %v3140_v32, %v3139_v59  ;;  %v3162_v32 = vmul.f32 %v11483_v46, %v11483_v46  ;;  %v3143_v59 = vmul.f32 %v11396_v37, %v11396_v37  ;;  %v4311_v46 = vld [vmem:[#allocation4 + $0x30] sm:$0xff] }
 0x564   :  { %8030 = vmatpush3.bf16.msra.mxu1 %v8029_v1  ;;  %v3142_v1 = vmul.f32 %v11393_v53, %v11393_v53 }
 0x565   :  { %8032 = vmatprep.subr.bf16.mxu1 %v8031_v41  ;;  %v8039_v41 = vpack.c.bf16 %v3158_v23, %v3157_v24  ;;  %v3161_v23 = vmul.f32 %v11478_v39, %v11478_v39  ;;  %v4312_v39 = vld [vmem:[#allocation4 + $0x38] sm:$0xff] }
 0x566   :  { %v8041_v25 = vpack.c.bf16 %v3142_v1, %v3141_v29 }
 0x567   :  { %v8047_v1 = vpack.c.bf16 %v3162_v32, %v3161_v23  ;;  %v4305_v32 = vld [vmem:[#allocation4] sm:$0xff] }
 0x568   :  { %8034 = vmatpush3.bf16.msra.mxu1 %v8033_v48  ;;  %v3144_v48 = vmul.f32 %v11399_v3, %v11399_v3 }
 0x569   :  { %8036 = vmatprep.subr.bf16.mxu1 %v8035_v55  ;;  %v8043_v55 = vpack.c.bf16 %v3160_v34, %v3159_v61  ;;  %v14780_v34 = vmov 0.0|0.0   ;;  %v11621_v61 = vld [vmem:[#allocation2 + $0x8] sm:$0xff] }
 0x56a   :  { %v8045_v24 = vpack.c.bf16 %v3144_v48, %v3143_v59  ;;  %v4306_v59 = vld [vmem:[#allocation4 + $0x8] sm:$0xff] }
 0x56b   :  { %v8052_v23 = vpack.c.bf16 %v4306_v59, %v4305_v32  ;;  %v4314_v32 = vld [vmem:[#allocation4 + $0x48] sm:$0xff] }
 0x56c   :  { %8038 = vmatpush3.bf16.msra.mxu1 %v8037_v51  ;;  %v3146_v51 = vmul.f32 %v11405_v27, %v11405_v27 }
 0x56d   :  { %8040 = vmatprep.subr.bf16.mxu1 %v8039_v41  ;;  %v3145_v41 = vmul.f32 %v11402_v15, %v11402_v15 }
 0x56f   :  { %v8049_v29 = vpack.c.bf16 %v3146_v51, %v3145_v41  ;;  %v4308_v51 = vld [vmem:[#allocation4 + $0x18] sm:$0xff] }
 0x570   :  { %8042 = vmatpush3.bf16.msra.mxu1 %v8041_v25 }
 0x571   :  { %8044 = vmatprep.subr.bf16.mxu1 %v8043_v55 }
 0x574   :  { %8046 = vmatpush3.bf16.msra.mxu1 %v8045_v24  ;;  %v4307_v24 = vld [vmem:[#allocation4 + $0x10] sm:$0xff] }
 0x575   :  { %8048 = vmatprep.subr.bf16.mxu1 %v8047_v1  ;;  %v4309_v1 = vld [vmem:[#allocation4 + $0x20] sm:$0xff]  ;;  %v8055_v41 = vpack.c.bf16 %v4308_v51, %v4307_v24 }
 0x576   :  { %v4317_v51 = vld [vmem:[#allocation4 + $0x60] sm:$0xff] }
 0x578   :  { %8050 = vmatpush3.bf16.msra.mxu1 %v8049_v29  ;;  %v4310_v29 = vld [vmem:[#allocation4 + $0x28] sm:$0xff] }
 0x579   :  { %8051 = vmatprep.subr.bf16.mxu1 %v14780_v34 }
 0x57b   :  { %3298 = vmatmul.mubr.f32.vlgmr.msra.gmra.mrb[70].mxu1 %v14758_v19  ;;  %v8058_v19 = vpack.c.bf16 %v4310_v29, %v4309_v1  ;;  %v4318_v1 = vld [vmem:[#allocation4 + $0x68] sm:$0xff]  ;;  %v4321_v29 = vld [vmem:[#allocation4 + $0x80] sm:$0xff] }
 0x57c   :  { %4513 = vmatprep.mubr.f32.mxu1 %v11621_v61  ;;  %8053 = vmatpush1.bf16.msra.mxu1 %v8052_v23  ;;  %v4315_v23 = vld [vmem:[#allocation4 + $0x50] sm:$0xff] }
 0x57d   :  { %8054 = vmatprep.subr.bf16.mxu1 %v14780_v34  ;;  %v8067_v24 = vpack.c.bf16 %v4316_v43, %v4315_v23  ;;  %v4325_v23 = vld [vmem:[#allocation4 + $0xa0] sm:$0xff] }
 0x580   :  { %8056 = vmatpush1.bf16.msra.mxu1 %v8055_v41  ;;  %v8070_v41 = vpack.c.bf16 %v4318_v1, %v4317_v51  ;;  %v4327_v1 = vld [vmem:[#allocation4 + $0xb0] sm:$0xff] }
 0x581   :  { %8057 = vmatprep.subr.bf16.mxu1 %v14780_v34 }
 0x584   :  { %8059 = vmatpush1.bf16.msra.mxu1 %v8058_v19  ;;  %v4319_v19 = vld [vmem:[#allocation4 + $0x70] sm:$0xff] }
 0x585   :  { %8060 = vmatprep.subr.bf16.mxu1 %v14780_v34 }
 0x58e   :  { %v7115_v25 = vpop.f32.mrb[64].mxu1 }
 0x58f   :  { %v7116_v48 = vpop.f32.mrb[65].mxu1 }
 0x590   :  { %v11624_v55 = vadd.f32 %v7116_v48, %v7115_v25  ;;  %v8061_v25 = vpack.c.bf16 %v4312_v39, %v4311_v46  ;;  %v4313_v48 = vld [vmem:[#allocation4 + $0x40] sm:$0xff]  ;;  %v4320_v39 = vld [vmem:[#allocation4 + $0x78] sm:$0xff] }
 0x591   :  { %v8064_v59 = vpack.c.bf16 %v4314_v32, %v4313_v48  ;;  %v8073_v46 = vpack.c.bf16 %v4320_v39, %v4319_v19  ;;  %v4323_v48 = vld [vmem:[#allocation4 + $0x90] sm:$0xff]  ;;  %v4324_v32 = vld [vmem:[#allocation4 + $0x98] sm:$0xff]  ;;  %v4433_v19 = vld [vmem:[#allocation4 + $0x400] sm:$0xff] }
 0x592   :  { %8062 = vmatpush1.bf16.msra.mxu1 %v8061_v25  ;;  %v4322_v25 = vld [vmem:[#allocation4 + $0x88] sm:$0xff] }
 0x593   :  { %8063 = vmatprep.subr.bf16.mxu1 %v14780_v34  ;;  %v8076_v43 = vpack.c.bf16 %v4322_v25, %v4321_v29  ;;  %v4434_v39 = vld [vmem:[#allocation4 + $0x408] sm:$0xff]  ;;  %v4329_v25 = vld [vmem:[#allocation4 + $0xc0] sm:$0xff] }
 0x594   :  { %v8243_v29 = vpack.c.bf16 %v4434_v39, %v4433_v19 }
 0x596   :  { %8065 = vmatpush1.bf16.msra.mxu1 %v8064_v59  ;;  %v8079_v59 = vpack.c.bf16 %v4324_v32, %v4323_v48  ;;  %8244 = vmatprep.subr.bf16.mxu0 %v8243_v29  ;;  %v4435_v48 = vld [vmem:[#allocation4 + $0x410] sm:$0xff]  ;;  %v4436_v32 = vld [vmem:[#allocation4 + $0x418] sm:$0xff] }
 0x597   :  { %8066 = vmatprep.subr.bf16.mxu1 %v14780_v34  ;;  %8246 = vmatpush3.bf16.msra.mxu0 %v8243_v29  ;;  %v4333_v29 = vld [vmem:[#allocation4 + $0xe0] sm:$0xff] }
 0x59a   :  { %8068 = vmatpush1.bf16.msra.mxu1 %v8067_v24  ;;  %v4326_v24 = vld [vmem:[#allocation4 + $0xa8] sm:$0xff] }
 0x59b   :  { %8069 = vmatprep.subr.bf16.mxu1 %v14780_v34  ;;  %v8082_v51 = vpack.c.bf16 %v4326_v24, %v4325_v23  ;;  %v8247_v23 = vpack.c.bf16 %v4436_v32, %v4435_v48  ;;  %v4331_v24 = vld [vmem:[#allocation4 + $0xd0] sm:$0xff]  ;;  %v4440_v48 = vld [vmem:[#allocation4 + $0x438] sm:$0xff]  ;;  %v8094_v32 = vpack.c.bf16 %v4334_v57, %v4333_v29 }
 0x59c   :  { %v4443_v57 = vld [vmem:[#allocation4 + $0x450] sm:$0xff] }
 0x59d   :  { %8248 = vmatprep.subr.bf16.mxu0 %v8247_v23 }
 0x59e   :  { %8071 = vmatpush1.bf16.msra.mxu1 %v8070_v41  ;;  %v4328_v41 = vld [vmem:[#allocation4 + $0xb8] sm:$0xff]  ;;  %8250 = vmatpush3.bf16.msra.mxu0 %v8247_v23 }
 0x59f   :  { %8072 = vmatprep.subr.bf16.mxu1 %v14780_v34 }
 0x5a2   :  { %8074 = vmatpush1.bf16.msra.mxu1 %v8073_v46  ;;  %v8085_v46 = vpack.c.bf16 %v4328_v41, %v4327_v1  ;;  %v4437_v1 = vld [vmem:[#allocation4 + $0x420] sm:$0xff]  ;;  %v4438_v41 = vld [vmem:[#allocation4 + $0x428] sm:$0xff] }
 0x5a3   :  { %8075 = vmatprep.subr.bf16.mxu1 %v14780_v34  ;;  %v8251_v39 = vpack.c.bf16 %v4438_v41, %v4437_v1  ;;  %v4441_v1 = vld [vmem:[#allocation4 + $0x440] sm:$0xff]  ;;  %v4442_v41 = vld [vmem:[#allocation4 + $0x448] sm:$0xff] }
 0x5a4   :  { %v8259_v45 = vpack.c.bf16 %v4442_v41, %v4441_v1  ;;  %v4339_v1 = vld [vmem:[#allocation4 + $0x110] sm:$0xff]  ;;  %v4340_v41 = vld [vmem:[#allocation4 + $0x118] sm:$0xff] }
 0x5a5   :  { %8252 = vmatprep.subr.bf16.mxu0 %v8251_v39 }
 0x5a6   :  { %8077 = vmatpush1.bf16.msra.mxu1 %v8076_v43  ;;  %v4330_v43 = vld [vmem:[#allocation4 + $0xc8] sm:$0xff]  ;;  %8254 = vmatpush3.bf16.msra.mxu0 %v8251_v39  ;;  %v4444_v39 = vld [vmem:[#allocation4 + $0x458] sm:$0xff] }
 0x5a7   :  { %8078 = vmatprep.subr.bf16.mxu1 %v14780_v34  ;;  %v8263_v29 = vpack.c.bf16 %v4444_v39, %v4443_v57  ;;  %v4341_v39 = vld [vmem:[#allocation4 + $0x120] sm:$0xff] }
 0x5aa   :  { %8080 = vmatpush1.bf16.msra.mxu1 %v8079_v59  ;;  %v8088_v59 = vpack.c.bf16 %v4330_v43, %v4329_v25  ;;  %v4439_v43 = vld [vmem:[#allocation4 + $0x430] sm:$0xff] }
 0x5ab   :  { %8081 = vmatprep.subr.bf16.mxu1 %v14780_v34  ;;  %v8255_v60 = vpack.c.bf16 %v4440_v48, %v4439_v43  ;;  %v4337_v48 = vld [vmem:[#allocation4 + $0x100] sm:$0xff] }
 0x5ad   :  { %8256 = vmatprep.subr.bf16.mxu0 %v8255_v60 }
 0x5ae   :  { %8083 = vmatpush1.bf16.msra.mxu1 %v8082_v51  ;;  %v4332_v51 = vld [vmem:[#allocation4 + $0xd8] sm:$0xff]  ;;  %8258 = vmatpush3.bf16.msra.mxu0 %v8255_v60  ;;  %v4446_v60 = vld [vmem:[#allocation4 + $0x468] sm:$0xff] }
 0x5af   :  { %8084 = vmatprep.subr.bf16.mxu1 %v14780_v34  ;;  %v8091_v19 = vpack.c.bf16 %v4332_v51, %v4331_v24  ;;  %v4335_v24 = vld [vmem:[#allocation4 + $0xf0] sm:$0xff]  ;;  %v4336_v51 = vld [vmem:[#allocation4 + $0xf8] sm:$0xff]  ;;  %8260 = vmatprep.subr.bf16.mxu0 %v8259_v45 }
 0x5b2   :  { %8086 = vmatpush1.bf16.msra.mxu1 %v8085_v46  ;;  %8262 = vmatpush3.bf16.msra.mxu0 %v8259_v45  ;;  %v4448_v45 = vld [vmem:[#allocation4 + $0x478] sm:$0xff] }
 0x5b3   :  { %8087 = vmatprep.subr.bf16.mxu1 %v14780_v34  ;;  %8264 = vmatprep.subr.bf16.mxu0 %v8263_v29 }
 0x5b6   :  { %8089 = vmatpush1.bf16.msra.mxu1 %v8088_v59  ;;  %8266 = vmatpush3.bf16.msra.mxu0 %v8263_v29 }
 0x5b7   :  { %8090 = vmatprep.subr.bf16.mxu1 %v14780_v34 }
 0x5ba   :  { %8092 = vmatpush1.bf16.msra.mxu1 %v8091_v19  ;;  %v8097_v19 = vpack.c.bf16 %v4336_v51, %v4335_v24 }
 0x5bb   :  { %8093 = vmatprep.subr.bf16.mxu1 %v14780_v34 }
 0x5be   :  { %8095 = vmatpush1.bf16.msra.mxu1 %v8094_v32  ;;  %v4338_v32 = vld [vmem:[#allocation4 + $0x108] sm:$0xff] }
 0x5bf   :  { %8096 = vmatprep.subr.bf16.mxu1 %v14780_v34  ;;  %v8100_v24 = vpack.c.bf16 %v4338_v32, %v4337_v48 }
 0x5c2   :  { %8098 = vmatpush1.bf16.msra.mxu1 %v8097_v19  ;;  %v8103_v19 = vpack.c.bf16 %v4340_v41, %v4339_v1 }
 0x5c3   :  { %8099 = vmatprep.subr.bf16.mxu1 %v14780_v34 }
 0x60e   :  { %v7150_v46 = vpop.f32.mrb[66].mxu1 }
 0x60f   :  { %v7151_v25 = vpop.f32.mrb[67].mxu1 }
 0x610   :  { %v7152_v59 = vadd.f32 %v7151_v25, %v7150_v46  ;;  %v3728_v46 = vld [vmem:[#allocation3 + $0x7] sm:$0xff]  ;;  %v3729_v25 = vld [vmem:[#allocation3 + $0xf] sm:$0xff] }
 0x611   :  { %4514 = vmatmul.mubr.f32.vlgmr.msra.gmra.mrb[72].mxu1 %v3728_v46  ;;  %v4342_v46 = vld [vmem:[#allocation4 + $0x128] sm:$0xff] }
 0x612   :  { %v3096_v23 = vadd.f32 %v7152_v59, %v11624_v55  ;;  %4518 = vmatprep.mubr.f32.mxu1 %v11621_v61  ;;  %v4445_v55 = vld [vmem:[#allocation4 + $0x460] sm:$0xff]  ;;  %v4447_v59 = vld [vmem:[#allocation4 + $0x470] sm:$0xff]  ;;  %8101 = vmatpush1.bf16.msra.mxu1 %v8100_v24  ;;  %v4346_v24 = vld [vmem:[#allocation4 + $0x148] sm:$0xff] }
 0x613   :  { %v8267_v43 = vpack.c.bf16 %v4446_v60, %v4445_v55  ;;  %v8271_v51 = vpack.c.bf16 %v4448_v45, %v4447_v59  ;;  %8102 = vmatprep.subr.bf16.mxu1 %v14780_v34  ;;  %v8106_v55 = vpack.c.bf16 %v4342_v46, %v4341_v39  ;;  %v4343_v60 = vld [vmem:[#allocation4 + $0x130] sm:$0xff]  ;;  %v4345_v59 = vld [vmem:[#allocation4 + $0x140] sm:$0xff] }
 0x614   :  { %v3303_v45 = vmul.f32 0.001953125, %v3096_v23  ;;  %v8112_v1 = vpack.c.bf16 %v4346_v24, %v4345_v59  ;;  %v3308_v23 = vld [vmem:[%s14519_s2] sm:$0x1] }
 0x615   :  { %4519 = vmatmul.mubr.f32.gmra.mrb[74].mxu1 %v3729_v25  ;;  %8268 = vmatprep.subr.bf16.mxu0 %v8267_v43  ;;  %v4344_v25 = vld [vmem:[#allocation4 + $0x138] sm:$0xff]  ;;  %v3312_v59 = vld [vmem:[%s14520_s3] sm:$0x1] }
 0x616   :  { %8270 = vmatpush3.bf16.msra.mxu0 %v8267_v43  ;;  %8104 = vmatpush1.bf16.msra.mxu1 %v8103_v19  ;;  %v8109_v43 = vpack.c.bf16 %v4344_v25, %v4343_v60  ;;  %v3305_v19 = vmul.f32 %v3303_v45, %v3303_v45  ;;  %v4347_v60 = vld [vmem:[#allocation4 + $0x150] sm:$0xff]  ;;  %v4348_v25 = vld [vmem:[#allocation4 + $0x158] sm:$0xff] }
 0x617   :  { %8272 = vmatprep.subr.bf16.mxu0 %v8271_v51  ;;  %8105 = vmatprep.subr.bf16.mxu1 %v14780_v34 }
 0x61a   :  { %8274 = vmatpush3.bf16.msra.mxu0 %v8271_v51  ;;  %8107 = vmatpush1.bf16.msra.mxu1 %v8106_v55  ;;  %v3316_v55 = vlaneseq }
 0x61b   :  { %8108 = vmatprep.subr.bf16.mxu1 %v14780_v34 }
 0x61c   :  { %v3317_v14 = vshrl.u32 %v3316_v55, 7  ;;  %v14784_v55 = vld [vmem:[#allocation22_spill] sm:$0xff] }
 0x61e   :  { %8110 = vmatpush1.bf16.msra.mxu1 %v8109_v43  ;;  %v8115_v43 = vpack.c.bf16 %v4348_v25, %v4347_v60  ;;  %v14785_v60 = vld [vmem:[#allocation23_spill] sm:$0xff]  ;;  %v14786_v25 = vld [vmem:[#allocation24_spill] sm:$0xff] }
 0x61f   :  { %8111 = vmatprep.subr.bf16.mxu1 %v14780_v34 }
 0x622   :  { %8113 = vmatpush1.bf16.msra.mxu1 %v8112_v1 }
 0x623   :  { %8114 = vmatprep.subr.bf16.mxu1 %v14780_v34 }
 0x626   :  { %8116 = vmatpush1.bf16.msra.mxu1 %v8115_v43  ;;  %v14787_v43 = vld [vmem:[#allocation25_spill] sm:$0xff] }
 0x627   :  { %8117 = vmatprep.subr.bf16.mxu1 %v14780_v34  ;;  %v14795_v34 = vld [vmem:[#allocation33_spill] sm:$0xff] }
 0x62e   :  { %v7185_v61 = vpop.f32.mrb[68].mxu1 }
 0x62f   :  { %v7186_v57 = vpop.f32.mrb[69].mxu1 }
 0x630   :  { %v7187_v29 = vadd.f32 %v7186_v57, %v7185_v61 }
 0x64e   :  { %v7220_v48 = vpop.f32.mrb[70].mxu1 }
 0x64f   :  { %v7221_v32 = vpop.f32.mrb[71].mxu1 }
 0x650   :  { %v7222_v51 = vadd.f32 %v7221_v32, %v7220_v48 }
 0x652   :  { %v3300_v41 = vadd.f32 %v7222_v51, %v7187_v29  ;;  %v11653_v29 = vsub.s32 0, %v3317_v14 }
 0x654   :  { %v3304_v61 = vmul.f32 0.001953125, %v3300_v41  ;;  %14781 = vst [vmem:[#allocation9_spill] sm:$0xff] %v11653_v29 }
 0x656   :  { %v3306_v57 = vsub.f32 %v3304_v61, %v3305_v19 }
 0x658   :  { %v3307_v39 = vmax.f32 %v3306_v57, 0.0 }
 0x65a   :  { %v3309_v46 = vadd.f32 1e-05, %v3307_v39  ;;  %v14782_v39 = vld [vmem:[#allocation20_spill] sm:$0xff] }
 0x65c   :  { %9177 = vrsqrt.f32 %v3309_v46  ;;  %v14783_v46 = vld [vmem:[#allocation21_spill] sm:$0xff] }
 0x666   :  { %v9178_v48 = vpop.eup %9177 }
 0x667   :  { %v3311_v32 = vmul.f32 %v9178_v48, %v3308_v23  ;;  %v14788_v48 = vld [vmem:[#allocation26_spill] sm:$0xff] }
 0x669   :  { %v3313_v24 = vmul.f32 %v3311_v32, %v3303_v45  ;;  %v11659_v51 = vrot.slane %v3311_v32, %v11653_v29 }
 0x66b   :  { %v3314_v1 = vsub.f32 %v3312_v59, %v3313_v24  ;;  %v11663_v41 = vmul.f32 %v11659_v51, %v11161_v2  ;;  %v11667_v19 = vmul.f32 %v11659_v51, %v11165_v7  ;;  %v11671_v14 = vmul.f32 %v11659_v51, %v14768_v26  ;;  %v14789_v59 = vld [vmem:[#allocation27_spill] sm:$0xff] }
 0x66c   :  { %v11675_v61 = vmul.f32 %v11659_v51, %v14767_v52  ;;  %v11679_v45 = vmul.f32 %v11659_v51, %v14770_v18  ;;  %v11683_v2 = vmul.f32 %v11659_v51, %v14769_v56  ;;  %v11687_v7 = vmul.f32 %v11659_v51, %v14772_v28 }
 0x66d   :  { %v11690_v57 = vrot.slane %v3314_v1, %v11653_v29  ;;  %v11694_v26 = vmul.f32 %v11659_v51, %v14771_v30  ;;  %v11698_v52 = vmul.f32 %v11659_v51, %v14774_v40  ;;  %v11702_v18 = vmul.f32 %v11659_v51, %v14773_v54  ;;  %v14790_v1 = vld [vmem:[#allocation28_spill] sm:$0xff] }
 0x66e   :  { %v11706_v56 = vmul.f32 %v11659_v51, %v14776_v63  ;;  %v11710_v28 = vmul.f32 %v11659_v51, %v14775_v20  ;;  %v11714_v30 = vmul.f32 %v11659_v51, %v14777_v62  ;;  %v11718_v40 = vmul.f32 %v11659_v51, %v11232_v0  ;;  %v14794_v29 = vld [vmem:[#allocation32_spill] sm:$0xff] }
 0x66f   :  { %v11722_v54 = vmul.f32 %v11659_v51, %v14779_v49  ;;  %v11726_v63 = vmul.f32 %v11659_v51, %v14778_v13  ;;  %v11730_v20 = vmul.f32 %v11659_v51, %v14782_v39  ;;  %v11734_v62 = vmul.f32 %v11659_v51, %v14783_v46  ;;  %v14791_v46 = vld [vmem:[#allocation29_spill] sm:$0xff] }
 0x670   :  { %v11738_v0 = vmul.f32 %v11659_v51, %v14784_v55  ;;  %v11742_v49 = vmul.f32 %v11659_v51, %v14785_v60  ;;  %v11746_v13 = vmul.f32 %v11659_v51, %v14786_v25  ;;  %v11750_v23 = vmul.f32 %v11659_v51, %v14787_v43  ;;  %v14792_v25 = vld [vmem:[#allocation30_spill] sm:$0xff] }
 0x671   :  { %v11754_v32 = vmul.f32 %v11659_v51, %v14788_v48  ;;  %v11758_v24 = vmul.f32 %v11659_v51, %v14789_v59  ;;  %v11762_v39 = vmul.f32 %v11659_v51, %v14790_v1  ;;  %v11766_v55 = vmul.f32 %v11659_v51, %v14791_v46  ;;  %v14793_v48 = vld [vmem:[#allocation31_spill] sm:$0xff] }
 0x672   :  { %v11770_v60 = vmul.f32 %v11659_v51, %v11320_v11  ;;  %v11774_v43 = vmul.f32 %v11659_v51, %v14792_v25  ;;  %v11778_v59 = vmul.f32 %v11659_v51, %v14793_v48  ;;  %v11782_v1 = vmul.f32 %v11659_v51, %v14794_v29 }
 0x673   :  { %v11786_v46 = vmul.f32 %v11659_v51, %v11348_v5  ;;  %v11790_v11 = vmul.f32 %v11659_v51, %v14795_v34  ;;  %v11794_v25 = vmul.f32 %v11659_v51, %v11358_v17  ;;  %v11798_v48 = vmul.f32 %v11659_v51, %v11361_v22 }
 0x674   :  { %v11802_v29 = vmul.f32 %v11659_v51, %v11366_v8  ;;  %v11806_v5 = vmul.f32 %v11659_v51, %v11369_v44  ;;  %v11810_v34 = vmul.f32 %v11659_v51, %v11372_v16  ;;  %v11814_v17 = vmul.f32 %v11659_v51, %v11375_v35 }
 0x675   :  { %v11818_v22 = vmul.f32 %v11659_v51, %v11378_v21  ;;  %v11822_v8 = vmul.f32 %v11659_v51, %v11381_v9  ;;  %v11826_v44 = vmul.f32 %v11659_v51, %v11384_v50  ;;  %v11830_v16 = vmul.f32 %v11659_v51, %v11387_v38 }
 0x676   :  { %v11834_v35 = vmul.f32 %v11659_v51, %v11390_v6  ;;  %v11838_v21 = vmul.f32 %v11659_v51, %v11393_v53  ;;  %v11842_v9 = vmul.f32 %v11659_v51, %v11396_v37  ;;  %v11846_v50 = vmul.f32 %v11659_v51, %v11399_v3 }
 0x677   :  { %v11850_v38 = vmul.f32 %v11659_v51, %v11402_v15  ;;  %v11854_v6 = vmul.f32 %v11659_v51, %v11405_v27  ;;  %v11858_v53 = vmul.f32 %v11659_v51, %v11408_v4  ;;  %v11862_v37 = vmul.f32 %v11659_v51, %v11411_v33 }
 0x678   :  { %v11866_v3 = vmul.f32 %v11659_v51, %v11418_v12  ;;  %v11870_v15 = vmul.f32 %v11659_v51, %v11421_v31  ;;  %v11874_v27 = vmul.f32 %v11659_v51, %v11428_v58  ;;  %v11878_v4 = vmul.f32 %v11659_v51, %v11431_v36 }
 0x679   :  { %v11882_v33 = vmul.f32 %v11659_v51, %v11438_v47  ;;  %v11886_v12 = vmul.f32 %v11659_v51, %v11441_v10  ;;  %v11890_v31 = vmul.f32 %v11659_v51, %v11448_v42 }
 0x67a   :  { %14796 = vst [vmem:[#allocation12_spill] sm:$0xff] %v11870_v15  ;;  %14797 = vst [vmem:[#allocation13_spill] sm:$0xff] %v11874_v27  ;;  %v14802_v15 = vld [vmem:[#allocation34_spill] sm:$0xff]  ;;  %v14804_v27 = vld [vmem:[#allocation35_spill] sm:$0xff] }
 0x67b   :  { %14798 = vst [vmem:[#allocation11_spill] sm:$0xff] %v11878_v4  ;;  %14799 = vst [vmem:[#allocation15_spill] sm:$0xff] %v11882_v33  ;;  %v11894_v58 = vmul.f32 %v11659_v51, %v14802_v15  ;;  %v11898_v36 = vmul.f32 %v11659_v51, %v14804_v27  ;;  %v14805_v4 = vld [vmem:[#allocation36_spill] sm:$0xff]  ;;  %v14806_v33 = vld [vmem:[#allocation37_spill] sm:$0xff] }
 0x67c   :  { %14800 = vst [vmem:[#allocation14_spill] sm:$0xff] %v11886_v12  ;;  %14801 = vst [vmem:[#allocation8_spill] sm:$0xff] %v11890_v31  ;;  %v11902_v47 = vmul.f32 %v11659_v51, %v14805_v4  ;;  %v11906_v10 = vmul.f32 %v11659_v51, %v14806_v33  ;;  %v14807_v12 = vld [vmem:[#allocation38_spill] sm:$0xff]  ;;  %v14808_v31 = vld [vmem:[#allocation39_spill] sm:$0xff]  ;;  %v11922_v4 = vadd.f32 %v11690_v57, %v11663_v41 }
 0x67d   :  { %14803 = vst [vmem:[#allocation7_spill] sm:$0xff] %v11894_v58  ;;  %v11910_v42 = vmul.f32 %v11659_v51, %v14807_v12  ;;  %v11914_v15 = vmul.f32 %v11659_v51, %v14808_v31  ;;  %v14809_v58 = vld [vmem:[#allocation40_spill] sm:$0xff]  ;;  %v11926_v33 = vadd.f32 %v11690_v57, %v11667_v19  ;;  %v11930_v12 = vadd.f32 %v11690_v57, %v11671_v14 }
 0x67e   :  { %v11918_v27 = vmul.f32 %v11659_v51, %v14809_v58  ;;  %v11934_v31 = vadd.f32 %v11690_v57, %v11675_v61  ;;  %v11938_v51 = vadd.f32 %v11690_v57, %v11679_v45  ;;  %v11942_v41 = vadd.f32 %v11690_v57, %v11683_v2 }
 0x67f   :  { %v11946_v19 = vadd.f32 %v11690_v57, %v11687_v7  ;;  %v11950_v14 = vadd.f32 %v11690_v57, %v11694_v26  ;;  %v11954_v61 = vadd.f32 %v11690_v57, %v11698_v52  ;;  %v11958_v45 = vadd.f32 %v11690_v57, %v11702_v18 }
 0x680   :  { %v11962_v2 = vadd.f32 %v11690_v57, %v11706_v56  ;;  %v11966_v7 = vadd.f32 %v11690_v57, %v11710_v28  ;;  %v11970_v26 = vadd.f32 %v11690_v57, %v11714_v30  ;;  %v11974_v52 = vadd.f32 %v11690_v57, %v11718_v40 }
 0x681   :  { %v11978_v18 = vadd.f32 %v11690_v57, %v11722_v54  ;;  %v11982_v56 = vadd.f32 %v11690_v57, %v11726_v63  ;;  %v11986_v28 = vadd.f32 %v11690_v57, %v11730_v20  ;;  %v11990_v30 = vadd.f32 %v11690_v57, %v11734_v62  ;;  %v14820_v58 = vld [vmem:[#allocation12_spill] sm:$0xff] }
 0x682   :  { %v11994_v40 = vadd.f32 %v11690_v57, %v11738_v0  ;;  %v11998_v54 = vadd.f32 %v11690_v57, %v11742_v49  ;;  %v12002_v63 = vadd.f32 %v11690_v57, %v11746_v13  ;;  %v12006_v20 = vadd.f32 %v11690_v57, %v11750_v23 }
 0x683   :  { %v12010_v62 = vadd.f32 %v11690_v57, %v11754_v32  ;;  %v12014_v0 = vadd.f32 %v11690_v57, %v11758_v24  ;;  %v12018_v49 = vadd.f32 %v11690_v57, %v11762_v39  ;;  %v12022_v13 = vadd.f32 %v11690_v57, %v11766_v55 }
 0x684   :  { %v12026_v23 = vadd.f32 %v11690_v57, %v11770_v60  ;;  %v12030_v32 = vadd.f32 %v11690_v57, %v11774_v43  ;;  %v12034_v24 = vadd.f32 %v11690_v57, %v11778_v59  ;;  %v12038_v39 = vadd.f32 %v11690_v57, %v11782_v1 }
 0x685   :  { %v12042_v55 = vadd.f32 %v11690_v57, %v11786_v46  ;;  %v12046_v60 = vadd.f32 %v11690_v57, %v11790_v11  ;;  %v12050_v43 = vadd.f32 %v11690_v57, %v11794_v25  ;;  %v12054_v59 = vadd.f32 %v11690_v57, %v11798_v48 }
 0x686   :  { %v12058_v1 = vadd.f32 %v11690_v57, %v11802_v29  ;;  %v12062_v46 = vadd.f32 %v11690_v57, %v11806_v5  ;;  %v12066_v11 = vadd.f32 %v11690_v57, %v11810_v34  ;;  %v12070_v25 = vadd.f32 %v11690_v57, %v11814_v17 }
 0x687   :  { %v12074_v48 = vadd.f32 %v11690_v57, %v11818_v22  ;;  %v12078_v29 = vadd.f32 %v11690_v57, %v11822_v8  ;;  %v12082_v5 = vadd.f32 %v11690_v57, %v11826_v44  ;;  %v12086_v34 = vadd.f32 %v11690_v57, %v11830_v16 }
 0x688   :  { %v12090_v17 = vadd.f32 %v11690_v57, %v11834_v35  ;;  %v12094_v22 = vadd.f32 %v11690_v57, %v11838_v21  ;;  %v12098_v8 = vadd.f32 %v11690_v57, %v11842_v9  ;;  %v12102_v44 = vadd.f32 %v11690_v57, %v11846_v50 }
 0x689   :  { %14810 = vst [vmem:[#allocation10_spill] sm:$0xff] %v12078_v29  ;;  %v12106_v16 = vadd.f32 %v11690_v57, %v11850_v38  ;;  %v12110_v35 = vadd.f32 %v11690_v57, %v11854_v6  ;;  %v12114_v21 = vadd.f32 %v11690_v57, %v11858_v53  ;;  %v12118_v9 = vadd.f32 %v11690_v57, %v11862_v37 }
 0x68a   :  { %14811 = vst [vmem:[#allocation16_spill] sm:$0xff] %v12090_v17  ;;  %14812 = vst [vmem:[#allocation17_spill] sm:$0xff] %v12094_v22  ;;  %v12122_v50 = vadd.f32 %v11690_v57, %v11866_v3  ;;  %v12126_v38 = vadd.f32 %v11690_v57, %v14820_v58 }
 0x68b   :  { %14813 = vst [vmem:[#allocation19_spill] sm:$0xff] %v12098_v8  ;;  %14814 = vst [vmem:[#allocation18_spill] sm:$0xff] %v12102_v44 }
 0x68c   :  { %14815 = vst [vmem:[#allocation20_spill] sm:$0xff] %v12106_v16  ;;  %14816 = vst [vmem:[#allocation21_spill] sm:$0xff] %v12110_v35  ;;  %v14822_v16 = vld [vmem:[#allocation13_spill] sm:$0xff]  ;;  %v14823_v35 = vld [vmem:[#allocation11_spill] sm:$0xff] }
 0x68d   :  { %14817 = vst [vmem:[#allocation22_spill] sm:$0xff] %v12114_v21  ;;  %14818 = vst [vmem:[#allocation23_spill] sm:$0xff] %v12118_v9  ;;  %v12130_v6 = vadd.f32 %v11690_v57, %v14822_v16  ;;  %v12134_v53 = vadd.f32 %v11690_v57, %v14823_v35  ;;  %v14824_v21 = vld [vmem:[#allocation15_spill] sm:$0xff]  ;;  %v14825_v9 = vld [vmem:[#allocation14_spill] sm:$0xff]  ;;  %v12154_v35 = vadd.f32 %v11690_v57, %v11898_v36 }
 0x68e   :  { %14819 = vst [vmem:[#allocation24_spill] sm:$0xff] %v12122_v50  ;;  %14821 = vst [vmem:[#allocation25_spill] sm:$0xff] %v12126_v38  ;;  %v12138_v37 = vadd.f32 %v11690_v57, %v14824_v21  ;;  %v12142_v3 = vadd.f32 %v11690_v57, %v14825_v9  ;;  %v14826_v50 = vld [vmem:[#allocation8_spill] sm:$0xff]  ;;  %v14827_v38 = vld [vmem:[#allocation7_spill] sm:$0xff]  ;;  %v12158_v21 = vadd.f32 %v11690_v57, %v11902_v47  ;;  %v14604_v47 = vmax.f32 %v11926_v33, 0.0 }
 0x68f   :  { %v12146_v58 = vadd.f32 %v11690_v57, %v14826_v50  ;;  %v12150_v16 = vadd.f32 %v11690_v57, %v14827_v38  ;;  %14828 = vst [vmem:[#allocation26_spill] sm:$0xff] %v12154_v35  ;;  %v12162_v9 = vadd.f32 %v11690_v57, %v11906_v10  ;;  %v12166_v50 = vadd.f32 %v11690_v57, %v11910_v42 }
 0x690   :  { %14829 = vst [vmem:[#allocation27_spill] sm:$0xff] %v12158_v21  ;;  %v12170_v38 = vadd.f32 %v11690_v57, %v11914_v15  ;;  %v12174_v36 = vadd.f32 %v11690_v57, %v11918_v27  ;;  %v3455_v35 = vmax.f32 %v11922_v4, 0.0  ;;  %v14606_v21 = vmax.f32 %v11930_v12, 0.0  ;;  %3665 = vst [vmem:[#allocation3 + $0x30] sm:$0xff] %v14604_v47 }
 0x691   :  { %14830 = vst [vmem:[#allocation28_spill] sm:$0xff] %v12162_v9  ;;  %14831 = vst [vmem:[#allocation29_spill] sm:$0xff] %v12166_v50  ;;  %v14605_v10 = vmax.f32 %v11934_v31, 0.0  ;;  %v14607_v50 = vmax.f32 %v11946_v19, 0.0  ;;  %v14608_v15 = vmax.f32 %v11950_v14, 0.0  ;;  %v14610_v27 = vmax.f32 %v11962_v2, 0.0 }
 0x692   :  { %14832 = vst [vmem:[#allocation30_spill] sm:$0xff] %v12170_v38  ;;  %v14609_v38 = vmax.f32 %v11954_v61, 0.0  ;;  %3664 = vst [vmem:[#allocation3 + $0x28] sm:$0xff] %v3455_v35  ;;  %4523 = vmatprep.mubr.f32.mxu1 %v3455_v35  ;;  %v14833_v57 = vmax.f32 %v11938_v51, 0.0  ;;  %v14834_v47 = vmax.f32 %v11942_v41, 0.0  ;;  %v14611_v35 = vmax.f32 %v11978_v18, 0.0 }
 0x693   :  { %3666 = vst [vmem:[#allocation3 + $0x48] sm:$0xff] %v14606_v21  ;;  %3667 = vst [vmem:[#allocation3 + $0x50] sm:$0xff] %v14605_v10  ;;  %v14612_v4 = vmax.f32 %v11982_v56, 0.0  ;;  %v14613_v9 = vmax.f32 %v11986_v28, 0.0  ;;  %v14615_v10 = vmax.f32 %v12014_v0, 0.0  ;;  %v14616_v21 = vmax.f32 %v12018_v49, 0.0 }
 0x694   :  { %3668 = vst [vmem:[#allocation3 + $0x68] sm:$0xff] %v14833_v57  ;;  %3669 = vst [vmem:[#allocation3 + $0x70] sm:$0xff] %v14834_v47  ;;  %v14835_v57 = vmax.f32 %v11958_v45, 0.0  ;;  %v14617_v47 = vmax.f32 %v11994_v40, 0.0  ;;  %v14619_v42 = vmax.f32 %v12054_v59, 0.0 }
 0x695   :  { %3670 = vst [vmem:[#allocation3 + $0x88] sm:$0xff] %v14607_v50  ;;  %3671 = vst [vmem:[#allocation3 + $0x90] sm:$0xff] %v14608_v15  ;;  %v14836_v50 = vmax.f32 %v11966_v7, 0.0  ;;  %v14837_v15 = vmax.f32 %v11970_v26, 0.0 }
 0x696   :  { %3672 = vst [vmem:[#allocation3 + $0xa8] sm:$0xff] %v14609_v38  ;;  %3673 = vst [vmem:[#allocation3 + $0xb0] sm:$0xff] %v14835_v57  ;;  %v14838_v38 = vmax.f32 %v11974_v52, 0.0  ;;  %v14614_v57 = vmax.f32 %v12010_v62, 0.0 }
 0x697   :  { %3674 = vst [vmem:[#allocation3 + $0xc8] sm:$0xff] %v14610_v27  ;;  %3675 = vst [vmem:[#allocation3 + $0xd0] sm:$0xff] %v14836_v50  ;;  %v14839_v50 = vmax.f32 %v11990_v30, 0.0  ;;  %v14620_v27 = vmax.f32 %v12050_v43, 0.0 }
 0x698   :  { %3676 = vst [vmem:[#allocation3 + $0xe8] sm:$0xff] %v14837_v15  ;;  %3677 = vst [vmem:[#allocation3 + $0xf0] sm:$0xff] %v14838_v38  ;;  %v14618_v38 = vmax.f32 %v12026_v23, 0.0  ;;  %v3486_v15 = vmax.f32 %v12046_v60, 0.0  ;;  %v14854_v60 = vld [vmem:[#allocation20_spill] sm:$0xff] }
 0x699   :  { %3678 = vst [vmem:[#allocation3 + $0x108] sm:$0xff] %v14611_v35  ;;  %3679 = vst [vmem:[#allocation3 + $0x110] sm:$0xff] %v14612_v4  ;;  %v14840_v35 = vmax.f32 %v11998_v54, 0.0  ;;  %v14841_v4 = vmax.f32 %v12002_v63, 0.0 }
 0x69a   :  { %3680 = vst [vmem:[#allocation3 + $0x128] sm:$0xff] %v14613_v9  ;;  %3681 = vst [vmem:[#allocation3 + $0x130] sm:$0xff] %v14839_v50  ;;  %v14842_v9 = vmax.f32 %v12006_v20, 0.0  ;;  %v3485_v50 = vmax.f32 %v12042_v55, 0.0  ;;  %v14621_v55 = vmax.f32 %v12058_v1, 0.0 }
 0x69b   :  { %3682 = vst [vmem:[#allocation3 + $0x148] sm:$0xff] %v14617_v47  ;;  %3683 = vst [vmem:[#allocation3 + $0x150] sm:$0xff] %v14840_v35  ;;  %v14857_v47 = vld [vmem:[#allocation23_spill] sm:$0xff] }
 0x69c   :  { %3684 = vst [vmem:[#allocation3 + $0x168] sm:$0xff] %v14841_v4  ;;  %3685 = vst [vmem:[#allocation3 + $0x170] sm:$0xff] %v14842_v9  ;;  %v14843_v4 = vmax.f32 %v12022_v13, 0.0  ;;  %v14856_v9 = vld [vmem:[#allocation22_spill] sm:$0xff]  ;;  %v4349_v35 = vld [vmem:[#allocation4 + $0x160] sm:$0xff] }
 0x69d   :  { %3686 = vst [vmem:[#allocation3 + $0x188] sm:$0xff] %v14614_v57  ;;  %3687 = vst [vmem:[#allocation3 + $0x190] sm:$0xff] %v14615_v10  ;;  %v14844_v57 = vmax.f32 %v12030_v32, 0.0  ;;  %v14845_v10 = vmax.f32 %v12034_v24, 0.0 }
 0x69e   :  { %3688 = vst [vmem:[#allocation3 + $0x1a8] sm:$0xff] %v14616_v21  ;;  %3689 = vst [vmem:[#allocation3 + $0x1b0] sm:$0xff] %v14843_v4  ;;  %v14846_v21 = vmax.f32 %v12038_v39, 0.0  ;;  %v12272_v4 = vld [vmem:[#allocation3 + $0x27] sm:$0xff] }
 0x69f   :  { %3690 = vst [vmem:[#allocation3 + $0x1c8] sm:$0xff] %v14618_v38  ;;  %3691 = vst [vmem:[#allocation3 + $0x1d0] sm:$0xff] %v14844_v57  ;;  %4524 = vmatmul.mubr.f32.gmra.mrb[76].mxu1 %v12272_v4  ;;  %v14853_v38 = vmax.f32 %v11926_v33, 0.0  ;;  %v14861_v33 = vmax.f32 %v12086_v34, 0.0  ;;  %v12330_v57 = vld [vmem:[#allocation3 + $0x2f] sm:$0xff] }
 0x6a0   :  { %3692 = vst [vmem:[#allocation3 + $0x1e8] sm:$0xff] %v14845_v10  ;;  %3693 = vst [vmem:[#allocation3 + $0x1f0] sm:$0xff] %v14846_v21  ;;  %v12282_v10 = vld [vmem:[#allocation3 + $0x49] sm:$0xff]  ;;  %v12285_v21 = vld [vmem:[#allocation3 + $0x51] sm:$0xff] }
 0x6a1   :  { %14847 = vst [vmem:[#allocation31_spill] sm:$0xff] %v12272_v4  ;;  %3694 = vst [vmem:[#allocation3 + $0x208] sm:$0xff] %v3485_v50  ;;  %v14850_v50 = vmax.f32 %v12062_v46, 0.0  ;;  %7603 = vmatprep.mubr.f32.mxu0 %v12282_v10  ;;  %4528 = vmatprep.mubr.f32.mxu1 %v14853_v38  ;;  %v12315_v38 = vld [vmem:[#allocation3 + $0x69] sm:$0xff] }
 0x6a2   :  { %3695 = vst [vmem:[#allocation3 + $0x210] sm:$0xff] %v3486_v15  ;;  %3696 = vst [vmem:[#allocation3 + $0x268] sm:$0xff] %v14620_v27  ;;  %v14852_v27 = vmax.f32 %v12070_v25, 0.0  ;;  %v14855_v15 = vld [vmem:[#allocation21_spill] sm:$0xff]  ;;  %7604 = vmatmul.mubr.f32.vlgmr.msra.gmra.mrb[128].mxu0 %v12285_v21 }
 0x6a3   :  { %3697 = vst [vmem:[#allocation3 + $0x270] sm:$0xff] %v14619_v42  ;;  %14848 = vst [vmem:[#allocation32_spill] sm:$0xff] %v12282_v10  ;;  %v14851_v42 = vmax.f32 %v12066_v11, 0.0  ;;  %v14864_v4 = vld [vmem:[#allocation25_spill] sm:$0xff]  ;;  %7606 = vmatprep.mubr.f32.mxu0 %v12315_v38  ;;  %v4350_v10 = vld [vmem:[#allocation4 + $0x168] sm:$0xff]  ;;  %4529 = vmatmul.mubr.f32.gmra.mrb[78].mxu1 %v12330_v57 }
 0x6a4   :  { %14849 = vst [vmem:[#allocation33_spill] sm:$0xff] %v12285_v21  ;;  %3698 = vst [vmem:[#allocation3 + $0x288] sm:$0xff] %v14621_v55  ;;  %v14863_v55 = vld [vmem:[#allocation24_spill] sm:$0xff]  ;;  %v14868_v21 = vmax.f32 %v12102_v44, 0.0  ;;  %v14875_v44 = vld [vmem:[#allocation27_spill] sm:$0xff] }
 0x6a5   :  { %3699 = vst [vmem:[#allocation3 + $0x290] sm:$0xff] %v14850_v50  ;;  %3700 = vst [vmem:[#allocation3 + $0x2a8] sm:$0xff] %v14851_v42  ;;  %v14858_v50 = vmax.f32 %v12074_v48, 0.0  ;;  %v14859_v42 = vmax.f32 %v12078_v29, 0.0  ;;  %v3510_v29 = vmax.f32 %v12142_v3, 0.0 }
 0x6a6   :  { %3701 = vst [vmem:[#allocation3 + $0x2b0] sm:$0xff] %v14852_v27  ;;  %v14860_v27 = vmax.f32 %v12082_v5, 0.0  ;;  %3705 = vst [vmem:[#allocation3 + $0x2f0] sm:$0xff] %v14861_v33  ;;  %v14867_v33 = vmax.f32 %v12098_v8, 0.0  ;;  %v14876_v8 = vld [vmem:[#allocation28_spill] sm:$0xff] }
 0x6a7   :  { %3702 = vst [vmem:[#allocation3 + $0x2c8] sm:$0xff] %v14858_v50  ;;  %3703 = vst [vmem:[#allocation3 + $0x2d0] sm:$0xff] %v14859_v42  ;;  %v14865_v42 = vmax.f32 %v12090_v17, 0.0  ;;  %v3509_v50 = vmax.f32 %v12138_v37, 0.0  ;;  %v14874_v37 = vld [vmem:[#allocation26_spill] sm:$0xff]  ;;  %v14877_v17 = vld [vmem:[#allocation29_spill] sm:$0xff] }
 0x6a8   :  { %3704 = vst [vmem:[#allocation3 + $0x2e8] sm:$0xff] %v14860_v27  ;;  %14862 = vst [vmem:[#allocation34_spill] sm:$0xff] %v12315_v38  ;;  %v14866_v27 = vmax.f32 %v12094_v22, 0.0  ;;  %v3512_v22 = vmax.f32 %v12150_v16, 0.0  ;;  %v14873_v38 = vmax.f32 %v14857_v47, 0.0  ;;  %v3513_v3 = vmax.f32 %v14874_v37, 0.0 }
 0x6a9   :  { %3706 = vst [vmem:[#allocation3 + $0x308] sm:$0xff] %v14865_v42  ;;  %3708 = vst [vmem:[#allocation3 + $0x328] sm:$0xff] %v14867_v33  ;;  %v3511_v42 = vmax.f32 %v12146_v58, 0.0  ;;  %v14871_v33 = vmax.f32 %v14855_v15, 0.0  ;;  %v3514_v58 = vmax.f32 %v14875_v44, 0.0  ;;  %v3515_v16 = vmax.f32 %v14876_v8, 0.0 }
 0x6aa   :  { %3707 = vst [vmem:[#allocation3 + $0x310] sm:$0xff] %v14866_v27  ;;  %3709 = vst [vmem:[#allocation3 + $0x330] sm:$0xff] %v14868_v21  ;;  %v14870_v27 = vmax.f32 %v14854_v60, 0.0  ;;  %v14872_v21 = vmax.f32 %v14856_v9, 0.0  ;;  %v3516_v60 = vmax.f32 %v14877_v17, 0.0  ;;  %v14882_v44 = vmax.f32 %v11930_v12, 0.0 }
 0x6ab   :  { %14869 = vst [vmem:[#allocation35_spill] sm:$0xff] %v12330_v57  ;;  %3711 = vst [vmem:[#allocation3 + $0x350] sm:$0xff] %v14871_v33  ;;  %v14879_v33 = vmax.f32 %v14864_v4, 0.0  ;;  %v12357_v57 = vld [vmem:[#allocation3 + $0x71] sm:$0xff]  ;;  %v3518_v17 = vmax.f32 %v12174_v36, 0.0  ;;  %v12367_v12 = vld [vmem:[#allocation3 + $0x47] sm:$0xff] }
 0x6ac   :  { %3710 = vst [vmem:[#allocation3 + $0x348] sm:$0xff] %v14870_v27  ;;  %3712 = vst [vmem:[#allocation3 + $0x368] sm:$0xff] %v14872_v21  ;;  %v14878_v27 = vmax.f32 %v14863_v55, 0.0  ;;  %v14880_v21 = vmax.f32 %v12130_v6, 0.0  ;;  %4533 = vmatprep.mubr.f32.mxu1 %v14882_v44  ;;  %v14883_v8 = vld [vmem:[#allocation30_spill] sm:$0xff]  ;;  %7607 = vmatmul.mubr.f32.gmra.mrb[130].mxu0 %v12357_v57  ;;  %v12382_v44 = vld [vmem:[#allocation3 + $0x67] sm:$0xff] }
 0x6ad   :  { %3713 = vst [vmem:[#allocation3 + $0x370] sm:$0xff] %v14873_v38  ;;  %3715 = vst [vmem:[#allocation3 + $0x390] sm:$0xff] %v14879_v33  ;;  %v14881_v38 = vmax.f32 %v12134_v53, 0.0  ;;  %v3517_v37 = vmax.f32 %v14883_v8, 0.0  ;;  %v8118_v33 = vpack.c.bf16 %v4350_v10, %v4349_v35  ;;  %4534 = vmatmul.mubr.f32.gmra.mrb[80].mxu1 %v12367_v12  ;;  %v12372_v35 = vld [vmem:[#allocation3 + $0xa9] sm:$0xff]  ;;  %v14885_v10 = vmov 0.0|0.0  }
 0x6ae   :  { %3714 = vst [vmem:[#allocation3 + $0x388] sm:$0xff] %v14878_v27  ;;  %3716 = vst [vmem:[#allocation3 + $0x3a8] sm:$0xff] %v14880_v21  ;;  %v12364_v27 = vld [vmem:[#allocation3 + $0x89] sm:$0xff]  ;;  %v4250_v8 = vld [vmem:[#allocation3 + $0xd1] sm:$0xff] }
 0x6af   :  { %3717 = vst [vmem:[#allocation3 + $0x3b0] sm:$0xff] %v14881_v38  ;;  %3718 = vst [vmem:[#allocation3 + $0x3c8] sm:$0xff] %v3509_v50  ;;  %v4351_v21 = vld [vmem:[#allocation4 + $0x170] sm:$0xff]  ;;  %v4352_v38 = vld [vmem:[#allocation4 + $0x178] sm:$0xff]  ;;  %7609 = vmatprep.mubr.f32.mxu0 %v12364_v27  ;;  %8119 = vmatpush1.bf16.msra.mxu1 %v8118_v33 }
 0x6b0   :  { %3719 = vst [vmem:[#allocation3 + $0x3d0] sm:$0xff] %v3510_v29  ;;  %3720 = vst [vmem:[#allocation3 + $0x3e8] sm:$0xff] %v3511_v42  ;;  %v4246_v29 = vld [vmem:[#allocation3 + $0x91] sm:$0xff]  ;;  %v8121_v36 = vpack.c.bf16 %v4352_v38, %v4351_v21  ;;  %8120 = vmatprep.subr.bf16.mxu1 %v14885_v10  ;;  %v4354_v50 = vld [vmem:[#allocation4 + $0x188] sm:$0xff]  ;;  %v14888_v21 = vmax.f32 %v11946_v19, 0.0 }
 0x6b1   :  { %3721 = vst [vmem:[#allocation3 + $0x3f0] sm:$0xff] %v3512_v22  ;;  %3722 = vst [vmem:[#allocation3 + $0x408] sm:$0xff] %v3513_v3  ;;  %v14884_v22 = vmax.f32 %v11934_v31, 0.0  ;;  %7610 = vmatmul.mubr.f32.gmra.mrb[132].mxu0 %v4246_v29  ;;  %v12376_v42 = vld [vmem:[#allocation3 + $0x4f] sm:$0xff]  ;;  %v12393_v29 = vld [vmem:[#allocation3 + $0x87] sm:$0xff] }
 0x6b2   :  { %3723 = vst [vmem:[#allocation3 + $0x410] sm:$0xff] %v3514_v58  ;;  %3724 = vst [vmem:[#allocation3 + $0x428] sm:$0xff] %v3515_v16  ;;  %7612 = vmatprep.mubr.f32.mxu0 %v12372_v35  ;;  %v4248_v3 = vld [vmem:[#allocation3 + $0xb1] sm:$0xff]  ;;  %v14886_v58 = vmax.f32 %v11938_v51, 0.0  ;;  %v4249_v16 = vld [vmem:[#allocation3 + $0xc9] sm:$0xff] }
 0x6b3   :  { %3725 = vst [vmem:[#allocation3 + $0x430] sm:$0xff] %v3516_v60  ;;  %3726 = vst [vmem:[#allocation3 + $0x448] sm:$0xff] %v3517_v37  ;;  %4538 = vmatprep.mubr.f32.mxu1 %v14884_v22  ;;  %v4353_v60 = vld [vmem:[#allocation4 + $0x180] sm:$0xff]  ;;  %8122 = vmatpush1.bf16.msra.mxu1 %v8121_v36  ;;  %v14887_v37 = vmax.f32 %v11942_v41, 0.0  ;;  %v12388_v51 = vld [vmem:[#allocation3 + $0x6f] sm:$0xff]  ;;  %v14889_v22 = vmax.f32 %v11950_v14, 0.0 }
 0x6b4   :  { %3727 = vst [vmem:[#allocation3 + $0x450] sm:$0xff] %v3518_v17  ;;  %4539 = vmatmul.mubr.f32.gmra.mrb[82].mxu1 %v12376_v42  ;;  %v8124_v31 = vpack.c.bf16 %v4354_v50, %v4353_v60  ;;  %8123 = vmatprep.subr.bf16.mxu1 %v14885_v10  ;;  %v4251_v17 = vld [vmem:[#allocation3 + $0xe9] sm:$0xff]  ;;  %v4252_v33 = vld [vmem:[#allocation3 + $0xf1] sm:$0xff]  ;;  %v14890_v50 = vmax.f32 %v11954_v61, 0.0 }
 0x6b5   :  { %4543 = vmatprep.mubr.f32.mxu1 %v14886_v58  ;;  %7613 = vmatmul.mubr.f32.gmra.mrb[134].mxu0 %v4248_v3  ;;  %v4253_v38 = vld [vmem:[#allocation3 + $0x109] sm:$0xff]  ;;  %v4254_v41 = vld [vmem:[#allocation3 + $0x111] sm:$0xff] }
 0x6b6   :  { %7615 = vmatprep.mubr.f32.mxu0 %v4249_v16  ;;  %v4255_v36 = vld [vmem:[#allocation3 + $0x129] sm:$0xff]  ;;  %v4256_v19 = vld [vmem:[#allocation3 + $0x131] sm:$0xff] }
 0x6b7   :  { %8125 = vmatpush1.bf16.msra.mxu1 %v8124_v31  ;;  %v12398_v60 = vld [vmem:[#allocation3 + $0x8f] sm:$0xff]  ;;  %v12403_v58 = vld [vmem:[#allocation3 + $0xa7] sm:$0xff]  ;;  %v4356_v31 = vld [vmem:[#allocation4 + $0x198] sm:$0xff] }
 0x6b8   :  { %4544 = vmatmul.mubr.f32.gmra.mrb[84].mxu1 %v12382_v44  ;;  %8126 = vmatprep.subr.bf16.mxu1 %v14885_v10  ;;  %v4257_v3 = vld [vmem:[#allocation3 + $0x149] sm:$0xff]  ;;  %v4258_v16 = vld [vmem:[#allocation3 + $0x151] sm:$0xff] }
 0x6b9   :  { %4548 = vmatprep.mubr.f32.mxu1 %v14887_v37  ;;  %7616 = vmatmul.mubr.f32.gmra.mrb[136].mxu0 %v4250_v8  ;;  %v4355_v14 = vld [vmem:[#allocation4 + $0x190] sm:$0xff]  ;;  %v14891_v8 = vmax.f32 %v11958_v45, 0.0 }
 0x6ba   :  { %7618 = vmatprep.mubr.f32.mxu0 %v4251_v17  ;;  %v8127_v37 = vpack.c.bf16 %v4356_v31, %v4355_v14  ;;  %v4259_v17 = vld [vmem:[#allocation3 + $0x169] sm:$0xff]  ;;  %v4360_v14 = vld [vmem:[#allocation4 + $0x1b8] sm:$0xff] }
 0x6bb   :  { %v12408_v61 = vld [vmem:[#allocation3 + $0xaf] sm:$0xff] }
 0x6bc   :  { %4549 = vmatmul.mubr.f32.gmra.mrb[86].mxu1 %v12388_v51  ;;  %v4261_v45 = vld [vmem:[#allocation3 + $0x189] sm:$0xff] }
 0x6bd   :  { %4553 = vmatprep.mubr.f32.mxu1 %v14888_v21  ;;  %7619 = vmatmul.mubr.f32.gmra.mrb[138].mxu0 %v4252_v33  ;;  %v4357_v33 = vld [vmem:[#allocation4 + $0x1a0] sm:$0xff]  ;;  %v4358_v21 = vld [vmem:[#allocation4 + $0x1a8] sm:$0xff] }
 0x6be   :  { %7621 = vmatprep.mubr.f32.mxu0 %v4253_v38  ;;  %8128 = vmatpush1.bf16.msra.mxu1 %v8127_v37  ;;  %v8130_v38 = vpack.c.bf16 %v4358_v21, %v4357_v33  ;;  %v4263_v31 = vld [vmem:[#allocation3 + $0x1a9] sm:$0xff]  ;;  %v14894_v37 = vmax.f32 %v11970_v26, 0.0  ;;  %v4266_v33 = vld [vmem:[#allocation3 + $0x1d1] sm:$0xff]  ;;  %v14895_v21 = vmax.f32 %v11974_v52, 0.0 }
 0x6bf   :  { %8129 = vmatprep.subr.bf16.mxu1 %v14885_v10  ;;  %v4268_v26 = vld [vmem:[#allocation3 + $0x1f1] sm:$0xff]  ;;  %v4271_v52 = vld [vmem:[#allocation3 + $0x229] sm:$0xff] }
 0x6c0   :  { %4554 = vmatmul.mubr.f32.gmra.mrb[88].mxu1 %v12393_v29 }
 0x6c1   :  { %4558 = vmatprep.mubr.f32.mxu1 %v14889_v22  ;;  %7622 = vmatmul.mubr.f32.gmra.mrb[140].mxu0 %v4254_v41  ;;  %v4260_v41 = vld [vmem:[#allocation3 + $0x171] sm:$0xff]  ;;  %v14892_v22 = vmax.f32 %v11962_v2, 0.0 }
 0x6c2   :  { %7624 = vmatprep.mubr.f32.mxu0 %v4255_v36  ;;  %v12414_v36 = vld [vmem:[#allocation3 + $0xc7] sm:$0xff]  ;;  %8131 = vmatpush1.bf16.msra.mxu1 %v8130_v38 }
 0x6c3   :  { %8132 = vmatprep.subr.bf16.mxu1 %v14885_v10  ;;  %v4267_v38 = vld [vmem:[#allocation3 + $0x1e9] sm:$0xff] }
 0x6c4   :  { %4559 = vmatmul.mubr.f32.gmra.mrb[90].mxu1 %v12398_v60 }
 0x6c5   :  { %4563 = vmatprep.mubr.f32.mxu1 %v14890_v50  ;;  %7625 = vmatmul.mubr.f32.gmra.mrb[142].mxu0 %v4256_v19  ;;  %v4262_v19 = vld [vmem:[#allocation3 + $0x191] sm:$0xff]  ;;  %v14893_v50 = vmax.f32 %v11966_v7, 0.0  ;;  %v12426_v7 = vld [vmem:[#allocation3 + $0xe7] sm:$0xff] }
 0x6c6   :  { %7627 = vmatprep.mubr.f32.mxu0 %v4257_v3  ;;  %v4359_v3 = vld [vmem:[#allocation4 + $0x1b0] sm:$0xff] }
 0x6c7   :  { %v8133_v2 = vpack.c.bf16 %v4360_v14, %v4359_v3  ;;  %v14897_v3 = vmax.f32 %v11982_v56, 0.0  ;;  %v4361_v14 = vld [vmem:[#allocation4 + $0x1c0] sm:$0xff] }
 0x6c8   :  { %4564 = vmatmul.mubr.f32.gmra.mrb[92].mxu1 %v12403_v58  ;;  %v12447_v56 = vld [vmem:[#allocation3 + $0x127] sm:$0xff] }
 0x6c9   :  { %4568 = vmatprep.mubr.f32.mxu1 %v14891_v8  ;;  %7628 = vmatmul.mubr.f32.gmra.mrb[144].mxu0 %v4258_v16  ;;  %v12420_v16 = vld [vmem:[#allocation3 + $0xcf] sm:$0xff] }
 0x6ca   :  { %7630 = vmatprep.mubr.f32.mxu0 %v4259_v17  ;;  %v4264_v8 = vld [vmem:[#allocation3 + $0x1b1] sm:$0xff]  ;;  %8134 = vmatpush1.bf16.msra.mxu1 %v8133_v2  ;;  %v4265_v17 = vld [vmem:[#allocation3 + $0x1c9] sm:$0xff] }
 0x6cb   :  { %8135 = vmatprep.subr.bf16.mxu1 %v14885_v10 }
 0x6cc   :  { %4569 = vmatmul.mubr.f32.gmra.mrb[94].mxu1 %v12408_v61 }
 0x6cd   :  { %4573 = vmatprep.mubr.f32.mxu1 %v14892_v22  ;;  %7631 = vmatmul.mubr.f32.gmra.mrb[146].mxu0 %v4260_v41  ;;  %v12431_v41 = vld [vmem:[#allocation3 + $0xef] sm:$0xff]  ;;  %v14896_v22 = vmax.f32 %v11978_v18, 0.0 }
 0x6ce   :  { %7633 = vmatprep.mubr.f32.mxu0 %v4261_v45  ;;  %v4269_v45 = vld [vmem:[#allocation3 + $0x209] sm:$0xff]  ;;  %v4272_v18 = vld [vmem:[#allocation3 + $0x231] sm:$0xff] }
 0x6d0   :  { %4574 = vmatmul.mubr.f32.gmra.mrb[96].mxu1 %v12414_v36 }
 0x6d1   :  { %4578 = vmatprep.mubr.f32.mxu1 %v14893_v50  ;;  %7634 = vmatmul.mubr.f32.gmra.mrb[148].mxu0 %v4262_v19  ;;  %v12436_v19 = vld [vmem:[#allocation3 + $0x107] sm:$0xff]  ;;  %v4270_v50 = vld [vmem:[#allocation3 + $0x211] sm:$0xff] }
 0x6d2   :  { %7636 = vmatprep.mubr.f32.mxu0 %v4263_v31  ;;  %v4362_v31 = vld [vmem:[#allocation4 + $0x1c8] sm:$0xff] }
 0x6d3   :  { %v8136_v2 = vpack.c.bf16 %v4362_v31, %v4361_v14  ;;  %v4364_v14 = vld [vmem:[#allocation4 + $0x1d8] sm:$0xff]  ;;  %v4279_v31 = vld [vmem:[#allocation3 + $0x2e9] sm:$0xff] }
 0x6d4   :  { %4579 = vmatmul.mubr.f32.gmra.mrb[98].mxu1 %v12420_v16 }
 0x6d5   :  { %4583 = vmatprep.mubr.f32.mxu1 %v14894_v37  ;;  %7637 = vmatmul.mubr.f32.gmra.mrb[150].mxu0 %v4264_v8  ;;  %v12441_v8 = vld [vmem:[#allocation3 + $0x10f] sm:$0xff]  ;;  %v14898_v37 = vmax.f32 %v11986_v28, 0.0 }
 0x6d6   :  { %7639 = vmatprep.mubr.f32.mxu0 %v4265_v17  ;;  %8137 = vmatpush1.bf16.msra.mxu1 %v8136_v2  ;;  %v4273_v17 = vld [vmem:[#allocation3 + $0x289] sm:$0xff]  ;;  %v4276_v28 = vld [vmem:[#allocation3 + $0x2b1] sm:$0xff] }
 0x6d7   :  { %8138 = vmatprep.subr.bf16.mxu1 %v14885_v10 }
 0x6d8   :  { %4584 = vmatmul.mubr.f32.gmra.mrb[100].mxu1 %v12426_v7 }
 0x6d9   :  { %4588 = vmatprep.mubr.f32.mxu1 %v14895_v21  ;;  %7640 = vmatmul.mubr.f32.gmra.mrb[152].mxu0 %v4266_v33  ;;  %v4274_v33 = vld [vmem:[#allocation3 + $0x291] sm:$0xff]  ;;  %v14899_v21 = vmax.f32 %v11990_v30, 0.0 }
 0x6da   :  { %7642 = vmatprep.mubr.f32.mxu0 %v4267_v38  ;;  %v4275_v38 = vld [vmem:[#allocation3 + $0x2a9] sm:$0xff]  ;;  %v4278_v30 = vld [vmem:[#allocation3 + $0x2d1] sm:$0xff] }
 0x6dc   :  { %4589 = vmatmul.mubr.f32.gmra.mrb[102].mxu1 %v12431_v41 }
 0x6dd   :  { %4593 = vmatprep.mubr.f32.mxu1 %v14896_v22  ;;  %7643 = vmatmul.mubr.f32.gmra.mrb[154].mxu0 %v4268_v26  ;;  %v12452_v26 = vld [vmem:[#allocation3 + $0x12f] sm:$0xff]  ;;  %v14900_v22 = vmax.f32 %v11994_v40, 0.0 }
 0x6de   :  { %7645 = vmatprep.mubr.f32.mxu0 %v4269_v45  ;;  %v4277_v45 = vld [vmem:[#allocation3 + $0x2c9] sm:$0xff]  ;;  %v4280_v40 = vld [vmem:[#allocation3 + $0x2f1] sm:$0xff] }
 0x6e0   :  { %4594 = vmatmul.mubr.f32.gmra.mrb[104].mxu1 %v12436_v19 }
 0x6e1   :  { %4598 = vmatprep.mubr.f32.mxu1 %v14897_v3  ;;  %7646 = vmatmul.mubr.f32.gmra.mrb[156].mxu0 %v4270_v50  ;;  %v14901_v50 = vmax.f32 %v11998_v54, 0.0  ;;  %v4363_v3 = vld [vmem:[#allocation4 + $0x1d0] sm:$0xff]  ;;  %v12468_v54 = vld [vmem:[#allocation3 + $0x167] sm:$0xff] }
 0x6e2   :  { %7648 = vmatprep.mubr.f32.mxu0 %v4271_v52  ;;  %v12457_v52 = vld [vmem:[#allocation3 + $0x147] sm:$0xff]  ;;  %v8139_v2 = vpack.c.bf16 %v4364_v14, %v4363_v3 }
 0x6e3   :  { %v4287_v3 = vld [vmem:[#allocation3 + $0x369] sm:$0xff]  ;;  %v4365_v14 = vld [vmem:[#allocation4 + $0x1e0] sm:$0xff] }
 0x6e4   :  { %4599 = vmatmul.mubr.f32.gmra.mrb[106].mxu1 %v12441_v8 }
 0x6e5   :  { %4603 = vmatprep.mubr.f32.mxu1 %v14898_v37  ;;  %7649 = vmatmul.mubr.f32.gmra.mrb[158].mxu0 %v4272_v18  ;;  %v12462_v18 = vld [vmem:[#allocation3 + $0x14f] sm:$0xff]  ;;  %v14902_v37 = vmax.f32 %v12002_v63, 0.0 }
 0x6e6   :  { %7651 = vmatprep.mubr.f32.mxu0 %v4273_v17  ;;  %8140 = vmatpush1.bf16.msra.mxu1 %v8139_v2  ;;  %v4281_v17 = vld [vmem:[#allocation3 + $0x309] sm:$0xff]  ;;  %v4284_v63 = vld [vmem:[#allocation3 + $0x331] sm:$0xff] }
 0x6e7   :  { %8141 = vmatprep.subr.bf16.mxu1 %v14885_v10  ;;  %v12483_v2 = vld [vmem:[#allocation3 + $0x18f] sm:$0xff] }
 0x6e8   :  { %4604 = vmatmul.mubr.f32.gmra.mrb[108].mxu1 %v12447_v56 }
 0x6e9   :  { %4608 = vmatprep.mubr.f32.mxu1 %v14899_v21  ;;  %7652 = vmatmul.mubr.f32.gmra.mrb[160].mxu0 %v4274_v33  ;;  %v4282_v33 = vld [vmem:[#allocation3 + $0x311] sm:$0xff]  ;;  %v14903_v21 = vmax.f32 %v12006_v20, 0.0 }
 0x6ea   :  { %7654 = vmatprep.mubr.f32.mxu0 %v4275_v38  ;;  %v4283_v38 = vld [vmem:[#allocation3 + $0x329] sm:$0xff]  ;;  %v4286_v20 = vld [vmem:[#allocation3 + $0x351] sm:$0xff] }
 0x6ec   :  { %4609 = vmatmul.mubr.f32.gmra.mrb[110].mxu1 %v12452_v26 }
 0x6ed   :  { %4613 = vmatprep.mubr.f32.mxu1 %v14900_v22  ;;  %7655 = vmatmul.mubr.f32.gmra.mrb[162].mxu0 %v4276_v28  ;;  %v12473_v28 = vld [vmem:[#allocation3 + $0x16f] sm:$0xff]  ;;  %v14904_v22 = vmax.f32 %v12010_v62, 0.0 }
 0x6ee   :  { %7657 = vmatprep.mubr.f32.mxu0 %v4277_v45  ;;  %v4285_v45 = vld [vmem:[#allocation3 + $0x349] sm:$0xff] }
 0x6f0   :  { %4614 = vmatmul.mubr.f32.gmra.mrb[112].mxu1 %v12457_v52 }
 0x6f1   :  { %4618 = vmatprep.mubr.f32.mxu1 %v14901_v50  ;;  %7658 = vmatmul.mubr.f32.gmra.mrb[164].mxu0 %v4278_v30  ;;  %v12478_v30 = vld [vmem:[#allocation3 + $0x187] sm:$0xff]  ;;  %v14905_v50 = vmax.f32 %v12014_v0, 0.0 }
 0x6f2   :  { %7660 = vmatprep.mubr.f32.mxu0 %v4279_v31  ;;  %v4366_v31 = vld [vmem:[#allocation4 + $0x1e8] sm:$0xff] }
 0x6f3   :  { %v8142_v62 = vpack.c.bf16 %v4366_v31, %v4365_v14  ;;  %v12489_v0 = vld [vmem:[#allocation3 + $0x1a7] sm:$0xff]  ;;  %v4367_v14 = vld [vmem:[#allocation4 + $0x1f0] sm:$0xff]  ;;  %v4368_v31 = vld [vmem:[#allocation4 + $0x1f8] sm:$0xff] }
 0x6f4   :  { %4619 = vmatmul.mubr.f32.gmra.mrb[114].mxu1 %v12462_v18 }
 0x6f5   :  { %4623 = vmatprep.mubr.f32.mxu1 %v14902_v37  ;;  %7661 = vmatmul.mubr.f32.gmra.mrb[166].mxu0 %v4280_v40  ;;  %v4288_v40 = vld [vmem:[#allocation3 + $0x371] sm:$0xff]  ;;  %v14906_v37 = vmax.f32 %v12018_v49, 0.0 }
 0x6f6   :  { %7663 = vmatprep.mubr.f32.mxu0 %v4281_v17  ;;  %8143 = vmatpush1.bf16.msra.mxu1 %v8142_v62  ;;  %v4289_v17 = vld [vmem:[#allocation3 + $0x389] sm:$0xff]  ;;  %v4292_v49 = vld [vmem:[#allocation3 + $0x3b1] sm:$0xff] }
 0x6f7   :  { %8144 = vmatprep.subr.bf16.mxu1 %v14885_v10  ;;  %v12504_v62 = vld [vmem:[#allocation3 + $0x1cf] sm:$0xff] }
 0x6f8   :  { %4624 = vmatmul.mubr.f32.gmra.mrb[116].mxu1 %v12468_v54 }
 0x6f9   :  { %4628 = vmatprep.mubr.f32.mxu1 %v14903_v21  ;;  %7664 = vmatmul.mubr.f32.gmra.mrb[168].mxu0 %v4282_v33  ;;  %v4290_v33 = vld [vmem:[#allocation3 + $0x391] sm:$0xff]  ;;  %v14907_v21 = vmax.f32 %v12022_v13, 0.0 }
 0x6fa   :  { %7666 = vmatprep.mubr.f32.mxu0 %v4283_v38  ;;  %v4291_v38 = vld [vmem:[#allocation3 + $0x3a9] sm:$0xff]  ;;  %v4294_v13 = vld [vmem:[#allocation3 + $0x3d1] sm:$0xff] }
 0x6fc   :  { %4629 = vmatmul.mubr.f32.gmra.mrb[118].mxu1 %v12473_v28 }
 0x6fd   :  { %4633 = vmatprep.mubr.f32.mxu1 %v14904_v22  ;;  %7667 = vmatmul.mubr.f32.gmra.mrb[170].mxu0 %v4284_v63  ;;  %v12494_v63 = vld [vmem:[#allocation3 + $0x1af] sm:$0xff]  ;;  %v14908_v22 = vmax.f32 %v12026_v23, 0.0  ;;  %v8145_v23 = vpack.c.bf16 %v4368_v31, %v4367_v14  ;;  %v12520_v14 = vld [vmem:[#allocation3 + $0x267] sm:$0xff]  ;;  %v14913_v31 = vmax.f32 %v12054_v59, 0.0  ;;  %v14916_v59 = vmax.f32 %v12066_v11, 0.0  ;;  %v14919_v11 = vld [vmem:[#allocation10_spill] sm:$0xff] }
 0x6fe   :  { %7669 = vmatprep.mubr.f32.mxu0 %v4285_v45  ;;  %v4293_v45 = vld [vmem:[#allocation3 + $0x3c9] sm:$0xff] }
 0x6ff   :  { %8146 = vmatpush1.bf16.msra.mxu1 %v8145_v23  ;;  %v12525_v23 = vld [vmem:[#allocation3 + $0x26f] sm:$0xff] }
 0x700   :  { %4634 = vmatmul.mubr.f32.gmra.mrb[120].mxu1 %v12478_v30  ;;  %8147 = vmatprep.subr.bf16.mxu1 %v14885_v10 }
 0x701   :  { %4638 = vmatprep.mubr.f32.mxu1 %v14905_v50  ;;  %7670 = vmatmul.mubr.f32.gmra.mrb[172].mxu0 %v4286_v20  ;;  %v12499_v20 = vld [vmem:[#allocation3 + $0x1c7] sm:$0xff]  ;;  %v14909_v50 = vmax.f32 %v12030_v32, 0.0 }
 0x702   :  { %7672 = vmatprep.mubr.f32.mxu0 %v4287_v3  ;;  %v4295_v3 = vld [vmem:[#allocation3 + $0x3e9] sm:$0xff] }
 0x703   :  { %v12510_v32 = vld [vmem:[#allocation3 + $0x1e7] sm:$0xff] }
 0x704   :  { %4639 = vmatmul.mubr.f32.gmra.mrb[122].mxu1 %v12483_v2 }
 0x705   :  { %4643 = vmatprep.mubr.f32.mxu1 %v14906_v37  ;;  %7673 = vmatmul.mubr.f32.gmra.mrb[174].mxu0 %v4288_v40  ;;  %v4296_v40 = vld [vmem:[#allocation3 + $0x3f1] sm:$0xff]  ;;  %v14910_v37 = vmax.f32 %v12034_v24, 0.0 }
 0x706   :  { %7675 = vmatprep.mubr.f32.mxu0 %v4289_v17  ;;  %v4297_v17 = vld [vmem:[#allocation3 + $0x409] sm:$0xff]  ;;  %v4300_v24 = vld [vmem:[#allocation3 + $0x431] sm:$0xff] }
 0x708   :  { %4644 = vmatmul.mubr.f32.gmra.mrb[124].mxu1 %v12489_v0 }
 0x709   :  { %4648 = vmatprep.mubr.f32.mxu1 %v14907_v21  ;;  %7676 = vmatmul.mubr.f32.gmra.mrb[176].mxu0 %v4290_v33  ;;  %v4298_v33 = vld [vmem:[#allocation3 + $0x411] sm:$0xff]  ;;  %v14911_v21 = vmax.f32 %v12038_v39, 0.0  ;;  %v14912_v39 = vmax.f32 %v12050_v43, 0.0  ;;  %v14915_v43 = vmax.f32 %v12062_v46, 0.0  ;;  %v14918_v46 = vmax.f32 %v12074_v48, 0.0 }
 0x70a   :  { %7678 = vmatprep.mubr.f32.mxu0 %v4291_v38  ;;  %v4299_v38 = vld [vmem:[#allocation3 + $0x429] sm:$0xff]  ;;  %v14922_v48 = vmax.f32 %v12086_v34, 0.0  ;;  %v14927_v34 = vld [vmem:[#allocation19_spill] sm:$0xff] }
 0x70c   :  { %4649 = vmatmul.mubr.f32.gmra.mrb[126].mxu1 %v12494_v63 }
 0x70d   :  { %4653 = vmatprep.mubr.f32.mxu1 %v14908_v22  ;;  %7679 = vmatmul.mubr.f32.gmra.mrb[178].mxu0 %v4292_v49  ;;  %v12515_v49 = vld [vmem:[#allocation3 + $0x1ef] sm:$0xff] }
 0x70e   :  { %7681 = vmatprep.mubr.f32.mxu0 %v4293_v45  ;;  %v9184_v22 = vld [vmem:[#allocation2 + $0x8] sm:$0xff] }
 0x70f   :  { %v3760_v45 = vld [vmem:[#allocation3 + $0x247] sm:$0xff] }
 0x710   :  { %4654 = vmatmul.mubr.f32.gmra.mrb[128].mxu1 %v12499_v20 }
 0x711   :  { %4658 = vmatprep.mubr.f32.mxu1 %v14909_v50  ;;  %7682 = vmatmul.mubr.f32.gmra.mrb[180].mxu0 %v4294_v13  ;;  %v4301_v13 = vld [vmem:[#allocation3 + $0x449] sm:$0xff]  ;;  %v4302_v50 = vld [vmem:[#allocation3 + $0x451] sm:$0xff] }
 0x712   :  { %7684 = vmatprep.mubr.f32.mxu0 %v4295_v3  ;;  %v3761_v3 = vld [vmem:[#allocation3 + $0x24f] sm:$0xff] }
 0x714   :  { %4659 = vmatmul.mubr.f32.gmra.mrb[130].mxu1 %v12504_v62 }
 0x715   :  { %4663 = vmatprep.mubr.f32.mxu1 %v14910_v37  ;;  %7685 = vmatmul.mubr.f32.gmra.mrb[182].mxu0 %v4296_v40  ;;  %v14914_v40 = vmax.f32 %v12058_v1, 0.0  ;;  %v12530_v37 = vld [vmem:[#allocation3 + $0x287] sm:$0xff]  ;;  %v14917_v1 = vmax.f32 %v12070_v25, 0.0  ;;  %v14921_v25 = vmax.f32 %v12082_v5, 0.0  ;;  %v14925_v5 = vld [vmem:[#allocation17_spill] sm:$0xff] }
 0x716   :  { %7687 = vmatprep.mubr.f32.mxu0 %v4297_v17  ;;  %v12535_v17 = vld [vmem:[#allocation3 + $0x28f] sm:$0xff] }
 0x718   :  { %4664 = vmatmul.mubr.f32.gmra.mrb[132].mxu1 %v12510_v32 }
 0x719   :  { %4668 = vmatprep.mubr.f32.mxu1 %v14911_v21  ;;  %7688 = vmatmul.mubr.f32.gmra.mrb[184].mxu0 %v4298_v33  ;;  %v12540_v33 = vld [vmem:[#allocation3 + $0x2a7] sm:$0xff]  ;;  %v12545_v21 = vld [vmem:[#allocation3 + $0x2af] sm:$0xff] }
 0x71a   :  { %7690 = vmatprep.mubr.f32.mxu0 %v4299_v38  ;;  %v12550_v38 = vld [vmem:[#allocation3 + $0x2c7] sm:$0xff] }
 0x71c   :  { %4669 = vmatmul.mubr.f32.gmra.mrb[134].mxu1 %v12515_v49 }
 0x71d   :  { %4673 = vmatprep.mubr.f32.mxu1 %v9184_v22  ;;  %7691 = vmatmul.mubr.f32.gmra.mrb[186].mxu0 %v4300_v24  ;;  %v14920_v24 = vmax.f32 %v14919_v11, 0.0  ;;  %v12585_v11 = vld [vmem:[#allocation3 + $0x32f] sm:$0xff] }
 0x71e   :  { %7693 = vmatprep.mubr.f32.mxu0 %v4301_v13  ;;  %v12565_v13 = vld [vmem:[#allocation3 + $0x2ef] sm:$0xff] }
 0x720   :  { %4674 = vmatmul.mubr.f32.gmra.mrb[136].mxu1 %v3760_v45  ;;  %v12560_v45 = vld [vmem:[#allocation3 + $0x2e7] sm:$0xff] }
 0x721   :  { %4678 = vmatprep.mubr.f32.mxu1 %v9184_v22  ;;  %7694 = vmatmul.mubr.f32.gmra.mrb[188].mxu0 %v4302_v50  ;;  %v12555_v22 = vld [vmem:[#allocation3 + $0x2cf] sm:$0xff] }
 0x722   :  { %v14923_v50 = vld [vmem:[#allocation16_spill] sm:$0xff] }
 0x724   :  { %4679 = vmatmul.mubr.f32.gmra.mrb[138].mxu1 %v3761_v3  ;;  %v14924_v3 = vmax.f32 %v14923_v50, 0.0  ;;  %v14933_v50 = vmax.f32 %v14855_v15, 0.0  ;;  %v14937_v15 = vmax.f32 %v14863_v55, 0.0  ;;  %v14943_v55 = vmax.f32 %v12134_v53, 0.0 }
 0x725   :  { %4683 = vmatprep.mubr.f32.mxu1 %v14912_v39  ;;  %v12570_v39 = vld [vmem:[#allocation3 + $0x307] sm:$0xff] }
 0x728   :  { %4684 = vmatmul.mubr.f32.gmra.mrb[140].mxu1 %v12520_v14 }
 0x729   :  { %4688 = vmatprep.mubr.f32.mxu1 %v14913_v31  ;;  %v14926_v31 = vmax.f32 %v14925_v5, 0.0  ;;  %v14934_v5 = vmax.f32 %v14856_v9, 0.0  ;;  %v14939_v9 = vmax.f32 %v14864_v4, 0.0  ;;  %v3848_v4 = vld [vmem:[#allocation3 + $0x3c8] sm:$0xff] }
 0x72c   :  { %4689 = vmatmul.mubr.f32.gmra.mrb[142].mxu1 %v12525_v23 }
 0x72d   :  { %4693 = vmatprep.mubr.f32.mxu1 %v14914_v40  ;;  %v12575_v40 = vld [vmem:[#allocation3 + $0x30f] sm:$0xff] }
 0x730   :  { %4694 = vmatmul.mubr.f32.gmra.mrb[144].mxu1 %v12530_v37 }
 0x731   :  { %4698 = vmatprep.mubr.f32.mxu1 %v14915_v43  ;;  %v14928_v43 = vmax.f32 %v14927_v34, 0.0  ;;  %v14935_v34 = vmax.f32 %v14857_v47, 0.0  ;;  %v14941_v47 = vmax.f32 %v12130_v6, 0.0  ;;  %v3849_v6 = vld [vmem:[#allocation3 + $0x3d0] sm:$0xff] }
 0x734   :  { %4699 = vmatmul.mubr.f32.gmra.mrb[146].mxu1 %v12535_v17 }
 0x735   :  { %4703 = vmatprep.mubr.f32.mxu1 %v14916_v59  ;;  %v12580_v59 = vld [vmem:[#allocation3 + $0x327] sm:$0xff] }
 0x738   :  { %4704 = vmatmul.mubr.f32.gmra.mrb[148].mxu1 %v12540_v33 }
 0x739   :  { %4708 = vmatprep.mubr.f32.mxu1 %v14917_v1  ;;  %v14929_v1 = vld [vmem:[#allocation18_spill] sm:$0xff] }
 0x73c   :  { %4709 = vmatmul.mubr.f32.gmra.mrb[150].mxu1 %v12545_v21 }
 0x73d   :  { %4713 = vmatprep.mubr.f32.mxu1 %v14918_v46  ;;  %v14930_v46 = vmax.f32 %v14929_v1, 0.0  ;;  %v12610_v1 = vld [vmem:[#allocation3 + $0x387] sm:$0xff] }
 0x73e   :  { %14938 = vst [vmem:[#allocation37_spill] sm:$0xff] %v12610_v1 }
 0x740   :  { %4714 = vmatmul.mubr.f32.gmra.mrb[152].mxu1 %v12550_v38 }
 0x741   :  { %4718 = vmatprep.mubr.f32.mxu1 %v14920_v24  ;;  %v14931_v24 = vld [vmem:[#allocation20_spill] sm:$0xff] }
 0x744   :  { %4719 = vmatmul.mubr.f32.gmra.mrb[154].mxu1 %v12555_v22 }
 0x745   :  { %4723 = vmatprep.mubr.f32.mxu1 %v14921_v25  ;;  %v14932_v25 = vmax.f32 %v14931_v24, 0.0  ;;  %v12620_v24 = vld [vmem:[#allocation3 + $0x3a7] sm:$0xff] }
 0x746   :  { %14942 = vst [vmem:[#allocation39_spill] sm:$0xff] %v12620_v24 }
 0x748   :  { %4724 = vmatmul.mubr.f32.gmra.mrb[156].mxu1 %v12560_v45 }
 0x749   :  { %4728 = vmatprep.mubr.f32.mxu1 %v14922_v48  ;;  %v12590_v48 = vld [vmem:[#allocation3 + $0x347] sm:$0xff] }
 0x74c   :  { %4729 = vmatmul.mubr.f32.gmra.mrb[158].mxu1 %v12565_v13 }
 0x74d   :  { %4733 = vmatprep.mubr.f32.mxu1 %v14924_v3  ;;  %v12595_v3 = vld [vmem:[#allocation3 + $0x34f] sm:$0xff] }
 0x750   :  { %4734 = vmatmul.mubr.f32.gmra.mrb[160].mxu1 %v12570_v39 }
 0x751   :  { %4738 = vmatprep.mubr.f32.mxu1 %v14926_v31  ;;  %v12600_v31 = vld [vmem:[#allocation3 + $0x367] sm:$0xff] }
 0x754   :  { %4739 = vmatmul.mubr.f32.gmra.mrb[162].mxu1 %v12575_v40 }
 0x755   :  { %4743 = vmatprep.mubr.f32.mxu1 %v14928_v43  ;;  %v12605_v43 = vld [vmem:[#allocation3 + $0x36f] sm:$0xff] }
 0x756   :  { %14936 = vst [vmem:[#allocation36_spill] sm:$0xff] %v12605_v43 }
 0x758   :  { %4744 = vmatmul.mubr.f32.gmra.mrb[164].mxu1 %v12580_v59 }
 0x759   :  { %4748 = vmatprep.mubr.f32.mxu1 %v14930_v46  ;;  %v12615_v46 = vld [vmem:[#allocation3 + $0x38f] sm:$0xff] }
 0x75a   :  { %14940 = vst [vmem:[#allocation38_spill] sm:$0xff] %v12615_v46 }
 0x75c   :  { %4749 = vmatmul.mubr.f32.gmra.mrb[166].mxu1 %v12585_v11 }
 0x75d   :  { %4753 = vmatprep.mubr.f32.mxu1 %v14932_v25  ;;  %v12625_v25 = vld [vmem:[#allocation3 + $0x3af] sm:$0xff] }
 0x75e   :  { %14944 = vst [vmem:[#allocation40_spill] sm:$0xff] %v12625_v25 }
 0x760   :  { %4754 = vmatmul.mubr.f32.gmra.mrb[168].mxu1 %v12590_v48 }
 0x761   :  { %4758 = vmatprep.mubr.f32.mxu1 %v14933_v50 }
 0x764   :  { %4759 = vmatmul.mubr.f32.gmra.mrb[170].mxu1 %v12595_v3 }
 0x765   :  { %4763 = vmatprep.mubr.f32.mxu1 %v14934_v5 }
 0x768   :  { %4764 = vmatmul.mubr.f32.gmra.mrb[172].mxu1 %v12600_v31 }
 0x769   :  { %4768 = vmatprep.mubr.f32.mxu1 %v14935_v34  ;;  %v12632_v34 = vld [vmem:[#allocation3 + $0x3c7] sm:$0xff] }
 0x76a   :  { %14947 = vst [vmem:[#allocation11_spill] sm:$0xff] %v12632_v34 }
 0x76c   :  { %4769 = vmatmul.mubr.f32.gmra.mrb[174].mxu1 %v12605_v43 }
 0x76d   :  { %4773 = vmatprep.mubr.f32.mxu1 %v14937_v15 }
 0x770   :  { %4774 = vmatmul.mubr.f32.gmra.mrb[176].mxu1 %v12610_v1 }
 0x771   :  { %4778 = vmatprep.mubr.f32.mxu1 %v14939_v9  ;;  %v12639_v9 = vld [vmem:[#allocation3 + $0x3cf] sm:$0xff] }
 0x772   :  { %14950 = vst [vmem:[#allocation8_spill] sm:$0xff] %v12639_v9 }
 0x774   :  { %4779 = vmatmul.mubr.f32.gmra.mrb[178].mxu1 %v12615_v46  ;;  %v4372_v46 = vld [vmem:[#allocation4 + $0x218] sm:$0xff] }
 0x775   :  { %4783 = vmatprep.mubr.f32.mxu1 %v14941_v47  ;;  %v12628_v50 = vpop.f32.mrb[128].mxu0  ;;  %v3850_v47 = vld [vmem:[#allocation3 + $0x3e8] sm:$0xff] }
 0x776   :  { %14945 = vst [vmem:[#allocation12_spill] sm:$0xff] %v12628_v50  ;;  %v12630_v5 = vpop.f32.mrb[129].mxu0  ;;  %v12646_v50 = vld [vmem:[#allocation3 + $0x3e7] sm:$0xff] }
 0x777   :  { %14946 = vst [vmem:[#allocation13_spill] sm:$0xff] %v12630_v5  ;;  %14953 = vst [vmem:[#allocation22_spill] sm:$0xff] %v12646_v50  ;;  %v3851_v5 = vld [vmem:[#allocation3 + $0x3f0] sm:$0xff] }
 0x778   :  { %4784 = vmatmul.mubr.f32.gmra.mrb[180].mxu1 %v12620_v24 }
 0x779   :  { %4788 = vmatprep.mubr.f32.mxu1 %v14943_v55 }
 0x77c   :  { %4789 = vmatmul.mubr.f32.gmra.mrb[182].mxu1 %v12625_v25  ;;  %v12681_v25 = vld [vmem:[#allocation3 + $0x42f] sm:$0xff] }
 0x77d   :  { %4793 = vmatprep.mubr.f32.mxu1 %v3848_v4 }
 0x77f   :  { %v12635_v15 = vpop.f32.mrb[130].mxu0 }
 0x780   :  { %4794 = vmatmul.mubr.f32.gmra.mrb[184].mxu1 %v12632_v34  ;;  %14948 = vst [vmem:[#allocation15_spill] sm:$0xff] %v12635_v15  ;;  %v12637_v53 = vpop.f32.mrb[131].mxu0  ;;  %v12653_v15 = vld [vmem:[#allocation3 + $0x3ef] sm:$0xff] }
 0x781   :  { %4798 = vmatprep.mubr.f32.mxu1 %v3849_v6  ;;  %14949 = vst [vmem:[#allocation14_spill] sm:$0xff] %v12637_v53  ;;  %14956 = vst [vmem:[#allocation25_spill] sm:$0xff] %v12653_v15  ;;  %v3852_v53 = vld [vmem:[#allocation3 + $0x408] sm:$0xff] }
 0x784   :  { %4799 = vmatmul.mubr.f32.gmra.mrb[186].mxu1 %v12639_v9  ;;  %v12642_v55 = vpop.f32.mrb[132].mxu0 }
 0x785   :  { %14951 = vst [vmem:[#allocation7_spill] sm:$0xff] %v12642_v55  ;;  %4803 = vmatprep.mubr.f32.mxu1 %v3850_v47  ;;  %v12644_v4 = vpop.f32.mrb[133].mxu0  ;;  %v12660_v55 = vld [vmem:[#allocation3 + $0x407] sm:$0xff] }
 0x786   :  { %14952 = vst [vmem:[#allocation21_spill] sm:$0xff] %v12644_v4  ;;  %14959 = vst [vmem:[#allocation28_spill] sm:$0xff] %v12660_v55  ;;  %v3853_v4 = vld [vmem:[#allocation3 + $0x410] sm:$0xff] }
 0x788   :  { %4804 = vmatmul.mubr.f32.gmra.mrb[188].mxu1 %v12646_v50  ;;  %v12649_v34 = vpop.f32.mrb[134].mxu0 }
 0x789   :  { %14954 = vst [vmem:[#allocation23_spill] sm:$0xff] %v12649_v34  ;;  %4808 = vmatprep.mubr.f32.mxu1 %v3851_v5  ;;  %v12651_v6 = vpop.f32.mrb[135].mxu0  ;;  %v12667_v34 = vld [vmem:[#allocation3 + $0x40f] sm:$0xff] }
 0x78a   :  { %14955 = vst [vmem:[#allocation24_spill] sm:$0xff] %v12651_v6  ;;  %14962 = vst [vmem:[#allocation10_spill] sm:$0xff] %v12667_v34  ;;  %v3854_v6 = vld [vmem:[#allocation3 + $0x428] sm:$0xff] }
 0x78c   :  { %4809 = vmatmul.mubr.f32.gmra.mrb[190].mxu1 %v12653_v15  ;;  %v12656_v9 = vpop.f32.mrb[136].mxu0 }
 0x78d   :  { %14957 = vst [vmem:[#allocation26_spill] sm:$0xff] %v12656_v9  ;;  %4813 = vmatprep.mubr.f32.mxu1 %v3852_v53  ;;  %v12658_v47 = vpop.f32.mrb[137].mxu0  ;;  %v12674_v9 = vld [vmem:[#allocation3 + $0x427] sm:$0xff] }
 0x78e   :  { %14958 = vst [vmem:[#allocation27_spill] sm:$0xff] %v12658_v47  ;;  %14965 = vst [vmem:[#allocation19_spill] sm:$0xff] %v12674_v9  ;;  %v3855_v47 = vld [vmem:[#allocation3 + $0x430] sm:$0xff] }
 0x790   :  { %4814 = vmatmul.mubr.f32.gmra.mrb[192].mxu1 %v12660_v55  ;;  %v12663_v50 = vpop.f32.mrb[138].mxu0 }
 0x791   :  { %14960 = vst [vmem:[#allocation29_spill] sm:$0xff] %v12663_v50  ;;  %4818 = vmatprep.mubr.f32.mxu1 %v3853_v4  ;;  %v12665_v5 = vpop.f32.mrb[139].mxu0  ;;  %v4369_v50 = vld [vmem:[#allocation4 + $0x200] sm:$0xff] }
 0x792   :  { %14961 = vst [vmem:[#allocation30_spill] sm:$0xff] %v12665_v5  ;;  %v4370_v5 = vld [vmem:[#allocation4 + $0x208] sm:$0xff] }
 0x794   :  { %4819 = vmatmul.mubr.f32.gmra.mrb[194].mxu1 %v12667_v34  ;;  %v12670_v15 = vpop.f32.mrb[140].mxu0  ;;  %v8148_v34 = vpack.c.bf16 %v4370_v5, %v4369_v50 }
 0x795   :  { %14963 = vst [vmem:[#allocation16_spill] sm:$0xff] %v12670_v15  ;;  %4823 = vmatprep.mubr.f32.mxu1 %v3854_v6  ;;  %v12672_v53 = vpop.f32.mrb[141].mxu0  ;;  %v14969_v6 = vld [vmem:[#allocation31_spill] sm:$0xff] }
 0x796   :  { %14964 = vst [vmem:[#allocation17_spill] sm:$0xff] %v12672_v53  ;;  %v3856_v53 = vld [vmem:[#allocation3 + $0x9] sm:$0xff] }
 0x798   :  { %4824 = vmatmul.mubr.f32.gmra.mrb[196].mxu1 %v12674_v9  ;;  %v12677_v55 = vpop.f32.mrb[142].mxu0  ;;  %v4371_v9 = vld [vmem:[#allocation4 + $0x210] sm:$0xff] }
 0x799   :  { %14966 = vst [vmem:[#allocation18_spill] sm:$0xff] %v12677_v55  ;;  %4828 = vmatprep.mubr.f32.mxu1 %v3855_v47  ;;  %v12679_v4 = vpop.f32.mrb[143].mxu0  ;;  %v14972_v55 = vld [vmem:[#allocation35_spill] sm:$0xff]  ;;  %v8151_v1 = vpack.c.bf16 %v4372_v46, %v4371_v9  ;;  %v12701_v46 = vld [vmem:[#allocation3 + $0x29] sm:$0xff] }
 0x79a   :  { %14967 = vst [vmem:[#allocation20_spill] sm:$0xff] %v12679_v4  ;;  %v3857_v4 = vld [vmem:[#allocation3 + $0x11] sm:$0xff] }
 0x79c   :  { %4829 = vmatmul.mubr.f32.gmra.mrb[198].mxu1 %v12681_v25  ;;  %v12684_v15 = vpop.f32.mrb[144].mxu0 }
 0x79d   :  { %14968 = vst [vmem:[#allocation41_spill] sm:$0xff] %v12684_v15  ;;  %4898 = vmatprep.mubr.f32.mxu1 %v14969_v6  ;;  %v12687_v24 = vpop.f32.mrb[145].mxu0  ;;  %v4373_v15 = vld [vmem:[#allocation4 + $0x220] sm:$0xff]  ;;  %v4374_v6 = vld [vmem:[#allocation4 + $0x228] sm:$0xff] }
 0x79e   :  { %14970 = vst [vmem:[#allocation31_spill] sm:$0xff] %v12687_v24  ;;  %v8154_v5 = vpack.c.bf16 %v4374_v6, %v4373_v15  ;;  %v12710_v15 = vld [vmem:[#allocation3 + $0x31] sm:$0xff]  ;;  %v4406_v24 = vld [vmem:[#allocation4 + $0x328] sm:$0xff] }
 0x7a0   :  { %4899 = vmatmul.mubr.f32.vlgmr.msra.gmra.mrb[72].mxu1 %v3856_v53  ;;  %v12689_v47 = vpop.f32.mrb[146].mxu0 }
 0x7a1   :  { %14971 = vst [vmem:[#allocation42_spill] sm:$0xff] %v12689_v47  ;;  %4903 = vmatprep.mubr.f32.mxu1 %v14972_v55  ;;  %8149 = vmatpush1.bf16.msra.mxu1 %v8148_v34  ;;  %v12692_v43 = vpop.f32.mrb[147].mxu0  ;;  %v4375_v34 = vld [vmem:[#allocation4 + $0x230] sm:$0xff]  ;;  %v4376_v55 = vld [vmem:[#allocation4 + $0x238] sm:$0xff] }
 0x7a2   :  { %14973 = vst [vmem:[#allocation35_spill] sm:$0xff] %v12692_v43  ;;  %8150 = vmatprep.subr.bf16.mxu1 %v14885_v10  ;;  %v3984_v43 = vld [vmem:[#allocation3 + $0x28] sm:$0xff] }
 0x7a4   :  { %4904 = vmatmul.mubr.f32.gmra.mrb[74].mxu1 %v3857_v4  ;;  %v12695_v50 = vpop.f32.mrb[148].mxu0  ;;  %v8157_v4 = vpack.c.bf16 %v4376_v55, %v4375_v34  ;;  %v14980_v34 = vld [vmem:[#allocation32_spill] sm:$0xff] }
 0x7a5   :  { %14974 = vst [vmem:[#allocation43_spill] sm:$0xff] %v12695_v50  ;;  %4908 = vmatprep.mubr.f32.mxu1 %v12367_v12  ;;  %8152 = vmatpush1.bf16.msra.mxu1 %v8151_v1  ;;  %v12698_v53 = vpop.f32.mrb[149].mxu0  ;;  %v4377_v12 = vld [vmem:[#allocation4 + $0x240] sm:$0xff]  ;;  %v4378_v1 = vld [vmem:[#allocation4 + $0x248] sm:$0xff] }
 0x7a6   :  { %14975 = vst [vmem:[#allocation44_spill] sm:$0xff] %v12698_v53  ;;  %8153 = vmatprep.subr.bf16.mxu1 %v14885_v10 }
 0x7a8   :  { %4909 = vmatmul.mubr.f32.gmra.mrb[76].mxu1 %v12701_v46  ;;  %v12704_v9 = vpop.f32.mrb[150].mxu0 }
 0x7a9   :  { %14976 = vst [vmem:[#allocation45_spill] sm:$0xff] %v12704_v9  ;;  %4913 = vmatprep.mubr.f32.mxu1 %v12376_v42  ;;  %8155 = vmatpush1.bf16.msra.mxu1 %v8154_v5  ;;  %v12707_v50 = vpop.f32.mrb[151].mxu0  ;;  %v8160_v9 = vpack.c.bf16 %v4378_v1, %v4377_v12  ;;  %v4379_v42 = vld [vmem:[#allocation4 + $0x250] sm:$0xff]  ;;  %v4380_v5 = vld [vmem:[#allocation4 + $0x258] sm:$0xff] }
 0x7aa   :  { %14977 = vst [vmem:[#allocation46_spill] sm:$0xff] %v12707_v50  ;;  %8156 = vmatprep.subr.bf16.mxu1 %v14885_v10  ;;  %v8163_v50 = vpack.c.bf16 %v4380_v5, %v4379_v42  ;;  %v14983_v12 = vld [vmem:[#allocation33_spill] sm:$0xff]  ;;  %v14986_v42 = vld [vmem:[#allocation34_spill] sm:$0xff] }
 0x7ac   :  { %4914 = vmatmul.mubr.f32.gmra.mrb[78].mxu1 %v12710_v15  ;;  %v12713_v6 = vpop.f32.mrb[152].mxu0 }
 0x7ad   :  { %14978 = vst [vmem:[#allocation47_spill] sm:$0xff] %v12713_v6  ;;  %4918 = vmatprep.mubr.f32.mxu1 %v12382_v44  ;;  %8158 = vmatpush1.bf16.msra.mxu1 %v8157_v4  ;;  %v12716_v53 = vpop.f32.mrb[153].mxu0  ;;  %v4381_v44 = vld [vmem:[#allocation4 + $0x260] sm:$0xff]  ;;  %v4382_v4 = vld [vmem:[#allocation4 + $0x268] sm:$0xff] }
 0x7ae   :  { %14979 = vst [vmem:[#allocation48_spill] sm:$0xff] %v12716_v53  ;;  %8159 = vmatprep.subr.bf16.mxu1 %v14885_v10  ;;  %v4404_v53 = vld [vmem:[#allocation4 + $0x318] sm:$0xff] }
 0x7b0   :  { %4919 = vmatmul.mubr.f32.gmra.mrb[80].mxu1 %v14980_v34  ;;  %v12720_v55 = vpop.f32.mrb[154].mxu0  ;;  %v8166_v34 = vpack.c.bf16 %v4382_v4, %v4381_v44 }
 0x7b1   :  { %14981 = vst [vmem:[#allocation32_spill] sm:$0xff] %v12720_v55  ;;  %4923 = vmatprep.mubr.f32.mxu1 %v12388_v51  ;;  %8161 = vmatpush1.bf16.msra.mxu1 %v8160_v9  ;;  %v12723_v47 = vpop.f32.mrb[155].mxu0  ;;  %v4383_v51 = vld [vmem:[#allocation4 + $0x270] sm:$0xff]  ;;  %v4384_v9 = vld [vmem:[#allocation4 + $0x278] sm:$0xff] }
 0x7b2   :  { %14982 = vst [vmem:[#allocation49_spill] sm:$0xff] %v12723_v47  ;;  %8162 = vmatprep.subr.bf16.mxu1 %v14885_v10  ;;  %v4403_v47 = vld [vmem:[#allocation4 + $0x310] sm:$0xff] }
 0x7b4   :  { %4924 = vmatmul.mubr.f32.gmra.mrb[82].mxu1 %v14983_v12  ;;  %v12727_v1 = vpop.f32.mrb[156].mxu0  ;;  %v8169_v12 = vpack.c.bf16 %v4384_v9, %v4383_v51 }
 0x7b5   :  { %14984 = vst [vmem:[#allocation33_spill] sm:$0xff] %v12727_v1  ;;  %4928 = vmatprep.mubr.f32.mxu1 %v12393_v29  ;;  %8164 = vmatpush1.bf16.msra.mxu1 %v8163_v50  ;;  %v12730_v6 = vpop.f32.mrb[157].mxu0  ;;  %v4385_v29 = vld [vmem:[#allocation4 + $0x280] sm:$0xff]  ;;  %v4386_v50 = vld [vmem:[#allocation4 + $0x288] sm:$0xff] }
 0x7b6   :  { %14985 = vst [vmem:[#allocation50_spill] sm:$0xff] %v12730_v6  ;;  %8165 = vmatprep.subr.bf16.mxu1 %v14885_v10  ;;  %v8172_v4 = vpack.c.bf16 %v4386_v50, %v4385_v29  ;;  %v12754_v29 = vld [vmem:[#allocation3 + $0x91] sm:$0xff]  ;;  %v4401_v1 = vld [vmem:[#allocation4 + $0x300] sm:$0xff] }
 0x7b7   :  { %v13017_v6 = vld [vmem:[#allocation3 + $0x431] sm:$0xff] }
 0x7b8   :  { %4929 = vmatmul.mubr.f32.gmra.mrb[84].mxu1 %v14986_v42  ;;  %v12735_v5 = vpop.f32.mrb[158].mxu0 }
 0x7b9   :  { %4933 = vmatprep.mubr.f32.mxu1 %v12398_v60  ;;  %14987 = vst [vmem:[#allocation34_spill] sm:$0xff] %v12735_v5  ;;  %8167 = vmatpush1.bf16.msra.mxu1 %v8166_v34  ;;  %v12737_v55 = vpop.f32.mrb[159].mxu0  ;;  %v4387_v60 = vld [vmem:[#allocation4 + $0x290] sm:$0xff]  ;;  %v4388_v34 = vld [vmem:[#allocation4 + $0x298] sm:$0xff] }
 0x7ba   :  { %14988 = vst [vmem:[#allocation51_spill] sm:$0xff] %v12737_v55  ;;  %8168 = vmatprep.subr.bf16.mxu1 %v14885_v10  ;;  %v13007_v5 = vld [vmem:[#allocation3 + $0x409] sm:$0xff] }
 0x7bb   :  { %v13014_v55 = vld [vmem:[#allocation3 + $0x429] sm:$0xff] }
 0x7bc   :  { %4934 = vmatmul.mubr.f32.gmra.mrb[86].mxu1 %v12357_v57  ;;  %v12741_v44 = vpop.f32.mrb[160].mxu0  ;;  %v8175_v57 = vpack.c.bf16 %v4388_v34, %v4387_v60  ;;  %v12770_v60 = vld [vmem:[#allocation3 + $0xb1] sm:$0xff] }
 0x7bd   :  { %14989 = vst [vmem:[#allocation52_spill] sm:$0xff] %v12741_v44  ;;  %4938 = vmatprep.mubr.f32.mxu1 %v12403_v58  ;;  %8170 = vmatpush1.bf16.msra.mxu1 %v8169_v12  ;;  %v12744_v42 = vpop.f32.mrb[161].mxu0  ;;  %v4389_v58 = vld [vmem:[#allocation4 + $0x2a0] sm:$0xff]  ;;  %v4390_v12 = vld [vmem:[#allocation4 + $0x2a8] sm:$0xff] }
 0x7be   :  { %14990 = vst [vmem:[#allocation53_spill] sm:$0xff] %v12744_v42  ;;  %8171 = vmatprep.subr.bf16.mxu1 %v14885_v10  ;;  %v12999_v44 = vld [vmem:[#allocation3 + $0x3e9] sm:$0xff]  ;;  %v13003_v42 = vld [vmem:[#allocation3 + $0x3f1] sm:$0xff] }
 0x7c0   :  { %4939 = vmatmul.mubr.f32.gmra.mrb[88].mxu1 %v12364_v27  ;;  %v12748_v51 = vpop.f32.mrb[162].mxu0  ;;  %v8178_v27 = vpack.c.bf16 %v4390_v12, %v4389_v58  ;;  %v4392_v58 = vld [vmem:[#allocation4 + $0x2b8] sm:$0xff] }
 0x7c1   :  { %14991 = vst [vmem:[#allocation54_spill] sm:$0xff] %v12748_v51  ;;  %4943 = vmatprep.mubr.f32.mxu1 %v12408_v61  ;;  %8173 = vmatpush1.bf16.msra.mxu1 %v8172_v4  ;;  %v12751_v9 = vpop.f32.mrb[163].mxu0 }
 0x7c2   :  { %14992 = vst [vmem:[#allocation55_spill] sm:$0xff] %v12751_v9  ;;  %8174 = vmatprep.subr.bf16.mxu1 %v14885_v10  ;;  %v12995_v9 = vld [vmem:[#allocation3 + $0x3d1] sm:$0xff] }
 0x7c4   :  { %4944 = vmatmul.mubr.f32.gmra.mrb[90].mxu1 %v12754_v29  ;;  %v12757_v50 = vpop.f32.mrb[164].mxu0 }
 0x7c5   :  { %14993 = vst [vmem:[#allocation56_spill] sm:$0xff] %v12757_v50  ;;  %4948 = vmatprep.mubr.f32.mxu1 %v12414_v36  ;;  %8176 = vmatpush1.bf16.msra.mxu1 %v8175_v57  ;;  %v12760_v51 = vpop.f32.mrb[165].mxu0  ;;  %v4391_v57 = vld [vmem:[#allocation4 + $0x2b0] sm:$0xff] }
 0x7c6   :  { %14994 = vst [vmem:[#allocation57_spill] sm:$0xff] %v12760_v51  ;;  %8177 = vmatprep.subr.bf16.mxu1 %v14885_v10  ;;  %v12987_v50 = vld [vmem:[#allocation3 + $0x3b1] sm:$0xff]  ;;  %v12991_v51 = vld [vmem:[#allocation3 + $0x3c9] sm:$0xff] }
 0x7c8   :  { %4949 = vmatmul.mubr.f32.gmra.mrb[92].mxu1 %v12372_v35  ;;  %v12764_v61 = vpop.f32.mrb[166].mxu0  ;;  %v12778_v35 = vld [vmem:[#allocation3 + $0xc9] sm:$0xff] }
 0x7c9   :  { %14995 = vst [vmem:[#allocation58_spill] sm:$0xff] %v12764_v61  ;;  %4953 = vmatprep.mubr.f32.mxu1 %v12420_v16  ;;  %8179 = vmatpush1.bf16.msra.mxu1 %v8178_v27  ;;  %v12767_v4 = vpop.f32.mrb[167].mxu0  ;;  %v8181_v27 = vpack.c.bf16 %v4392_v58, %v4391_v57  ;;  %v12786_v61 = vld [vmem:[#allocation3 + $0xd1] sm:$0xff] }
 0x7ca   :  { %14996 = vst [vmem:[#allocation59_spill] sm:$0xff] %v12767_v4  ;;  %8180 = vmatprep.subr.bf16.mxu1 %v14885_v10  ;;  %v12803_v58 = vld [vmem:[#allocation3 + $0xf1] sm:$0xff]  ;;  %v12983_v4 = vld [vmem:[#allocation3 + $0x3a9] sm:$0xff] }
 0x7cc   :  { %4954 = vmatmul.mubr.f32.gmra.mrb[94].mxu1 %v12770_v60  ;;  %v12773_v36 = vpop.f32.mrb[168].mxu0 }
 0x7cd   :  { %14997 = vst [vmem:[#allocation60_spill] sm:$0xff] %v12773_v36  ;;  %4958 = vmatprep.mubr.f32.mxu1 %v12426_v7  ;;  %v12776_v34 = vpop.f32.mrb[169].mxu0  ;;  %8182 = vmatpush1.bf16.msra.mxu1 %v8181_v27 }
 0x7ce   :  { %14998 = vst [vmem:[#allocation61_spill] sm:$0xff] %v12776_v34  ;;  %8183 = vmatprep.subr.bf16.mxu1 %v14885_v10  ;;  %v12819_v34 = vld [vmem:[#allocation3 + $0x111] sm:$0xff] }
 0x7d0   :  { %4959 = vmatmul.mubr.f32.gmra.mrb[96].mxu1 %v12778_v35  ;;  %v12781_v16 = vpop.f32.mrb[170].mxu0 }
 0x7d1   :  { %14999 = vst [vmem:[#allocation62_spill] sm:$0xff] %v12781_v16  ;;  %4963 = vmatprep.mubr.f32.mxu1 %v12431_v41  ;;  %v12784_v12 = vpop.f32.mrb[171].mxu0  ;;  %v12795_v16 = vld [vmem:[#allocation3 + $0xe9] sm:$0xff] }
 0x7d2   :  { %15000 = vst [vmem:[#allocation63_spill] sm:$0xff] %v12784_v12 }
 0x7d4   :  { %4964 = vmatmul.mubr.f32.gmra.mrb[98].mxu1 %v12786_v61  ;;  %v12789_v7 = vpop.f32.mrb[172].mxu0 }
 0x7d5   :  { %15001 = vst [vmem:[#allocation64_spill] sm:$0xff] %v12789_v7  ;;  %4968 = vmatprep.mubr.f32.mxu1 %v12436_v19  ;;  %v12792_v36 = vpop.f32.mrb[173].mxu0  ;;  %v12811_v7 = vld [vmem:[#allocation3 + $0x109] sm:$0xff] }
 0x7d6   :  { %15002 = vst [vmem:[#allocation65_spill] sm:$0xff] %v12792_v36 }
 0x7d8   :  { %4969 = vmatmul.mubr.f32.gmra.mrb[100].mxu1 %v12795_v16  ;;  %v12798_v41 = vpop.f32.mrb[174].mxu0 }
 0x7d9   :  { %15003 = vst [vmem:[#allocation66_spill] sm:$0xff] %v12798_v41  ;;  %4973 = vmatprep.mubr.f32.mxu1 %v12441_v8  ;;  %v12801_v57 = vpop.f32.mrb[175].mxu0  ;;  %v4393_v8 = vld [vmem:[#allocation4 + $0x2c0] sm:$0xff]  ;;  %v4394_v41 = vld [vmem:[#allocation4 + $0x2c8] sm:$0xff] }
 0x7da   :  { %15004 = vst [vmem:[#allocation67_spill] sm:$0xff] %v12801_v57  ;;  %v8184_v12 = vpack.c.bf16 %v4394_v41, %v4393_v8  ;;  %v12836_v8 = vld [vmem:[#allocation3 + $0x131] sm:$0xff] }
 0x7dc   :  { %4974 = vmatmul.mubr.f32.gmra.mrb[102].mxu1 %v12803_v58  ;;  %v12806_v19 = vpop.f32.mrb[176].mxu0 }
 0x7dd   :  { %15005 = vst [vmem:[#allocation68_spill] sm:$0xff] %v12806_v19  ;;  %4978 = vmatprep.mubr.f32.mxu1 %v12447_v56  ;;  %v12809_v27 = vpop.f32.mrb[177].mxu0  ;;  %8185 = vmatpush1.bf16.msra.mxu1 %v8184_v12 }
 0x7de   :  { %15006 = vst [vmem:[#allocation69_spill] sm:$0xff] %v12809_v27  ;;  %8186 = vmatprep.subr.bf16.mxu1 %v14885_v10  ;;  %v12852_v27 = vld [vmem:[#allocation3 + $0x151] sm:$0xff] }
 0x7e0   :  { %4979 = vmatmul.mubr.f32.gmra.mrb[104].mxu1 %v12811_v7  ;;  %v12814_v36 = vpop.f32.mrb[178].mxu0 }
 0x7e1   :  { %15007 = vst [vmem:[#allocation70_spill] sm:$0xff] %v12814_v36  ;;  %4983 = vmatprep.mubr.f32.mxu1 %v12452_v26  ;;  %v12817_v57 = vpop.f32.mrb[179].mxu0  ;;  %v12828_v36 = vld [vmem:[#allocation3 + $0x129] sm:$0xff] }
 0x7e2   :  { %15008 = vst [vmem:[#allocation71_spill] sm:$0xff] %v12817_v57 }
 0x7e4   :  { %4984 = vmatmul.mubr.f32.gmra.mrb[106].mxu1 %v12819_v34  ;;  %v12822_v56 = vpop.f32.mrb[180].mxu0 }
 0x7e5   :  { %15009 = vst [vmem:[#allocation72_spill] sm:$0xff] %v12822_v56  ;;  %4988 = vmatprep.mubr.f32.mxu1 %v12457_v52  ;;  %v12825_v19 = vpop.f32.mrb[181].mxu0  ;;  %v12844_v56 = vld [vmem:[#allocation3 + $0x149] sm:$0xff] }
 0x7e6   :  { %15010 = vst [vmem:[#allocation73_spill] sm:$0xff] %v12825_v19 }
 0x7e8   :  { %4989 = vmatmul.mubr.f32.gmra.mrb[108].mxu1 %v12828_v36  ;;  %v12831_v26 = vpop.f32.mrb[182].mxu0 }
 0x7e9   :  { %15011 = vst [vmem:[#allocation74_spill] sm:$0xff] %v12831_v26  ;;  %4993 = vmatprep.mubr.f32.mxu1 %v12462_v18  ;;  %v12834_v41 = vpop.f32.mrb[183].mxu0  ;;  %v4395_v18 = vld [vmem:[#allocation4 + $0x2d0] sm:$0xff]  ;;  %v4396_v26 = vld [vmem:[#allocation4 + $0x2d8] sm:$0xff] }
 0x7ea   :  { %15012 = vst [vmem:[#allocation75_spill] sm:$0xff] %v12834_v41  ;;  %v8187_v57 = vpack.c.bf16 %v4396_v26, %v4395_v18  ;;  %v12869_v26 = vld [vmem:[#allocation3 + $0x189] sm:$0xff] }
 0x7ec   :  { %4994 = vmatmul.mubr.f32.gmra.mrb[110].mxu1 %v12836_v8  ;;  %v12839_v52 = vpop.f32.mrb[184].mxu0 }
 0x7ed   :  { %15013 = vst [vmem:[#allocation76_spill] sm:$0xff] %v12839_v52  ;;  %4998 = vmatprep.mubr.f32.mxu1 %v12468_v54  ;;  %v12842_v12 = vpop.f32.mrb[185].mxu0  ;;  %8188 = vmatpush1.bf16.msra.mxu1 %v8187_v57  ;;  %v4398_v57 = vld [vmem:[#allocation4 + $0x2e8] sm:$0xff] }
 0x7ee   :  { %15014 = vst [vmem:[#allocation77_spill] sm:$0xff] %v12842_v12  ;;  %8189 = vmatprep.subr.bf16.mxu1 %v14885_v10  ;;  %v12979_v12 = vld [vmem:[#allocation3 + $0x391] sm:$0xff] }
 0x7f0   :  { %4999 = vmatmul.mubr.f32.gmra.mrb[112].mxu1 %v12844_v56  ;;  %v12847_v19 = vpop.f32.mrb[186].mxu0 }
 0x7f1   :  { %15015 = vst [vmem:[#allocation78_spill] sm:$0xff] %v12847_v19  ;;  %5003 = vmatprep.mubr.f32.mxu1 %v12473_v28  ;;  %v12850_v41 = vpop.f32.mrb[187].mxu0  ;;  %v12861_v19 = vld [vmem:[#allocation3 + $0x169] sm:$0xff]  ;;  %v12865_v28 = vld [vmem:[#allocation3 + $0x171] sm:$0xff] }
 0x7f2   :  { %15016 = vst [vmem:[#allocation79_spill] sm:$0xff] %v12850_v41  ;;  %v12897_v41 = vld [vmem:[#allocation3 + $0x1f1] sm:$0xff] }
 0x7f4   :  { %5004 = vmatmul.mubr.f32.gmra.mrb[114].mxu1 %v12852_v27  ;;  %v12855_v54 = vpop.f32.mrb[188].mxu0 }
 0x7f5   :  { %15017 = vst [vmem:[#allocation80_spill] sm:$0xff] %v12855_v54  ;;  %5008 = vmatprep.mubr.f32.mxu1 %v12478_v30  ;;  %v12858_v52 = vpop.f32.mrb[189].mxu0  ;;  %v4397_v30 = vld [vmem:[#allocation4 + $0x2e0] sm:$0xff]  ;;  %v12873_v54 = vld [vmem:[#allocation3 + $0x191] sm:$0xff] }
 0x7f6   :  { %15018 = vst [vmem:[#allocation81_spill] sm:$0xff] %v12858_v52  ;;  %v8190_v18 = vpack.c.bf16 %v4398_v57, %v4397_v30  ;;  %v4400_v30 = vld [vmem:[#allocation4 + $0x2f8] sm:$0xff]  ;;  %v12894_v52 = vld [vmem:[#allocation3 + $0x1e9] sm:$0xff] }
 0x7f8   :  { %5009 = vmatmul.mubr.f32.gmra.mrb[116].mxu1 %v12861_v19 }
 0x7f9   :  { %5013 = vmatprep.mubr.f32.mxu1 %v12483_v2  ;;  %8191 = vmatpush1.bf16.msra.mxu1 %v8190_v18  ;;  %v12878_v2 = vld [vmem:[#allocation3 + $0x1a9] sm:$0xff]  ;;  %v12890_v18 = vld [vmem:[#allocation3 + $0x1d1] sm:$0xff] }
 0x7fa   :  { %8192 = vmatprep.subr.bf16.mxu1 %v14885_v10 }
 0x7fc   :  { %5014 = vmatmul.mubr.f32.gmra.mrb[118].mxu1 %v12865_v28 }
 0x7fd   :  { %5018 = vmatprep.mubr.f32.mxu1 %v12489_v0  ;;  %v12882_v0 = vld [vmem:[#allocation3 + $0x1b1] sm:$0xff] }
 0x800   :  { %5019 = vmatmul.mubr.f32.gmra.mrb[120].mxu1 %v12869_v26 }
 0x801   :  { %5023 = vmatprep.mubr.f32.mxu1 %v12494_v63  ;;  %v12886_v63 = vld [vmem:[#allocation3 + $0x1c9] sm:$0xff] }
 0x804   :  { %5024 = vmatmul.mubr.f32.gmra.mrb[122].mxu1 %v12873_v54 }
 0x805   :  { %5028 = vmatprep.mubr.f32.mxu1 %v12499_v20  ;;  %v4399_v20 = vld [vmem:[#allocation4 + $0x2f0] sm:$0xff] }
 0x806   :  { %v8193_v57 = vpack.c.bf16 %v4400_v30, %v4399_v20  ;;  %v3889_v20 = vld [vmem:[#allocation3 + $0x251] sm:$0xff]  ;;  %v12903_v30 = vld [vmem:[#allocation3 + $0x269] sm:$0xff] }
 0x808   :  { %5029 = vmatmul.mubr.f32.gmra.mrb[124].mxu1 %v12878_v2 }
 0x809   :  { %5033 = vmatprep.mubr.f32.mxu1 %v12504_v62  ;;  %v3950_v62 = vld [vmem:[#allocation3 + $0x207] sm:$0xff]  ;;  %8194 = vmatpush1.bf16.msra.mxu1 %v8193_v57  ;;  %v12907_v57 = vld [vmem:[#allocation3 + $0x271] sm:$0xff] }
 0x80a   :  { %8195 = vmatprep.subr.bf16.mxu1 %v14885_v10 }
 0x80c   :  { %5034 = vmatmul.mubr.f32.gmra.mrb[126].mxu1 %v12882_v0 }
 0x80d   :  { %5038 = vmatprep.mubr.f32.mxu1 %v12510_v32  ;;  %v3951_v32 = vld [vmem:[#allocation3 + $0x20f] sm:$0xff] }
 0x810   :  { %5039 = vmatmul.mubr.f32.gmra.mrb[128].mxu1 %v12886_v63 }
 0x811   :  { %5043 = vmatprep.mubr.f32.mxu1 %v12515_v49  ;;  %v3888_v49 = vld [vmem:[#allocation3 + $0x249] sm:$0xff] }
 0x814   :  { %5044 = vmatmul.mubr.f32.gmra.mrb[130].mxu1 %v12890_v18 }
 0x815   :  { %5048 = vmatprep.mubr.f32.mxu1 %v3950_v62  ;;  %v12963_v62 = vld [vmem:[#allocation3 + $0x351] sm:$0xff] }
 0x818   :  { %5049 = vmatmul.mubr.f32.gmra.mrb[132].mxu1 %v12894_v52 }
 0x819   :  { %5053 = vmatprep.mubr.f32.mxu1 %v3951_v32  ;;  %v12967_v32 = vld [vmem:[#allocation3 + $0x369] sm:$0xff] }
 0x81c   :  { %5054 = vmatmul.mubr.f32.gmra.mrb[134].mxu1 %v12897_v41 }
 0x81d   :  { %5058 = vmatprep.mubr.f32.mxu1 %v12520_v14  ;;  %v12911_v14 = vld [vmem:[#allocation3 + $0x289] sm:$0xff] }
 0x820   :  { %5059 = vmatmul.mubr.f32.gmra.mrb[136].mxu1 %v3888_v49  ;;  %v12971_v49 = vld [vmem:[#allocation3 + $0x371] sm:$0xff] }
 0x821   :  { %5063 = vmatprep.mubr.f32.mxu1 %v12525_v23  ;;  %v12915_v23 = vld [vmem:[#allocation3 + $0x291] sm:$0xff] }
 0x824   :  { %5064 = vmatmul.mubr.f32.gmra.mrb[138].mxu1 %v3889_v20  ;;  %v12975_v20 = vld [vmem:[#allocation3 + $0x389] sm:$0xff] }
 0x825   :  { %5068 = vmatprep.mubr.f32.mxu1 %v12530_v37  ;;  %v12919_v37 = vld [vmem:[#allocation3 + $0x2a9] sm:$0xff] }
 0x828   :  { %5069 = vmatmul.mubr.f32.gmra.mrb[140].mxu1 %v12903_v30 }
 0x829   :  { %5073 = vmatprep.mubr.f32.mxu1 %v12535_v17  ;;  %v12923_v17 = vld [vmem:[#allocation3 + $0x2b1] sm:$0xff] }
 0x82c   :  { %5074 = vmatmul.mubr.f32.gmra.mrb[142].mxu1 %v12907_v57 }
 0x82d   :  { %5078 = vmatprep.mubr.f32.mxu1 %v12540_v33  ;;  %v12927_v33 = vld [vmem:[#allocation3 + $0x2c9] sm:$0xff] }
 0x830   :  { %5079 = vmatmul.mubr.f32.gmra.mrb[144].mxu1 %v12911_v14 }
 0x831   :  { %5083 = vmatprep.mubr.f32.mxu1 %v12545_v21  ;;  %v12931_v21 = vld [vmem:[#allocation3 + $0x2d1] sm:$0xff] }
 0x834   :  { %5084 = vmatmul.mubr.f32.gmra.mrb[146].mxu1 %v12915_v23 }
 0x835   :  { %5088 = vmatprep.mubr.f32.mxu1 %v12550_v38  ;;  %v12935_v38 = vld [vmem:[#allocation3 + $0x2e9] sm:$0xff] }
 0x838   :  { %5089 = vmatmul.mubr.f32.gmra.mrb[148].mxu1 %v12919_v37 }
 0x839   :  { %5093 = vmatprep.mubr.f32.mxu1 %v12555_v22  ;;  %v12939_v22 = vld [vmem:[#allocation3 + $0x2f1] sm:$0xff] }
 0x83c   :  { %5094 = vmatmul.mubr.f32.gmra.mrb[150].mxu1 %v12923_v17 }
 0x83d   :  { %5098 = vmatprep.mubr.f32.mxu1 %v12560_v45  ;;  %v12943_v45 = vld [vmem:[#allocation3 + $0x309] sm:$0xff] }
 0x840   :  { %5099 = vmatmul.mubr.f32.gmra.mrb[152].mxu1 %v12927_v33 }
 0x841   :  { %5103 = vmatprep.mubr.f32.mxu1 %v12565_v13  ;;  %v12947_v13 = vld [vmem:[#allocation3 + $0x311] sm:$0xff] }
 0x844   :  { %5104 = vmatmul.mubr.f32.gmra.mrb[154].mxu1 %v12931_v21 }
 0x845   :  { %5108 = vmatprep.mubr.f32.mxu1 %v12570_v39  ;;  %v12951_v39 = vld [vmem:[#allocation3 + $0x329] sm:$0xff] }
 0x848   :  { %5109 = vmatmul.mubr.f32.gmra.mrb[156].mxu1 %v12935_v38 }
 0x849   :  { %5113 = vmatprep.mubr.f32.mxu1 %v12575_v40  ;;  %v12955_v40 = vld [vmem:[#allocation3 + $0x331] sm:$0xff] }
 0x84c   :  { %5114 = vmatmul.mubr.f32.gmra.mrb[158].mxu1 %v12939_v22 }
 0x84d   :  { %5118 = vmatprep.mubr.f32.mxu1 %v12580_v59  ;;  %v12959_v59 = vld [vmem:[#allocation3 + $0x349] sm:$0xff] }
 0x850   :  { %5119 = vmatmul.mubr.f32.gmra.mrb[160].mxu1 %v12943_v45 }
 0x851   :  { %5123 = vmatprep.mubr.f32.mxu1 %v12585_v11  ;;  %v15019_v11 = vld [vmem:[#allocation36_spill] sm:$0xff] }
 0x854   :  { %5124 = vmatmul.mubr.f32.gmra.mrb[162].mxu1 %v12947_v13 }
 0x855   :  { %5128 = vmatprep.mubr.f32.mxu1 %v12590_v48  ;;  %v15020_v48 = vld [vmem:[#allocation37_spill] sm:$0xff] }
 0x856   :  { %15032 = vst [vmem:[#allocation37_spill] sm:$0xff] %v13014_v55 }
 0x858   :  { %5129 = vmatmul.mubr.f32.gmra.mrb[164].mxu1 %v12951_v39 }
 0x859   :  { %5133 = vmatprep.mubr.f32.mxu1 %v12595_v3  ;;  %v15021_v3 = vld [vmem:[#allocation38_spill] sm:$0xff] }
 0x85a   :  { %15033 = vst [vmem:[#allocation38_spill] sm:$0xff] %v13017_v6 }
 0x85c   :  { %5134 = vmatmul.mubr.f32.gmra.mrb[166].mxu1 %v12955_v40 }
 0x85d   :  { %5138 = vmatprep.mubr.f32.mxu1 %v12600_v31  ;;  %v15022_v31 = vld [vmem:[#allocation39_spill] sm:$0xff] }
 0x860   :  { %5139 = vmatmul.mubr.f32.gmra.mrb[168].mxu1 %v12959_v59 }
 0x861   :  { %5143 = vmatprep.mubr.f32.mxu1 %v15019_v11  ;;  %v15023_v11 = vld [vmem:[#allocation40_spill] sm:$0xff] }
 0x864   :  { %5144 = vmatmul.mubr.f32.gmra.mrb[170].mxu1 %v12963_v62 }
 0x865   :  { %5148 = vmatprep.mubr.f32.mxu1 %v15020_v48  ;;  %v15024_v48 = vld [vmem:[#allocation11_spill] sm:$0xff] }
 0x868   :  { %5149 = vmatmul.mubr.f32.gmra.mrb[172].mxu1 %v12967_v32 }
 0x869   :  { %5153 = vmatprep.mubr.f32.mxu1 %v15021_v3  ;;  %v15025_v3 = vld [vmem:[#allocation8_spill] sm:$0xff] }
 0x86c   :  { %5154 = vmatmul.mubr.f32.gmra.mrb[174].mxu1 %v12971_v49 }
 0x86d   :  { %5158 = vmatprep.mubr.f32.mxu1 %v15022_v31  ;;  %v15026_v31 = vld [vmem:[#allocation22_spill] sm:$0xff] }
 0x870   :  { %5159 = vmatmul.mubr.f32.gmra.mrb[176].mxu1 %v12975_v20 }
 0x871   :  { %5163 = vmatprep.mubr.f32.mxu1 %v15023_v11  ;;  %v15027_v11 = vld [vmem:[#allocation25_spill] sm:$0xff] }
 0x874   :  { %5164 = vmatmul.mubr.f32.gmra.mrb[178].mxu1 %v12979_v12 }
 0x875   :  { %5168 = vmatprep.mubr.f32.mxu1 %v15024_v48  ;;  %v15028_v48 = vld [vmem:[#allocation28_spill] sm:$0xff] }
 0x878   :  { %5169 = vmatmul.mubr.f32.gmra.mrb[180].mxu1 %v12983_v4 }
 0x879   :  { %5173 = vmatprep.mubr.f32.mxu1 %v15025_v3  ;;  %v15029_v3 = vld [vmem:[#allocation10_spill] sm:$0xff] }
 0x87c   :  { %5174 = vmatmul.mubr.f32.gmra.mrb[182].mxu1 %v12987_v50 }
 0x87d   :  { %5178 = vmatprep.mubr.f32.mxu1 %v15026_v31  ;;  %v15030_v31 = vld [vmem:[#allocation19_spill] sm:$0xff] }
 0x880   :  { %5179 = vmatmul.mubr.f32.gmra.mrb[184].mxu1 %v12991_v51 }
 0x881   :  { %5183 = vmatprep.mubr.f32.mxu1 %v15027_v11  ;;  %v13011_v11 = vld [vmem:[#allocation3 + $0x411] sm:$0xff] }
 0x882   :  { %15031 = vst [vmem:[#allocation36_spill] sm:$0xff] %v13011_v11 }
 0x884   :  { %5184 = vmatmul.mubr.f32.gmra.mrb[186].mxu1 %v12995_v9 }
 0x885   :  { %5188 = vmatprep.mubr.f32.mxu1 %v15028_v48  ;;  %v3982_v48 = vld [vmem:[#allocation3 + $0x447] sm:$0xff] }
 0x888   :  { %5189 = vmatmul.mubr.f32.gmra.mrb[188].mxu1 %v12999_v44 }
 0x889   :  { %5193 = vmatprep.mubr.f32.mxu1 %v15029_v3  ;;  %v3983_v3 = vld [vmem:[#allocation3 + $0x44f] sm:$0xff] }
 0x88c   :  { %5194 = vmatmul.mubr.f32.gmra.mrb[190].mxu1 %v13003_v42 }
 0x88d   :  { %5198 = vmatprep.mubr.f32.mxu1 %v15030_v31  ;;  %v4402_v31 = vld [vmem:[#allocation4 + $0x308] sm:$0xff] }
 0x890   :  { %5199 = vmatmul.mubr.f32.gmra.mrb[192].mxu1 %v13007_v5 }
 0x891   :  { %5203 = vmatprep.mubr.f32.mxu1 %v12681_v25  ;;  %v8196_v25 = vpack.c.bf16 %v4402_v31, %v4401_v1  ;;  %v4408_v1 = vld [vmem:[#allocation4 + $0x338] sm:$0xff]  ;;  %v13024_v31 = vld [vmem:[#allocation3 + $0x48] sm:$0xff] }
 0x894   :  { %5204 = vmatmul.mubr.f32.gmra.mrb[194].mxu1 %v13011_v11  ;;  %v4050_v11 = vld [vmem:[#allocation3 + $0x49] sm:$0xff] }
 0x895   :  { %5208 = vmatprep.mubr.f32.mxu1 %v3982_v48  ;;  %v8199_v48 = vpack.c.bf16 %v4404_v53, %v4403_v47  ;;  %v4409_v53 = vld [vmem:[#allocation4 + $0x340] sm:$0xff] }
 0x898   :  { %5209 = vmatmul.mubr.f32.gmra.mrb[196].mxu1 %v13014_v55  ;;  %v3985_v55 = vld [vmem:[#allocation3 + $0x30] sm:$0xff] }
 0x899   :  { %5213 = vmatprep.mubr.f32.mxu1 %v3983_v3  ;;  %v4405_v3 = vld [vmem:[#allocation4 + $0x320] sm:$0xff] }
 0x89c   :  { %5214 = vmatmul.mubr.f32.gmra.mrb[198].mxu1 %v13017_v6  ;;  %v8202_v6 = vpack.c.bf16 %v4406_v24, %v4405_v3  ;;  %v4052_v24 = vld [vmem:[#allocation3 + $0x69] sm:$0xff] }
 0x89d   :  { %5283 = vmatprep.mubr.f32.mxu1 %v12701_v46  ;;  %v4407_v46 = vld [vmem:[#allocation4 + $0x330] sm:$0xff]  ;;  %v13032_v3 = vld [vmem:[#allocation3 + $0x68] sm:$0xff] }
 0x89e   :  { %v8205_v47 = vpack.c.bf16 %v4408_v1, %v4407_v46  ;;  %15035 = vst [vmem:[#allocation40_spill] sm:$0xff] %v13032_v3  ;;  %v4413_v1 = vld [vmem:[#allocation4 + $0x360] sm:$0xff] }
 0x8a0   :  { %5284 = vmatmul.mubr.f32.vlgmr.msra.gmra.mrb[72].mxu1 %v3984_v43  ;;  %v4051_v43 = vld [vmem:[#allocation3 + $0x51] sm:$0xff] }
 0x8a1   :  { %5288 = vmatprep.mubr.f32.mxu1 %v12710_v15  ;;  %8197 = vmatpush1.bf16.msra.mxu1 %v8196_v25  ;;  %v4410_v15 = vld [vmem:[#allocation4 + $0x348] sm:$0xff]  ;;  %v4411_v25 = vld [vmem:[#allocation4 + $0x350] sm:$0xff] }
 0x8a2   :  { %8198 = vmatprep.subr.bf16.mxu1 %v14885_v10 }
 0x8a4   :  { %5289 = vmatmul.mubr.f32.gmra.mrb[74].mxu1 %v3985_v55  ;;  %v13028_v55 = vld [vmem:[#allocation3 + $0x50] sm:$0xff] }
 0x8a5   :  { %5293 = vmatprep.mubr.f32.mxu1 %v4050_v11  ;;  %8200 = vmatpush1.bf16.msra.mxu1 %v8199_v48  ;;  %15034 = vst [vmem:[#allocation39_spill] sm:$0xff] %v13028_v55  ;;  %v8208_v11 = vpack.c.bf16 %v4410_v15, %v4409_v53  ;;  %v4412_v48 = vld [vmem:[#allocation4 + $0x358] sm:$0xff]  ;;  %v4415_v15 = vld [vmem:[#allocation4 + $0x370] sm:$0xff] }
 0x8a6   :  { %8201 = vmatprep.subr.bf16.mxu1 %v14885_v10  ;;  %v8211_v46 = vpack.c.bf16 %v4412_v48, %v4411_v25  ;;  %v4417_v25 = vld [vmem:[#allocation4 + $0x380] sm:$0xff]  ;;  %v4418_v48 = vld [vmem:[#allocation4 + $0x388] sm:$0xff] }
 0x8a8   :  { %5294 = vmatmul.mubr.f32.gmra.mrb[76].mxu1 %v13024_v31 }
 0x8a9   :  { %5298 = vmatprep.mubr.f32.mxu1 %v4051_v43  ;;  %8203 = vmatpush1.bf16.msra.mxu1 %v8202_v6  ;;  %v4053_v6 = vld [vmem:[#allocation3 + $0x71] sm:$0xff]  ;;  %v4414_v43 = vld [vmem:[#allocation4 + $0x368] sm:$0xff] }
 0x8aa   :  { %8204 = vmatprep.subr.bf16.mxu1 %v14885_v10  ;;  %v8214_v53 = vpack.c.bf16 %v4414_v43, %v4413_v1  ;;  %v8220_v1 = vpack.c.bf16 %v4418_v48, %v4417_v25  ;;  %v4419_v43 = vld [vmem:[#allocation4 + $0x390] sm:$0xff]  ;;  %v13059_v25 = vld [vmem:[#allocation3 + $0xc8] sm:$0xff] }
 0x8ab   :  { %v4423_v48 = vld [vmem:[#allocation4 + $0x3b0] sm:$0xff] }
 0x8ac   :  { %5299 = vmatmul.mubr.f32.gmra.mrb[78].mxu1 %v13028_v55  ;;  %v13036_v55 = vld [vmem:[#allocation3 + $0x70] sm:$0xff] }
 0x8ad   :  { %5303 = vmatprep.mubr.f32.mxu1 %v4052_v24  ;;  %8206 = vmatpush1.bf16.msra.mxu1 %v8205_v47  ;;  %v4054_v47 = vld [vmem:[#allocation3 + $0x89] sm:$0xff]  ;;  %v4416_v24 = vld [vmem:[#allocation4 + $0x378] sm:$0xff] }
 0x8ae   :  { %8207 = vmatprep.subr.bf16.mxu1 %v14885_v10 }
 0x8b0   :  { %5304 = vmatmul.mubr.f32.gmra.mrb[80].mxu1 %v13032_v3  ;;  %v13040_v3 = vld [vmem:[#allocation3 + $0x88] sm:$0xff] }
 0x8b1   :  { %5308 = vmatprep.mubr.f32.mxu1 %v4053_v6  ;;  %8209 = vmatpush1.bf16.msra.mxu1 %v8208_v11  ;;  %15036 = vst [vmem:[#allocation11_spill] sm:$0xff] %v13040_v3  ;;  %v8217_v11 = vpack.c.bf16 %v4416_v24, %v4415_v15  ;;  %v13045_v6 = vld [vmem:[#allocation3 + $0x90] sm:$0xff]  ;;  %v4422_v15 = vld [vmem:[#allocation4 + $0x3a8] sm:$0xff] }
 0x8b2   :  { %8210 = vmatprep.subr.bf16.mxu1 %v14885_v10  ;;  %v13054_v24 = vld [vmem:[#allocation3 + $0xb0] sm:$0xff] }
 0x8b4   :  { %5309 = vmatmul.mubr.f32.gmra.mrb[82].mxu1 %v13036_v55 }
 0x8b5   :  { %5313 = vmatprep.mubr.f32.mxu1 %v4054_v47  ;;  %8212 = vmatpush1.bf16.msra.mxu1 %v8211_v46  ;;  %v4056_v46 = vld [vmem:[#allocation3 + $0xa9] sm:$0xff]  ;;  %v4420_v47 = vld [vmem:[#allocation4 + $0x398] sm:$0xff] }
 0x8b6   :  { %8213 = vmatprep.subr.bf16.mxu1 %v14885_v10 }
 0x8b8   :  { %5314 = vmatmul.mubr.f32.gmra.mrb[84].mxu1 %v13040_v3  ;;  %v13049_v3 = vld [vmem:[#allocation3 + $0xa8] sm:$0xff] }
 0x8b9   :  { %5318 = vmatprep.mubr.f32.mxu1 %v12754_v29  ;;  %8215 = vmatpush1.bf16.msra.mxu1 %v8214_v53  ;;  %v8223_v29 = vpack.c.bf16 %v4420_v47, %v4419_v43  ;;  %v4421_v53 = vld [vmem:[#allocation4 + $0x3a0] sm:$0xff]  ;;  %v13072_v43 = vld [vmem:[#allocation3 + $0xf0] sm:$0xff]  ;;  %v4426_v47 = vld [vmem:[#allocation4 + $0x3c8] sm:$0xff] }
 0x8ba   :  { %8216 = vmatprep.subr.bf16.mxu1 %v14885_v10 }
 0x8bc   :  { %5319 = vmatmul.mubr.f32.gmra.mrb[86].mxu1 %v13045_v6 }
 0x8bd   :  { %5323 = vmatprep.mubr.f32.mxu1 %v4056_v46  ;;  %8218 = vmatpush1.bf16.msra.mxu1 %v8217_v11  ;;  %v8226_v11 = vpack.c.bf16 %v4422_v15, %v4421_v53  ;;  %v4424_v46 = vld [vmem:[#allocation4 + $0x3b8] sm:$0xff]  ;;  %v13089_v53 = vld [vmem:[#allocation3 + $0x130] sm:$0xff] }
 0x8be   :  { %8219 = vmatprep.subr.bf16.mxu1 %v14885_v10  ;;  %v4428_v15 = vld [vmem:[#allocation4 + $0x3d8] sm:$0xff] }
 0x8c0   :  { %5324 = vmatmul.mubr.f32.gmra.mrb[88].mxu1 %v13049_v3 }
 0x8c1   :  { %5328 = vmatprep.mubr.f32.mxu1 %v12770_v60  ;;  %8221 = vmatpush1.bf16.msra.mxu1 %v8220_v1  ;;  %v13064_v60 = vld [vmem:[#allocation3 + $0xd0] sm:$0xff]  ;;  %v8229_v1 = vpack.c.bf16 %v4424_v46, %v4423_v48  ;;  %v4430_v46 = vld [vmem:[#allocation4 + $0x3e8] sm:$0xff] }
 0x8c2   :  { %8222 = vmatprep.subr.bf16.mxu1 %v14885_v10  ;;  %v13106_v48 = vld [vmem:[#allocation3 + $0x170] sm:$0xff] }
 0x8c4   :  { %5329 = vmatmul.mubr.f32.gmra.mrb[90].mxu1 %v13054_v24 }
 0x8c5   :  { %5333 = vmatprep.mubr.f32.mxu1 %v12778_v35  ;;  %8224 = vmatpush1.bf16.msra.mxu1 %v8223_v29  ;;  %v13068_v35 = vld [vmem:[#allocation3 + $0xe8] sm:$0xff] }
 0x8c6   :  { %8225 = vmatprep.subr.bf16.mxu1 %v14885_v10 }
 0x8c8   :  { %5334 = vmatmul.mubr.f32.gmra.mrb[92].mxu1 %v13059_v25 }
 0x8c9   :  { %5338 = vmatprep.mubr.f32.mxu1 %v12786_v61  ;;  %8227 = vmatpush1.bf16.msra.mxu1 %v8226_v11  ;;  %v13077_v61 = vld [vmem:[#allocation3 + $0x108] sm:$0xff] }
 0x8ca   :  { %8228 = vmatprep.subr.bf16.mxu1 %v14885_v10 }
 0x8cc   :  { %5339 = vmatmul.mubr.f32.gmra.mrb[94].mxu1 %v13064_v60 }
 0x8cd   :  { %5343 = vmatprep.mubr.f32.mxu1 %v12795_v16  ;;  %8230 = vmatpush1.bf16.msra.mxu1 %v8229_v1  ;;  %v13081_v16 = vld [vmem:[#allocation3 + $0x110] sm:$0xff] }
 0x8ce   :  { %8231 = vmatprep.subr.bf16.mxu1 %v14885_v10 }
 0x8d0   :  { %5344 = vmatmul.mubr.f32.gmra.mrb[96].mxu1 %v13068_v35 }
 0x8d1   :  { %5348 = vmatprep.mubr.f32.mxu1 %v12803_v58  ;;  %v13085_v58 = vld [vmem:[#allocation3 + $0x128] sm:$0xff] }
 0x8d4   :  { %5349 = vmatmul.mubr.f32.gmra.mrb[98].mxu1 %v13072_v43 }
 0x8d5   :  { %5353 = vmatprep.mubr.f32.mxu1 %v12811_v7  ;;  %v4425_v7 = vld [vmem:[#allocation4 + $0x3c0] sm:$0xff] }
 0x8d6   :  { %v8232_v29 = vpack.c.bf16 %v4426_v47, %v4425_v7  ;;  %v13123_v7 = vld [vmem:[#allocation3 + $0x1b0] sm:$0xff] }
 0x8d8   :  { %5354 = vmatmul.mubr.f32.gmra.mrb[100].mxu1 %v13077_v61 }
 0x8d9   :  { %5358 = vmatprep.mubr.f32.mxu1 %v12819_v34  ;;  %8233 = vmatpush1.bf16.msra.mxu1 %v8232_v29  ;;  %v13094_v34 = vld [vmem:[#allocation3 + $0x148] sm:$0xff]  ;;  %v13140_v29 = vld [vmem:[#allocation3 + $0x1f0] sm:$0xff] }
 0x8da   :  { %8234 = vmatprep.subr.bf16.mxu1 %v14885_v10 }
 0x8dc   :  { %5359 = vmatmul.mubr.f32.gmra.mrb[102].mxu1 %v13081_v16 }
 0x8dd   :  { %5363 = vmatprep.mubr.f32.mxu1 %v12828_v36  ;;  %v13098_v36 = vld [vmem:[#allocation3 + $0x150] sm:$0xff] }
 0x8e0   :  { %5364 = vmatmul.mubr.f32.gmra.mrb[104].mxu1 %v13085_v58 }
 0x8e1   :  { %5368 = vmatprep.mubr.f32.mxu1 %v12836_v8  ;;  %v13102_v8 = vld [vmem:[#allocation3 + $0x168] sm:$0xff] }
 0x8e4   :  { %5369 = vmatmul.mubr.f32.gmra.mrb[106].mxu1 %v13089_v53 }
 0x8e5   :  { %5373 = vmatprep.mubr.f32.mxu1 %v12844_v56  ;;  %v4427_v56 = vld [vmem:[#allocation4 + $0x3d0] sm:$0xff] }
 0x8e6   :  { %v8235_v11 = vpack.c.bf16 %v4428_v15, %v4427_v56  ;;  %v13143_v56 = vld [vmem:[#allocation3 + $0x208] sm:$0xff]  ;;  %v13146_v15 = vld [vmem:[#allocation3 + $0x210] sm:$0xff] }
 0x8e8   :  { %5374 = vmatmul.mubr.f32.gmra.mrb[108].mxu1 %v13094_v34 }
 0x8e9   :  { %5378 = vmatprep.mubr.f32.mxu1 %v12852_v27  ;;  %8236 = vmatpush1.bf16.msra.mxu1 %v8235_v11  ;;  %v13111_v27 = vld [vmem:[#allocation3 + $0x188] sm:$0xff]  ;;  %v4017_v11 = vld [vmem:[#allocation3 + $0x270] sm:$0xff] }
 0x8ea   :  { %8237 = vmatprep.subr.bf16.mxu1 %v14885_v10 }
 0x8ec   :  { %5379 = vmatmul.mubr.f32.gmra.mrb[110].mxu1 %v13098_v36 }
 0x8ed   :  { %5383 = vmatprep.mubr.f32.mxu1 %v12861_v19  ;;  %v13115_v19 = vld [vmem:[#allocation3 + $0x190] sm:$0xff] }
 0x8f0   :  { %5384 = vmatmul.mubr.f32.gmra.mrb[112].mxu1 %v13102_v8 }
 0x8f1   :  { %5388 = vmatprep.mubr.f32.mxu1 %v12865_v28  ;;  %v13119_v28 = vld [vmem:[#allocation3 + $0x1a8] sm:$0xff] }
 0x8f4   :  { %5389 = vmatmul.mubr.f32.gmra.mrb[114].mxu1 %v13106_v48 }
 0x8f5   :  { %5393 = vmatprep.mubr.f32.mxu1 %v12869_v26  ;;  %v4429_v26 = vld [vmem:[#allocation4 + $0x3e0] sm:$0xff] }
 0x8f6   :  { %v8238_v1 = vpack.c.bf16 %v4430_v46, %v4429_v26  ;;  %v13152_v26 = vld [vmem:[#allocation3 + $0x288] sm:$0xff]  ;;  %v13156_v46 = vld [vmem:[#allocation3 + $0x290] sm:$0xff] }
 0x8f8   :  { %5394 = vmatmul.mubr.f32.gmra.mrb[116].mxu1 %v13111_v27 }
 0x8f9   :  { %5398 = vmatprep.mubr.f32.mxu1 %v12873_v54  ;;  %8239 = vmatpush1.bf16.msra.mxu1 %v8238_v1  ;;  %v13128_v54 = vld [vmem:[#allocation3 + $0x1c8] sm:$0xff]  ;;  %v13252_v1 = vld [vmem:[#allocation3 + $0x410] sm:$0xff] }
 0x8fa   :  { %8240 = vmatprep.subr.bf16.mxu1 %v14885_v10  ;;  %v4432_v10 = vld [vmem:[#allocation4 + $0x3f8] sm:$0xff] }
 0x8fc   :  { %5399 = vmatmul.mubr.f32.gmra.mrb[118].mxu1 %v13115_v19 }
 0x8fd   :  { %5403 = vmatprep.mubr.f32.mxu1 %v12878_v2  ;;  %v13132_v2 = vld [vmem:[#allocation3 + $0x1d0] sm:$0xff] }
 0x900   :  { %5404 = vmatmul.mubr.f32.gmra.mrb[120].mxu1 %v13119_v28 }
 0x901   :  { %5408 = vmatprep.mubr.f32.mxu1 %v12882_v0  ;;  %v13136_v0 = vld [vmem:[#allocation3 + $0x1e8] sm:$0xff] }
 0x904   :  { %5409 = vmatmul.mubr.f32.gmra.mrb[122].mxu1 %v13123_v7 }
 0x905   :  { %5413 = vmatprep.mubr.f32.mxu1 %v12886_v63  ;;  %v4431_v63 = vld [vmem:[#allocation4 + $0x3f0] sm:$0xff] }
 0x906   :  { %v8241_v47 = vpack.c.bf16 %v4432_v10, %v4431_v63  ;;  %v13256_v63 = vld [vmem:[#allocation3 + $0x428] sm:$0xff]  ;;  %v13260_v10 = vld [vmem:[#allocation3 + $0x430] sm:$0xff] }
 0x908   :  { %5414 = vmatmul.mubr.f32.gmra.mrb[124].mxu1 %v13128_v54 }
 0x909   :  { %5418 = vmatprep.mubr.f32.mxu1 %v12890_v18  ;;  %v4078_v18 = vld [vmem:[#allocation3 + $0x209] sm:$0xff]  ;;  %8242 = vmatpush1.bf16.msra.mxu1 %v8241_v47 }
 0x90a   :  { %v13263_v47 = vld [vmem:[#allocation3 + $0x448] sm:$0xff] }
 0x90b   :  { %15040 = vst [vmem:[#allocation8_spill] sm:$0xff] %v13263_v47 }
 0x90c   :  { %5419 = vmatmul.mubr.f32.gmra.mrb[126].mxu1 %v13132_v2 }
 0x90d   :  { %5423 = vmatprep.mubr.f32.mxu1 %v12894_v52  ;;  %v4079_v52 = vld [vmem:[#allocation3 + $0x211] sm:$0xff] }
 0x910   :  { %5424 = vmatmul.mubr.f32.gmra.mrb[128].mxu1 %v13136_v0 }
 0x911   :  { %5428 = vmatprep.mubr.f32.mxu1 %v12897_v41  ;;  %v4016_v41 = vld [vmem:[#allocation3 + $0x268] sm:$0xff] }
 0x914   :  { %5429 = vmatmul.mubr.f32.gmra.mrb[130].mxu1 %v13140_v29 }
 0x915   :  { %5433 = vmatprep.mubr.f32.mxu1 %v4078_v18  ;;  %v4111_v18 = vld [vmem:[#allocation3 + $0x451] sm:$0xff] }
 0x918   :  { %5434 = vmatmul.mubr.f32.gmra.mrb[132].mxu1 %v13143_v56 }
 0x919   :  { %5438 = vmatprep.mubr.f32.mxu1 %v4079_v52  ;;  %v13266_v52 = vld [vmem:[#allocation3 + $0x450] sm:$0xff] }
 0x91c   :  { %5439 = vmatmul.mubr.f32.gmra.mrb[134].mxu1 %v13146_v15 }
 0x91d   :  { %5443 = vmatprep.mubr.f32.mxu1 %v12903_v30  ;;  %v13160_v30 = vld [vmem:[#allocation3 + $0x2a8] sm:$0xff] }
 0x920   :  { %5444 = vmatmul.mubr.f32.gmra.mrb[136].mxu1 %v4016_v41  ;;  %v4113_v41 = vld [vmem:[#allocation3 + $0x47] sm:$0xff] }
 0x921   :  { %5448 = vmatprep.mubr.f32.mxu1 %v12907_v57  ;;  %v13164_v57 = vld [vmem:[#allocation3 + $0x2b0] sm:$0xff] }
 0x924   :  { %5449 = vmatmul.mubr.f32.gmra.mrb[138].mxu1 %v4017_v11  ;;  %v15041_v11 = vld [vmem:[#allocation39_spill] sm:$0xff] }
 0x925   :  { %5453 = vmatprep.mubr.f32.mxu1 %v12911_v14  ;;  %v13168_v14 = vld [vmem:[#allocation3 + $0x2c8] sm:$0xff] }
 0x928   :  { %5454 = vmatmul.mubr.f32.gmra.mrb[140].mxu1 %v13152_v26 }
 0x929   :  { %5458 = vmatprep.mubr.f32.mxu1 %v12915_v23  ;;  %v13172_v23 = vld [vmem:[#allocation3 + $0x2d0] sm:$0xff] }
 0x92c   :  { %5459 = vmatmul.mubr.f32.gmra.mrb[142].mxu1 %v13156_v46 }
 0x92d   :  { %5463 = vmatprep.mubr.f32.mxu1 %v12919_v37  ;;  %v13176_v37 = vld [vmem:[#allocation3 + $0x2e8] sm:$0xff] }
 0x930   :  { %5464 = vmatmul.mubr.f32.gmra.mrb[144].mxu1 %v13160_v30 }
 0x931   :  { %5468 = vmatprep.mubr.f32.mxu1 %v12923_v17  ;;  %v13180_v17 = vld [vmem:[#allocation3 + $0x2f0] sm:$0xff] }
 0x934   :  { %5469 = vmatmul.mubr.f32.gmra.mrb[146].mxu1 %v13164_v57 }
 0x935   :  { %5473 = vmatprep.mubr.f32.mxu1 %v12927_v33  ;;  %v13184_v33 = vld [vmem:[#allocation3 + $0x308] sm:$0xff] }
 0x938   :  { %5474 = vmatmul.mubr.f32.gmra.mrb[148].mxu1 %v13168_v14 }
 0x939   :  { %5478 = vmatprep.mubr.f32.mxu1 %v12931_v21  ;;  %v13188_v21 = vld [vmem:[#allocation3 + $0x310] sm:$0xff] }
 0x93c   :  { %5479 = vmatmul.mubr.f32.gmra.mrb[150].mxu1 %v13172_v23 }
 0x93d   :  { %5483 = vmatprep.mubr.f32.mxu1 %v12935_v38  ;;  %v13192_v38 = vld [vmem:[#allocation3 + $0x328] sm:$0xff] }
 0x940   :  { %5484 = vmatmul.mubr.f32.gmra.mrb[152].mxu1 %v13176_v37 }
 0x941   :  { %5488 = vmatprep.mubr.f32.mxu1 %v12939_v22  ;;  %v13196_v22 = vld [vmem:[#allocation3 + $0x330] sm:$0xff] }
 0x944   :  { %5489 = vmatmul.mubr.f32.gmra.mrb[154].mxu1 %v13180_v17 }
 0x945   :  { %5493 = vmatprep.mubr.f32.mxu1 %v12943_v45  ;;  %v13200_v45 = vld [vmem:[#allocation3 + $0x348] sm:$0xff] }
 0x948   :  { %5494 = vmatmul.mubr.f32.gmra.mrb[156].mxu1 %v13184_v33 }
 0x949   :  { %5498 = vmatprep.mubr.f32.mxu1 %v12947_v13  ;;  %v13204_v13 = vld [vmem:[#allocation3 + $0x350] sm:$0xff] }
 0x94c   :  { %5499 = vmatmul.mubr.f32.gmra.mrb[158].mxu1 %v13188_v21 }
 0x94d   :  { %5503 = vmatprep.mubr.f32.mxu1 %v12951_v39  ;;  %v13208_v39 = vld [vmem:[#allocation3 + $0x368] sm:$0xff] }
 0x950   :  { %5504 = vmatmul.mubr.f32.gmra.mrb[160].mxu1 %v13192_v38 }
 0x951   :  { %5508 = vmatprep.mubr.f32.mxu1 %v12955_v40  ;;  %v13212_v40 = vld [vmem:[#allocation3 + $0x370] sm:$0xff] }
 0x954   :  { %5509 = vmatmul.mubr.f32.gmra.mrb[162].mxu1 %v13196_v22 }
 0x955   :  { %5513 = vmatprep.mubr.f32.mxu1 %v12959_v59  ;;  %v13216_v59 = vld [vmem:[#allocation3 + $0x388] sm:$0xff] }
 0x958   :  { %5514 = vmatmul.mubr.f32.gmra.mrb[164].mxu1 %v13200_v45 }
 0x959   :  { %5518 = vmatprep.mubr.f32.mxu1 %v12963_v62  ;;  %v13220_v62 = vld [vmem:[#allocation3 + $0x390] sm:$0xff] }
 0x95c   :  { %5519 = vmatmul.mubr.f32.gmra.mrb[166].mxu1 %v13204_v13 }
 0x95d   :  { %5523 = vmatprep.mubr.f32.mxu1 %v12967_v32  ;;  %v13224_v32 = vld [vmem:[#allocation3 + $0x3a8] sm:$0xff] }
 0x960   :  { %5524 = vmatmul.mubr.f32.gmra.mrb[168].mxu1 %v13208_v39 }
 0x961   :  { %5528 = vmatprep.mubr.f32.mxu1 %v12971_v49  ;;  %v13228_v49 = vld [vmem:[#allocation3 + $0x3b0] sm:$0xff] }
 0x964   :  { %5529 = vmatmul.mubr.f32.gmra.mrb[170].mxu1 %v13212_v40 }
 0x965   :  { %5533 = vmatprep.mubr.f32.mxu1 %v12975_v20  ;;  %v13232_v20 = vld [vmem:[#allocation3 + $0x3c8] sm:$0xff] }
 0x968   :  { %5534 = vmatmul.mubr.f32.gmra.mrb[172].mxu1 %v13216_v59 }
 0x969   :  { %5538 = vmatprep.mubr.f32.mxu1 %v12979_v12  ;;  %v13236_v12 = vld [vmem:[#allocation3 + $0x3d0] sm:$0xff] }
 0x96c   :  { %5539 = vmatmul.mubr.f32.gmra.mrb[174].mxu1 %v13220_v62 }
 0x96d   :  { %5543 = vmatprep.mubr.f32.mxu1 %v12983_v4  ;;  %v13240_v4 = vld [vmem:[#allocation3 + $0x3e8] sm:$0xff] }
 0x970   :  { %5544 = vmatmul.mubr.f32.gmra.mrb[176].mxu1 %v13224_v32 }
 0x971   :  { %5548 = vmatprep.mubr.f32.mxu1 %v12987_v50  ;;  %v13244_v50 = vld [vmem:[#allocation3 + $0x3f0] sm:$0xff] }
 0x974   :  { %5549 = vmatmul.mubr.f32.gmra.mrb[178].mxu1 %v13228_v49 }
 0x975   :  { %5553 = vmatprep.mubr.f32.mxu1 %v12991_v51  ;;  %v13248_v51 = vld [vmem:[#allocation3 + $0x408] sm:$0xff] }
 0x978   :  { %5554 = vmatmul.mubr.f32.gmra.mrb[180].mxu1 %v13232_v20 }
 0x979   :  { %5558 = vmatprep.mubr.f32.mxu1 %v12995_v9  ;;  %v15037_v9 = vld [vmem:[#allocation36_spill] sm:$0xff] }
 0x97c   :  { %5559 = vmatmul.mubr.f32.gmra.mrb[182].mxu1 %v13236_v12 }
 0x97d   :  { %5563 = vmatprep.mubr.f32.mxu1 %v12999_v44  ;;  %v15038_v44 = vld [vmem:[#allocation37_spill] sm:$0xff] }
 0x980   :  { %5564 = vmatmul.mubr.f32.gmra.mrb[184].mxu1 %v13240_v4 }
 0x981   :  { %5568 = vmatprep.mubr.f32.mxu1 %v13003_v42  ;;  %v15039_v42 = vld [vmem:[#allocation38_spill] sm:$0xff] }
 0x984   :  { %5569 = vmatmul.mubr.f32.gmra.mrb[186].mxu1 %v13244_v50 }
 0x985   :  { %5573 = vmatprep.mubr.f32.mxu1 %v13007_v5  ;;  %v4110_v5 = vld [vmem:[#allocation3 + $0x449] sm:$0xff] }
 0x988   :  { %5574 = vmatmul.mubr.f32.gmra.mrb[188].mxu1 %v13248_v51 }
 0x989   :  { %5578 = vmatprep.mubr.f32.mxu1 %v15037_v9  ;;  %v4114_v9 = vld [vmem:[#allocation3 + $0x4f] sm:$0xff] }
 0x98c   :  { %5579 = vmatmul.mubr.f32.gmra.mrb[190].mxu1 %v13252_v1 }
 0x98d   :  { %5583 = vmatprep.mubr.f32.mxu1 %v15038_v44  ;;  %v15042_v44 = vld [vmem:[#allocation40_spill] sm:$0xff] }
 0x990   :  { %5584 = vmatmul.mubr.f32.gmra.mrb[192].mxu1 %v13256_v63 }
 0x991   :  { %5588 = vmatprep.mubr.f32.mxu1 %v15039_v42  ;;  %v4115_v42 = vld [vmem:[#allocation3 + $0x67] sm:$0xff] }
 0x994   :  { %5589 = vmatmul.mubr.f32.gmra.mrb[194].mxu1 %v13260_v10 }
 0x995   :  { %5593 = vmatprep.mubr.f32.mxu1 %v4110_v5  ;;  %v4116_v5 = vld [vmem:[#allocation3 + $0x6f] sm:$0xff] }
 0x998   :  { %5594 = vmatmul.mubr.f32.gmra.mrb[196].mxu1 %v13263_v47  ;;  %v4117_v47 = vld [vmem:[#allocation3 + $0x87] sm:$0xff] }
 0x999   :  { %5598 = vmatprep.mubr.f32.mxu1 %v4111_v18  ;;  %v15043_v18 = vld [vmem:[#allocation11_spill] sm:$0xff] }
 0x99c   :  { %5599 = vmatmul.mubr.f32.gmra.mrb[198].mxu1 %v13266_v52 }
 0x99d   :  { %5668 = vmatprep.mubr.f32.mxu1 %v13024_v31  ;;  %v4118_v31 = vld [vmem:[#allocation3 + $0x8f] sm:$0xff] }
 0x9a0   :  { %5669 = vmatmul.mubr.f32.vlgmr.msra.gmra.mrb[72].mxu1 %v4113_v41  ;;  %v4119_v41 = vld [vmem:[#allocation3 + $0xa7] sm:$0xff] }
 0x9a1   :  { %5673 = vmatprep.mubr.f32.mxu1 %v15041_v11  ;;  %v4120_v11 = vld [vmem:[#allocation3 + $0xaf] sm:$0xff] }
 0x9a4   :  { %5674 = vmatmul.mubr.f32.gmra.mrb[74].mxu1 %v4114_v9  ;;  %v4122_v9 = vld [vmem:[#allocation3 + $0xcf] sm:$0xff] }
 0x9a5   :  { %5678 = vmatprep.mubr.f32.mxu1 %v15042_v44  ;;  %v4304_v44 = vld [vmem:[#allocation3 + $0x471] sm:$0xff] }
 0x9a8   :  { %5679 = vmatmul.mubr.f32.gmra.mrb[76].mxu1 %v4115_v42  ;;  %v4146_v42 = vld [vmem:[#allocation3 + $0x28f] sm:$0xff] }
 0x9a9   :  { %5683 = vmatprep.mubr.f32.mxu1 %v13036_v55  ;;  %v4121_v55 = vld [vmem:[#allocation3 + $0xc7] sm:$0xff] }
 0x9ac   :  { %5684 = vmatmul.mubr.f32.gmra.mrb[78].mxu1 %v4116_v5  ;;  %v4147_v5 = vld [vmem:[#allocation3 + $0x2a7] sm:$0xff] }
 0x9ad   :  { %5688 = vmatprep.mubr.f32.mxu1 %v15043_v18  ;;  %v4148_v18 = vld [vmem:[#allocation3 + $0x2af] sm:$0xff] }
 0x9b0   :  { %5689 = vmatmul.mubr.f32.gmra.mrb[80].mxu1 %v4117_v47  ;;  %v13299_v47 = vld [vmem:[#allocation2 + $0x8] sm:$0xff] }
 0x9b1   :  { %5693 = vmatprep.mubr.f32.mxu1 %v13045_v6  ;;  %v4123_v6 = vld [vmem:[#allocation3 + $0xe7] sm:$0xff] }
 0x9b4   :  { %5694 = vmatmul.mubr.f32.gmra.mrb[82].mxu1 %v4118_v31  ;;  %v4150_v31 = vld [vmem:[#allocation3 + $0x2cf] sm:$0xff] }
 0x9b5   :  { %5698 = vmatprep.mubr.f32.mxu1 %v13049_v3  ;;  %v4124_v3 = vld [vmem:[#allocation3 + $0xef] sm:$0xff] }
 0x9b8   :  { %5699 = vmatmul.mubr.f32.gmra.mrb[84].mxu1 %v4119_v41  ;;  %v4166_v41 = vld [vmem:[#allocation3 + $0x3cf] sm:$0xff] }
 0x9b9   :  { %5703 = vmatprep.mubr.f32.mxu1 %v13054_v24  ;;  %v4125_v24 = vld [vmem:[#allocation3 + $0x107] sm:$0xff] }
 0x9bc   :  { %5704 = vmatmul.mubr.f32.gmra.mrb[86].mxu1 %v4120_v11  ;;  %v15045_v11 = vld [vmem:[#allocation13_spill] sm:$0xff] }
 0x9bd   :  { %5708 = vmatprep.mubr.f32.mxu1 %v13059_v25  ;;  %v4126_v25 = vld [vmem:[#allocation3 + $0x10f] sm:$0xff] }
 0x9c0   :  { %5709 = vmatmul.mubr.f32.gmra.mrb[88].mxu1 %v4121_v55 }
 0x9c1   :  { %5713 = vmatprep.mubr.f32.mxu1 %v13064_v60  ;;  %v4127_v60 = vld [vmem:[#allocation3 + $0x127] sm:$0xff] }
 0x9c4   :  { %5714 = vmatmul.mubr.f32.gmra.mrb[90].mxu1 %v4122_v9  ;;  %v4167_v9 = vld [vmem:[#allocation3 + $0x3e7] sm:$0xff] }
 0x9c5   :  { %5718 = vmatprep.mubr.f32.mxu1 %v13068_v35  ;;  %v4128_v35 = vld [vmem:[#allocation3 + $0x12f] sm:$0xff] }
 0x9c8   :  { %5719 = vmatmul.mubr.f32.gmra.mrb[92].mxu1 %v4123_v6 }
 0x9c9   :  { %5723 = vmatprep.mubr.f32.mxu1 %v13072_v43  ;;  %v4129_v43 = vld [vmem:[#allocation3 + $0x147] sm:$0xff] }
 0x9cc   :  { %5724 = vmatmul.mubr.f32.gmra.mrb[94].mxu1 %v4124_v3 }
 0x9cd   :  { %5728 = vmatprep.mubr.f32.mxu1 %v13077_v61  ;;  %v4130_v61 = vld [vmem:[#allocation3 + $0x14f] sm:$0xff] }
 0x9d0   :  { %5729 = vmatmul.mubr.f32.gmra.mrb[96].mxu1 %v4125_v24  ;;  %v15047_v24 = vld [vmem:[#allocation14_spill] sm:$0xff] }
 0x9d1   :  { %5733 = vmatprep.mubr.f32.mxu1 %v13081_v16  ;;  %v4131_v16 = vld [vmem:[#allocation3 + $0x167] sm:$0xff] }
 0x9d4   :  { %5734 = vmatmul.mubr.f32.gmra.mrb[98].mxu1 %v4126_v25 }
 0x9d5   :  { %5738 = vmatprep.mubr.f32.mxu1 %v13085_v58  ;;  %v4132_v58 = vld [vmem:[#allocation3 + $0x16f] sm:$0xff] }
 0x9d8   :  { %5739 = vmatmul.mubr.f32.gmra.mrb[100].mxu1 %v4127_v60 }
 0x9d9   :  { %5743 = vmatprep.mubr.f32.mxu1 %v13089_v53  ;;  %v4133_v53 = vld [vmem:[#allocation3 + $0x187] sm:$0xff] }
 0x9dc   :  { %5744 = vmatmul.mubr.f32.gmra.mrb[102].mxu1 %v4128_v35 }
 0x9dd   :  { %5748 = vmatprep.mubr.f32.mxu1 %v13094_v34  ;;  %v4134_v34 = vld [vmem:[#allocation3 + $0x18f] sm:$0xff] }
 0x9e0   :  { %5749 = vmatmul.mubr.f32.gmra.mrb[104].mxu1 %v4129_v43  ;;  %v15048_v43 = vld [vmem:[#allocation15_spill] sm:$0xff] }
 0x9e1   :  { %5753 = vmatprep.mubr.f32.mxu1 %v13098_v36  ;;  %v4135_v36 = vld [vmem:[#allocation3 + $0x1a7] sm:$0xff] }
 0x9e4   :  { %5754 = vmatmul.mubr.f32.gmra.mrb[106].mxu1 %v4130_v61 }
 0x9e5   :  { %5758 = vmatprep.mubr.f32.mxu1 %v13102_v8  ;;  %v4136_v8 = vld [vmem:[#allocation3 + $0x1af] sm:$0xff] }
 0x9e8   :  { %5759 = vmatmul.mubr.f32.gmra.mrb[108].mxu1 %v4131_v16 }
 0x9e9   :  { %5763 = vmatprep.mubr.f32.mxu1 %v13106_v48  ;;  %v4137_v48 = vld [vmem:[#allocation3 + $0x1c7] sm:$0xff] }
 0x9ec   :  { %5764 = vmatmul.mubr.f32.gmra.mrb[110].mxu1 %v4132_v58 }
 0x9ed   :  { %5768 = vmatprep.mubr.f32.mxu1 %v13111_v27  ;;  %v4138_v27 = vld [vmem:[#allocation3 + $0x1cf] sm:$0xff] }
 0x9f0   :  { %5769 = vmatmul.mubr.f32.gmra.mrb[112].mxu1 %v4133_v53  ;;  %v15049_v53 = vld [vmem:[#allocation21_spill] sm:$0xff] }
 0x9f1   :  { %5773 = vmatprep.mubr.f32.mxu1 %v13115_v19  ;;  %v4139_v19 = vld [vmem:[#allocation3 + $0x1e7] sm:$0xff] }
 0x9f4   :  { %5774 = vmatmul.mubr.f32.gmra.mrb[114].mxu1 %v4134_v34 }
 0x9f5   :  { %5778 = vmatprep.mubr.f32.mxu1 %v13119_v28  ;;  %v4140_v28 = vld [vmem:[#allocation3 + $0x1ef] sm:$0xff] }
 0x9f8   :  { %5779 = vmatmul.mubr.f32.gmra.mrb[116].mxu1 %v4135_v36 }
 0x9f9   :  { %5783 = vmatprep.mubr.f32.mxu1 %v13123_v7  ;;  %v4141_v7 = vld [vmem:[#allocation3 + $0x207] sm:$0xff] }
 0x9fc   :  { %5784 = vmatmul.mubr.f32.gmra.mrb[118].mxu1 %v4136_v8 }
 0x9fd   :  { %5788 = vmatprep.mubr.f32.mxu1 %v13128_v54  ;;  %v4142_v54 = vld [vmem:[#allocation3 + $0x20f] sm:$0xff] }
 0xa00   :  { %5789 = vmatmul.mubr.f32.gmra.mrb[120].mxu1 %v4137_v48  ;;  %v15050_v48 = vld [vmem:[#allocation7_spill] sm:$0xff] }
 0xa01   :  { %5793 = vmatprep.mubr.f32.mxu1 %v13132_v2  ;;  %v4143_v2 = vld [vmem:[#allocation3 + $0x227] sm:$0xff] }
 0xa04   :  { %5794 = vmatmul.mubr.f32.gmra.mrb[122].mxu1 %v4138_v27 }
 0xa05   :  { %5798 = vmatprep.mubr.f32.mxu1 %v13136_v0  ;;  %v4303_v0 = vld [vmem:[#allocation3 + $0x469] sm:$0xff] }
 0xa06   :  { %7696 = vmatprep.mubr.f32.mxu0 %v4303_v0  ;;  %v15052_v0 = vld [vmem:[#allocation8_spill] sm:$0xff] }
 0xa07   :  { %7697 = vmatmul.mubr.f32.gmra.mrb[190].mxu0 %v4304_v44  ;;  %v15053_v44 = vld [vmem:[#allocation23_spill] sm:$0xff] }
 0xa08   :  { %5799 = vmatmul.mubr.f32.gmra.mrb[124].mxu1 %v4139_v19 }
 0xa09   :  { %5803 = vmatprep.mubr.f32.mxu1 %v13140_v29  ;;  %v4144_v29 = vld [vmem:[#allocation3 + $0x22f] sm:$0xff] }
 0xa0c   :  { %5804 = vmatmul.mubr.f32.gmra.mrb[126].mxu1 %v4140_v28 }
 0xa0d   :  { %5808 = vmatprep.mubr.f32.mxu1 %v13143_v56  ;;  %v15044_v56 = vmov 1.0  }
 0xa0e   :  { %6438 = vmatprep.mubr.f32.mxu0 %v15044_v56 }
 0xa10   :  { %5809 = vmatmul.mubr.f32.gmra.mrb[128].mxu1 %v4141_v7  ;;  %v15051_v7 = vld [vmem:[#allocation24_spill] sm:$0xff] }
 0xa11   :  { %5813 = vmatprep.mubr.f32.mxu1 %v13146_v15  ;;  %v4145_v15 = vld [vmem:[#allocation3 + $0x287] sm:$0xff] }
 0xa14   :  { %5814 = vmatmul.mubr.f32.gmra.mrb[130].mxu1 %v4142_v54 }
 0xa15   :  { %5818 = vmatprep.mubr.f32.mxu1 %v13299_v47 }
 0xa18   :  { %5819 = vmatmul.mubr.f32.gmra.mrb[132].mxu1 %v4143_v2 }
 0xa19   :  { %5823 = vmatprep.mubr.f32.mxu1 %v13299_v47 }
 0xa1c   :  { %5824 = vmatmul.mubr.f32.gmra.mrb[134].mxu1 %v4144_v29 }
 0xa1d   :  { %5828 = vmatprep.mubr.f32.mxu1 %v13152_v26  ;;  %v4149_v26 = vld [vmem:[#allocation3 + $0x2c7] sm:$0xff] }
 0xa20   :  { %5829 = vmatmul.mubr.f32.gmra.mrb[136].mxu1 %v4145_v15 }
 0xa21   :  { %5833 = vmatprep.mubr.f32.mxu1 %v13156_v46  ;;  %v4151_v46 = vld [vmem:[#allocation3 + $0x2e7] sm:$0xff] }
 0xa24   :  { %5834 = vmatmul.mubr.f32.gmra.mrb[138].mxu1 %v4146_v42 }
 0xa25   :  { %5838 = vmatprep.mubr.f32.mxu1 %v13160_v30  ;;  %v4152_v30 = vld [vmem:[#allocation3 + $0x2ef] sm:$0xff] }
 0xa28   :  { %5839 = vmatmul.mubr.f32.gmra.mrb[140].mxu1 %v4147_v5 }
 0xa29   :  { %5843 = vmatprep.mubr.f32.mxu1 %v13164_v57  ;;  %v4153_v57 = vld [vmem:[#allocation3 + $0x307] sm:$0xff] }
 0xa2c   :  { %5844 = vmatmul.mubr.f32.gmra.mrb[142].mxu1 %v4148_v18  ;;  %v15054_v18 = vld [vmem:[#allocation27_spill] sm:$0xff] }
 0xa2d   :  { %5848 = vmatprep.mubr.f32.mxu1 %v13168_v14  ;;  %v4154_v14 = vld [vmem:[#allocation3 + $0x30f] sm:$0xff] }
 0xa30   :  { %5849 = vmatmul.mubr.f32.gmra.mrb[144].mxu1 %v4149_v26 }
 0xa31   :  { %5853 = vmatprep.mubr.f32.mxu1 %v13172_v23  ;;  %v4155_v23 = vld [vmem:[#allocation3 + $0x327] sm:$0xff] }
 0xa34   :  { %5854 = vmatmul.mubr.f32.gmra.mrb[146].mxu1 %v4150_v31 }
 0xa35   :  { %5858 = vmatprep.mubr.f32.mxu1 %v13176_v37  ;;  %v4156_v37 = vld [vmem:[#allocation3 + $0x32f] sm:$0xff] }
 0xa38   :  { %5859 = vmatmul.mubr.f32.gmra.mrb[148].mxu1 %v4151_v46  ;;  %v4175_v46 = vld [vmem:[#allocation3 + $0x467] sm:$0xff] }
 0xa39   :  { %5863 = vmatprep.mubr.f32.mxu1 %v13180_v17  ;;  %v4157_v17 = vld [vmem:[#allocation3 + $0x347] sm:$0xff] }
 0xa3c   :  { %5864 = vmatmul.mubr.f32.gmra.mrb[150].mxu1 %v4152_v30 }
 0xa3d   :  { %5868 = vmatprep.mubr.f32.mxu1 %v13184_v33  ;;  %v4158_v33 = vld [vmem:[#allocation3 + $0x34f] sm:$0xff] }
 0xa40   :  { %5869 = vmatmul.mubr.f32.gmra.mrb[152].mxu1 %v4153_v57  ;;  %v15055_v57 = vld [vmem:[#allocation26_spill] sm:$0xff] }
 0xa41   :  { %5873 = vmatprep.mubr.f32.mxu1 %v13188_v21  ;;  %v4159_v21 = vld [vmem:[#allocation3 + $0x367] sm:$0xff] }
 0xa44   :  { %5874 = vmatmul.mubr.f32.gmra.mrb[154].mxu1 %v4154_v14 }
 0xa45   :  { %5878 = vmatprep.mubr.f32.mxu1 %v13192_v38  ;;  %v4160_v38 = vld [vmem:[#allocation3 + $0x36f] sm:$0xff] }
 0xa48   :  { %5879 = vmatmul.mubr.f32.gmra.mrb[156].mxu1 %v4155_v23 }
 0xa49   :  { %5883 = vmatprep.mubr.f32.mxu1 %v13196_v22  ;;  %v4161_v22 = vld [vmem:[#allocation3 + $0x387] sm:$0xff] }
 0xa4c   :  { %5884 = vmatmul.mubr.f32.gmra.mrb[158].mxu1 %v4156_v37  ;;  %v4176_v37 = vld [vmem:[#allocation3 + $0x46f] sm:$0xff] }
 0xa4d   :  { %5888 = vmatprep.mubr.f32.mxu1 %v13200_v45  ;;  %v4162_v45 = vld [vmem:[#allocation3 + $0x38f] sm:$0xff] }
 0xa50   :  { %5889 = vmatmul.mubr.f32.gmra.mrb[160].mxu1 %v4157_v17  ;;  %v15056_v17 = vld [vmem:[#allocation30_spill] sm:$0xff] }
 0xa51   :  { %5893 = vmatprep.mubr.f32.mxu1 %v13204_v13  ;;  %v4163_v13 = vld [vmem:[#allocation3 + $0x3a7] sm:$0xff] }
 0xa54   :  { %5894 = vmatmul.mubr.f32.gmra.mrb[162].mxu1 %v4158_v33 }
 0xa55   :  { %5898 = vmatprep.mubr.f32.mxu1 %v13208_v39  ;;  %v4164_v39 = vld [vmem:[#allocation3 + $0x3af] sm:$0xff] }
 0xa58   :  { %5899 = vmatmul.mubr.f32.gmra.mrb[164].mxu1 %v4159_v21 }
 0xa59   :  { %5903 = vmatprep.mubr.f32.mxu1 %v13212_v40  ;;  %v4165_v40 = vld [vmem:[#allocation3 + $0x3c7] sm:$0xff] }
 0xa5c   :  { %5904 = vmatmul.mubr.f32.gmra.mrb[166].mxu1 %v4160_v38 }
 0xa5d   :  { %5908 = vmatprep.mubr.f32.mxu1 %v13216_v59 }
 0xa60   :  { %5909 = vmatmul.mubr.f32.gmra.mrb[168].mxu1 %v4161_v22  ;;  %v15057_v22 = vld [vmem:[#allocation29_spill] sm:$0xff] }
 0xa61   :  { %5913 = vmatprep.mubr.f32.mxu1 %v13220_v62 }
 0xa64   :  { %5914 = vmatmul.mubr.f32.gmra.mrb[170].mxu1 %v4162_v45 }
 0xa65   :  { %5918 = vmatprep.mubr.f32.mxu1 %v13224_v32 }
 0xa68   :  { %5919 = vmatmul.mubr.f32.gmra.mrb[172].mxu1 %v4163_v13 }
 0xa69   :  { %5923 = vmatprep.mubr.f32.mxu1 %v13228_v49  ;;  %v15046_v49 = vld [vmem:[#allocation12_spill] sm:$0xff] }
 0xa6c   :  { %5924 = vmatmul.mubr.f32.gmra.mrb[174].mxu1 %v4164_v39 }
 0xa6d   :  { %5928 = vmatprep.mubr.f32.mxu1 %v13232_v20 }
 0xa70   :  { %5929 = vmatmul.mubr.f32.gmra.mrb[176].mxu1 %v4165_v40  ;;  %v15058_v40 = vld [vmem:[#allocation17_spill] sm:$0xff] }
 0xa71   :  { %5933 = vmatprep.mubr.f32.mxu1 %v13236_v12  ;;  %v4168_v12 = vld [vmem:[#allocation3 + $0x3ef] sm:$0xff] }
 0xa73   :  { %v5670_v59 = vpop.f32.mrb[72].mxu1 }
 0xa74   :  { %v13327_v62 = vadd.f32 %v15045_v11, %v5670_v59  ;;  %v5672_v55 = vpop.f32.mrb[73].mxu1  ;;  %5934 = vmatmul.mubr.f32.gmra.mrb[178].mxu1 %v4166_v41 }
 0xa75   :  { %5938 = vmatprep.mubr.f32.mxu1 %v13240_v4  ;;  %v4169_v4 = vld [vmem:[#allocation3 + $0x407] sm:$0xff] }
 0xa76   :  { %v15059_v55 = vld [vmem:[#allocation16_spill] sm:$0xff] }
 0xa77   :  { %v5675_v32 = vpop.f32.mrb[74].mxu1 }
 0xa78   :  { %v13331_v6 = vadd.f32 %v15046_v49, %v5675_v32  ;;  %v5677_v3 = vpop.f32.mrb[75].mxu1  ;;  %5939 = vmatmul.mubr.f32.gmra.mrb[180].mxu1 %v4167_v9  ;;  %v15060_v49 = vld [vmem:[#allocation20_spill] sm:$0xff] }
 0xa79   :  { %5943 = vmatprep.mubr.f32.mxu1 %v13244_v50  ;;  %v4170_v50 = vld [vmem:[#allocation3 + $0x40f] sm:$0xff] }
 0xa7b   :  { %v5680_v20 = vpop.f32.mrb[76].mxu1 }
 0xa7c   :  { %v13335_v25 = vadd.f32 %v15047_v24, %v5680_v20  ;;  %v5682_v60 = vpop.f32.mrb[77].mxu1  ;;  %5944 = vmatmul.mubr.f32.gmra.mrb[182].mxu1 %v4168_v12  ;;  %v15062_v24 = vld [vmem:[#allocation18_spill] sm:$0xff] }
 0xa7d   :  { %5948 = vmatprep.mubr.f32.mxu1 %v13248_v51  ;;  %v4171_v51 = vld [vmem:[#allocation3 + $0x427] sm:$0xff] }
 0xa7f   :  { %v5685_v35 = vpop.f32.mrb[78].mxu1 }
 0xa80   :  { %v13339_v61 = vadd.f32 %v15048_v43, %v5685_v35  ;;  %v5687_v16 = vpop.f32.mrb[79].mxu1  ;;  %5949 = vmatmul.mubr.f32.gmra.mrb[184].mxu1 %v4169_v4  ;;  %v15064_v43 = vld [vmem:[#allocation31_spill] sm:$0xff] }
 0xa81   :  { %5953 = vmatprep.mubr.f32.mxu1 %v13252_v1  ;;  %v4172_v1 = vld [vmem:[#allocation3 + $0x42f] sm:$0xff] }
 0xa83   :  { %v5690_v58 = vpop.f32.mrb[80].mxu1 }
 0xa84   :  { %v13343_v34 = vadd.f32 %v15049_v53, %v5690_v58  ;;  %v5692_v36 = vpop.f32.mrb[81].mxu1  ;;  %5954 = vmatmul.mubr.f32.gmra.mrb[186].mxu1 %v4170_v50  ;;  %v15065_v53 = vld [vmem:[#allocation41_spill] sm:$0xff] }
 0xa85   :  { %5958 = vmatprep.mubr.f32.mxu1 %v13256_v63  ;;  %v4173_v63 = vld [vmem:[#allocation3 + $0x447] sm:$0xff] }
 0xa87   :  { %v5695_v8 = vpop.f32.mrb[82].mxu1 }
 0xa88   :  { %v13347_v27 = vadd.f32 %v15050_v48, %v5695_v8  ;;  %v5697_v19 = vpop.f32.mrb[83].mxu1  ;;  %5959 = vmatmul.mubr.f32.gmra.mrb[188].mxu1 %v4171_v51  ;;  %v8277_v48 = vpack.c.bf16 %v13331_v6, %v13327_v62 }
 0xa89   :  { %5963 = vmatprep.mubr.f32.mxu1 %v13260_v10  ;;  %v4174_v10 = vld [vmem:[#allocation3 + $0x44f] sm:$0xff] }
 0xa8b   :  { %v5700_v28 = vpop.f32.mrb[84].mxu1 }
 0xa8c   :  { %v13351_v54 = vadd.f32 %v15051_v7, %v5700_v28  ;;  %v5702_v2 = vpop.f32.mrb[85].mxu1  ;;  %5964 = vmatmul.mubr.f32.gmra.mrb[190].mxu1 %v4172_v1  ;;  %v15066_v28 = vld [vmem:[#allocation35_spill] sm:$0xff] }
 0xa8d   :  { %5968 = vmatprep.mubr.f32.mxu1 %v15052_v0  ;;  %v15067_v0 = vld [vmem:[#allocation42_spill] sm:$0xff] }
 0xa8f   :  { %v5705_v29 = vpop.f32.mrb[86].mxu1 }
 0xa90   :  { %v13355_v15 = vadd.f32 %v15053_v44, %v5705_v29  ;;  %v5707_v42 = vpop.f32.mrb[87].mxu1  ;;  %5969 = vmatmul.mubr.f32.gmra.mrb[192].mxu1 %v4173_v63 }
 0xa91   :  { %5973 = vmatprep.mubr.f32.mxu1 %v13266_v52  ;;  %v8281_v42 = vpack.c.bf16 %v13339_v61, %v13335_v25 }
 0xa93   :  { %v5710_v5 = vpop.f32.mrb[88].mxu1 }
 0xa94   :  { %v13359_v26 = vadd.f32 %v15054_v18, %v5710_v5  ;;  %v5712_v31 = vpop.f32.mrb[89].mxu1  ;;  %5974 = vmatmul.mubr.f32.gmra.mrb[194].mxu1 %v4174_v10  ;;  %v15069_v10 = vld [vmem:[#allocation44_spill] sm:$0xff] }
 0xa95   :  { %5978 = vmatprep.mubr.f32.mxu1 %v13299_v47 }
 0xa97   :  { %v5715_v30 = vpop.f32.mrb[90].mxu1 }
 0xa98   :  { %v13363_v14 = vadd.f32 %v15055_v57, %v5715_v30  ;;  %v5717_v23 = vpop.f32.mrb[91].mxu1  ;;  %5979 = vmatmul.mubr.f32.gmra.mrb[196].mxu1 %v4175_v46  ;;  %v15070_v30 = vld [vmem:[#allocation43_spill] sm:$0xff] }
 0xa99   :  { %5983 = vmatprep.mubr.f32.mxu1 %v13299_v47 }
 0xa9b   :  { %v5720_v52 = vpop.f32.mrb[92].mxu1 }
 0xa9c   :  { %v13367_v33 = vadd.f32 %v15056_v17, %v5720_v52  ;;  %v5722_v21 = vpop.f32.mrb[93].mxu1  ;;  %5984 = vmatmul.mubr.f32.gmra.mrb[198].mxu1 %v4176_v37  ;;  %v8285_v52 = vpack.c.bf16 %v13347_v27, %v13343_v34 }
 0xa9d   :  { %v15071_v21 = vld [vmem:[#allocation46_spill] sm:$0xff] }
 0xa9f   :  { %v5725_v38 = vpop.f32.mrb[94].mxu1 }
 0xaa0   :  { %v13370_v45 = vadd.f32 %v15057_v22, %v5725_v38  ;;  %v5727_v13 = vpop.f32.mrb[95].mxu1 }
 0xaa3   :  { %v5730_v39 = vpop.f32.mrb[96].mxu1 }
 0xaa4   :  { %v13373_v59 = vadd.f32 %v15058_v40, %v5730_v39  ;;  %v5732_v41 = vpop.f32.mrb[97].mxu1  ;;  %v15072_v39 = vld [vmem:[#allocation45_spill] sm:$0xff] }
 0xaa7   :  { %v5735_v11 = vpop.f32.mrb[98].mxu1 }
 0xaa8   :  { %v13376_v47 = vadd.f32 %v15059_v55, %v5735_v11  ;;  %v5737_v32 = vpop.f32.mrb[99].mxu1  ;;  %v8289_v55 = vpack.c.bf16 %v13355_v15, %v13351_v54 }
 0xaab   :  { %v5740_v9 = vpop.f32.mrb[100].mxu1 }
 0xaac   :  { %v13379_v3 = vadd.f32 %v15060_v49, %v5740_v9  ;;  %v5742_v20 = vpop.f32.mrb[101].mxu1  ;;  %v15073_v9 = vld [vmem:[#allocation48_spill] sm:$0xff] }
 0xaae   :  { %15061 = vst [vmem:[#allocation22_spill] sm:$0xff] %v13379_v3 }
 0xaaf   :  { %v5745_v12 = vpop.f32.mrb[102].mxu1 }
 0xab0   :  { %v13382_v60 = vadd.f32 %v15062_v24, %v5745_v12  ;;  %v5747_v35 = vpop.f32.mrb[103].mxu1  ;;  %v15074_v24 = vld [vmem:[#allocation47_spill] sm:$0xff] }
 0xab2   :  { %15063 = vst [vmem:[#allocation25_spill] sm:$0xff] %v13382_v60 }
 0xab3   :  { %v5750_v4 = vpop.f32.mrb[104].mxu1 }
 0xab4   :  { %v13385_v16 = vadd.f32 %v15064_v43, %v5750_v4  ;;  %v5752_v58 = vpop.f32.mrb[105].mxu1 }
 0xab5   :  { %v8293_v58 = vpack.c.bf16 %v13363_v14, %v13359_v26 }
 0xab7   :  { %v5755_v50 = vpop.f32.mrb[106].mxu1 }
 0xab8   :  { %v13388_v36 = vadd.f32 %v15065_v53, %v5755_v50  ;;  %v5757_v8 = vpop.f32.mrb[107].mxu1  ;;  %v15075_v53 = vld [vmem:[#allocation49_spill] sm:$0xff] }
 0xaba   :  { %v8275_v51 = vpack.c.bf16 %v13388_v36, %v13385_v16 }
 0xabb   :  { %v5760_v19 = vpop.f32.mrb[108].mxu1 }
 0xabc   :  { %v13395_v1 = vadd.f32 %v15066_v28, %v5760_v19  ;;  %v5762_v7 = vpop.f32.mrb[109].mxu1  ;;  %8276 = vmatprep.subr.bf16.mxu0 %v8275_v51  ;;  %v15076_v19 = vld [vmem:[#allocation32_spill] sm:$0xff] }
 0xabd   :  { %8278 = vmatpush3.bf16.msra.mxu0 %v8277_v48 }
 0xabf   :  { %v5765_v2 = vpop.f32.mrb[110].mxu1 }
 0xac0   :  { %v13398_v29 = vadd.f32 %v15067_v0, %v5765_v2  ;;  %v5767_v63 = vpop.f32.mrb[111].mxu1  ;;  %v8297_v0 = vpack.c.bf16 %v13370_v45, %v13367_v33 }
 0xac2   :  { %15068 = vst [vmem:[#allocation28_spill] sm:$0xff] %v13398_v29  ;;  %v8279_v44 = vpack.c.bf16 %v13398_v29, %v13395_v1 }
 0xac3   :  { %v5770_v5 = vpop.f32.mrb[112].mxu1 }
 0xac4   :  { %v13405_v18 = vadd.f32 %v15069_v10, %v5770_v5  ;;  %v5772_v31 = vpop.f32.mrb[113].mxu1  ;;  %8280 = vmatprep.subr.bf16.mxu0 %v8279_v44  ;;  %v15077_v44 = vld [vmem:[#allocation50_spill] sm:$0xff] }
 0xac5   :  { %8282 = vmatpush3.bf16.msra.mxu0 %v8281_v42  ;;  %v15078_v31 = vld [vmem:[#allocation33_spill] sm:$0xff] }
 0xac7   :  { %v5775_v46 = vpop.f32.mrb[114].mxu1 }
 0xac8   :  { %v13408_v57 = vadd.f32 %v15070_v30, %v5775_v46  ;;  %v5777_v23 = vpop.f32.mrb[115].mxu1 }
 0xaca   :  { %v8283_v37 = vpack.c.bf16 %v13408_v57, %v13405_v18 }
 0xacb   :  { %v5780_v17 = vpop.f32.mrb[116].mxu1 }
 0xacc   :  { %v13415_v38 = vadd.f32 %v15071_v21, %v5780_v17  ;;  %v5782_v22 = vpop.f32.mrb[117].mxu1  ;;  %8284 = vmatprep.subr.bf16.mxu0 %v8283_v37  ;;  %v8301_v37 = vpack.c.bf16 %v13376_v47, %v13373_v59  ;;  %v15080_v17 = vld [vmem:[#allocation51_spill] sm:$0xff] }
 0xacd   :  { %8286 = vmatpush3.bf16.msra.mxu0 %v8285_v52 }
 0xacf   :  { %v5785_v13 = vpop.f32.mrb[118].mxu1 }
 0xad0   :  { %v13418_v40 = vadd.f32 %v15072_v39, %v5785_v13  ;;  %v5787_v41 = vpop.f32.mrb[119].mxu1  ;;  %v15082_v39 = vld [vmem:[#allocation34_spill] sm:$0xff] }
 0xad2   :  { %v8287_v11 = vpack.c.bf16 %v13418_v40, %v13415_v38 }
 0xad3   :  { %v5790_v32 = vpop.f32.mrb[120].mxu1 }
 0xad4   :  { %v13425_v49 = vadd.f32 %v15073_v9, %v5790_v32  ;;  %v5792_v20 = vpop.f32.mrb[121].mxu1  ;;  %8288 = vmatprep.subr.bf16.mxu0 %v8287_v11 }
 0xad5   :  { %8290 = vmatpush3.bf16.msra.mxu0 %v8289_v55  ;;  %v8305_v20 = vpack.c.bf16 %v13382_v60, %v13379_v3  ;;  %v15111_v3 = vld [vmem:[#allocation69_spill] sm:$0xff]  ;;  %v15113_v60 = vld [vmem:[#allocation68_spill] sm:$0xff] }
 0xad7   :  { %v5795_v12 = vpop.f32.mrb[122].mxu1 }
 0xad8   :  { %v13428_v35 = vadd.f32 %v15074_v24, %v5795_v12  ;;  %v5797_v4 = vpop.f32.mrb[123].mxu1  ;;  %v15084_v24 = vld [vmem:[#allocation53_spill] sm:$0xff] }
 0xada   :  { %v8291_v43 = vpack.c.bf16 %v13428_v35, %v13425_v49  ;;  %v13460_v55 = vpop.f32.mrb[190].mxu0 }
 0xadb   :  { %v5800_v50 = vpop.f32.mrb[124].mxu1  ;;  %v13462_v32 = vpop.f32.mrb[191].mxu0 }
 0xadc   :  { %v13435_v8 = vadd.f32 %v15075_v53, %v5800_v50  ;;  %v5802_v51 = vpop.f32.mrb[125].mxu1  ;;  %8292 = vmatprep.subr.bf16.mxu0 %v8291_v43  ;;  %v15086_v50 = vld [vmem:[#allocation52_spill] sm:$0xff] }
 0xadd   :  { %8294 = vmatpush3.bf16.msra.mxu0 %v8293_v58 }
 0xadf   :  { %v5805_v48 = vpop.f32.mrb[126].mxu1 }
 0xae0   :  { %v13438_v28 = vadd.f32 %v15076_v19, %v5805_v48  ;;  %v5807_v7 = vpop.f32.mrb[127].mxu1  ;;  %v15088_v19 = vld [vmem:[#allocation55_spill] sm:$0xff] }
 0xae2   :  { %v8295_v2 = vpack.c.bf16 %v13438_v28, %v13435_v8 }
 0xae3   :  { %v5810_v63 = vpop.f32.mrb[128].mxu1 }
 0xae4   :  { %v13445_v42 = vadd.f32 %v15077_v44, %v5810_v63  ;;  %v5812_v5 = vpop.f32.mrb[129].mxu1  ;;  %8296 = vmatprep.subr.bf16.mxu0 %v8295_v2  ;;  %v15090_v63 = vld [vmem:[#allocation54_spill] sm:$0xff] }
 0xae5   :  { %8298 = vmatpush3.bf16.msra.mxu0 %v8297_v0 }
 0xae7   :  { %v5815_v10 = vpop.f32.mrb[130].mxu1 }
 0xae8   :  { %v13448_v46 = vadd.f32 %v15078_v31, %v5815_v10  ;;  %v5817_v30 = vpop.f32.mrb[131].mxu1  ;;  %v15092_v31 = vld [vmem:[#allocation57_spill] sm:$0xff] }
 0xaea   :  { %15079 = vst [vmem:[#allocation10_spill] sm:$0xff] %v13448_v46  ;;  %v8299_v23 = vpack.c.bf16 %v13448_v46, %v13445_v42 }
 0xaeb   :  { %v5820_v52 = vpop.f32.mrb[132].mxu1 }
 0xaec   :  { %v13455_v21 = vadd.f32 %v15080_v17, %v5820_v52  ;;  %v5822_v22 = vpop.f32.mrb[133].mxu1  ;;  %8300 = vmatprep.subr.bf16.mxu0 %v8299_v23  ;;  %v15094_v52 = vld [vmem:[#allocation56_spill] sm:$0xff] }
 0xaed   :  { %8302 = vmatpush3.bf16.msra.mxu0 %v8301_v37 }
 0xaee   :  { %15081 = vst [vmem:[#allocation19_spill] sm:$0xff] %v13455_v21 }
 0xaef   :  { %v5825_v13 = vpop.f32.mrb[134].mxu1 }
 0xaf0   :  { %v13458_v41 = vadd.f32 %v15082_v39, %v5825_v13  ;;  %v5827_v11 = vpop.f32.mrb[135].mxu1  ;;  %v15096_v39 = vld [vmem:[#allocation59_spill] sm:$0xff] }
 0xaf2   :  { %15083 = vst [vmem:[#allocation36_spill] sm:$0xff] %v13458_v41  ;;  %v8303_v9 = vpack.c.bf16 %v13458_v41, %v13455_v21 }
 0xaf3   :  { %v5830_v12 = vpop.f32.mrb[136].mxu1 }
 0xaf4   :  { %v13469_v4 = vadd.f32 %v15084_v24, %v5830_v12  ;;  %v5832_v43 = vpop.f32.mrb[137].mxu1  ;;  %8304 = vmatprep.subr.bf16.mxu0 %v8303_v9  ;;  %v15098_v12 = vld [vmem:[#allocation58_spill] sm:$0xff] }
 0xaf5   :  { %8306 = vmatpush3.bf16.msra.mxu0 %v8305_v20 }
 0xaf6   :  { %15085 = vst [vmem:[#allocation37_spill] sm:$0xff] %v13469_v4 }
 0xaf7   :  { %v5835_v58 = vpop.f32.mrb[138].mxu1 }
 0xaf8   :  { %v13472_v53 = vadd.f32 %v15086_v50, %v5835_v58  ;;  %v5837_v51 = vpop.f32.mrb[139].mxu1  ;;  %6439 = vmatmul.mubr.f32.vlgmr.msra.gmra.mrb[192].mxu0 %v15044_v56  ;;  %v15100_v50 = vld [vmem:[#allocation61_spill] sm:$0xff] }
 0xaf9   :  { %6508 = vmatprep.mubr.f32.mxu0 %v15044_v56 }
 0xafa   :  { %15087 = vst [vmem:[#allocation38_spill] sm:$0xff] %v13472_v53 }
 0xafb   :  { %v5840_v48 = vpop.f32.mrb[140].mxu1 }
 0xafc   :  { %v13477_v7 = vadd.f32 %v15088_v19, %v5840_v48  ;;  %v5842_v2 = vpop.f32.mrb[141].mxu1 }
 0xafd   :  { %v15102_v2 = vld [vmem:[#allocation60_spill] sm:$0xff] }
 0xafe   :  { %15089 = vst [vmem:[#allocation39_spill] sm:$0xff] %v13477_v7 }
 0xaff   :  { %v5845_v0 = vpop.f32.mrb[142].mxu1 }
 0xb00   :  { %v13480_v44 = vadd.f32 %v15090_v63, %v5845_v0  ;;  %v5847_v5 = vpop.f32.mrb[143].mxu1 }
 0xb02   :  { %15091 = vst [vmem:[#allocation40_spill] sm:$0xff] %v13480_v44 }
 0xb03   :  { %v5850_v10 = vpop.f32.mrb[144].mxu1 }
 0xb04   :  { %v13483_v30 = vadd.f32 %v15092_v31, %v5850_v10  ;;  %v5852_v23 = vpop.f32.mrb[145].mxu1  ;;  %v15104_v10 = vld [vmem:[#allocation63_spill] sm:$0xff] }
 0xb06   :  { %15093 = vst [vmem:[#allocation11_spill] sm:$0xff] %v13483_v30 }
 0xb07   :  { %v5855_v37 = vpop.f32.mrb[146].mxu1 }
 0xb08   :  { %v13486_v17 = vadd.f32 %v15094_v52, %v5855_v37  ;;  %v5857_v22 = vpop.f32.mrb[147].mxu1  ;;  %v15106_v52 = vld [vmem:[#allocation62_spill] sm:$0xff] }
 0xb0a   :  { %15095 = vst [vmem:[#allocation13_spill] sm:$0xff] %v13486_v17 }
 0xb0b   :  { %v5860_v13 = vpop.f32.mrb[148].mxu1 }
 0xb0c   :  { %v13489_v11 = vadd.f32 %v15096_v39, %v5860_v13  ;;  %v5862_v9 = vpop.f32.mrb[149].mxu1 }
 0xb0d   :  { %v15107_v9 = vld [vmem:[#allocation65_spill] sm:$0xff] }
 0xb0e   :  { %15097 = vst [vmem:[#allocation12_spill] sm:$0xff] %v13489_v11 }
 0xb0f   :  { %v5865_v20 = vpop.f32.mrb[150].mxu1 }
 0xb10   :  { %v13492_v24 = vadd.f32 %v15098_v12, %v5865_v20  ;;  %v5867_v43 = vpop.f32.mrb[151].mxu1 }
 0xb12   :  { %15099 = vst [vmem:[#allocation14_spill] sm:$0xff] %v13492_v24 }
 0xb13   :  { %v5870_v58 = vpop.f32.mrb[152].mxu1 }
 0xb14   :  { %v13495_v51 = vadd.f32 %v15100_v50, %v5870_v58  ;;  %v5872_v48 = vpop.f32.mrb[153].mxu1  ;;  %v15108_v58 = vld [vmem:[#allocation64_spill] sm:$0xff] }
 0xb16   :  { %15101 = vst [vmem:[#allocation15_spill] sm:$0xff] %v13495_v51 }
 0xb17   :  { %v5875_v19 = vpop.f32.mrb[154].mxu1 }
 0xb18   :  { %v13498_v0 = vadd.f32 %v15102_v2, %v5875_v19  ;;  %v5877_v63 = vpop.f32.mrb[155].mxu1  ;;  %v15109_v2 = vld [vmem:[#allocation67_spill] sm:$0xff] }
 0xb1a   :  { %15103 = vst [vmem:[#allocation21_spill] sm:$0xff] %v13498_v0 }
 0xb1b   :  { %v5880_v5 = vpop.f32.mrb[156].mxu1 }
 0xb1c   :  { %v13501_v31 = vadd.f32 %v15104_v10, %v5880_v5  ;;  %v5882_v23 = vpop.f32.mrb[157].mxu1 }
 0xb1d   :  { %v15110_v23 = vld [vmem:[#allocation66_spill] sm:$0xff] }
 0xb1e   :  { %15105 = vst [vmem:[#allocation7_spill] sm:$0xff] %v13501_v31 }
 0xb1f   :  { %v5885_v37 = vpop.f32.mrb[158].mxu1 }
 0xb20   :  { %v13504_v22 = vadd.f32 %v15106_v52, %v5885_v37  ;;  %v5887_v13 = vpop.f32.mrb[159].mxu1 }
 0xb23   :  { %v5890_v39 = vpop.f32.mrb[160].mxu1 }
 0xb24   :  { %v13507_v20 = vadd.f32 %v15107_v9, %v5890_v39  ;;  %v5892_v12 = vpop.f32.mrb[161].mxu1 }
 0xb27   :  { %v5895_v43 = vpop.f32.mrb[162].mxu1 }
 0xb28   :  { %v13510_v50 = vadd.f32 %v15108_v58, %v5895_v43  ;;  %v5897_v48 = vpop.f32.mrb[163].mxu1 }
 0xb2b   :  { %v5900_v19 = vpop.f32.mrb[164].mxu1 }
 0xb2c   :  { %v13513_v63 = vadd.f32 %v15109_v2, %v5900_v19  ;;  %v5902_v5 = vpop.f32.mrb[165].mxu1  ;;  %v8309_v19 = vpack.c.bf16 %v13472_v53, %v13469_v4  ;;  %v15119_v4 = vld [vmem:[#allocation73_spill] sm:$0xff] }
 0xb2d   :  { %v15115_v5 = vld [vmem:[#allocation71_spill] sm:$0xff] }
 0xb2f   :  { %v5905_v10 = vpop.f32.mrb[166].mxu1 }
 0xb30   :  { %v13516_v37 = vadd.f32 %v15110_v23, %v5905_v10  ;;  %v5907_v52 = vpop.f32.mrb[167].mxu1 }
 0xb31   :  { %v15117_v52 = vld [vmem:[#allocation70_spill] sm:$0xff] }
 0xb33   :  { %v5910_v13 = vpop.f32.mrb[168].mxu1 }
 0xb34   :  { %v13519_v39 = vadd.f32 %v15111_v3, %v5910_v13  ;;  %v5912_v9 = vpop.f32.mrb[169].mxu1 }
 0xb36   :  { %15112 = vst [vmem:[#allocation24_spill] sm:$0xff] %v13519_v39 }
 0xb37   :  { %v5915_v12 = vpop.f32.mrb[170].mxu1 }
 0xb38   :  { %v13522_v43 = vadd.f32 %v15113_v60, %v5915_v12  ;;  %v5917_v58 = vpop.f32.mrb[171].mxu1  ;;  %v8313_v12 = vpack.c.bf16 %v13480_v44, %v13477_v7  ;;  %v15123_v7 = vld [vmem:[#allocation75_spill] sm:$0xff] }
 0xb3a   :  { %15114 = vst [vmem:[#allocation8_spill] sm:$0xff] %v13522_v43  ;;  %v8307_v48 = vpack.c.bf16 %v13522_v43, %v13519_v39 }
 0xb3b   :  { %v5920_v2 = vpop.f32.mrb[172].mxu1 }
 0xb3c   :  { %v13529_v10 = vadd.f32 %v15115_v5, %v5920_v2  ;;  %v5922_v23 = vpop.f32.mrb[173].mxu1  ;;  %8308 = vmatprep.subr.bf16.mxu0 %v8307_v48 }
 0xb3d   :  { %8310 = vmatpush3.bf16.msra.mxu0 %v8309_v19  ;;  %v15121_v19 = vld [vmem:[#allocation72_spill] sm:$0xff] }
 0xb3e   :  { %15116 = vst [vmem:[#allocation23_spill] sm:$0xff] %v13529_v10 }
 0xb3f   :  { %v5925_v3 = vpop.f32.mrb[174].mxu1 }
 0xb40   :  { %v13532_v13 = vadd.f32 %v15117_v52, %v5925_v3  ;;  %v5927_v60 = vpop.f32.mrb[175].mxu1  ;;  %v8317_v52 = vpack.c.bf16 %v13486_v17, %v13483_v30  ;;  %v15127_v30 = vld [vmem:[#allocation77_spill] sm:$0xff] }
 0xb42   :  { %15118 = vst [vmem:[#allocation27_spill] sm:$0xff] %v13532_v13  ;;  %v8311_v9 = vpack.c.bf16 %v13532_v13, %v13529_v10 }
 0xb43   :  { %v5930_v58 = vpop.f32.mrb[176].mxu1 }
 0xb44   :  { %v13539_v53 = vadd.f32 %v15119_v4, %v5930_v58  ;;  %v5932_v2 = vpop.f32.mrb[177].mxu1  ;;  %8312 = vmatprep.subr.bf16.mxu0 %v8311_v9 }
 0xb45   :  { %8314 = vmatpush3.bf16.msra.mxu0 %v8313_v12  ;;  %v15125_v12 = vld [vmem:[#allocation74_spill] sm:$0xff] }
 0xb46   :  { %15120 = vst [vmem:[#allocation26_spill] sm:$0xff] %v13539_v53 }
 0xb47   :  { %v5935_v48 = vpop.f32.mrb[178].mxu1 }
 0xb48   :  { %v13542_v5 = vadd.f32 %v15121_v19, %v5935_v48  ;;  %v5937_v23 = vpop.f32.mrb[179].mxu1  ;;  %v8321_v19 = vpack.c.bf16 %v13492_v24, %v13489_v11  ;;  %v15131_v11 = vld [vmem:[#allocation79_spill] sm:$0xff] }
 0xb4a   :  { %15122 = vst [vmem:[#allocation30_spill] sm:$0xff] %v13542_v5  ;;  %v8315_v3 = vpack.c.bf16 %v13542_v5, %v13539_v53 }
 0xb4b   :  { %v5940_v60 = vpop.f32.mrb[180].mxu1 }
 0xb4c   :  { %v13549_v44 = vadd.f32 %v15123_v7, %v5940_v60  ;;  %v5942_v4 = vpop.f32.mrb[181].mxu1  ;;  %8316 = vmatprep.subr.bf16.mxu0 %v8315_v3 }
 0xb4d   :  { %8318 = vmatpush3.bf16.msra.mxu0 %v8317_v52  ;;  %v15129_v52 = vld [vmem:[#allocation76_spill] sm:$0xff] }
 0xb4e   :  { %15124 = vst [vmem:[#allocation29_spill] sm:$0xff] %v13549_v44 }
 0xb4f   :  { %v5945_v9 = vpop.f32.mrb[182].mxu1 }
 0xb50   :  { %v13552_v58 = vadd.f32 %v15125_v12, %v5945_v9  ;;  %v5947_v2 = vpop.f32.mrb[183].mxu1  ;;  %v8325_v12 = vpack.c.bf16 %v13498_v0, %v13495_v51  ;;  %v15135_v51 = vld [vmem:[#allocation81_spill] sm:$0xff] }
 0xb52   :  { %15126 = vst [vmem:[#allocation17_spill] sm:$0xff] %v13552_v58  ;;  %v8319_v48 = vpack.c.bf16 %v13552_v58, %v13549_v44 }
 0xb53   :  { %v5950_v23 = vpop.f32.mrb[184].mxu1 }
 0xb54   :  { %v13559_v17 = vadd.f32 %v15127_v30, %v5950_v23  ;;  %v5952_v7 = vpop.f32.mrb[185].mxu1  ;;  %8320 = vmatprep.subr.bf16.mxu0 %v8319_v48 }
 0xb55   :  { %8322 = vmatpush3.bf16.msra.mxu0 %v8321_v19  ;;  %v15133_v19 = vld [vmem:[#allocation78_spill] sm:$0xff] }
 0xb56   :  { %15128 = vst [vmem:[#allocation16_spill] sm:$0xff] %v13559_v17 }
 0xb57   :  { %v5955_v3 = vpop.f32.mrb[186].mxu1 }
 0xb58   :  { %v13562_v60 = vadd.f32 %v15129_v52, %v5955_v3  ;;  %v5957_v4 = vpop.f32.mrb[187].mxu1  ;;  %v8329_v52 = vpack.c.bf16 %v13504_v22, %v13501_v31 }
 0xb5a   :  { %15130 = vst [vmem:[#allocation20_spill] sm:$0xff] %v13562_v60  ;;  %v8323_v9 = vpack.c.bf16 %v13562_v60, %v13559_v17 }
 0xb5b   :  { %v5960_v2 = vpop.f32.mrb[188].mxu1 }
 0xb5c   :  { %v13569_v24 = vadd.f32 %v15131_v11, %v5960_v2  ;;  %v5962_v30 = vpop.f32.mrb[189].mxu1  ;;  %8324 = vmatprep.subr.bf16.mxu0 %v8323_v9 }
 0xb5d   :  { %8326 = vmatpush3.bf16.msra.mxu0 %v8325_v12  ;;  %v15137_v12 = vld [vmem:[#allocation80_spill] sm:$0xff] }
 0xb5e   :  { %15132 = vst [vmem:[#allocation18_spill] sm:$0xff] %v13569_v24 }
 0xb5f   :  { %v5965_v48 = vpop.f32.mrb[190].mxu1 }
 0xb60   :  { %v13572_v23 = vadd.f32 %v15133_v19, %v5965_v48  ;;  %v5967_v7 = vpop.f32.mrb[191].mxu1  ;;  %v8333_v19 = vpack.c.bf16 %v13510_v50, %v13507_v20 }
 0xb62   :  { %15134 = vst [vmem:[#allocation31_spill] sm:$0xff] %v13572_v23  ;;  %v8327_v3 = vpack.c.bf16 %v13572_v23, %v13569_v24 }
 0xb63   :  { %v5970_v4 = vpop.f32.mrb[192].mxu1 }
 0xb64   :  { %v13579_v0 = vadd.f32 %v15135_v51, %v5970_v4  ;;  %v5972_v11 = vpop.f32.mrb[193].mxu1  ;;  %8328 = vmatprep.subr.bf16.mxu0 %v8327_v3 }
 0xb65   :  { %8330 = vmatpush3.bf16.msra.mxu0 %v8329_v52  ;;  %v6531_v52 = vmul.f32 %v13388_v36, %v13388_v36 }
 0xb66   :  { %15136 = vst [vmem:[#allocation41_spill] sm:$0xff] %v13579_v0 }
 0xb67   :  { %v5975_v9 = vpop.f32.mrb[194].mxu1 }
 0xb68   :  { %v13582_v2 = vadd.f32 %v15137_v12, %v5975_v9  ;;  %v5977_v30 = vpop.f32.mrb[195].mxu1  ;;  %v6530_v9 = vmul.f32 %v13385_v16, %v13385_v16 }
 0xb69   :  { %v8337_v30 = vpack.c.bf16 %v13516_v37, %v13513_v63 }
 0xb6a   :  { %15138 = vst [vmem:[#allocation35_spill] sm:$0xff] %v13582_v2  ;;  %v8331_v48 = vpack.c.bf16 %v13582_v2, %v13579_v0 }
 0xb6b   :  { %v5980_v7 = vpop.f32.mrb[196].mxu1 }
 0xb6c   :  { %v13589_v31 = vadd.f32 %v13462_v32, %v5980_v7  ;;  %v5982_v51 = vpop.f32.mrb[197].mxu1  ;;  %8332 = vmatprep.subr.bf16.mxu0 %v8331_v48  ;;  %v6515_v32 = vmul.f32 %v13331_v6, %v13331_v6  ;;  %v6533_v48 = vmul.f32 %v13398_v29, %v13398_v29  ;;  %v6532_v7 = vmul.f32 %v13395_v1, %v13395_v1 }
 0xb6d   :  { %8334 = vmatpush3.bf16.msra.mxu0 %v8333_v19  ;;  %v8339_v19 = vpack.c.bf16 %v6531_v52, %v6530_v9  ;;  %v6516_v52 = vmul.f32 %v13335_v25, %v13335_v25  ;;  %v6534_v9 = vmul.f32 %v13405_v18, %v13405_v18 }
 0xb6e   :  { %15139 = vst [vmem:[#allocation42_spill] sm:$0xff] %v13589_v31  ;;  %v8343_v29 = vpack.c.bf16 %v6533_v48, %v6532_v7  ;;  %v6518_v48 = vmul.f32 %v13343_v34, %v13343_v34 }
 0xb6f   :  { %v5985_v3 = vpop.f32.mrb[198].mxu1 }
 0xb70   :  { %v13594_v4 = vadd.f32 %v13460_v55, %v5985_v3  ;;  %v5987_v11 = vpop.f32.mrb[199].mxu1  ;;  %v6514_v55 = vmul.f32 %v13327_v62, %v13327_v62  ;;  %v6517_v3 = vmul.f32 %v13339_v61, %v13339_v61 }
 0xb71   :  { %v6535_v11 = vmul.f32 %v13408_v57, %v13408_v57 }
 0xb72   :  { %15140 = vst [vmem:[#allocation44_spill] sm:$0xff] %v13594_v4  ;;  %v8335_v12 = vpack.c.bf16 %v13594_v4, %v13589_v31  ;;  %v8341_v51 = vpack.c.bf16 %v6515_v32, %v6514_v55  ;;  %v6519_v32 = vmul.f32 %v13347_v27, %v13347_v27  ;;  %v6536_v55 = vmul.f32 %v13415_v38, %v13415_v38 }
 0xb74   :  { %8336 = vmatprep.subr.bf16.mxu0 %v8335_v12  ;;  %v8345_v12 = vpack.c.bf16 %v6517_v3, %v6516_v52  ;;  %v8349_v7 = vpack.c.bf16 %v6519_v32, %v6518_v48  ;;  %v6520_v52 = vmul.f32 %v13351_v54, %v13351_v54  ;;  %v6541_v32 = vmul.f32 %v13438_v28, %v13438_v28 }
 0xb75   :  { %8338 = vmatpush3.bf16.msra.mxu0 %v8337_v30  ;;  %v6537_v30 = vmul.f32 %v13418_v40, %v13418_v40  ;;  %v6522_v48 = vmul.f32 %v13359_v26, %v13359_v26 }
 0xb76   :  { %8340 = vmatprep.subr.bf16.mxu0 %v8339_v19  ;;  %v8347_v19 = vpack.c.bf16 %v6535_v11, %v6534_v9  ;;  %v6538_v11 = vmul.f32 %v13425_v49, %v13425_v49 }
 0xb77   :  { %v8351_v3 = vpack.c.bf16 %v6537_v30, %v6536_v55  ;;  %v6540_v30 = vmul.f32 %v13435_v8, %v13435_v8 }
 0xb78   :  { %6509 = vmatmul.mubr.f32.vlgmr.msra.gmra.mrb[194].mxu0 %v15044_v56 }
 0xb79   :  { %8342 = vmatpush3.bf16.msra.mxu0 %v8341_v51  ;;  %6642 = vmatprep.mubr.f32.mxu0 %v15044_v56  ;;  %v6539_v51 = vmul.f32 %v13428_v35, %v13428_v35 }
 0xb7a   :  { %8344 = vmatprep.subr.bf16.mxu0 %v8343_v29  ;;  %v6521_v29 = vmul.f32 %v13355_v15, %v13355_v15 }
 0xb7c   :  { %v8353_v9 = vpack.c.bf16 %v6521_v29, %v6520_v52  ;;  %v6543_v29 = vmul.f32 %v13448_v46, %v13448_v46  ;;  %v6524_v52 = vmul.f32 %v13367_v33, %v13367_v33  ;;  %v15142_v46 = vld [vmem:[#allocation22_spill] sm:$0xff] }
 0xb7d   :  { %8346 = vmatpush3.bf16.msra.mxu0 %v8345_v12  ;;  %v6523_v12 = vmul.f32 %v13363_v14, %v13363_v14 }
 0xb7e   :  { %8348 = vmatprep.subr.bf16.mxu0 %v8347_v19  ;;  %v8355_v19 = vpack.c.bf16 %v6539_v51, %v6538_v11  ;;  %v6542_v51 = vmul.f32 %v13445_v42, %v13445_v42 }
 0xb7f   :  { %v8357_v55 = vpack.c.bf16 %v6523_v12, %v6522_v48  ;;  %v6545_v12 = vmul.f32 %v13458_v41, %v13458_v41  ;;  %v6526_v48 = vmul.f32 %v13373_v59, %v13373_v59  ;;  %v6528_v41 = vmul.f32 %v15142_v46, %v15142_v46 }
 0xb81   :  { %8350 = vmatpush3.bf16.msra.mxu0 %v8349_v7  ;;  %v6525_v7 = vmul.f32 %v13370_v45, %v13370_v45 }
 0xb82   :  { %8352 = vmatprep.subr.bf16.mxu0 %v8351_v3  ;;  %v8359_v3 = vpack.c.bf16 %v6541_v32, %v6540_v30  ;;  %v6544_v32 = vmul.f32 %v13455_v21, %v13455_v21  ;;  %v15144_v21 = vld [vmem:[#allocation37_spill] sm:$0xff] }
 0xb83   :  { %v8361_v11 = vpack.c.bf16 %v6525_v7, %v6524_v52  ;;  %v6563_v7 = vmul.f32 %v13522_v43, %v13522_v43  ;;  %v6546_v43 = vmul.f32 %v15144_v21, %v15144_v21 }
 0xb84   :  { %v8367_v52 = vpack.c.bf16 %v6545_v12, %v6544_v32  ;;  %v6564_v12 = vmul.f32 %v13529_v10, %v13529_v10  ;;  %v15148_v10 = vld [vmem:[#allocation11_spill] sm:$0xff] }
 0xb85   :  { %8354 = vmatpush3.bf16.msra.mxu0 %v8353_v9  ;;  %v6527_v9 = vmul.f32 %v13376_v47, %v13376_v47 }
 0xb86   :  { %8356 = vmatprep.subr.bf16.mxu0 %v8355_v19  ;;  %v8363_v19 = vpack.c.bf16 %v6543_v29, %v6542_v51  ;;  %v6562_v29 = vmul.f32 %v13519_v39, %v13519_v39  ;;  %v15149_v39 = vld [vmem:[#allocation14_spill] sm:$0xff] }
 0xb87   :  { %v8365_v30 = vpack.c.bf16 %v6527_v9, %v6526_v48  ;;  %v6565_v9 = vmul.f32 %v13532_v13, %v13532_v13  ;;  %v15146_v13 = vld [vmem:[#allocation39_spill] sm:$0xff] }
 0xb88   :  { %v8371_v48 = vpack.c.bf16 %v6563_v7, %v6562_v29  ;;  %v6548_v7 = vmul.f32 %v15146_v13, %v15146_v13  ;;  %v6566_v29 = vmul.f32 %v13539_v53, %v13539_v53  ;;  %v15150_v53 = vld [vmem:[#allocation12_spill] sm:$0xff] }
 0xb89   :  { %8358 = vmatpush3.bf16.msra.mxu0 %v8357_v55  ;;  %v15141_v55 = vld [vmem:[#allocation25_spill] sm:$0xff] }
 0xb8a   :  { %8360 = vmatprep.subr.bf16.mxu0 %v8359_v3  ;;  %v6529_v3 = vmul.f32 %v15141_v55, %v15141_v55 }
 0xb8c   :  { %v8369_v51 = vpack.c.bf16 %v6529_v3, %v6528_v41  ;;  %v6567_v41 = vmul.f32 %v13542_v5, %v13542_v5  ;;  %v8375_v3 = vpack.c.bf16 %v6565_v9, %v6564_v12  ;;  %v6550_v9 = vmul.f32 %v15148_v10, %v15148_v10 }
 0xb8d   :  { %8362 = vmatpush3.bf16.msra.mxu0 %v8361_v11  ;;  %v15143_v11 = vld [vmem:[#allocation38_spill] sm:$0xff]  ;;  %v6568_v12 = vmul.f32 %v13549_v44, %v13549_v44  ;;  %v15152_v44 = vld [vmem:[#allocation15_spill] sm:$0xff] }
 0xb8e   :  { %8364 = vmatprep.subr.bf16.mxu0 %v8363_v19  ;;  %v6547_v19 = vmul.f32 %v15143_v11, %v15143_v11  ;;  %v8379_v5 = vpack.c.bf16 %v6567_v41, %v6566_v29  ;;  %v6570_v41 = vmul.f32 %v13559_v17, %v13559_v17 }
 0xb90   :  { %v8373_v32 = vpack.c.bf16 %v6547_v19, %v6546_v43 }
 0xb91   :  { %8366 = vmatpush3.bf16.msra.mxu0 %v8365_v30  ;;  %v15145_v30 = vld [vmem:[#allocation40_spill] sm:$0xff] }
 0xb92   :  { %8368 = vmatprep.subr.bf16.mxu0 %v8367_v52  ;;  %v6549_v52 = vmul.f32 %v15145_v30, %v15145_v30 }
 0xb94   :  { %v8377_v43 = vpack.c.bf16 %v6549_v52, %v6548_v7  ;;  %v6571_v52 = vmul.f32 %v13562_v60, %v13562_v60  ;;  %v6554_v60 = vmul.f32 %v15152_v44, %v15152_v44 }
 0xb95   :  { %8370 = vmatpush3.bf16.msra.mxu0 %v8369_v51  ;;  %v15147_v51 = vld [vmem:[#allocation13_spill] sm:$0xff] }
 0xb96   :  { %8372 = vmatprep.subr.bf16.mxu0 %v8371_v48  ;;  %v6551_v19 = vmul.f32 %v15147_v51, %v15147_v51  ;;  %v6569_v48 = vmul.f32 %v13552_v58, %v13552_v58  ;;  %v6552_v58 = vmul.f32 %v15150_v53, %v15150_v53 }
 0xb98   :  { %6643 = vmatmul.mubr.f32.vlgmr.msra.gmra.mrb[196].mxu0 %v15044_v56  ;;  %v8383_v7 = vpack.c.bf16 %v6569_v48, %v6568_v12  ;;  %v6572_v48 = vmul.f32 %v13569_v24, %v13569_v24 }
 0xb99   :  { %8374 = vmatpush3.bf16.msra.mxu0 %v8373_v32  ;;  %6712 = vmatprep.mubr.f32.mxu0 %v15044_v56  ;;  %v8381_v32 = vpack.c.bf16 %v6551_v19, %v6550_v9  ;;  %v6573_v19 = vmul.f32 %v13572_v23, %v13572_v23  ;;  %v8387_v9 = vpack.c.bf16 %v6571_v52, %v6570_v41 }
 0xb9a   :  { %8376 = vmatprep.subr.bf16.mxu0 %v8375_v3  ;;  %v6553_v3 = vmul.f32 %v15149_v39, %v15149_v39  ;;  %v6574_v52 = vmul.f32 %v13579_v0, %v13579_v0 }
 0xb9c   :  { %v8385_v29 = vpack.c.bf16 %v6553_v3, %v6552_v58  ;;  %v6575_v58 = vmul.f32 %v13582_v2, %v13582_v2  ;;  %v8391_v3 = vpack.c.bf16 %v6573_v19, %v6572_v48  ;;  %v6576_v19 = vmul.f32 %v13589_v31, %v13589_v31 }
 0xb9d   :  { %8378 = vmatpush3.bf16.msra.mxu0 %v8377_v43  ;;  %v15151_v43 = vld [vmem:[#allocation21_spill] sm:$0xff] }
 0xb9e   :  { %8380 = vmatprep.subr.bf16.mxu0 %v8379_v5  ;;  %v6555_v5 = vmul.f32 %v15151_v43, %v15151_v43 }
 0xba0   :  { %v8389_v12 = vpack.c.bf16 %v6555_v5, %v6554_v60  ;;  %v6577_v60 = vmul.f32 %v13594_v4, %v13594_v4  ;;  %v8395_v5 = vpack.c.bf16 %v6575_v58, %v6574_v52 }
 0xba1   :  { %8382 = vmatpush3.bf16.msra.mxu0 %v8381_v32  ;;  %v6557_v32 = vmul.f32 %v13504_v22, %v13504_v22 }
 0xba2   :  { %8384 = vmatprep.subr.bf16.mxu0 %v8383_v7  ;;  %v15153_v7 = vld [vmem:[#allocation7_spill] sm:$0xff] }
 0xba3   :  { %v6556_v23 = vmul.f32 %v15153_v7, %v15153_v7 }
 0xba5   :  { %8386 = vmatpush3.bf16.msra.mxu0 %v8385_v29  ;;  %v8393_v41 = vpack.c.bf16 %v6557_v32, %v6556_v23  ;;  %v6559_v29 = vmul.f32 %v13510_v50, %v13510_v50  ;;  %v8399_v23 = vpack.c.bf16 %v6577_v60, %v6576_v19  ;;  %v6560_v32 = vmul.f32 %v13513_v63, %v13513_v63 }
 0xba6   :  { %8388 = vmatprep.subr.bf16.mxu0 %v8387_v9  ;;  %v6558_v9 = vmul.f32 %v13507_v20, %v13507_v20 }
 0xba8   :  { %v8397_v48 = vpack.c.bf16 %v6559_v29, %v6558_v9 }
 0xba9   :  { %8390 = vmatpush3.bf16.msra.mxu0 %v8389_v12  ;;  %v6561_v12 = vmul.f32 %v13516_v37, %v13516_v37 }
 0xbaa   :  { %8392 = vmatprep.subr.bf16.mxu0 %v8391_v3 }
 0xbab   :  { %v8401_v3 = vpack.c.bf16 %v6561_v12, %v6560_v32 }
 0xbad   :  { %8394 = vmatpush3.bf16.msra.mxu0 %v8393_v41 }
 0xbae   :  { %8396 = vmatprep.subr.bf16.mxu0 %v8395_v5 }
 0xbb1   :  { %8398 = vmatpush3.bf16.msra.mxu0 %v8397_v48 }
 0xbb2   :  { %8400 = vmatprep.subr.bf16.mxu0 %v8399_v23 }
 0xbb5   :  { %8402 = vmatpush3.bf16.msra.mxu0 %v8401_v3 }
 0xbb8   :  { %6713 = vmatmul.mubr.f32.vlgmr.msra.gmra.mrb[198].mxu0 %v15044_v56 }
 0xbcb   :  { %v7335_v58 = vpop.f32.mrb[192].mxu0 }
 0xbcc   :  { %v7336_v52 = vpop.f32.mrb[193].mxu0 }
 0xbcd   :  { %v7337_v41 = vadd.f32 %v7336_v52, %v7335_v58  ;;  %v6723_v58 = vld [vmem:[%s14522_s5] sm:$0x1] }
 0xc4b   :  { %v7370_v4 = vpop.f32.mrb[194].mxu0 }
 0xc4c   :  { %v7371_v31 = vpop.f32.mrb[195].mxu0 }
 0xc4d   :  { %v7372_v5 = vadd.f32 %v7371_v31, %v7370_v4 }
 0xc4f   :  { %v6511_v29 = vadd.f32 %v7372_v5, %v7337_v41 }
 0xc51   :  { %v6718_v24 = vmul.f32 0.001953125, %v6511_v29 }
 0xc53   :  { %v6720_v23 = vmul.f32 %v6718_v24, %v6718_v24 }
 0xc6b   :  { %v7405_v9 = vpop.f32.mrb[196].mxu0 }
 0xc6c   :  { %v7406_v2 = vpop.f32.mrb[197].mxu0 }
 0xc6d   :  { %v7407_v0 = vadd.f32 %v7406_v2, %v7405_v9  ;;  %v13737_v2 = vld [vmem:[%s14523_s6] sm:$0x1] }
 0xc8b   :  { %v7440_v60 = vpop.f32.mrb[198].mxu0 }
 0xc8c   :  { %v7441_v19 = vpop.f32.mrb[199].mxu0 }
 0xc8d   :  { %v7442_v17 = vadd.f32 %v7441_v19, %v7440_v60  ;;  %v15155_v19 = vld [vmem:[#allocation28_spill] sm:$0xff] }
 0xc8f   :  { %v6715_v48 = vadd.f32 %v7442_v17, %v7407_v0  ;;  %v15154_v17 = vld [vmem:[#allocation9_spill] sm:$0xff] }
 0xc91   :  { %v6719_v12 = vmul.f32 0.001953125, %v6715_v48 }
 0xc93   :  { %v6721_v32 = vsub.f32 %v6719_v12, %v6720_v23  ;;  %v15156_v23 = vld [vmem:[#allocation10_spill] sm:$0xff]  ;;  %v15157_v12 = vld [vmem:[#allocation19_spill] sm:$0xff] }
 0xc95   :  { %v6722_v3 = vmax.f32 %v6721_v32, 0.0  ;;  %v15158_v32 = vld [vmem:[#allocation36_spill] sm:$0xff] }
 0xc97   :  { %v6724_v56 = vadd.f32 1e-05, %v6722_v3 }
 0xc99   :  { %9179 = vrsqrt.f32 %v6724_v56 }
 0xca3   :  { %v9180_v31 = vpop.eup %9179 }
 0xca4   :  { %v6726_v4 = vmul.f32 %v9180_v31, %v6723_v58  ;;  %v15159_v31 = vld [vmem:[#allocation24_spill] sm:$0xff] }
 0xca6   :  { %v13739_v52 = vmul.f32 %v6726_v4, %v6718_v24  ;;  %v13742_v0 = vrot.slane %v6726_v4, %v15154_v17  ;;  %v15160_v4 = vld [vmem:[#allocation8_spill] sm:$0xff] }
 0xca8   :  { %v6729_v41 = vsub.f32 %v13737_v2, %v13739_v52  ;;  %v13748_v5 = vmul.f32 %v13742_v0, %v13327_v62  ;;  %v13752_v29 = vmul.f32 %v13742_v0, %v13331_v6  ;;  %v13756_v9 = vmul.f32 %v13742_v0, %v13335_v25  ;;  %v15161_v2 = vld [vmem:[#allocation23_spill] sm:$0xff] }
 0xca9   :  { %v13760_v24 = vmul.f32 %v13742_v0, %v13339_v61  ;;  %v13764_v60 = vmul.f32 %v13742_v0, %v13343_v34  ;;  %v13768_v62 = vmul.f32 %v13742_v0, %v13347_v27  ;;  %v13772_v6 = vmul.f32 %v13742_v0, %v13351_v54  ;;  %v15163_v52 = vld [vmem:[#allocation27_spill] sm:$0xff] }
 0xcaa   :  { %v13776_v25 = vmul.f32 %v13742_v0, %v13355_v15  ;;  %v13780_v61 = vmul.f32 %v13742_v0, %v13359_v26  ;;  %v13784_v34 = vmul.f32 %v13742_v0, %v13363_v14  ;;  %v13788_v27 = vmul.f32 %v13742_v0, %v13367_v33 }
 0xcab   :  { %v13792_v54 = vmul.f32 %v13742_v0, %v13370_v45  ;;  %v13796_v15 = vmul.f32 %v13742_v0, %v13373_v59  ;;  %v13800_v26 = vmul.f32 %v13742_v0, %v13376_v47  ;;  %v13804_v14 = vmul.f32 %v13742_v0, %v15142_v46 }
 0xcac   :  { %v13808_v33 = vmul.f32 %v13742_v0, %v15141_v55  ;;  %v13812_v45 = vmul.f32 %v13742_v0, %v13385_v16  ;;  %v13816_v59 = vmul.f32 %v13742_v0, %v13388_v36  ;;  %v13820_v47 = vmul.f32 %v13742_v0, %v13395_v1 }
 0xcad   :  { %v13824_v46 = vmul.f32 %v13742_v0, %v15155_v19  ;;  %v13828_v55 = vmul.f32 %v13742_v0, %v13405_v18  ;;  %v13832_v16 = vmul.f32 %v13742_v0, %v13408_v57  ;;  %v13836_v36 = vmul.f32 %v13742_v0, %v13415_v38  ;;  %v15165_v19 = vld [vmem:[#allocation26_spill] sm:$0xff] }
 0xcae   :  { %v13840_v1 = vmul.f32 %v13742_v0, %v13418_v40  ;;  %v13844_v48 = vmul.f32 %v13742_v0, %v13425_v49  ;;  %v13848_v18 = vmul.f32 %v13742_v0, %v13428_v35  ;;  %v13852_v57 = vmul.f32 %v13742_v0, %v13435_v8 }
 0xcaf   :  { %v13856_v38 = vmul.f32 %v13742_v0, %v13438_v28  ;;  %v13860_v40 = vmul.f32 %v13742_v0, %v13445_v42  ;;  %v13864_v49 = vmul.f32 %v13742_v0, %v15156_v23  ;;  %v13868_v35 = vmul.f32 %v13742_v0, %v15157_v12  ;;  %v15167_v23 = vld [vmem:[#allocation30_spill] sm:$0xff] }
 0xcb0   :  { %v13872_v8 = vmul.f32 %v13742_v0, %v15158_v32  ;;  %v13876_v28 = vmul.f32 %v13742_v0, %v15144_v21  ;;  %v13880_v42 = vmul.f32 %v13742_v0, %v15143_v11  ;;  %v13884_v3 = vmul.f32 %v13742_v0, %v15146_v13  ;;  %v15169_v32 = vld [vmem:[#allocation29_spill] sm:$0xff] }
 0xcb1   :  { %v13888_v56 = vmul.f32 %v13742_v0, %v15145_v30  ;;  %v13892_v58 = vmul.f32 %v13742_v0, %v15148_v10  ;;  %v13896_v21 = vmul.f32 %v13742_v0, %v15147_v51  ;;  %v13900_v11 = vmul.f32 %v13742_v0, %v15150_v53 }
 0xcb2   :  { %v13904_v13 = vmul.f32 %v13742_v0, %v15149_v39  ;;  %v13908_v30 = vmul.f32 %v13742_v0, %v15152_v44  ;;  %v13912_v10 = vmul.f32 %v13742_v0, %v15151_v43  ;;  %v13916_v51 = vmul.f32 %v13742_v0, %v15153_v7 }
 0xcb3   :  { %v13920_v53 = vmul.f32 %v13742_v0, %v13504_v22  ;;  %v13924_v39 = vmul.f32 %v13742_v0, %v13507_v20  ;;  %v13928_v44 = vmul.f32 %v13742_v0, %v13510_v50  ;;  %v13932_v43 = vmul.f32 %v13742_v0, %v13513_v63 }
 0xcb4   :  { %v13936_v7 = vmul.f32 %v13742_v0, %v13516_v37  ;;  %v13940_v22 = vmul.f32 %v13742_v0, %v15159_v31  ;;  %v13944_v20 = vmul.f32 %v13742_v0, %v15160_v4  ;;  %v13948_v50 = vmul.f32 %v13742_v0, %v15161_v2  ;;  %v15171_v4 = vld [vmem:[#allocation17_spill] sm:$0xff] }
 0xcb5   :  { %v13952_v63 = vmul.f32 %v13742_v0, %v15163_v52  ;;  %v13956_v37 = vmul.f32 %v13742_v0, %v15165_v19  ;;  %v13960_v12 = vmul.f32 %v13742_v0, %v15167_v23  ;;  %v13964_v31 = vmul.f32 %v13742_v0, %v15169_v32 }
 0xcb6   :  { %15162 = vst [vmem:[#allocation43_spill] sm:$0xff] %v13948_v50  ;;  %v13968_v2 = vmul.f32 %v13742_v0, %v15171_v4  ;;  %v15173_v50 = vld [vmem:[#allocation16_spill] sm:$0xff]  ;;  %v15180_v4 = vld [vmem:[#allocation41_spill] sm:$0xff] }
 0xcb7   :  { %15164 = vst [vmem:[#allocation46_spill] sm:$0xff] %v13952_v63  ;;  %15166 = vst [vmem:[#allocation45_spill] sm:$0xff] %v13956_v37  ;;  %v13972_v52 = vmul.f32 %v13742_v0, %v15173_v50  ;;  %v15175_v63 = vld [vmem:[#allocation20_spill] sm:$0xff]  ;;  %v15177_v37 = vld [vmem:[#allocation18_spill] sm:$0xff] }
 0xcb8   :  { %15168 = vst [vmem:[#allocation48_spill] sm:$0xff] %v13960_v12  ;;  %15170 = vst [vmem:[#allocation47_spill] sm:$0xff] %v13964_v31  ;;  %v13976_v19 = vmul.f32 %v13742_v0, %v15175_v63  ;;  %v13980_v23 = vmul.f32 %v13742_v0, %v15177_v37  ;;  %v15179_v12 = vld [vmem:[#allocation31_spill] sm:$0xff]  ;;  %v13987_v31 = vrot.slane %v6729_v41, %v15154_v17  ;;  %v15182_v63 = vld [vmem:[#allocation42_spill] sm:$0xff] }
 0xcb9   :  { %15172 = vst [vmem:[#allocation49_spill] sm:$0xff] %v13968_v2  ;;  %15174 = vst [vmem:[#allocation32_spill] sm:$0xff] %v13972_v52  ;;  %v13984_v32 = vmul.f32 %v13742_v0, %v15179_v12  ;;  %v13991_v2 = vmul.f32 %v13742_v0, %v15180_v4  ;;  %v15181_v50 = vld [vmem:[#allocation35_spill] sm:$0xff]  ;;  %v15183_v37 = vld [vmem:[#allocation44_spill] sm:$0xff] }
 0xcba   :  { %15176 = vst [vmem:[#allocation50_spill] sm:$0xff] %v13976_v19  ;;  %15178 = vst [vmem:[#allocation33_spill] sm:$0xff] %v13980_v23  ;;  %v13995_v52 = vmul.f32 %v13742_v0, %v15181_v50  ;;  %v13999_v19 = vmul.f32 %v13742_v0, %v15182_v63  ;;  %v14003_v23 = vmul.f32 %v13742_v0, %v15183_v37 }
 0xcbb   :  { %v14007_v17 = vadd.f32 %v13987_v31, %v13748_v5  ;;  %v14011_v41 = vadd.f32 %v13987_v31, %v13752_v29  ;;  %v14015_v12 = vadd.f32 %v13987_v31, %v13756_v9  ;;  %v14019_v4 = vadd.f32 %v13987_v31, %v13760_v24 }
 0xcbc   :  { %v14023_v0 = vadd.f32 %v13987_v31, %v13764_v60  ;;  %v14027_v5 = vadd.f32 %v13987_v31, %v13768_v62  ;;  %v14031_v29 = vadd.f32 %v13987_v31, %v13772_v6  ;;  %v14035_v9 = vadd.f32 %v13987_v31, %v13776_v25 }
 0xcbd   :  { %v14039_v24 = vadd.f32 %v13987_v31, %v13780_v61  ;;  %v14043_v60 = vadd.f32 %v13987_v31, %v13784_v34  ;;  %v14047_v62 = vadd.f32 %v13987_v31, %v13788_v27  ;;  %v14051_v6 = vadd.f32 %v13987_v31, %v13792_v54  ;;  %v15187_v50 = vld [vmem:[#allocation43_spill] sm:$0xff] }
 0xcbe   :  { %v14055_v25 = vadd.f32 %v13987_v31, %v13796_v15  ;;  %v14059_v61 = vadd.f32 %v13987_v31, %v13800_v26  ;;  %v14063_v34 = vadd.f32 %v13987_v31, %v13804_v14  ;;  %v14067_v27 = vadd.f32 %v13987_v31, %v13808_v33  ;;  %v15189_v63 = vld [vmem:[#allocation46_spill] sm:$0xff]  ;;  %v15191_v37 = vld [vmem:[#allocation45_spill] sm:$0xff] }
 0xcbf   :  { %v14071_v54 = vadd.f32 %v13987_v31, %v13812_v45  ;;  %v14075_v15 = vadd.f32 %v13987_v31, %v13816_v59  ;;  %v14079_v26 = vadd.f32 %v13987_v31, %v13820_v47  ;;  %v14083_v14 = vadd.f32 %v13987_v31, %v13824_v46 }
 0xcc0   :  { %v14087_v33 = vadd.f32 %v13987_v31, %v13828_v55  ;;  %v14091_v45 = vadd.f32 %v13987_v31, %v13832_v16  ;;  %v14095_v59 = vadd.f32 %v13987_v31, %v13836_v36  ;;  %v14099_v47 = vadd.f32 %v13987_v31, %v13840_v1 }
 0xcc1   :  { %v14103_v46 = vadd.f32 %v13987_v31, %v13844_v48  ;;  %v14107_v55 = vadd.f32 %v13987_v31, %v13848_v18  ;;  %v14111_v16 = vadd.f32 %v13987_v31, %v13852_v57  ;;  %v14115_v36 = vadd.f32 %v13987_v31, %v13856_v38 }
 0xcc2   :  { %v14119_v1 = vadd.f32 %v13987_v31, %v13860_v40  ;;  %v14123_v48 = vadd.f32 %v13987_v31, %v13864_v49  ;;  %v14127_v18 = vadd.f32 %v13987_v31, %v13868_v35  ;;  %v14131_v57 = vadd.f32 %v13987_v31, %v13872_v8 }
 0xcc3   :  { %v14135_v38 = vadd.f32 %v13987_v31, %v13876_v28  ;;  %v14139_v40 = vadd.f32 %v13987_v31, %v13880_v42  ;;  %v14143_v49 = vadd.f32 %v13987_v31, %v13884_v3  ;;  %v14147_v35 = vadd.f32 %v13987_v31, %v13888_v56 }
 0xcc4   :  { %v14151_v8 = vadd.f32 %v13987_v31, %v13892_v58  ;;  %v14155_v28 = vadd.f32 %v13987_v31, %v13896_v21  ;;  %v14159_v42 = vadd.f32 %v13987_v31, %v13900_v11  ;;  %v14163_v3 = vadd.f32 %v13987_v31, %v13904_v13 }
 0xcc5   :  { %v14167_v56 = vadd.f32 %v13987_v31, %v13908_v30  ;;  %v14171_v58 = vadd.f32 %v13987_v31, %v13912_v10  ;;  %v14175_v21 = vadd.f32 %v13987_v31, %v13916_v51  ;;  %v14179_v11 = vadd.f32 %v13987_v31, %v13920_v53 }
 0xcc6   :  { %v14183_v13 = vadd.f32 %v13987_v31, %v13924_v39  ;;  %v14187_v30 = vadd.f32 %v13987_v31, %v13928_v44  ;;  %v14191_v10 = vadd.f32 %v13987_v31, %v13932_v43  ;;  %v14195_v51 = vadd.f32 %v13987_v31, %v13936_v7 }
 0xcc7   :  { %v14199_v53 = vadd.f32 %v13987_v31, %v13940_v22  ;;  %v14203_v39 = vadd.f32 %v13987_v31, %v13944_v20  ;;  %v14207_v44 = vadd.f32 %v13987_v31, %v15187_v50  ;;  %v14211_v43 = vadd.f32 %v13987_v31, %v15189_v63 }
 0xcc8   :  { %15184 = vst [vmem:[#allocation51_spill] sm:$0xff] %v14195_v51  ;;  %v14215_v7 = vadd.f32 %v13987_v31, %v15191_v37  ;;  %v15193_v51 = vld [vmem:[#allocation48_spill] sm:$0xff] }
 0xcc9   :  { %15185 = vst [vmem:[#allocation34_spill] sm:$0xff] %v14199_v53  ;;  %15186 = vst [vmem:[#allocation53_spill] sm:$0xff] %v14203_v39  ;;  %v14219_v22 = vadd.f32 %v13987_v31, %v15193_v51  ;;  %v15194_v53 = vld [vmem:[#allocation47_spill] sm:$0xff]  ;;  %v15195_v39 = vld [vmem:[#allocation49_spill] sm:$0xff] }
 0xcca   :  { %15188 = vst [vmem:[#allocation52_spill] sm:$0xff] %v14207_v44  ;;  %15190 = vst [vmem:[#allocation55_spill] sm:$0xff] %v14211_v43  ;;  %v14223_v20 = vadd.f32 %v13987_v31, %v15194_v53  ;;  %v14227_v50 = vadd.f32 %v13987_v31, %v15195_v39  ;;  %v15196_v44 = vld [vmem:[#allocation32_spill] sm:$0xff]  ;;  %v15197_v43 = vld [vmem:[#allocation50_spill] sm:$0xff]  ;;  %v14243_v53 = vadd.f32 %v13987_v31, %v13984_v32  ;;  %v6871_v32 = vmax.f32 %v14011_v41, 0.0 }
 0xccb   :  { %15192 = vst [vmem:[#allocation54_spill] sm:$0xff] %v14215_v7  ;;  %v14231_v63 = vadd.f32 %v13987_v31, %v15196_v44  ;;  %v14235_v37 = vadd.f32 %v13987_v31, %v15197_v43  ;;  %v15198_v7 = vld [vmem:[#allocation33_spill] sm:$0xff]  ;;  %v14247_v39 = vadd.f32 %v13987_v31, %v13991_v2  ;;  %v14251_v44 = vadd.f32 %v13987_v31, %v13995_v52 }
 0xccc   :  { %v14239_v51 = vadd.f32 %v13987_v31, %v15198_v7  ;;  %15200 = vst [vmem:[#allocation56_spill] sm:$0xff] %v14243_v53  ;;  %v14255_v43 = vadd.f32 %v13987_v31, %v13999_v19  ;;  %v14259_v7 = vadd.f32 %v13987_v31, %v14003_v23  ;;  %v6872_v53 = vmax.f32 %v14015_v12, 0.0  ;;  %6935 = vst [vmem:[%s14524_s7 + $0x8] sm:$0xff] %v6871_v32 }
 0xccd   :  { %15201 = vst [vmem:[#allocation59_spill] sm:$0xff] %v14247_v39  ;;  %15202 = vst [vmem:[#allocation58_spill] sm:$0xff] %v14251_v44  ;;  %v6873_v2 = vmax.f32 %v14019_v4, 0.0  ;;  %v6874_v39 = vmax.f32 %v14023_v0, 0.0  ;;  %v6875_v52 = vmax.f32 %v14027_v5, 0.0  ;;  %v6876_v44 = vmax.f32 %v14031_v29, 0.0 }
 0xcce   :  { %15199 = vst [vmem:[#allocation57_spill] sm:$0xff] %v14239_v51  ;;  %15203 = vst [vmem:[#allocation61_spill] sm:$0xff] %v14255_v43  ;;  %v6870_v51 = vmax.f32 %v14007_v17, 0.0  ;;  %v6877_v19 = vmax.f32 %v14035_v9, 0.0  ;;  %v6878_v43 = vmax.f32 %v14039_v24, 0.0  ;;  %v6879_v31 = vmax.f32 %v14043_v60, 0.0 }
 0xccf   :  { %v6880_v23 = vmax.f32 %v14047_v62, 0.0  ;;  %v6881_v17 = vmax.f32 %v14051_v6, 0.0  ;;  %6936 = vst [vmem:[%s14524_s7 + $0x10] sm:$0xff] %v6872_v53  ;;  %6937 = vst [vmem:[%s14524_s7 + $0x18] sm:$0xff] %v6873_v2  ;;  %v6882_v41 = vmax.f32 %v14055_v25, 0.0  ;;  %v6883_v12 = vmax.f32 %v14059_v61, 0.0 }
 0xcd0   :  { %6934 = vst [vmem:[%s14524_s7] sm:$0xff] %v6870_v51  ;;  %v6884_v4 = vmax.f32 %v14063_v34, 0.0  ;;  %v6885_v0 = vmax.f32 %v14067_v27, 0.0  ;;  %6938 = vst [vmem:[%s14524_s7 + $0x20] sm:$0xff] %v6874_v39  ;;  %v6886_v5 = vmax.f32 %v14071_v54, 0.0  ;;  %v6887_v29 = vmax.f32 %v14075_v15, 0.0 }
 0xcd1   :  { %6939 = vst [vmem:[%s14524_s7 + $0x28] sm:$0xff] %v6875_v52  ;;  %6940 = vst [vmem:[%s14524_s7 + $0x30] sm:$0xff] %v6876_v44  ;;  %v6888_v9 = vmax.f32 %v14079_v26, 0.0  ;;  %v6889_v24 = vmax.f32 %v14083_v14, 0.0  ;;  %v6890_v60 = vmax.f32 %v14087_v33, 0.0  ;;  %v6891_v62 = vmax.f32 %v14091_v45, 0.0 }
 0xcd2   :  { %6941 = vst [vmem:[%s14524_s7 + $0x38] sm:$0xff] %v6877_v19  ;;  %6942 = vst [vmem:[%s14524_s7 + $0x40] sm:$0xff] %v6878_v43  ;;  %v6892_v6 = vmax.f32 %v14095_v59, 0.0  ;;  %v6893_v25 = vmax.f32 %v14099_v47, 0.0  ;;  %v6894_v61 = vmax.f32 %v14103_v46, 0.0  ;;  %v6895_v34 = vmax.f32 %v14107_v55, 0.0 }
 0xcd3   :  { %6943 = vst [vmem:[%s14524_s7 + $0x48] sm:$0xff] %v6879_v31  ;;  %6944 = vst [vmem:[%s14524_s7 + $0x50] sm:$0xff] %v6880_v23  ;;  %v6896_v27 = vmax.f32 %v14111_v16, 0.0  ;;  %v6897_v54 = vmax.f32 %v14115_v36, 0.0  ;;  %v6898_v15 = vmax.f32 %v14119_v1, 0.0  ;;  %v6899_v26 = vmax.f32 %v14123_v48, 0.0 }
 0xcd4   :  { %6945 = vst [vmem:[%s14524_s7 + $0x58] sm:$0xff] %v6881_v17  ;;  %6946 = vst [vmem:[%s14524_s7 + $0x60] sm:$0xff] %v6882_v41  ;;  %v6900_v14 = vmax.f32 %v14127_v18, 0.0  ;;  %v6901_v33 = vmax.f32 %v14131_v57, 0.0  ;;  %v6902_v45 = vmax.f32 %v14135_v38, 0.0  ;;  %v6903_v59 = vmax.f32 %v14139_v40, 0.0 }
 0xcd5   :  { %6947 = vst [vmem:[%s14524_s7 + $0x68] sm:$0xff] %v6883_v12  ;;  %6948 = vst [vmem:[%s14524_s7 + $0x70] sm:$0xff] %v6884_v4  ;;  %v6904_v47 = vmax.f32 %v14143_v49, 0.0  ;;  %v6905_v46 = vmax.f32 %v14147_v35, 0.0  ;;  %v6906_v55 = vmax.f32 %v14151_v8, 0.0  ;;  %v6907_v16 = vmax.f32 %v14155_v28, 0.0 }
 0xcd6   :  { %6949 = vst [vmem:[%s14524_s7 + $0x78] sm:$0xff] %v6885_v0  ;;  %6950 = vst [vmem:[%s14524_s7 + $0x80] sm:$0xff] %v6886_v5  ;;  %v6908_v36 = vmax.f32 %v14159_v42, 0.0  ;;  %v6909_v1 = vmax.f32 %v14163_v3, 0.0  ;;  %v6910_v48 = vmax.f32 %v14167_v56, 0.0  ;;  %v6911_v18 = vmax.f32 %v14171_v58, 0.0 }
 0xcd7   :  { %6951 = vst [vmem:[%s14524_s7 + $0x88] sm:$0xff] %v6887_v29  ;;  %6952 = vst [vmem:[%s14524_s7 + $0x90] sm:$0xff] %v6888_v9  ;;  %v6912_v57 = vmax.f32 %v14175_v21, 0.0  ;;  %v6913_v38 = vmax.f32 %v14179_v11, 0.0  ;;  %v6914_v40 = vmax.f32 %v14183_v13, 0.0  ;;  %v6915_v49 = vmax.f32 %v14187_v30, 0.0 }
 0xcd8   :  { %6953 = vst [vmem:[%s14524_s7 + $0x98] sm:$0xff] %v6889_v24  ;;  %6954 = vst [vmem:[%s14524_s7 + $0xa0] sm:$0xff] %v6890_v60  ;;  %v6916_v35 = vmax.f32 %v14191_v10, 0.0  ;;  %v15204_v8 = vld [vmem:[#allocation51_spill] sm:$0xff]  ;;  %v15205_v42 = vld [vmem:[#allocation34_spill] sm:$0xff]  ;;  %v6923_v53 = vmax.f32 %v14219_v22, 0.0 }
 0xcd9   :  { %6955 = vst [vmem:[%s14524_s7 + $0xa8] sm:$0xff] %v6891_v62  ;;  %6956 = vst [vmem:[%s14524_s7 + $0xb0] sm:$0xff] %v6892_v6  ;;  %v6917_v28 = vmax.f32 %v15204_v8, 0.0  ;;  %v6918_v3 = vmax.f32 %v15205_v42, 0.0  ;;  %v15206_v56 = vld [vmem:[#allocation53_spill] sm:$0xff]  ;;  %v15207_v21 = vld [vmem:[#allocation52_spill] sm:$0xff] }
 0xcda   :  { %6957 = vst [vmem:[%s14524_s7 + $0xb8] sm:$0xff] %v6893_v25  ;;  %6958 = vst [vmem:[%s14524_s7 + $0xc0] sm:$0xff] %v6894_v61  ;;  %v6919_v58 = vmax.f32 %v15206_v56, 0.0  ;;  %v6920_v11 = vmax.f32 %v15207_v21, 0.0  ;;  %v15208_v13 = vld [vmem:[#allocation55_spill] sm:$0xff]  ;;  %v15209_v10 = vld [vmem:[#allocation54_spill] sm:$0xff] }
 0xcdb   :  { %6959 = vst [vmem:[%s14524_s7 + $0xc8] sm:$0xff] %v6895_v34  ;;  %6960 = vst [vmem:[%s14524_s7 + $0xd0] sm:$0xff] %v6896_v27  ;;  %v6921_v30 = vmax.f32 %v15208_v13, 0.0  ;;  %v6922_v51 = vmax.f32 %v15209_v10, 0.0  ;;  %v6924_v39 = vmax.f32 %v14223_v20, 0.0  ;;  %v6925_v44 = vmax.f32 %v14227_v50, 0.0 }
 0xcdc   :  { %6961 = vst [vmem:[%s14524_s7 + $0xd8] sm:$0xff] %v6897_v54  ;;  %6962 = vst [vmem:[%s14524_s7 + $0xe0] sm:$0xff] %v6898_v15  ;;  %v6926_v22 = vmax.f32 %v14231_v63, 0.0  ;;  %v6927_v20 = vmax.f32 %v14235_v37, 0.0  ;;  %v15210_v50 = vld [vmem:[#allocation57_spill] sm:$0xff]  ;;  %v15211_v32 = vld [vmem:[#allocation56_spill] sm:$0xff] }
 0xcdd   :  { %6963 = vst [vmem:[%s14524_s7 + $0xe8] sm:$0xff] %v6899_v26  ;;  %6964 = vst [vmem:[%s14524_s7 + $0xf0] sm:$0xff] %v6900_v14  ;;  %v6928_v43 = vmax.f32 %v15210_v50, 0.0  ;;  %v6929_v2 = vmax.f32 %v15211_v32, 0.0  ;;  %v15212_v63 = vld [vmem:[#allocation59_spill] sm:$0xff]  ;;  %v15213_v52 = vld [vmem:[#allocation58_spill] sm:$0xff] }
 0xcde   :  { %6965 = vst [vmem:[%s14524_s7 + $0xf8] sm:$0xff] %v6901_v33  ;;  %6966 = vst [vmem:[%s14524_s7 + $0x100] sm:$0xff] %v6902_v45  ;;  %v6930_v37 = vmax.f32 %v15212_v63, 0.0  ;;  %v6931_v19 = vmax.f32 %v15213_v52, 0.0  ;;  %v15214_v31 = vld [vmem:[#allocation61_spill] sm:$0xff]  ;;  %v6933_v17 = vmax.f32 %v14259_v7, 0.0 }
 0xcdf   :  { %6967 = vst [vmem:[%s14524_s7 + $0x108] sm:$0xff] %v6903_v59  ;;  %6968 = vst [vmem:[%s14524_s7 + $0x110] sm:$0xff] %v6904_v47  ;;  %v6932_v23 = vmax.f32 %v15214_v31, 0.0 }
 0xce0   :  { %6969 = vst [vmem:[%s14524_s7 + $0x118] sm:$0xff] %v6905_v46  ;;  %6970 = vst [vmem:[%s14524_s7 + $0x120] sm:$0xff] %v6906_v55 }
 0xce1   :  { %6971 = vst [vmem:[%s14524_s7 + $0x128] sm:$0xff] %v6907_v16  ;;  %6972 = vst [vmem:[%s14524_s7 + $0x130] sm:$0xff] %v6908_v36 }
 0xce2   :  { %6973 = vst [vmem:[%s14524_s7 + $0x138] sm:$0xff] %v6909_v1  ;;  %6974 = vst [vmem:[%s14524_s7 + $0x140] sm:$0xff] %v6910_v48 }
 0xce3   :  { %6975 = vst [vmem:[%s14524_s7 + $0x148] sm:$0xff] %v6911_v18  ;;  %6976 = vst [vmem:[%s14524_s7 + $0x150] sm:$0xff] %v6912_v57 }
 0xce4   :  { %6977 = vst [vmem:[%s14524_s7 + $0x158] sm:$0xff] %v6913_v38  ;;  %6978 = vst [vmem:[%s14524_s7 + $0x160] sm:$0xff] %v6914_v40 }
 0xce5   :  { %6979 = vst [vmem:[%s14524_s7 + $0x168] sm:$0xff] %v6915_v49  ;;  %6980 = vst [vmem:[%s14524_s7 + $0x170] sm:$0xff] %v6916_v35 }
 0xce6   :  { %6981 = vst [vmem:[%s14524_s7 + $0x178] sm:$0xff] %v6917_v28  ;;  %6982 = vst [vmem:[%s14524_s7 + $0x180] sm:$0xff] %v6918_v3 }
 0xce7   :  { %6983 = vst [vmem:[%s14524_s7 + $0x188] sm:$0xff] %v6919_v58  ;;  %6984 = vst [vmem:[%s14524_s7 + $0x190] sm:$0xff] %v6920_v11 }
 0xce8   :  { %6985 = vst [vmem:[%s14524_s7 + $0x198] sm:$0xff] %v6921_v30  ;;  %6986 = vst [vmem:[%s14524_s7 + $0x1a0] sm:$0xff] %v6922_v51 }
 0xce9   :  { %6987 = vst [vmem:[%s14524_s7 + $0x1a8] sm:$0xff] %v6923_v53  ;;  %6988 = vst [vmem:[%s14524_s7 + $0x1b0] sm:$0xff] %v6924_v39 }
 0xcea   :  { %6989 = vst [vmem:[%s14524_s7 + $0x1b8] sm:$0xff] %v6925_v44  ;;  %6990 = vst [vmem:[%s14524_s7 + $0x1c0] sm:$0xff] %v6926_v22 }
 0xceb   :  { %6991 = vst [vmem:[%s14524_s7 + $0x1c8] sm:$0xff] %v6927_v20  ;;  %6992 = vst [vmem:[%s14524_s7 + $0x1d0] sm:$0xff] %v6928_v43 }
 0xcec   :  { %6993 = vst [vmem:[%s14524_s7 + $0x1d8] sm:$0xff] %v6929_v2  ;;  %6994 = vst [vmem:[%s14524_s7 + $0x1e0] sm:$0xff] %v6930_v37 }
 0xced   :  { %6995 = vst [vmem:[%s14524_s7 + $0x1e8] sm:$0xff] %v6931_v19  ;;  %6996 = vst [vmem:[%s14524_s7 + $0x1f0] sm:$0xff] %v6932_v23 }
 0xcee   :  { %6997 = vst [vmem:[%s14524_s7 + $0x1f8] sm:$0xff] %v6933_v17 }
 0xcef   :  { %7002 = vsyncpa [#allocation5], 1 }

</bundles_post_ra>
